<compile_context>
chip_gen: v6e
topology: v6e:2x2x1
jax: 0.10.0
libtpu: 0.0.40
codegen_flags: <defaults>
</compile_context>

<pallas_src>
import jax
import jax.numpy as jnp
from jax import lax
from jax.experimental import pallas as pl
from jax.experimental.pallas import tpu as pltpu

HALO = 3   # three chained 3x3 convs -> 3-row data dependence per side
PAD = 4    # guard rows actually fetched per side (>= HALO, keeps DMA windows 8-aligned)


def _round_up(a, m):
    return (a + m - 1) // m * m


# --------------------------------- the kernel --------------------------------

def _make_kernel(H, W, TH, Wp, CH, cdt):
    HL = TH + 2 * PAD  # local (halo'd) tile height held in VMEM

    # Row ranges (local coords) each stage is evaluated on, derived from the
    # 3-deep halo: out/k need rows [PAD, PAD+TH); conv3 pulls x1,x2 from one row
    # further out; conv2 pulls x1 from two; conv1 pulls x from three.  The
    # asserts tie every read range to what the previous stage produced.
    LO1, HI1 = PAD - 2, PAD + TH + 2   # rows where x1 is produced
    LO2, HI2 = PAD - 1, PAD + TH + 1   # rows where x2 is produced
    LO3, HI3 = PAD, PAD + TH           # rows where x3 / k / out are produced
    assert PAD >= HALO
    assert LO1 - 1 >= 0 and HI1 + 1 <= HL       # conv1 input reads stay in the tile
    assert LO2 - 1 >= LO1 and HI2 + 1 <= HI1    # conv2 reads only produced x1 rows
    assert LO3 - 1 >= LO2 and HI3 + 1 <= HI2    # conv3 reads only produced x1/x2 rows

    def _for_chunks(lo, hi, body):
        # Static (fully unrolled) row-chunk loop: every slice below is static, so
        # each chunk's taps/accumulators stay register resident.
        r0 = lo
        while r0 < hi:
            sz = min(CH, hi - r0)
            body(r0, sz)
            r0 += sz

    def kernel(x_hbm, w1, b1, w2, b2, w3, b3, w4, b4, out_ref,
               x_buf, x1_buf, x2_buf, dma_sem):
        n = pl.program_id(0)
        t = pl.program_id(1)

        # Fetch the halo'd input tile straight from HBM (no host-side overlapping
        # tile materialization).  Blocking copy: small vs. the per-tile compute.
        cp = pltpu.make_async_copy(
            x_hbm.at[n, :, pl.ds(t * TH, HL), :], x_buf, dma_sem)
        cp.start()
        cp.wait()

        grow0 = t * TH - PAD  # global image row of local row 0 (may be < 0)

        # Hoist all weight/bias scalar reads (SMEM) + casts out of the chunk loops.
        w1v = [w1[i].astype(cdt) for i in range(3 * 3 * 9)]
        w2v = [w2[i].astype(cdt) for i in range(3 * 3 * 9)]
        w3v = [w3[i].astype(cdt) for i in range(3 * 6 * 9)]
        w4v = [w4[i].astype(cdt) for i in range(3 * 6)]
        b1v = [b1[i].astype(cdt) for i in range(3)]
        b2v = [b2[i].astype(cdt) for i in range(3)]
        b3v = [b3[i].astype(cdt) for i in range(3)]
        b4v = [b4[i].astype(cdt) for i in range(3)]

        def conv3x3_chunk(srcs, wv, bv, cin, r0, sz):
            # 3x3 conv + bias + ReLU on output rows [r0, r0+sz); taps come from
            # rows [r0-1, r0+sz+1) of the source planes.  Column shifts are plain
            # cyclic lane rolls: the wrapped column is either an already-zero pad
            # column (Wp > W guaranteed) or lands in a pad column that is masked /
            # discarded downstream, so no wrap selects are needed.
            acc = [None, None, None]
            gci = 0
            for ref, nc in srcs:
                for c in range(nc):
                    for kh in range(3):
                        win = ref[c, r0 - 1 + kh:r0 - 1 + kh + sz, :]
                        taps = (jnp.roll(win, 1, axis=1), win,
                                jnp.roll(win, -1, axis=1))
                        for kw in range(3):
                            for co in range(3):
                                w = wv[((co * cin + gci) * 3 + kh) * 3 + kw]
                                term = taps[kw] * w
                                acc[co] = term if acc[co] is None else acc[co] + term
                    gci += 1
            return [jnp.maximum(acc[co] + bv[co], 0.0) for co in range(3)]

        def store_masked(dst, outs, r0, sz):
            # Re-zero out-of-image rows / lane-pad columns so the next conv's
            # neighbour reads see the exact "same"-padding zeros.
            rows = lax.broadcasted_iota(jnp.int32, (sz, Wp), 0) + (grow0 + r0)
            cols = lax.broadcasted_iota(jnp.int32, (sz, Wp), 1)
            valid = (rows >= 0) & (rows < H) & (cols < W)
            for co in range(3):
                dst[co, r0:r0 + sz, :] = jnp.where(valid, outs[co], 0.0).astype(cdt)

        # --- stage 1: x1 = relu(conv1(x)) ------------------------------------
        def stage1(r0, sz):
            outs = conv3x3_chunk([(x_buf, 3)], w1v, b1v, 3, r0, sz)
            store_masked(x1_buf, outs, r0, sz)
        _for_chunks(LO1, HI1, stage1)

        # --- stage 2: x2 = relu(conv2(x1)) -----------------------------------
        def stage2(r0, sz):
            outs = conv3x3_chunk([(x1_buf, 3)], w2v, b2v, 3, r0, sz)
            store_masked(x2_buf, outs, r0, sz)
        _for_chunks(LO2, HI2, stage2)

        # --- stage 3 (fused): x3 = relu(conv3([x1,x2])), k = relu(conv4([x2,x3])),
        #     out = k*x - k + 1.  x3 and k never touch VMEM. --------------------
        def stage3(r0, sz):
            x3 = conv3x3_chunk([(x1_buf, 3), (x2_buf, 3)], w3v, b3v, 6, r0, sz)
            x2c = [x2_buf[c, r0:r0 + sz, :] for c in range(3)]
            cat = x2c + x3  # conv4 input channel order: [x2(3), x3(3)]
            for co in range(3):
                a = None
                for ci in range(6):
                    term = cat[ci] * w4v[co * 6 + ci]
                    a = term if a is None else a + term
                k = jnp.maximum(a + b4v[co], 0.0).astype(jnp.float32)
                xc = x_buf[co, r0:r0 + sz, :].astype(jnp.float32)
                out_ref[co, r0 - PAD:r0 - PAD + sz, :] = k * xc - k + 1.0
        _for_chunks(LO3, HI3, stage3)

    return kernel


# ------------------------------- host-side glue -------------------------------

def xl_tiny_aod_net(x, params, *, tile_rows=128, chunk_rows=16,
                    compute_dtype=jnp.float32):
    """params = [w1, b1, w2, b2, w3, b3, w4, b4] with PyTorch OIHW weight layout."""
    N, C, H, W = x.shape
    assert C == 3
    cdt = jnp.dtype(compute_dtype)

    TH = min(_round_up(tile_rows, 8), _round_up(H, 8))  # rows per tile (mult of 8)
    if N == 1:  # v7x megacore: expose >= 2 parallel grid steps even at batch 1
        TH = min(TH, _round_up(max(8, (H + 1) // 2), 8))
    n_tiles = -(-H // TH)
    Hp = n_tiles * TH
    Wp = _round_up(W + 1, 128)  # >= 1 zero lane-pad column -> no wrap selects
    HL = TH + 2 * PAD

    # Chunk height: keep a plane chunk around <= 2k elements so the 3 accumulators
    # + taps stay in vregs.  TODO(synk): add a column-tile grid axis for Wp >> 128.
    CH = _round_up(max(8, min(chunk_rows, max(8, 2048 // Wp))), 8)

    # Zero padding: PAD guard rows top/bottom (so the kernel's row windows stay in
    # bounds and out-of-image rows read as the convs' "same" zeros) + lane padding.
    x_pad = jnp.pad(x.astype(cdt),
                    ((0, 0), (0, 0), (PAD, Hp - H + PAD), (0, Wp - W)))

    flat = [p.reshape(-1).astype(jnp.float32) for p in params]

    smem = pl.BlockSpec(memory_space=pltpu.MemorySpace.SMEM)
    in_specs = [pl.BlockSpec(memory_space=pl.ANY)] + [smem] * 8
    out_specs = pl.BlockSpec((None, 3, TH, Wp), lambda n, t: (n, 0, t, 0))

    itemsize = jnp.dtype(cdt).itemsize
    scratch_bytes = 3 * 3 * HL * Wp * itemsize          # x, x1, x2 tiles
    out_buf_bytes = 2 * 3 * TH * Wp * 4                  # double-buffered out block
    vmem_limit = int(min(max(2 * (scratch_bytes + out_buf_bytes) + (4 << 20),
                             16 << 20), 48 << 20))

    out = pl.pallas_call(
        _make_kernel(H, W, TH, Wp, CH, cdt),
        out_shape=jax.ShapeDtypeStruct((N, 3, Hp, Wp), jnp.float32),
        grid_spec=pltpu.PrefetchScalarGridSpec(
            num_scalar_prefetch=0,
            grid=(N, n_tiles),
            in_specs=in_specs,
            out_specs=out_specs,
            scratch_shapes=[
                pltpu.VMEM((3, HL, Wp), cdt),   # halo'd input tile
                pltpu.VMEM((3, HL, Wp), cdt),   # x1
                pltpu.VMEM((3, HL, Wp), cdt),   # x2
                pltpu.SemaphoreType.DMA(()),
            ]),
        compiler_params=pltpu.CompilerParams(
            dimension_semantics=("parallel", "parallel"),
            vmem_limit_bytes=vmem_limit,
        ),
    )(x_pad, *flat)

    return out[:, :, :H, :W]


# ------------------------------- pure-JAX reference ---------------------------

def _conv_ref(x, w, b, pad):
    y = lax.conv_general_dilated(
        x, w, window_strides=(1, 1), padding=[(pad, pad), (pad, pad)],
        dimension_numbers=("NCHW", "OIHW", "NCHW"),
        precision=lax.Precision.HIGHEST)
    return y + b[None, :, None, None]


def forward_ref(x, params):
    w1, b1, w2, b2, w3, b3, w4, b4 = params
    relu = jax.nn.relu
    x1 = relu(_conv_ref(x, w1, b1, 1))
    x2 = relu(_conv_ref(x1, w2, b2, 1))
    x3 = relu(_conv_ref(jnp.concatenate([x1, x2], axis=1), w3, b3, 1))
    k = relu(_conv_ref(jnp.concatenate([x2, x3], axis=1), w4, b4, 0))
    return k * x - k + 1.0


def init_params(key):
    shapes = [
        ((3, 3, 3, 3), (3,)),   # conv1 3x3
        ((3, 3, 3, 3), (3,)),   # conv2 3x3
        ((3, 6, 3, 3), (3,)),   # conv3 3x3
        ((3, 6, 1, 1), (3,)),   # conv4 1x1
    ]
    params = []
    for wshape, bshape in shapes:
        key, kw, kb = jax.random.split(key, 3)
        params.append(jax.random.normal(kw, wshape, jnp.float32) * 0.02)
        params.append(jax.random.normal(kb, bshape, jnp.float32) * 0.1)
    return params


if __name__ == "__main__":
    key = jax.random.PRNGKey(0)
    key, kx = jax.random.split(key)
    N, C, H, W = 2, 3, 16, 16
    x = jax.random.normal(kx, (N, C, H, W), jnp.float32)
    params = init_params(key)

    ref = jax.block_until_ready(forward_ref(x, params))

    fwd = jax.jit(xl_tiny_aod_net,
                  static_argnames=("tile_rows", "chunk_rows", "compute_dtype"))

    # Multi-tile path (2 row tiles -> exercises the halo / cross-tile masking)
    # and the default single-tile path (exercises the chunk-remainder code).
    out_tiled = jax.block_until_ready(fwd(x, params, tile_rows=8))
    out_full = jax.block_until_ready(fwd(x, params))

    assert out_tiled.shape == (N, C, H, W)
    assert jnp.allclose(out_tiled, ref, atol=2e-4, rtol=2e-4)
    assert jnp.allclose(out_full, ref, atol=2e-4, rtol=2e-4)
    print("KERNEL_OK")
</pallas_src>

<mosaic_0001>
module attributes {stable_mosaic.version = 11 : i64} {
  func.func @kernel(%arg0: i32, %arg1: i32, %arg2: memref<2x3x24x128xf32, #tpu.memory_space<any>>, %arg3: memref<81xf32, #tpu.memory_space<smem>>, %arg4: memref<3xf32, #tpu.memory_space<smem>>, %arg5: memref<81xf32, #tpu.memory_space<smem>>, %arg6: memref<3xf32, #tpu.memory_space<smem>>, %arg7: memref<162xf32, #tpu.memory_space<smem>>, %arg8: memref<3xf32, #tpu.memory_space<smem>>, %arg9: memref<18xf32, #tpu.memory_space<smem>>, %arg10: memref<3xf32, #tpu.memory_space<smem>>, %arg11: memref<1x3x8x128xf32, #tpu.memory_space<vmem>>, %arg12: memref<3x16x128xf32, #tpu.memory_space<vmem>>, %arg13: memref<3x16x128xf32, #tpu.memory_space<vmem>>, %arg14: memref<3x16x128xf32, #tpu.memory_space<vmem>>, %arg15: memref<!tpu.dma_semaphore, #tpu.memory_space<semaphore_mem>>) attributes {dimension_semantics = [#tpu.dimension_semantics<parallel>, #tpu.dimension_semantics<parallel>], iteration_bounds = array<i64: 2, 2>, scalar_prefetch = 0 : i64, scratch_operands = 4 : i64, tpu.core_type = #tpu.core_type<tc>, window_params = [{}, {transform_indices = @transform_1, window_bounds = array<i64: 81>}, {transform_indices = @transform_2, window_bounds = array<i64: 3>}, {transform_indices = @transform_3, window_bounds = array<i64: 81>}, {transform_indices = @transform_4, window_bounds = array<i64: 3>}, {transform_indices = @transform_5, window_bounds = array<i64: 162>}, {transform_indices = @transform_6, window_bounds = array<i64: 3>}, {transform_indices = @transform_7, window_bounds = array<i64: 18>}, {transform_indices = @transform_8, window_bounds = array<i64: 3>}, {transform_indices = @transform_9, window_bounds = array<i64: 1, 3, 8, 128>}]} {
    %c8_i32 = arith.constant 8 : i32
    %0 = arith.muli %arg1, %c8_i32 : i32
    %c0_i32 = arith.constant 0 : i32
    %c0_i32_0 = arith.constant 0 : i32
    %1 = tpu.memref_slice %arg2[%arg0, %c0_i32, %0, %c0_i32_0] : memref<2x3x24x128xf32, #tpu.memory_space<any>> -> memref<1x3x16x128xf32, #tpu.memory_space<any>>
    %2 = tpu.memref_squeeze %1 : memref<1x3x16x128xf32, #tpu.memory_space<any>> -> memref<3x16x128xf32, #tpu.memory_space<any>>
    tpu.enqueue_dma source(%2 : memref<3x16x128xf32, #tpu.memory_space<any>>) target(%arg12 : memref<3x16x128xf32, #tpu.memory_space<vmem>>) target_semaphore(%arg15 : memref<!tpu.dma_semaphore, #tpu.memory_space<semaphore_mem>>)
    %c0_i32_1 = arith.constant 0 : i32
    %c0_i32_2 = arith.constant 0 : i32
    %3 = tpu.memref_slice %arg2[%arg0, %c0_i32_1, %0, %c0_i32_2] : memref<2x3x24x128xf32, #tpu.memory_space<any>> -> memref<1x3x16x128xf32, #tpu.memory_space<any>>
    %4 = tpu.memref_squeeze %3 : memref<1x3x16x128xf32, #tpu.memory_space<any>> -> memref<3x16x128xf32, #tpu.memory_space<any>>
    tpu.wait_dma2 semaphore(%arg15 : memref<!tpu.dma_semaphore, #tpu.memory_space<semaphore_mem>>) src(%4 : memref<3x16x128xf32, #tpu.memory_space<any>>) dst(%arg12 : memref<3x16x128xf32, #tpu.memory_space<vmem>>)
    %c8_i32_3 = arith.constant 8 : i32
    %5 = arith.muli %arg1, %c8_i32_3 : i32
    %c4_i32 = arith.constant 4 : i32
    %6 = arith.subi %5, %c4_i32 : i32
    %c0 = arith.constant 0 : index
    %7 = memref.load %arg3[%c0] : memref<81xf32, #tpu.memory_space<smem>>
    %c1 = arith.constant 1 : index
    %8 = memref.load %arg3[%c1] : memref<81xf32, #tpu.memory_space<smem>>
    %c2 = arith.constant 2 : index
    %9 = memref.load %arg3[%c2] : memref<81xf32, #tpu.memory_space<smem>>
    %c3 = arith.constant 3 : index
    %10 = memref.load %arg3[%c3] : memref<81xf32, #tpu.memory_space<smem>>
    %c4 = arith.constant 4 : index
    %11 = memref.load %arg3[%c4] : memref<81xf32, #tpu.memory_space<smem>>
    %c5 = arith.constant 5 : index
    %12 = memref.load %arg3[%c5] : memref<81xf32, #tpu.memory_space<smem>>
    %c6 = arith.constant 6 : index
    %13 = memref.load %arg3[%c6] : memref<81xf32, #tpu.memory_space<smem>>
    %c7 = arith.constant 7 : index
    %14 = memref.load %arg3[%c7] : memref<81xf32, #tpu.memory_space<smem>>
    %c8 = arith.constant 8 : index
    %15 = memref.load %arg3[%c8] : memref<81xf32, #tpu.memory_space<smem>>
    %c9 = arith.constant 9 : index
    %16 = memref.load %arg3[%c9] : memref<81xf32, #tpu.memory_space<smem>>
    %c10 = arith.constant 10 : index
    %17 = memref.load %arg3[%c10] : memref<81xf32, #tpu.memory_space<smem>>
    %c11 = arith.constant 11 : index
    %18 = memref.load %arg3[%c11] : memref<81xf32, #tpu.memory_space<smem>>
    %c12 = arith.constant 12 : index
    %19 = memref.load %arg3[%c12] : memref<81xf32, #tpu.memory_space<smem>>
    %c13 = arith.constant 13 : index
    %20 = memref.load %arg3[%c13] : memref<81xf32, #tpu.memory_space<smem>>
    %c14 = arith.constant 14 : index
    %21 = memref.load %arg3[%c14] : memref<81xf32, #tpu.memory_space<smem>>
    %c15 = arith.constant 15 : index
    %22 = memref.load %arg3[%c15] : memref<81xf32, #tpu.memory_space<smem>>
    %c16 = arith.constant 16 : index
    %23 = memref.load %arg3[%c16] : memref<81xf32, #tpu.memory_space<smem>>
    %c17 = arith.constant 17 : index
    %24 = memref.load %arg3[%c17] : memref<81xf32, #tpu.memory_space<smem>>
    %c18 = arith.constant 18 : index
    %25 = memref.load %arg3[%c18] : memref<81xf32, #tpu.memory_space<smem>>
    %c19 = arith.constant 19 : index
    %26 = memref.load %arg3[%c19] : memref<81xf32, #tpu.memory_space<smem>>
    %c20 = arith.constant 20 : index
    %27 = memref.load %arg3[%c20] : memref<81xf32, #tpu.memory_space<smem>>
    %c21 = arith.constant 21 : index
    %28 = memref.load %arg3[%c21] : memref<81xf32, #tpu.memory_space<smem>>
    %c22 = arith.constant 22 : index
    %29 = memref.load %arg3[%c22] : memref<81xf32, #tpu.memory_space<smem>>
    %c23 = arith.constant 23 : index
    %30 = memref.load %arg3[%c23] : memref<81xf32, #tpu.memory_space<smem>>
    %c24 = arith.constant 24 : index
    %31 = memref.load %arg3[%c24] : memref<81xf32, #tpu.memory_space<smem>>
    %c25 = arith.constant 25 : index
    %32 = memref.load %arg3[%c25] : memref<81xf32, #tpu.memory_space<smem>>
    %c26 = arith.constant 26 : index
    %33 = memref.load %arg3[%c26] : memref<81xf32, #tpu.memory_space<smem>>
    %c27 = arith.constant 27 : index
    %34 = memref.load %arg3[%c27] : memref<81xf32, #tpu.memory_space<smem>>
    %c28 = arith.constant 28 : index
    %35 = memref.load %arg3[%c28] : memref<81xf32, #tpu.memory_space<smem>>
    %c29 = arith.constant 29 : index
    %36 = memref.load %arg3[%c29] : memref<81xf32, #tpu.memory_space<smem>>
    %c30 = arith.constant 30 : index
    %37 = memref.load %arg3[%c30] : memref<81xf32, #tpu.memory_space<smem>>
    %c31 = arith.constant 31 : index
    %38 = memref.load %arg3[%c31] : memref<81xf32, #tpu.memory_space<smem>>
    %c32 = arith.constant 32 : index
    %39 = memref.load %arg3[%c32] : memref<81xf32, #tpu.memory_space<smem>>
    %c33 = arith.constant 33 : index
    %40 = memref.load %arg3[%c33] : memref<81xf32, #tpu.memory_space<smem>>
    %c34 = arith.constant 34 : index
    %41 = memref.load %arg3[%c34] : memref<81xf32, #tpu.memory_space<smem>>
    %c35 = arith.constant 35 : index
    %42 = memref.load %arg3[%c35] : memref<81xf32, #tpu.memory_space<smem>>
    %c36 = arith.constant 36 : index
    %43 = memref.load %arg3[%c36] : memref<81xf32, #tpu.memory_space<smem>>
    %c37 = arith.constant 37 : index
    %44 = memref.load %arg3[%c37] : memref<81xf32, #tpu.memory_space<smem>>
    %c38 = arith.constant 38 : index
    %45 = memref.load %arg3[%c38] : memref<81xf32, #tpu.memory_space<smem>>
    %c39 = arith.constant 39 : index
    %46 = memref.load %arg3[%c39] : memref<81xf32, #tpu.memory_space<smem>>
    %c40 = arith.constant 40 : index
    %47 = memref.load %arg3[%c40] : memref<81xf32, #tpu.memory_space<smem>>
    %c41 = arith.constant 41 : index
    %48 = memref.load %arg3[%c41] : memref<81xf32, #tpu.memory_space<smem>>
    %c42 = arith.constant 42 : index
    %49 = memref.load %arg3[%c42] : memref<81xf32, #tpu.memory_space<smem>>
    %c43 = arith.constant 43 : index
    %50 = memref.load %arg3[%c43] : memref<81xf32, #tpu.memory_space<smem>>
    %c44 = arith.constant 44 : index
    %51 = memref.load %arg3[%c44] : memref<81xf32, #tpu.memory_space<smem>>
    %c45 = arith.constant 45 : index
    %52 = memref.load %arg3[%c45] : memref<81xf32, #tpu.memory_space<smem>>
    %c46 = arith.constant 46 : index
    %53 = memref.load %arg3[%c46] : memref<81xf32, #tpu.memory_space<smem>>
    %c47 = arith.constant 47 : index
    %54 = memref.load %arg3[%c47] : memref<81xf32, #tpu.memory_space<smem>>
    %c48 = arith.constant 48 : index
    %55 = memref.load %arg3[%c48] : memref<81xf32, #tpu.memory_space<smem>>
    %c49 = arith.constant 49 : index
    %56 = memref.load %arg3[%c49] : memref<81xf32, #tpu.memory_space<smem>>
    %c50 = arith.constant 50 : index
    %57 = memref.load %arg3[%c50] : memref<81xf32, #tpu.memory_space<smem>>
    %c51 = arith.constant 51 : index
    %58 = memref.load %arg3[%c51] : memref<81xf32, #tpu.memory_space<smem>>
    %c52 = arith.constant 52 : index
    %59 = memref.load %arg3[%c52] : memref<81xf32, #tpu.memory_space<smem>>
    %c53 = arith.constant 53 : index
    %60 = memref.load %arg3[%c53] : memref<81xf32, #tpu.memory_space<smem>>
    %c54 = arith.constant 54 : index
    %61 = memref.load %arg3[%c54] : memref<81xf32, #tpu.memory_space<smem>>
    %c55 = arith.constant 55 : index
    %62 = memref.load %arg3[%c55] : memref<81xf32, #tpu.memory_space<smem>>
    %c56 = arith.constant 56 : index
    %63 = memref.load %arg3[%c56] : memref<81xf32, #tpu.memory_space<smem>>
    %c57 = arith.constant 57 : index
    %64 = memref.load %arg3[%c57] : memref<81xf32, #tpu.memory_space<smem>>
    %c58 = arith.constant 58 : index
    %65 = memref.load %arg3[%c58] : memref<81xf32, #tpu.memory_space<smem>>
    %c59 = arith.constant 59 : index
    %66 = memref.load %arg3[%c59] : memref<81xf32, #tpu.memory_space<smem>>
    %c60 = arith.constant 60 : index
    %67 = memref.load %arg3[%c60] : memref<81xf32, #tpu.memory_space<smem>>
    %c61 = arith.constant 61 : index
    %68 = memref.load %arg3[%c61] : memref<81xf32, #tpu.memory_space<smem>>
    %c62 = arith.constant 62 : index
    %69 = memref.load %arg3[%c62] : memref<81xf32, #tpu.memory_space<smem>>
    %c63 = arith.constant 63 : index
    %70 = memref.load %arg3[%c63] : memref<81xf32, #tpu.memory_space<smem>>
    %c64 = arith.constant 64 : index
    %71 = memref.load %arg3[%c64] : memref<81xf32, #tpu.memory_space<smem>>
    %c65 = arith.constant 65 : index
    %72 = memref.load %arg3[%c65] : memref<81xf32, #tpu.memory_space<smem>>
    %c66 = arith.constant 66 : index
    %73 = memref.load %arg3[%c66] : memref<81xf32, #tpu.memory_space<smem>>
    %c67 = arith.constant 67 : index
    %74 = memref.load %arg3[%c67] : memref<81xf32, #tpu.memory_space<smem>>
    %c68 = arith.constant 68 : index
    %75 = memref.load %arg3[%c68] : memref<81xf32, #tpu.memory_space<smem>>
    %c69 = arith.constant 69 : index
    %76 = memref.load %arg3[%c69] : memref<81xf32, #tpu.memory_space<smem>>
    %c70 = arith.constant 70 : index
    %77 = memref.load %arg3[%c70] : memref<81xf32, #tpu.memory_space<smem>>
    %c71 = arith.constant 71 : index
    %78 = memref.load %arg3[%c71] : memref<81xf32, #tpu.memory_space<smem>>
    %c72 = arith.constant 72 : index
    %79 = memref.load %arg3[%c72] : memref<81xf32, #tpu.memory_space<smem>>
    %c73 = arith.constant 73 : index
    %80 = memref.load %arg3[%c73] : memref<81xf32, #tpu.memory_space<smem>>
    %c74 = arith.constant 74 : index
    %81 = memref.load %arg3[%c74] : memref<81xf32, #tpu.memory_space<smem>>
    %c75 = arith.constant 75 : index
    %82 = memref.load %arg3[%c75] : memref<81xf32, #tpu.memory_space<smem>>
    %c76 = arith.constant 76 : index
    %83 = memref.load %arg3[%c76] : memref<81xf32, #tpu.memory_space<smem>>
    %c77 = arith.constant 77 : index
    %84 = memref.load %arg3[%c77] : memref<81xf32, #tpu.memory_space<smem>>
    %c78 = arith.constant 78 : index
    %85 = memref.load %arg3[%c78] : memref<81xf32, #tpu.memory_space<smem>>
    %c79 = arith.constant 79 : index
    %86 = memref.load %arg3[%c79] : memref<81xf32, #tpu.memory_space<smem>>
    %c80 = arith.constant 80 : index
    %87 = memref.load %arg3[%c80] : memref<81xf32, #tpu.memory_space<smem>>
    %c0_4 = arith.constant 0 : index
    %88 = memref.load %arg5[%c0_4] : memref<81xf32, #tpu.memory_space<smem>>
    %c1_5 = arith.constant 1 : index
    %89 = memref.load %arg5[%c1_5] : memref<81xf32, #tpu.memory_space<smem>>
    %c2_6 = arith.constant 2 : index
    %90 = memref.load %arg5[%c2_6] : memref<81xf32, #tpu.memory_space<smem>>
    %c3_7 = arith.constant 3 : index
    %91 = memref.load %arg5[%c3_7] : memref<81xf32, #tpu.memory_space<smem>>
    %c4_8 = arith.constant 4 : index
    %92 = memref.load %arg5[%c4_8] : memref<81xf32, #tpu.memory_space<smem>>
    %c5_9 = arith.constant 5 : index
    %93 = memref.load %arg5[%c5_9] : memref<81xf32, #tpu.memory_space<smem>>
    %c6_10 = arith.constant 6 : index
    %94 = memref.load %arg5[%c6_10] : memref<81xf32, #tpu.memory_space<smem>>
    %c7_11 = arith.constant 7 : index
    %95 = memref.load %arg5[%c7_11] : memref<81xf32, #tpu.memory_space<smem>>
    %c8_12 = arith.constant 8 : index
    %96 = memref.load %arg5[%c8_12] : memref<81xf32, #tpu.memory_space<smem>>
    %c9_13 = arith.constant 9 : index
    %97 = memref.load %arg5[%c9_13] : memref<81xf32, #tpu.memory_space<smem>>
    %c10_14 = arith.constant 10 : index
    %98 = memref.load %arg5[%c10_14] : memref<81xf32, #tpu.memory_space<smem>>
    %c11_15 = arith.constant 11 : index
    %99 = memref.load %arg5[%c11_15] : memref<81xf32, #tpu.memory_space<smem>>
    %c12_16 = arith.constant 12 : index
    %100 = memref.load %arg5[%c12_16] : memref<81xf32, #tpu.memory_space<smem>>
    %c13_17 = arith.constant 13 : index
    %101 = memref.load %arg5[%c13_17] : memref<81xf32, #tpu.memory_space<smem>>
    %c14_18 = arith.constant 14 : index
    %102 = memref.load %arg5[%c14_18] : memref<81xf32, #tpu.memory_space<smem>>
    %c15_19 = arith.constant 15 : index
    %103 = memref.load %arg5[%c15_19] : memref<81xf32, #tpu.memory_space<smem>>
    %c16_20 = arith.constant 16 : index
    %104 = memref.load %arg5[%c16_20] : memref<81xf32, #tpu.memory_space<smem>>
    %c17_21 = arith.constant 17 : index
    %105 = memref.load %arg5[%c17_21] : memref<81xf32, #tpu.memory_space<smem>>
    %c18_22 = arith.constant 18 : index
    %106 = memref.load %arg5[%c18_22] : memref<81xf32, #tpu.memory_space<smem>>
    %c19_23 = arith.constant 19 : index
    %107 = memref.load %arg5[%c19_23] : memref<81xf32, #tpu.memory_space<smem>>
    %c20_24 = arith.constant 20 : index
    %108 = memref.load %arg5[%c20_24] : memref<81xf32, #tpu.memory_space<smem>>
    %c21_25 = arith.constant 21 : index
    %109 = memref.load %arg5[%c21_25] : memref<81xf32, #tpu.memory_space<smem>>
    %c22_26 = arith.constant 22 : index
    %110 = memref.load %arg5[%c22_26] : memref<81xf32, #tpu.memory_space<smem>>
    %c23_27 = arith.constant 23 : index
    %111 = memref.load %arg5[%c23_27] : memref<81xf32, #tpu.memory_space<smem>>
    %c24_28 = arith.constant 24 : index
    %112 = memref.load %arg5[%c24_28] : memref<81xf32, #tpu.memory_space<smem>>
    %c25_29 = arith.constant 25 : index
    %113 = memref.load %arg5[%c25_29] : memref<81xf32, #tpu.memory_space<smem>>
    %c26_30 = arith.constant 26 : index
    %114 = memref.load %arg5[%c26_30] : memref<81xf32, #tpu.memory_space<smem>>
    %c27_31 = arith.constant 27 : index
    %115 = memref.load %arg5[%c27_31] : memref<81xf32, #tpu.memory_space<smem>>
    %c28_32 = arith.constant 28 : index
    %116 = memref.load %arg5[%c28_32] : memref<81xf32, #tpu.memory_space<smem>>
    %c29_33 = arith.constant 29 : index
    %117 = memref.load %arg5[%c29_33] : memref<81xf32, #tpu.memory_space<smem>>
    %c30_34 = arith.constant 30 : index
    %118 = memref.load %arg5[%c30_34] : memref<81xf32, #tpu.memory_space<smem>>
    %c31_35 = arith.constant 31 : index
    %119 = memref.load %arg5[%c31_35] : memref<81xf32, #tpu.memory_space<smem>>
    %c32_36 = arith.constant 32 : index
    %120 = memref.load %arg5[%c32_36] : memref<81xf32, #tpu.memory_space<smem>>
    %c33_37 = arith.constant 33 : index
    %121 = memref.load %arg5[%c33_37] : memref<81xf32, #tpu.memory_space<smem>>
    %c34_38 = arith.constant 34 : index
    %122 = memref.load %arg5[%c34_38] : memref<81xf32, #tpu.memory_space<smem>>
    %c35_39 = arith.constant 35 : index
    %123 = memref.load %arg5[%c35_39] : memref<81xf32, #tpu.memory_space<smem>>
    %c36_40 = arith.constant 36 : index
    %124 = memref.load %arg5[%c36_40] : memref<81xf32, #tpu.memory_space<smem>>
    %c37_41 = arith.constant 37 : index
    %125 = memref.load %arg5[%c37_41] : memref<81xf32, #tpu.memory_space<smem>>
    %c38_42 = arith.constant 38 : index
    %126 = memref.load %arg5[%c38_42] : memref<81xf32, #tpu.memory_space<smem>>
    %c39_43 = arith.constant 39 : index
    %127 = memref.load %arg5[%c39_43] : memref<81xf32, #tpu.memory_space<smem>>
    %c40_44 = arith.constant 40 : index
    %128 = memref.load %arg5[%c40_44] : memref<81xf32, #tpu.memory_space<smem>>
    %c41_45 = arith.constant 41 : index
    %129 = memref.load %arg5[%c41_45] : memref<81xf32, #tpu.memory_space<smem>>
    %c42_46 = arith.constant 42 : index
    %130 = memref.load %arg5[%c42_46] : memref<81xf32, #tpu.memory_space<smem>>
    %c43_47 = arith.constant 43 : index
    %131 = memref.load %arg5[%c43_47] : memref<81xf32, #tpu.memory_space<smem>>
    %c44_48 = arith.constant 44 : index
    %132 = memref.load %arg5[%c44_48] : memref<81xf32, #tpu.memory_space<smem>>
    %c45_49 = arith.constant 45 : index
    %133 = memref.load %arg5[%c45_49] : memref<81xf32, #tpu.memory_space<smem>>
    %c46_50 = arith.constant 46 : index
    %134 = memref.load %arg5[%c46_50] : memref<81xf32, #tpu.memory_space<smem>>
    %c47_51 = arith.constant 47 : index
    %135 = memref.load %arg5[%c47_51] : memref<81xf32, #tpu.memory_space<smem>>
    %c48_52 = arith.constant 48 : index
    %136 = memref.load %arg5[%c48_52] : memref<81xf32, #tpu.memory_space<smem>>
    %c49_53 = arith.constant 49 : index
    %137 = memref.load %arg5[%c49_53] : memref<81xf32, #tpu.memory_space<smem>>
    %c50_54 = arith.constant 50 : index
    %138 = memref.load %arg5[%c50_54] : memref<81xf32, #tpu.memory_space<smem>>
    %c51_55 = arith.constant 51 : index
    %139 = memref.load %arg5[%c51_55] : memref<81xf32, #tpu.memory_space<smem>>
    %c52_56 = arith.constant 52 : index
    %140 = memref.load %arg5[%c52_56] : memref<81xf32, #tpu.memory_space<smem>>
    %c53_57 = arith.constant 53 : index
    %141 = memref.load %arg5[%c53_57] : memref<81xf32, #tpu.memory_space<smem>>
    %c54_58 = arith.constant 54 : index
    %142 = memref.load %arg5[%c54_58] : memref<81xf32, #tpu.memory_space<smem>>
    %c55_59 = arith.constant 55 : index
    %143 = memref.load %arg5[%c55_59] : memref<81xf32, #tpu.memory_space<smem>>
    %c56_60 = arith.constant 56 : index
    %144 = memref.load %arg5[%c56_60] : memref<81xf32, #tpu.memory_space<smem>>
    %c57_61 = arith.constant 57 : index
    %145 = memref.load %arg5[%c57_61] : memref<81xf32, #tpu.memory_space<smem>>
    %c58_62 = arith.constant 58 : index
    %146 = memref.load %arg5[%c58_62] : memref<81xf32, #tpu.memory_space<smem>>
    %c59_63 = arith.constant 59 : index
    %147 = memref.load %arg5[%c59_63] : memref<81xf32, #tpu.memory_space<smem>>
    %c60_64 = arith.constant 60 : index
    %148 = memref.load %arg5[%c60_64] : memref<81xf32, #tpu.memory_space<smem>>
    %c61_65 = arith.constant 61 : index
    %149 = memref.load %arg5[%c61_65] : memref<81xf32, #tpu.memory_space<smem>>
    %c62_66 = arith.constant 62 : index
    %150 = memref.load %arg5[%c62_66] : memref<81xf32, #tpu.memory_space<smem>>
    %c63_67 = arith.constant 63 : index
    %151 = memref.load %arg5[%c63_67] : memref<81xf32, #tpu.memory_space<smem>>
    %c64_68 = arith.constant 64 : index
    %152 = memref.load %arg5[%c64_68] : memref<81xf32, #tpu.memory_space<smem>>
    %c65_69 = arith.constant 65 : index
    %153 = memref.load %arg5[%c65_69] : memref<81xf32, #tpu.memory_space<smem>>
    %c66_70 = arith.constant 66 : index
    %154 = memref.load %arg5[%c66_70] : memref<81xf32, #tpu.memory_space<smem>>
    %c67_71 = arith.constant 67 : index
    %155 = memref.load %arg5[%c67_71] : memref<81xf32, #tpu.memory_space<smem>>
    %c68_72 = arith.constant 68 : index
    %156 = memref.load %arg5[%c68_72] : memref<81xf32, #tpu.memory_space<smem>>
    %c69_73 = arith.constant 69 : index
    %157 = memref.load %arg5[%c69_73] : memref<81xf32, #tpu.memory_space<smem>>
    %c70_74 = arith.constant 70 : index
    %158 = memref.load %arg5[%c70_74] : memref<81xf32, #tpu.memory_space<smem>>
    %c71_75 = arith.constant 71 : index
    %159 = memref.load %arg5[%c71_75] : memref<81xf32, #tpu.memory_space<smem>>
    %c72_76 = arith.constant 72 : index
    %160 = memref.load %arg5[%c72_76] : memref<81xf32, #tpu.memory_space<smem>>
    %c73_77 = arith.constant 73 : index
    %161 = memref.load %arg5[%c73_77] : memref<81xf32, #tpu.memory_space<smem>>
    %c74_78 = arith.constant 74 : index
    %162 = memref.load %arg5[%c74_78] : memref<81xf32, #tpu.memory_space<smem>>
    %c75_79 = arith.constant 75 : index
    %163 = memref.load %arg5[%c75_79] : memref<81xf32, #tpu.memory_space<smem>>
    %c76_80 = arith.constant 76 : index
    %164 = memref.load %arg5[%c76_80] : memref<81xf32, #tpu.memory_space<smem>>
    %c77_81 = arith.constant 77 : index
    %165 = memref.load %arg5[%c77_81] : memref<81xf32, #tpu.memory_space<smem>>
    %c78_82 = arith.constant 78 : index
    %166 = memref.load %arg5[%c78_82] : memref<81xf32, #tpu.memory_space<smem>>
    %c79_83 = arith.constant 79 : index
    %167 = memref.load %arg5[%c79_83] : memref<81xf32, #tpu.memory_space<smem>>
    %c80_84 = arith.constant 80 : index
    %168 = memref.load %arg5[%c80_84] : memref<81xf32, #tpu.memory_space<smem>>
    %c0_85 = arith.constant 0 : index
    %169 = memref.load %arg7[%c0_85] : memref<162xf32, #tpu.memory_space<smem>>
    %c1_86 = arith.constant 1 : index
    %170 = memref.load %arg7[%c1_86] : memref<162xf32, #tpu.memory_space<smem>>
    %c2_87 = arith.constant 2 : index
    %171 = memref.load %arg7[%c2_87] : memref<162xf32, #tpu.memory_space<smem>>
    %c3_88 = arith.constant 3 : index
    %172 = memref.load %arg7[%c3_88] : memref<162xf32, #tpu.memory_space<smem>>
    %c4_89 = arith.constant 4 : index
    %173 = memref.load %arg7[%c4_89] : memref<162xf32, #tpu.memory_space<smem>>
    %c5_90 = arith.constant 5 : index
    %174 = memref.load %arg7[%c5_90] : memref<162xf32, #tpu.memory_space<smem>>
    %c6_91 = arith.constant 6 : index
    %175 = memref.load %arg7[%c6_91] : memref<162xf32, #tpu.memory_space<smem>>
    %c7_92 = arith.constant 7 : index
    %176 = memref.load %arg7[%c7_92] : memref<162xf32, #tpu.memory_space<smem>>
    %c8_93 = arith.constant 8 : index
    %177 = memref.load %arg7[%c8_93] : memref<162xf32, #tpu.memory_space<smem>>
    %c9_94 = arith.constant 9 : index
    %178 = memref.load %arg7[%c9_94] : memref<162xf32, #tpu.memory_space<smem>>
    %c10_95 = arith.constant 10 : index
    %179 = memref.load %arg7[%c10_95] : memref<162xf32, #tpu.memory_space<smem>>
    %c11_96 = arith.constant 11 : index
    %180 = memref.load %arg7[%c11_96] : memref<162xf32, #tpu.memory_space<smem>>
    %c12_97 = arith.constant 12 : index
    %181 = memref.load %arg7[%c12_97] : memref<162xf32, #tpu.memory_space<smem>>
    %c13_98 = arith.constant 13 : index
    %182 = memref.load %arg7[%c13_98] : memref<162xf32, #tpu.memory_space<smem>>
    %c14_99 = arith.constant 14 : index
    %183 = memref.load %arg7[%c14_99] : memref<162xf32, #tpu.memory_space<smem>>
    %c15_100 = arith.constant 15 : index
    %184 = memref.load %arg7[%c15_100] : memref<162xf32, #tpu.memory_space<smem>>
    %c16_101 = arith.constant 16 : index
    %185 = memref.load %arg7[%c16_101] : memref<162xf32, #tpu.memory_space<smem>>
    %c17_102 = arith.constant 17 : index
    %186 = memref.load %arg7[%c17_102] : memref<162xf32, #tpu.memory_space<smem>>
    %c18_103 = arith.constant 18 : index
    %187 = memref.load %arg7[%c18_103] : memref<162xf32, #tpu.memory_space<smem>>
    %c19_104 = arith.constant 19 : index
    %188 = memref.load %arg7[%c19_104] : memref<162xf32, #tpu.memory_space<smem>>
    %c20_105 = arith.constant 20 : index
    %189 = memref.load %arg7[%c20_105] : memref<162xf32, #tpu.memory_space<smem>>
    %c21_106 = arith.constant 21 : index
    %190 = memref.load %arg7[%c21_106] : memref<162xf32, #tpu.memory_space<smem>>
    %c22_107 = arith.constant 22 : index
    %191 = memref.load %arg7[%c22_107] : memref<162xf32, #tpu.memory_space<smem>>
    %c23_108 = arith.constant 23 : index
    %192 = memref.load %arg7[%c23_108] : memref<162xf32, #tpu.memory_space<smem>>
    %c24_109 = arith.constant 24 : index
    %193 = memref.load %arg7[%c24_109] : memref<162xf32, #tpu.memory_space<smem>>
    %c25_110 = arith.constant 25 : index
    %194 = memref.load %arg7[%c25_110] : memref<162xf32, #tpu.memory_space<smem>>
    %c26_111 = arith.constant 26 : index
    %195 = memref.load %arg7[%c26_111] : memref<162xf32, #tpu.memory_space<smem>>
    %c27_112 = arith.constant 27 : index
    %196 = memref.load %arg7[%c27_112] : memref<162xf32, #tpu.memory_space<smem>>
    %c28_113 = arith.constant 28 : index
    %197 = memref.load %arg7[%c28_113] : memref<162xf32, #tpu.memory_space<smem>>
    %c29_114 = arith.constant 29 : index
    %198 = memref.load %arg7[%c29_114] : memref<162xf32, #tpu.memory_space<smem>>
    %c30_115 = arith.constant 30 : index
    %199 = memref.load %arg7[%c30_115] : memref<162xf32, #tpu.memory_space<smem>>
    %c31_116 = arith.constant 31 : index
    %200 = memref.load %arg7[%c31_116] : memref<162xf32, #tpu.memory_space<smem>>
    %c32_117 = arith.constant 32 : index
    %201 = memref.load %arg7[%c32_117] : memref<162xf32, #tpu.memory_space<smem>>
    %c33_118 = arith.constant 33 : index
    %202 = memref.load %arg7[%c33_118] : memref<162xf32, #tpu.memory_space<smem>>
    %c34_119 = arith.constant 34 : index
    %203 = memref.load %arg7[%c34_119] : memref<162xf32, #tpu.memory_space<smem>>
    %c35_120 = arith.constant 35 : index
    %204 = memref.load %arg7[%c35_120] : memref<162xf32, #tpu.memory_space<smem>>
    %c36_121 = arith.constant 36 : index
    %205 = memref.load %arg7[%c36_121] : memref<162xf32, #tpu.memory_space<smem>>
    %c37_122 = arith.constant 37 : index
    %206 = memref.load %arg7[%c37_122] : memref<162xf32, #tpu.memory_space<smem>>
    %c38_123 = arith.constant 38 : index
    %207 = memref.load %arg7[%c38_123] : memref<162xf32, #tpu.memory_space<smem>>
    %c39_124 = arith.constant 39 : index
    %208 = memref.load %arg7[%c39_124] : memref<162xf32, #tpu.memory_space<smem>>
    %c40_125 = arith.constant 40 : index
    %209 = memref.load %arg7[%c40_125] : memref<162xf32, #tpu.memory_space<smem>>
    %c41_126 = arith.constant 41 : index
    %210 = memref.load %arg7[%c41_126] : memref<162xf32, #tpu.memory_space<smem>>
    %c42_127 = arith.constant 42 : index
    %211 = memref.load %arg7[%c42_127] : memref<162xf32, #tpu.memory_space<smem>>
    %c43_128 = arith.constant 43 : index
    %212 = memref.load %arg7[%c43_128] : memref<162xf32, #tpu.memory_space<smem>>
    %c44_129 = arith.constant 44 : index
    %213 = memref.load %arg7[%c44_129] : memref<162xf32, #tpu.memory_space<smem>>
    %c45_130 = arith.constant 45 : index
    %214 = memref.load %arg7[%c45_130] : memref<162xf32, #tpu.memory_space<smem>>
    %c46_131 = arith.constant 46 : index
    %215 = memref.load %arg7[%c46_131] : memref<162xf32, #tpu.memory_space<smem>>
    %c47_132 = arith.constant 47 : index
    %216 = memref.load %arg7[%c47_132] : memref<162xf32, #tpu.memory_space<smem>>
    %c48_133 = arith.constant 48 : index
    %217 = memref.load %arg7[%c48_133] : memref<162xf32, #tpu.memory_space<smem>>
    %c49_134 = arith.constant 49 : index
    %218 = memref.load %arg7[%c49_134] : memref<162xf32, #tpu.memory_space<smem>>
    %c50_135 = arith.constant 50 : index
    %219 = memref.load %arg7[%c50_135] : memref<162xf32, #tpu.memory_space<smem>>
    %c51_136 = arith.constant 51 : index
    %220 = memref.load %arg7[%c51_136] : memref<162xf32, #tpu.memory_space<smem>>
    %c52_137 = arith.constant 52 : index
    %221 = memref.load %arg7[%c52_137] : memref<162xf32, #tpu.memory_space<smem>>
    %c53_138 = arith.constant 53 : index
    %222 = memref.load %arg7[%c53_138] : memref<162xf32, #tpu.memory_space<smem>>
    %c54_139 = arith.constant 54 : index
    %223 = memref.load %arg7[%c54_139] : memref<162xf32, #tpu.memory_space<smem>>
    %c55_140 = arith.constant 55 : index
    %224 = memref.load %arg7[%c55_140] : memref<162xf32, #tpu.memory_space<smem>>
    %c56_141 = arith.constant 56 : index
    %225 = memref.load %arg7[%c56_141] : memref<162xf32, #tpu.memory_space<smem>>
    %c57_142 = arith.constant 57 : index
    %226 = memref.load %arg7[%c57_142] : memref<162xf32, #tpu.memory_space<smem>>
    %c58_143 = arith.constant 58 : index
    %227 = memref.load %arg7[%c58_143] : memref<162xf32, #tpu.memory_space<smem>>
    %c59_144 = arith.constant 59 : index
    %228 = memref.load %arg7[%c59_144] : memref<162xf32, #tpu.memory_space<smem>>
    %c60_145 = arith.constant 60 : index
    %229 = memref.load %arg7[%c60_145] : memref<162xf32, #tpu.memory_space<smem>>
    %c61_146 = arith.constant 61 : index
    %230 = memref.load %arg7[%c61_146] : memref<162xf32, #tpu.memory_space<smem>>
    %c62_147 = arith.constant 62 : index
    %231 = memref.load %arg7[%c62_147] : memref<162xf32, #tpu.memory_space<smem>>
    %c63_148 = arith.constant 63 : index
    %232 = memref.load %arg7[%c63_148] : memref<162xf32, #tpu.memory_space<smem>>
    %c64_149 = arith.constant 64 : index
    %233 = memref.load %arg7[%c64_149] : memref<162xf32, #tpu.memory_space<smem>>
    %c65_150 = arith.constant 65 : index
    %234 = memref.load %arg7[%c65_150] : memref<162xf32, #tpu.memory_space<smem>>
    %c66_151 = arith.constant 66 : index
    %235 = memref.load %arg7[%c66_151] : memref<162xf32, #tpu.memory_space<smem>>
    %c67_152 = arith.constant 67 : index
    %236 = memref.load %arg7[%c67_152] : memref<162xf32, #tpu.memory_space<smem>>
    %c68_153 = arith.constant 68 : index
    %237 = memref.load %arg7[%c68_153] : memref<162xf32, #tpu.memory_space<smem>>
    %c69_154 = arith.constant 69 : index
    %238 = memref.load %arg7[%c69_154] : memref<162xf32, #tpu.memory_space<smem>>
    %c70_155 = arith.constant 70 : index
    %239 = memref.load %arg7[%c70_155] : memref<162xf32, #tpu.memory_space<smem>>
    %c71_156 = arith.constant 71 : index
    %240 = memref.load %arg7[%c71_156] : memref<162xf32, #tpu.memory_space<smem>>
    %c72_157 = arith.constant 72 : index
    %241 = memref.load %arg7[%c72_157] : memref<162xf32, #tpu.memory_space<smem>>
    %c73_158 = arith.constant 73 : index
    %242 = memref.load %arg7[%c73_158] : memref<162xf32, #tpu.memory_space<smem>>
    %c74_159 = arith.constant 74 : index
    %243 = memref.load %arg7[%c74_159] : memref<162xf32, #tpu.memory_space<smem>>
    %c75_160 = arith.constant 75 : index
    %244 = memref.load %arg7[%c75_160] : memref<162xf32, #tpu.memory_space<smem>>
    %c76_161 = arith.constant 76 : index
    %245 = memref.load %arg7[%c76_161] : memref<162xf32, #tpu.memory_space<smem>>
    %c77_162 = arith.constant 77 : index
    %246 = memref.load %arg7[%c77_162] : memref<162xf32, #tpu.memory_space<smem>>
    %c78_163 = arith.constant 78 : index
    %247 = memref.load %arg7[%c78_163] : memref<162xf32, #tpu.memory_space<smem>>
    %c79_164 = arith.constant 79 : index
    %248 = memref.load %arg7[%c79_164] : memref<162xf32, #tpu.memory_space<smem>>
    %c80_165 = arith.constant 80 : index
    %249 = memref.load %arg7[%c80_165] : memref<162xf32, #tpu.memory_space<smem>>
    %c81 = arith.constant 81 : index
    %250 = memref.load %arg7[%c81] : memref<162xf32, #tpu.memory_space<smem>>
    %c82 = arith.constant 82 : index
    %251 = memref.load %arg7[%c82] : memref<162xf32, #tpu.memory_space<smem>>
    %c83 = arith.constant 83 : index
    %252 = memref.load %arg7[%c83] : memref<162xf32, #tpu.memory_space<smem>>
    %c84 = arith.constant 84 : index
    %253 = memref.load %arg7[%c84] : memref<162xf32, #tpu.memory_space<smem>>
    %c85 = arith.constant 85 : index
    %254 = memref.load %arg7[%c85] : memref<162xf32, #tpu.memory_space<smem>>
    %c86 = arith.constant 86 : index
    %255 = memref.load %arg7[%c86] : memref<162xf32, #tpu.memory_space<smem>>
    %c87 = arith.constant 87 : index
    %256 = memref.load %arg7[%c87] : memref<162xf32, #tpu.memory_space<smem>>
    %c88 = arith.constant 88 : index
    %257 = memref.load %arg7[%c88] : memref<162xf32, #tpu.memory_space<smem>>
    %c89 = arith.constant 89 : index
    %258 = memref.load %arg7[%c89] : memref<162xf32, #tpu.memory_space<smem>>
    %c90 = arith.constant 90 : index
    %259 = memref.load %arg7[%c90] : memref<162xf32, #tpu.memory_space<smem>>
    %c91 = arith.constant 91 : index
    %260 = memref.load %arg7[%c91] : memref<162xf32, #tpu.memory_space<smem>>
    %c92 = arith.constant 92 : index
    %261 = memref.load %arg7[%c92] : memref<162xf32, #tpu.memory_space<smem>>
    %c93 = arith.constant 93 : index
    %262 = memref.load %arg7[%c93] : memref<162xf32, #tpu.memory_space<smem>>
    %c94 = arith.constant 94 : index
    %263 = memref.load %arg7[%c94] : memref<162xf32, #tpu.memory_space<smem>>
    %c95 = arith.constant 95 : index
    %264 = memref.load %arg7[%c95] : memref<162xf32, #tpu.memory_space<smem>>
    %c96 = arith.constant 96 : index
    %265 = memref.load %arg7[%c96] : memref<162xf32, #tpu.memory_space<smem>>
    %c97 = arith.constant 97 : index
    %266 = memref.load %arg7[%c97] : memref<162xf32, #tpu.memory_space<smem>>
    %c98 = arith.constant 98 : index
    %267 = memref.load %arg7[%c98] : memref<162xf32, #tpu.memory_space<smem>>
    %c99 = arith.constant 99 : index
    %268 = memref.load %arg7[%c99] : memref<162xf32, #tpu.memory_space<smem>>
    %c100 = arith.constant 100 : index
    %269 = memref.load %arg7[%c100] : memref<162xf32, #tpu.memory_space<smem>>
    %c101 = arith.constant 101 : index
    %270 = memref.load %arg7[%c101] : memref<162xf32, #tpu.memory_space<smem>>
    %c102 = arith.constant 102 : index
    %271 = memref.load %arg7[%c102] : memref<162xf32, #tpu.memory_space<smem>>
    %c103 = arith.constant 103 : index
    %272 = memref.load %arg7[%c103] : memref<162xf32, #tpu.memory_space<smem>>
    %c104 = arith.constant 104 : index
    %273 = memref.load %arg7[%c104] : memref<162xf32, #tpu.memory_space<smem>>
    %c105 = arith.constant 105 : index
    %274 = memref.load %arg7[%c105] : memref<162xf32, #tpu.memory_space<smem>>
    %c106 = arith.constant 106 : index
    %275 = memref.load %arg7[%c106] : memref<162xf32, #tpu.memory_space<smem>>
    %c107 = arith.constant 107 : index
    %276 = memref.load %arg7[%c107] : memref<162xf32, #tpu.memory_space<smem>>
    %c108 = arith.constant 108 : index
    %277 = memref.load %arg7[%c108] : memref<162xf32, #tpu.memory_space<smem>>
    %c109 = arith.constant 109 : index
    %278 = memref.load %arg7[%c109] : memref<162xf32, #tpu.memory_space<smem>>
    %c110 = arith.constant 110 : index
    %279 = memref.load %arg7[%c110] : memref<162xf32, #tpu.memory_space<smem>>
    %c111 = arith.constant 111 : index
    %280 = memref.load %arg7[%c111] : memref<162xf32, #tpu.memory_space<smem>>
    %c112 = arith.constant 112 : index
    %281 = memref.load %arg7[%c112] : memref<162xf32, #tpu.memory_space<smem>>
    %c113 = arith.constant 113 : index
    %282 = memref.load %arg7[%c113] : memref<162xf32, #tpu.memory_space<smem>>
    %c114 = arith.constant 114 : index
    %283 = memref.load %arg7[%c114] : memref<162xf32, #tpu.memory_space<smem>>
    %c115 = arith.constant 115 : index
    %284 = memref.load %arg7[%c115] : memref<162xf32, #tpu.memory_space<smem>>
    %c116 = arith.constant 116 : index
    %285 = memref.load %arg7[%c116] : memref<162xf32, #tpu.memory_space<smem>>
    %c117 = arith.constant 117 : index
    %286 = memref.load %arg7[%c117] : memref<162xf32, #tpu.memory_space<smem>>
    %c118 = arith.constant 118 : index
    %287 = memref.load %arg7[%c118] : memref<162xf32, #tpu.memory_space<smem>>
    %c119 = arith.constant 119 : index
    %288 = memref.load %arg7[%c119] : memref<162xf32, #tpu.memory_space<smem>>
    %c120 = arith.constant 120 : index
    %289 = memref.load %arg7[%c120] : memref<162xf32, #tpu.memory_space<smem>>
    %c121 = arith.constant 121 : index
    %290 = memref.load %arg7[%c121] : memref<162xf32, #tpu.memory_space<smem>>
    %c122 = arith.constant 122 : index
    %291 = memref.load %arg7[%c122] : memref<162xf32, #tpu.memory_space<smem>>
    %c123 = arith.constant 123 : index
    %292 = memref.load %arg7[%c123] : memref<162xf32, #tpu.memory_space<smem>>
    %c124 = arith.constant 124 : index
    %293 = memref.load %arg7[%c124] : memref<162xf32, #tpu.memory_space<smem>>
    %c125 = arith.constant 125 : index
    %294 = memref.load %arg7[%c125] : memref<162xf32, #tpu.memory_space<smem>>
    %c126 = arith.constant 126 : index
    %295 = memref.load %arg7[%c126] : memref<162xf32, #tpu.memory_space<smem>>
    %c127 = arith.constant 127 : index
    %296 = memref.load %arg7[%c127] : memref<162xf32, #tpu.memory_space<smem>>
    %c128 = arith.constant 128 : index
    %297 = memref.load %arg7[%c128] : memref<162xf32, #tpu.memory_space<smem>>
    %c129 = arith.constant 129 : index
    %298 = memref.load %arg7[%c129] : memref<162xf32, #tpu.memory_space<smem>>
    %c130 = arith.constant 130 : index
    %299 = memref.load %arg7[%c130] : memref<162xf32, #tpu.memory_space<smem>>
    %c131 = arith.constant 131 : index
    %300 = memref.load %arg7[%c131] : memref<162xf32, #tpu.memory_space<smem>>
    %c132 = arith.constant 132 : index
    %301 = memref.load %arg7[%c132] : memref<162xf32, #tpu.memory_space<smem>>
    %c133 = arith.constant 133 : index
    %302 = memref.load %arg7[%c133] : memref<162xf32, #tpu.memory_space<smem>>
    %c134 = arith.constant 134 : index
    %303 = memref.load %arg7[%c134] : memref<162xf32, #tpu.memory_space<smem>>
    %c135 = arith.constant 135 : index
    %304 = memref.load %arg7[%c135] : memref<162xf32, #tpu.memory_space<smem>>
    %c136 = arith.constant 136 : index
    %305 = memref.load %arg7[%c136] : memref<162xf32, #tpu.memory_space<smem>>
    %c137 = arith.constant 137 : index
    %306 = memref.load %arg7[%c137] : memref<162xf32, #tpu.memory_space<smem>>
    %c138 = arith.constant 138 : index
    %307 = memref.load %arg7[%c138] : memref<162xf32, #tpu.memory_space<smem>>
    %c139 = arith.constant 139 : index
    %308 = memref.load %arg7[%c139] : memref<162xf32, #tpu.memory_space<smem>>
    %c140 = arith.constant 140 : index
    %309 = memref.load %arg7[%c140] : memref<162xf32, #tpu.memory_space<smem>>
    %c141 = arith.constant 141 : index
    %310 = memref.load %arg7[%c141] : memref<162xf32, #tpu.memory_space<smem>>
    %c142 = arith.constant 142 : index
    %311 = memref.load %arg7[%c142] : memref<162xf32, #tpu.memory_space<smem>>
    %c143 = arith.constant 143 : index
    %312 = memref.load %arg7[%c143] : memref<162xf32, #tpu.memory_space<smem>>
    %c144 = arith.constant 144 : index
    %313 = memref.load %arg7[%c144] : memref<162xf32, #tpu.memory_space<smem>>
    %c145 = arith.constant 145 : index
    %314 = memref.load %arg7[%c145] : memref<162xf32, #tpu.memory_space<smem>>
    %c146 = arith.constant 146 : index
    %315 = memref.load %arg7[%c146] : memref<162xf32, #tpu.memory_space<smem>>
    %c147 = arith.constant 147 : index
    %316 = memref.load %arg7[%c147] : memref<162xf32, #tpu.memory_space<smem>>
    %c148 = arith.constant 148 : index
    %317 = memref.load %arg7[%c148] : memref<162xf32, #tpu.memory_space<smem>>
    %c149 = arith.constant 149 : index
    %318 = memref.load %arg7[%c149] : memref<162xf32, #tpu.memory_space<smem>>
    %c150 = arith.constant 150 : index
    %319 = memref.load %arg7[%c150] : memref<162xf32, #tpu.memory_space<smem>>
    %c151 = arith.constant 151 : index
    %320 = memref.load %arg7[%c151] : memref<162xf32, #tpu.memory_space<smem>>
    %c152 = arith.constant 152 : index
    %321 = memref.load %arg7[%c152] : memref<162xf32, #tpu.memory_space<smem>>
    %c153 = arith.constant 153 : index
    %322 = memref.load %arg7[%c153] : memref<162xf32, #tpu.memory_space<smem>>
    %c154 = arith.constant 154 : index
    %323 = memref.load %arg7[%c154] : memref<162xf32, #tpu.memory_space<smem>>
    %c155 = arith.constant 155 : index
    %324 = memref.load %arg7[%c155] : memref<162xf32, #tpu.memory_space<smem>>
    %c156 = arith.constant 156 : index
    %325 = memref.load %arg7[%c156] : memref<162xf32, #tpu.memory_space<smem>>
    %c157 = arith.constant 157 : index
    %326 = memref.load %arg7[%c157] : memref<162xf32, #tpu.memory_space<smem>>
    %c158 = arith.constant 158 : index
    %327 = memref.load %arg7[%c158] : memref<162xf32, #tpu.memory_space<smem>>
    %c159 = arith.constant 159 : index
    %328 = memref.load %arg7[%c159] : memref<162xf32, #tpu.memory_space<smem>>
    %c160 = arith.constant 160 : index
    %329 = memref.load %arg7[%c160] : memref<162xf32, #tpu.memory_space<smem>>
    %c161 = arith.constant 161 : index
    %330 = memref.load %arg7[%c161] : memref<162xf32, #tpu.memory_space<smem>>
    %c0_166 = arith.constant 0 : index
    %331 = memref.load %arg9[%c0_166] : memref<18xf32, #tpu.memory_space<smem>>
    %c1_167 = arith.constant 1 : index
    %332 = memref.load %arg9[%c1_167] : memref<18xf32, #tpu.memory_space<smem>>
    %c2_168 = arith.constant 2 : index
    %333 = memref.load %arg9[%c2_168] : memref<18xf32, #tpu.memory_space<smem>>
    %c3_169 = arith.constant 3 : index
    %334 = memref.load %arg9[%c3_169] : memref<18xf32, #tpu.memory_space<smem>>
    %c4_170 = arith.constant 4 : index
    %335 = memref.load %arg9[%c4_170] : memref<18xf32, #tpu.memory_space<smem>>
    %c5_171 = arith.constant 5 : index
    %336 = memref.load %arg9[%c5_171] : memref<18xf32, #tpu.memory_space<smem>>
    %c6_172 = arith.constant 6 : index
    %337 = memref.load %arg9[%c6_172] : memref<18xf32, #tpu.memory_space<smem>>
    %c7_173 = arith.constant 7 : index
    %338 = memref.load %arg9[%c7_173] : memref<18xf32, #tpu.memory_space<smem>>
    %c8_174 = arith.constant 8 : index
    %339 = memref.load %arg9[%c8_174] : memref<18xf32, #tpu.memory_space<smem>>
    %c9_175 = arith.constant 9 : index
    %340 = memref.load %arg9[%c9_175] : memref<18xf32, #tpu.memory_space<smem>>
    %c10_176 = arith.constant 10 : index
    %341 = memref.load %arg9[%c10_176] : memref<18xf32, #tpu.memory_space<smem>>
    %c11_177 = arith.constant 11 : index
    %342 = memref.load %arg9[%c11_177] : memref<18xf32, #tpu.memory_space<smem>>
    %c12_178 = arith.constant 12 : index
    %343 = memref.load %arg9[%c12_178] : memref<18xf32, #tpu.memory_space<smem>>
    %c13_179 = arith.constant 13 : index
    %344 = memref.load %arg9[%c13_179] : memref<18xf32, #tpu.memory_space<smem>>
    %c14_180 = arith.constant 14 : index
    %345 = memref.load %arg9[%c14_180] : memref<18xf32, #tpu.memory_space<smem>>
    %c15_181 = arith.constant 15 : index
    %346 = memref.load %arg9[%c15_181] : memref<18xf32, #tpu.memory_space<smem>>
    %c16_182 = arith.constant 16 : index
    %347 = memref.load %arg9[%c16_182] : memref<18xf32, #tpu.memory_space<smem>>
    %c17_183 = arith.constant 17 : index
    %348 = memref.load %arg9[%c17_183] : memref<18xf32, #tpu.memory_space<smem>>
    %c0_184 = arith.constant 0 : index
    %349 = memref.load %arg4[%c0_184] : memref<3xf32, #tpu.memory_space<smem>>
    %c1_185 = arith.constant 1 : index
    %350 = memref.load %arg4[%c1_185] : memref<3xf32, #tpu.memory_space<smem>>
    %c2_186 = arith.constant 2 : index
    %351 = memref.load %arg4[%c2_186] : memref<3xf32, #tpu.memory_space<smem>>
    %c0_187 = arith.constant 0 : index
    %352 = memref.load %arg6[%c0_187] : memref<3xf32, #tpu.memory_space<smem>>
    %c1_188 = arith.constant 1 : index
    %353 = memref.load %arg6[%c1_188] : memref<3xf32, #tpu.memory_space<smem>>
    %c2_189 = arith.constant 2 : index
    %354 = memref.load %arg6[%c2_189] : memref<3xf32, #tpu.memory_space<smem>>
    %c0_190 = arith.constant 0 : index
    %355 = memref.load %arg8[%c0_190] : memref<3xf32, #tpu.memory_space<smem>>
    %c1_191 = arith.constant 1 : index
    %356 = memref.load %arg8[%c1_191] : memref<3xf32, #tpu.memory_space<smem>>
    %c2_192 = arith.constant 2 : index
    %357 = memref.load %arg8[%c2_192] : memref<3xf32, #tpu.memory_space<smem>>
    %c0_193 = arith.constant 0 : index
    %358 = memref.load %arg10[%c0_193] : memref<3xf32, #tpu.memory_space<smem>>
    %c1_194 = arith.constant 1 : index
    %359 = memref.load %arg10[%c1_194] : memref<3xf32, #tpu.memory_space<smem>>
    %c2_195 = arith.constant 2 : index
    %360 = memref.load %arg10[%c2_195] : memref<3xf32, #tpu.memory_space<smem>>
    %c0_196 = arith.constant 0 : index
    %c1_197 = arith.constant 1 : index
    %c0_198 = arith.constant 0 : index
    %361 = vector.load %arg12[%c0_196, %c1_197, %c0_198] : memref<3x16x128xf32, #tpu.memory_space<vmem>>, vector<1x12x128xf32>
    %362 = vector.shape_cast %361 : vector<1x12x128xf32> to vector<12x128xf32>
    %363 = vector.extract_strided_slice %362 {offsets = [0, 127], sizes = [12, 1], strides = [1, 1]} : vector<12x128xf32> to vector<12x1xf32>
    %364 = vector.extract_strided_slice %362 {offsets = [0, 0], sizes = [12, 127], strides = [1, 1]} : vector<12x128xf32> to vector<12x127xf32>
    %365 = tpu.concatenate %363, %364 in 1 : vector<12x1xf32>, vector<12x127xf32> -> vector<12x128xf32>
    %366 = vector.extract_strided_slice %362 {offsets = [0, 1], sizes = [12, 127], strides = [1, 1]} : vector<12x128xf32> to vector<12x127xf32>
    %367 = vector.extract_strided_slice %362 {offsets = [0, 0], sizes = [12, 1], strides = [1, 1]} : vector<12x128xf32> to vector<12x1xf32>
    %368 = tpu.concatenate %366, %367 in 1 : vector<12x127xf32>, vector<12x1xf32> -> vector<12x128xf32>
    %369 = vector.broadcast %7 : f32 to vector<12x128xf32>
    %370 = arith.mulf %365, %369 : vector<12x128xf32>
    %371 = vector.broadcast %34 : f32 to vector<12x128xf32>
    %372 = arith.mulf %365, %371 : vector<12x128xf32>
    %373 = vector.broadcast %61 : f32 to vector<12x128xf32>
    %374 = arith.mulf %365, %373 : vector<12x128xf32>
    %375 = vector.broadcast %8 : f32 to vector<12x128xf32>
    %376 = arith.mulf %362, %375 : vector<12x128xf32>
    %377 = arith.addf %370, %376 : vector<12x128xf32>
    %378 = vector.broadcast %35 : f32 to vector<12x128xf32>
    %379 = arith.mulf %362, %378 : vector<12x128xf32>
    %380 = arith.addf %372, %379 : vector<12x128xf32>
    %381 = vector.broadcast %62 : f32 to vector<12x128xf32>
    %382 = arith.mulf %362, %381 : vector<12x128xf32>
    %383 = arith.addf %374, %382 : vector<12x128xf32>
    %384 = vector.broadcast %9 : f32 to vector<12x128xf32>
    %385 = arith.mulf %368, %384 : vector<12x128xf32>
    %386 = arith.addf %377, %385 : vector<12x128xf32>
    %387 = vector.broadcast %36 : f32 to vector<12x128xf32>
    %388 = arith.mulf %368, %387 : vector<12x128xf32>
    %389 = arith.addf %380, %388 : vector<12x128xf32>
    %390 = vector.broadcast %63 : f32 to vector<12x128xf32>
    %391 = arith.mulf %368, %390 : vector<12x128xf32>
    %392 = arith.addf %383, %391 : vector<12x128xf32>
    %c0_199 = arith.constant 0 : index
    %c2_200 = arith.constant 2 : index
    %c0_201 = arith.constant 0 : index
    %393 = vector.load %arg12[%c0_199, %c2_200, %c0_201] : memref<3x16x128xf32, #tpu.memory_space<vmem>>, vector<1x12x128xf32>
    %394 = vector.shape_cast %393 : vector<1x12x128xf32> to vector<12x128xf32>
    %395 = vector.extract_strided_slice %394 {offsets = [0, 127], sizes = [12, 1], strides = [1, 1]} : vector<12x128xf32> to vector<12x1xf32>
    %396 = vector.extract_strided_slice %394 {offsets = [0, 0], sizes = [12, 127], strides = [1, 1]} : vector<12x128xf32> to vector<12x127xf32>
    %397 = tpu.concatenate %395, %396 in 1 : vector<12x1xf32>, vector<12x127xf32> -> vector<12x128xf32>
    %398 = vector.extract_strided_slice %394 {offsets = [0, 1], sizes = [12, 127], strides = [1, 1]} : vector<12x128xf32> to vector<12x127xf32>
    %399 = vector.extract_strided_slice %394 {offsets = [0, 0], sizes = [12, 1], strides = [1, 1]} : vector<12x128xf32> to vector<12x1xf32>
    %400 = tpu.concatenate %398, %399 in 1 : vector<12x127xf32>, vector<12x1xf32> -> vector<12x128xf32>
    %401 = vector.broadcast %10 : f32 to vector<12x128xf32>
    %402 = arith.mulf %397, %401 : vector<12x128xf32>
    %403 = arith.addf %386, %402 : vector<12x128xf32>
    %404 = vector.broadcast %37 : f32 to vector<12x128xf32>
    %405 = arith.mulf %397, %404 : vector<12x128xf32>
    %406 = arith.addf %389, %405 : vector<12x128xf32>
    %407 = vector.broadcast %64 : f32 to vector<12x128xf32>
    %408 = arith.mulf %397, %407 : vector<12x128xf32>
    %409 = arith.addf %392, %408 : vector<12x128xf32>
    %410 = vector.broadcast %11 : f32 to vector<12x128xf32>
    %411 = arith.mulf %394, %410 : vector<12x128xf32>
    %412 = arith.addf %403, %411 : vector<12x128xf32>
    %413 = vector.broadcast %38 : f32 to vector<12x128xf32>
    %414 = arith.mulf %394, %413 : vector<12x128xf32>
    %415 = arith.addf %406, %414 : vector<12x128xf32>
    %416 = vector.broadcast %65 : f32 to vector<12x128xf32>
    %417 = arith.mulf %394, %416 : vector<12x128xf32>
    %418 = arith.addf %409, %417 : vector<12x128xf32>
    %419 = vector.broadcast %12 : f32 to vector<12x128xf32>
    %420 = arith.mulf %400, %419 : vector<12x128xf32>
    %421 = arith.addf %412, %420 : vector<12x128xf32>
    %422 = vector.broadcast %39 : f32 to vector<12x128xf32>
    %423 = arith.mulf %400, %422 : vector<12x128xf32>
    %424 = arith.addf %415, %423 : vector<12x128xf32>
    %425 = vector.broadcast %66 : f32 to vector<12x128xf32>
    %426 = arith.mulf %400, %425 : vector<12x128xf32>
    %427 = arith.addf %418, %426 : vector<12x128xf32>
    %c0_202 = arith.constant 0 : index
    %c3_203 = arith.constant 3 : index
    %c0_204 = arith.constant 0 : index
    %428 = vector.load %arg12[%c0_202, %c3_203, %c0_204] : memref<3x16x128xf32, #tpu.memory_space<vmem>>, vector<1x12x128xf32>
    %429 = vector.shape_cast %428 : vector<1x12x128xf32> to vector<12x128xf32>
    %430 = vector.extract_strided_slice %429 {offsets = [0, 127], sizes = [12, 1], strides = [1, 1]} : vector<12x128xf32> to vector<12x1xf32>
    %431 = vector.extract_strided_slice %429 {offsets = [0, 0], sizes = [12, 127], strides = [1, 1]} : vector<12x128xf32> to vector<12x127xf32>
    %432 = tpu.concatenate %430, %431 in 1 : vector<12x1xf32>, vector<12x127xf32> -> vector<12x128xf32>
    %433 = vector.extract_strided_slice %429 {offsets = [0, 1], sizes = [12, 127], strides = [1, 1]} : vector<12x128xf32> to vector<12x127xf32>
    %434 = vector.extract_strided_slice %429 {offsets = [0, 0], sizes = [12, 1], strides = [1, 1]} : vector<12x128xf32> to vector<12x1xf32>
    %435 = tpu.concatenate %433, %434 in 1 : vector<12x127xf32>, vector<12x1xf32> -> vector<12x128xf32>
    %436 = vector.broadcast %13 : f32 to vector<12x128xf32>
    %437 = arith.mulf %432, %436 : vector<12x128xf32>
    %438 = arith.addf %421, %437 : vector<12x128xf32>
    %439 = vector.broadcast %40 : f32 to vector<12x128xf32>
    %440 = arith.mulf %432, %439 : vector<12x128xf32>
    %441 = arith.addf %424, %440 : vector<12x128xf32>
    %442 = vector.broadcast %67 : f32 to vector<12x128xf32>
    %443 = arith.mulf %432, %442 : vector<12x128xf32>
    %444 = arith.addf %427, %443 : vector<12x128xf32>
    %445 = vector.broadcast %14 : f32 to vector<12x128xf32>
    %446 = arith.mulf %429, %445 : vector<12x128xf32>
    %447 = arith.addf %438, %446 : vector<12x128xf32>
    %448 = vector.broadcast %41 : f32 to vector<12x128xf32>
    %449 = arith.mulf %429, %448 : vector<12x128xf32>
    %450 = arith.addf %441, %449 : vector<12x128xf32>
    %451 = vector.broadcast %68 : f32 to vector<12x128xf32>
    %452 = arith.mulf %429, %451 : vector<12x128xf32>
    %453 = arith.addf %444, %452 : vector<12x128xf32>
    %454 = vector.broadcast %15 : f32 to vector<12x128xf32>
    %455 = arith.mulf %435, %454 : vector<12x128xf32>
    %456 = arith.addf %447, %455 : vector<12x128xf32>
    %457 = vector.broadcast %42 : f32 to vector<12x128xf32>
    %458 = arith.mulf %435, %457 : vector<12x128xf32>
    %459 = arith.addf %450, %458 : vector<12x128xf32>
    %460 = vector.broadcast %69 : f32 to vector<12x128xf32>
    %461 = arith.mulf %435, %460 : vector<12x128xf32>
    %462 = arith.addf %453, %461 : vector<12x128xf32>
    %c1_205 = arith.constant 1 : index
    %c1_206 = arith.constant 1 : index
    %c0_207 = arith.constant 0 : index
    %463 = vector.load %arg12[%c1_205, %c1_206, %c0_207] : memref<3x16x128xf32, #tpu.memory_space<vmem>>, vector<1x12x128xf32>
    %464 = vector.shape_cast %463 : vector<1x12x128xf32> to vector<12x128xf32>
    %465 = vector.extract_strided_slice %464 {offsets = [0, 127], sizes = [12, 1], strides = [1, 1]} : vector<12x128xf32> to vector<12x1xf32>
    %466 = vector.extract_strided_slice %464 {offsets = [0, 0], sizes = [12, 127], strides = [1, 1]} : vector<12x128xf32> to vector<12x127xf32>
    %467 = tpu.concatenate %465, %466 in 1 : vector<12x1xf32>, vector<12x127xf32> -> vector<12x128xf32>
    %468 = vector.extract_strided_slice %464 {offsets = [0, 1], sizes = [12, 127], strides = [1, 1]} : vector<12x128xf32> to vector<12x127xf32>
    %469 = vector.extract_strided_slice %464 {offsets = [0, 0], sizes = [12, 1], strides = [1, 1]} : vector<12x128xf32> to vector<12x1xf32>
    %470 = tpu.concatenate %468, %469 in 1 : vector<12x127xf32>, vector<12x1xf32> -> vector<12x128xf32>
    %471 = vector.broadcast %16 : f32 to vector<12x128xf32>
    %472 = arith.mulf %467, %471 : vector<12x128xf32>
    %473 = arith.addf %456, %472 : vector<12x128xf32>
    %474 = vector.broadcast %43 : f32 to vector<12x128xf32>
    %475 = arith.mulf %467, %474 : vector<12x128xf32>
    %476 = arith.addf %459, %475 : vector<12x128xf32>
    %477 = vector.broadcast %70 : f32 to vector<12x128xf32>
    %478 = arith.mulf %467, %477 : vector<12x128xf32>
    %479 = arith.addf %462, %478 : vector<12x128xf32>
    %480 = vector.broadcast %17 : f32 to vector<12x128xf32>
    %481 = arith.mulf %464, %480 : vector<12x128xf32>
    %482 = arith.addf %473, %481 : vector<12x128xf32>
    %483 = vector.broadcast %44 : f32 to vector<12x128xf32>
    %484 = arith.mulf %464, %483 : vector<12x128xf32>
    %485 = arith.addf %476, %484 : vector<12x128xf32>
    %486 = vector.broadcast %71 : f32 to vector<12x128xf32>
    %487 = arith.mulf %464, %486 : vector<12x128xf32>
    %488 = arith.addf %479, %487 : vector<12x128xf32>
    %489 = vector.broadcast %18 : f32 to vector<12x128xf32>
    %490 = arith.mulf %470, %489 : vector<12x128xf32>
    %491 = arith.addf %482, %490 : vector<12x128xf32>
    %492 = vector.broadcast %45 : f32 to vector<12x128xf32>
    %493 = arith.mulf %470, %492 : vector<12x128xf32>
    %494 = arith.addf %485, %493 : vector<12x128xf32>
    %495 = vector.broadcast %72 : f32 to vector<12x128xf32>
    %496 = arith.mulf %470, %495 : vector<12x128xf32>
    %497 = arith.addf %488, %496 : vector<12x128xf32>
    %c1_208 = arith.constant 1 : index
    %c2_209 = arith.constant 2 : index
    %c0_210 = arith.constant 0 : index
    %498 = vector.load %arg12[%c1_208, %c2_209, %c0_210] : memref<3x16x128xf32, #tpu.memory_space<vmem>>, vector<1x12x128xf32>
    %499 = vector.shape_cast %498 : vector<1x12x128xf32> to vector<12x128xf32>
    %500 = vector.extract_strided_slice %499 {offsets = [0, 127], sizes = [12, 1], strides = [1, 1]} : vector<12x128xf32> to vector<12x1xf32>
    %501 = vector.extract_strided_slice %499 {offsets = [0, 0], sizes = [12, 127], strides = [1, 1]} : vector<12x128xf32> to vector<12x127xf32>
    %502 = tpu.concatenate %500, %501 in 1 : vector<12x1xf32>, vector<12x127xf32> -> vector<12x128xf32>
    %503 = vector.extract_strided_slice %499 {offsets = [0, 1], sizes = [12, 127], strides = [1, 1]} : vector<12x128xf32> to vector<12x127xf32>
    %504 = vector.extract_strided_slice %499 {offsets = [0, 0], sizes = [12, 1], strides = [1, 1]} : vector<12x128xf32> to vector<12x1xf32>
    %505 = tpu.concatenate %503, %504 in 1 : vector<12x127xf32>, vector<12x1xf32> -> vector<12x128xf32>
    %506 = vector.broadcast %19 : f32 to vector<12x128xf32>
    %507 = arith.mulf %502, %506 : vector<12x128xf32>
    %508 = arith.addf %491, %507 : vector<12x128xf32>
    %509 = vector.broadcast %46 : f32 to vector<12x128xf32>
    %510 = arith.mulf %502, %509 : vector<12x128xf32>
    %511 = arith.addf %494, %510 : vector<12x128xf32>
    %512 = vector.broadcast %73 : f32 to vector<12x128xf32>
    %513 = arith.mulf %502, %512 : vector<12x128xf32>
    %514 = arith.addf %497, %513 : vector<12x128xf32>
    %515 = vector.broadcast %20 : f32 to vector<12x128xf32>
    %516 = arith.mulf %499, %515 : vector<12x128xf32>
    %517 = arith.addf %508, %516 : vector<12x128xf32>
    %518 = vector.broadcast %47 : f32 to vector<12x128xf32>
    %519 = arith.mulf %499, %518 : vector<12x128xf32>
    %520 = arith.addf %511, %519 : vector<12x128xf32>
    %521 = vector.broadcast %74 : f32 to vector<12x128xf32>
    %522 = arith.mulf %499, %521 : vector<12x128xf32>
    %523 = arith.addf %514, %522 : vector<12x128xf32>
    %524 = vector.broadcast %21 : f32 to vector<12x128xf32>
    %525 = arith.mulf %505, %524 : vector<12x128xf32>
    %526 = arith.addf %517, %525 : vector<12x128xf32>
    %527 = vector.broadcast %48 : f32 to vector<12x128xf32>
    %528 = arith.mulf %505, %527 : vector<12x128xf32>
    %529 = arith.addf %520, %528 : vector<12x128xf32>
    %530 = vector.broadcast %75 : f32 to vector<12x128xf32>
    %531 = arith.mulf %505, %530 : vector<12x128xf32>
    %532 = arith.addf %523, %531 : vector<12x128xf32>
    %c1_211 = arith.constant 1 : index
    %c3_212 = arith.constant 3 : index
    %c0_213 = arith.constant 0 : index
    %533 = vector.load %arg12[%c1_211, %c3_212, %c0_213] : memref<3x16x128xf32, #tpu.memory_space<vmem>>, vector<1x12x128xf32>
    %534 = vector.shape_cast %533 : vector<1x12x128xf32> to vector<12x128xf32>
    %535 = vector.extract_strided_slice %534 {offsets = [0, 127], sizes = [12, 1], strides = [1, 1]} : vector<12x128xf32> to vector<12x1xf32>
    %536 = vector.extract_strided_slice %534 {offsets = [0, 0], sizes = [12, 127], strides = [1, 1]} : vector<12x128xf32> to vector<12x127xf32>
    %537 = tpu.concatenate %535, %536 in 1 : vector<12x1xf32>, vector<12x127xf32> -> vector<12x128xf32>
    %538 = vector.extract_strided_slice %534 {offsets = [0, 1], sizes = [12, 127], strides = [1, 1]} : vector<12x128xf32> to vector<12x127xf32>
    %539 = vector.extract_strided_slice %534 {offsets = [0, 0], sizes = [12, 1], strides = [1, 1]} : vector<12x128xf32> to vector<12x1xf32>
    %540 = tpu.concatenate %538, %539 in 1 : vector<12x127xf32>, vector<12x1xf32> -> vector<12x128xf32>
    %541 = vector.broadcast %22 : f32 to vector<12x128xf32>
    %542 = arith.mulf %537, %541 : vector<12x128xf32>
    %543 = arith.addf %526, %542 : vector<12x128xf32>
    %544 = vector.broadcast %49 : f32 to vector<12x128xf32>
    %545 = arith.mulf %537, %544 : vector<12x128xf32>
    %546 = arith.addf %529, %545 : vector<12x128xf32>
    %547 = vector.broadcast %76 : f32 to vector<12x128xf32>
    %548 = arith.mulf %537, %547 : vector<12x128xf32>
    %549 = arith.addf %532, %548 : vector<12x128xf32>
    %550 = vector.broadcast %23 : f32 to vector<12x128xf32>
    %551 = arith.mulf %534, %550 : vector<12x128xf32>
    %552 = arith.addf %543, %551 : vector<12x128xf32>
    %553 = vector.broadcast %50 : f32 to vector<12x128xf32>
    %554 = arith.mulf %534, %553 : vector<12x128xf32>
    %555 = arith.addf %546, %554 : vector<12x128xf32>
    %556 = vector.broadcast %77 : f32 to vector<12x128xf32>
    %557 = arith.mulf %534, %556 : vector<12x128xf32>
    %558 = arith.addf %549, %557 : vector<12x128xf32>
    %559 = vector.broadcast %24 : f32 to vector<12x128xf32>
    %560 = arith.mulf %540, %559 : vector<12x128xf32>
    %561 = arith.addf %552, %560 : vector<12x128xf32>
    %562 = vector.broadcast %51 : f32 to vector<12x128xf32>
    %563 = arith.mulf %540, %562 : vector<12x128xf32>
    %564 = arith.addf %555, %563 : vector<12x128xf32>
    %565 = vector.broadcast %78 : f32 to vector<12x128xf32>
    %566 = arith.mulf %540, %565 : vector<12x128xf32>
    %567 = arith.addf %558, %566 : vector<12x128xf32>
    %c2_214 = arith.constant 2 : index
    %c1_215 = arith.constant 1 : index
    %c0_216 = arith.constant 0 : index
    %568 = vector.load %arg12[%c2_214, %c1_215, %c0_216] : memref<3x16x128xf32, #tpu.memory_space<vmem>>, vector<1x12x128xf32>
    %569 = vector.shape_cast %568 : vector<1x12x128xf32> to vector<12x128xf32>
    %570 = vector.extract_strided_slice %569 {offsets = [0, 127], sizes = [12, 1], strides = [1, 1]} : vector<12x128xf32> to vector<12x1xf32>
    %571 = vector.extract_strided_slice %569 {offsets = [0, 0], sizes = [12, 127], strides = [1, 1]} : vector<12x128xf32> to vector<12x127xf32>
    %572 = tpu.concatenate %570, %571 in 1 : vector<12x1xf32>, vector<12x127xf32> -> vector<12x128xf32>
    %573 = vector.extract_strided_slice %569 {offsets = [0, 1], sizes = [12, 127], strides = [1, 1]} : vector<12x128xf32> to vector<12x127xf32>
    %574 = vector.extract_strided_slice %569 {offsets = [0, 0], sizes = [12, 1], strides = [1, 1]} : vector<12x128xf32> to vector<12x1xf32>
    %575 = tpu.concatenate %573, %574 in 1 : vector<12x127xf32>, vector<12x1xf32> -> vector<12x128xf32>
    %576 = vector.broadcast %25 : f32 to vector<12x128xf32>
    %577 = arith.mulf %572, %576 : vector<12x128xf32>
    %578 = arith.addf %561, %577 : vector<12x128xf32>
    %579 = vector.broadcast %52 : f32 to vector<12x128xf32>
    %580 = arith.mulf %572, %579 : vector<12x128xf32>
    %581 = arith.addf %564, %580 : vector<12x128xf32>
    %582 = vector.broadcast %79 : f32 to vector<12x128xf32>
    %583 = arith.mulf %572, %582 : vector<12x128xf32>
    %584 = arith.addf %567, %583 : vector<12x128xf32>
    %585 = vector.broadcast %26 : f32 to vector<12x128xf32>
    %586 = arith.mulf %569, %585 : vector<12x128xf32>
    %587 = arith.addf %578, %586 : vector<12x128xf32>
    %588 = vector.broadcast %53 : f32 to vector<12x128xf32>
    %589 = arith.mulf %569, %588 : vector<12x128xf32>
    %590 = arith.addf %581, %589 : vector<12x128xf32>
    %591 = vector.broadcast %80 : f32 to vector<12x128xf32>
    %592 = arith.mulf %569, %591 : vector<12x128xf32>
    %593 = arith.addf %584, %592 : vector<12x128xf32>
    %594 = vector.broadcast %27 : f32 to vector<12x128xf32>
    %595 = arith.mulf %575, %594 : vector<12x128xf32>
    %596 = arith.addf %587, %595 : vector<12x128xf32>
    %597 = vector.broadcast %54 : f32 to vector<12x128xf32>
    %598 = arith.mulf %575, %597 : vector<12x128xf32>
    %599 = arith.addf %590, %598 : vector<12x128xf32>
    %600 = vector.broadcast %81 : f32 to vector<12x128xf32>
    %601 = arith.mulf %575, %600 : vector<12x128xf32>
    %602 = arith.addf %593, %601 : vector<12x128xf32>
    %c2_217 = arith.constant 2 : index
    %c2_218 = arith.constant 2 : index
    %c0_219 = arith.constant 0 : index
    %603 = vector.load %arg12[%c2_217, %c2_218, %c0_219] : memref<3x16x128xf32, #tpu.memory_space<vmem>>, vector<1x12x128xf32>
    %604 = vector.shape_cast %603 : vector<1x12x128xf32> to vector<12x128xf32>
    %605 = vector.extract_strided_slice %604 {offsets = [0, 127], sizes = [12, 1], strides = [1, 1]} : vector<12x128xf32> to vector<12x1xf32>
    %606 = vector.extract_strided_slice %604 {offsets = [0, 0], sizes = [12, 127], strides = [1, 1]} : vector<12x128xf32> to vector<12x127xf32>
    %607 = tpu.concatenate %605, %606 in 1 : vector<12x1xf32>, vector<12x127xf32> -> vector<12x128xf32>
    %608 = vector.extract_strided_slice %604 {offsets = [0, 1], sizes = [12, 127], strides = [1, 1]} : vector<12x128xf32> to vector<12x127xf32>
    %609 = vector.extract_strided_slice %604 {offsets = [0, 0], sizes = [12, 1], strides = [1, 1]} : vector<12x128xf32> to vector<12x1xf32>
    %610 = tpu.concatenate %608, %609 in 1 : vector<12x127xf32>, vector<12x1xf32> -> vector<12x128xf32>
    %611 = vector.broadcast %28 : f32 to vector<12x128xf32>
    %612 = arith.mulf %607, %611 : vector<12x128xf32>
    %613 = arith.addf %596, %612 : vector<12x128xf32>
    %614 = vector.broadcast %55 : f32 to vector<12x128xf32>
    %615 = arith.mulf %607, %614 : vector<12x128xf32>
    %616 = arith.addf %599, %615 : vector<12x128xf32>
    %617 = vector.broadcast %82 : f32 to vector<12x128xf32>
    %618 = arith.mulf %607, %617 : vector<12x128xf32>
    %619 = arith.addf %602, %618 : vector<12x128xf32>
    %620 = vector.broadcast %29 : f32 to vector<12x128xf32>
    %621 = arith.mulf %604, %620 : vector<12x128xf32>
    %622 = arith.addf %613, %621 : vector<12x128xf32>
    %623 = vector.broadcast %56 : f32 to vector<12x128xf32>
    %624 = arith.mulf %604, %623 : vector<12x128xf32>
    %625 = arith.addf %616, %624 : vector<12x128xf32>
    %626 = vector.broadcast %83 : f32 to vector<12x128xf32>
    %627 = arith.mulf %604, %626 : vector<12x128xf32>
    %628 = arith.addf %619, %627 : vector<12x128xf32>
    %629 = vector.broadcast %30 : f32 to vector<12x128xf32>
    %630 = arith.mulf %610, %629 : vector<12x128xf32>
    %631 = arith.addf %622, %630 : vector<12x128xf32>
    %632 = vector.broadcast %57 : f32 to vector<12x128xf32>
    %633 = arith.mulf %610, %632 : vector<12x128xf32>
    %634 = arith.addf %625, %633 : vector<12x128xf32>
    %635 = vector.broadcast %84 : f32 to vector<12x128xf32>
    %636 = arith.mulf %610, %635 : vector<12x128xf32>
    %637 = arith.addf %628, %636 : vector<12x128xf32>
    %c2_220 = arith.constant 2 : index
    %c3_221 = arith.constant 3 : index
    %c0_222 = arith.constant 0 : index
    %638 = vector.load %arg12[%c2_220, %c3_221, %c0_222] : memref<3x16x128xf32, #tpu.memory_space<vmem>>, vector<1x12x128xf32>
    %639 = vector.shape_cast %638 : vector<1x12x128xf32> to vector<12x128xf32>
    %640 = vector.extract_strided_slice %639 {offsets = [0, 127], sizes = [12, 1], strides = [1, 1]} : vector<12x128xf32> to vector<12x1xf32>
    %641 = vector.extract_strided_slice %639 {offsets = [0, 0], sizes = [12, 127], strides = [1, 1]} : vector<12x128xf32> to vector<12x127xf32>
    %642 = tpu.concatenate %640, %641 in 1 : vector<12x1xf32>, vector<12x127xf32> -> vector<12x128xf32>
    %643 = vector.extract_strided_slice %639 {offsets = [0, 1], sizes = [12, 127], strides = [1, 1]} : vector<12x128xf32> to vector<12x127xf32>
    %644 = vector.extract_strided_slice %639 {offsets = [0, 0], sizes = [12, 1], strides = [1, 1]} : vector<12x128xf32> to vector<12x1xf32>
    %645 = tpu.concatenate %643, %644 in 1 : vector<12x127xf32>, vector<12x1xf32> -> vector<12x128xf32>
    %646 = vector.broadcast %31 : f32 to vector<12x128xf32>
    %647 = arith.mulf %642, %646 : vector<12x128xf32>
    %648 = arith.addf %631, %647 : vector<12x128xf32>
    %649 = vector.broadcast %58 : f32 to vector<12x128xf32>
    %650 = arith.mulf %642, %649 : vector<12x128xf32>
    %651 = arith.addf %634, %650 : vector<12x128xf32>
    %652 = vector.broadcast %85 : f32 to vector<12x128xf32>
    %653 = arith.mulf %642, %652 : vector<12x128xf32>
    %654 = arith.addf %637, %653 : vector<12x128xf32>
    %655 = vector.broadcast %32 : f32 to vector<12x128xf32>
    %656 = arith.mulf %639, %655 : vector<12x128xf32>
    %657 = arith.addf %648, %656 : vector<12x128xf32>
    %658 = vector.broadcast %59 : f32 to vector<12x128xf32>
    %659 = arith.mulf %639, %658 : vector<12x128xf32>
    %660 = arith.addf %651, %659 : vector<12x128xf32>
    %661 = vector.broadcast %86 : f32 to vector<12x128xf32>
    %662 = arith.mulf %639, %661 : vector<12x128xf32>
    %663 = arith.addf %654, %662 : vector<12x128xf32>
    %664 = vector.broadcast %33 : f32 to vector<12x128xf32>
    %665 = arith.mulf %645, %664 : vector<12x128xf32>
    %666 = arith.addf %657, %665 : vector<12x128xf32>
    %667 = vector.broadcast %60 : f32 to vector<12x128xf32>
    %668 = arith.mulf %645, %667 : vector<12x128xf32>
    %669 = arith.addf %660, %668 : vector<12x128xf32>
    %670 = vector.broadcast %87 : f32 to vector<12x128xf32>
    %671 = arith.mulf %645, %670 : vector<12x128xf32>
    %672 = arith.addf %663, %671 : vector<12x128xf32>
    %673 = vector.broadcast %349 : f32 to vector<12x128xf32>
    %674 = arith.addf %666, %673 : vector<12x128xf32>
    %cst = arith.constant 0.000000e+00 : f32
    %675 = vector.broadcast %cst : f32 to vector<12x128xf32>
    %676 = arith.maximumf %674, %675 : vector<12x128xf32>
    %677 = vector.broadcast %350 : f32 to vector<12x128xf32>
    %678 = arith.addf %669, %677 : vector<12x128xf32>
    %cst_223 = arith.constant 0.000000e+00 : f32
    %679 = vector.broadcast %cst_223 : f32 to vector<12x128xf32>
    %680 = arith.maximumf %678, %679 : vector<12x128xf32>
    %681 = vector.broadcast %351 : f32 to vector<12x128xf32>
    %682 = arith.addf %672, %681 : vector<12x128xf32>
    %cst_224 = arith.constant 0.000000e+00 : f32
    %683 = vector.broadcast %cst_224 : f32 to vector<12x128xf32>
    %684 = arith.maximumf %682, %683 : vector<12x128xf32>
    %685 = tpu.iota {dimensions = array<i32: 0>} : vector<12x128xi32>
    %c2_i32 = arith.constant 2 : i32
    %686 = arith.addi %6, %c2_i32 : i32
    %687 = vector.broadcast %686 : i32 to vector<12x128xi32>
    %688 = arith.addi %685, %687 : vector<12x128xi32>
    %689 = tpu.iota {dimensions = array<i32: 1>} : vector<12x128xi32>
    %c0_i32_225 = arith.constant 0 : i32
    %690 = vector.broadcast %c0_i32_225 : i32 to vector<12x128xi32>
    %691 = arith.cmpi sge, %688, %690 : vector<12x128xi32>
    %c16_i32 = arith.constant 16 : i32
    %692 = vector.broadcast %c16_i32 : i32 to vector<12x128xi32>
    %693 = arith.cmpi slt, %688, %692 : vector<12x128xi32>
    %694 = arith.andi %691, %693 : vector<12x128xi1>
    %c16_i32_226 = arith.constant 16 : i32
    %695 = vector.broadcast %c16_i32_226 : i32 to vector<12x128xi32>
    %696 = arith.cmpi slt, %689, %695 : vector<12x128xi32>
    %697 = arith.andi %694, %696 : vector<12x128xi1>
    %cst_227 = arith.constant 0.000000e+00 : f32
    %698 = vector.broadcast %cst_227 : f32 to vector<12x128xf32>
    %699 = arith.select %697, %676, %698 : vector<12x128xi1>, vector<12x128xf32>
    %c0_228 = arith.constant 0 : index
    %c2_229 = arith.constant 2 : index
    %c0_230 = arith.constant 0 : index
    %700 = vector.load %arg13[%c0_228, %c2_229, %c0_230] : memref<3x16x128xf32, #tpu.memory_space<vmem>>, vector<1x12x128xf32>
    %701 = vector.shape_cast %700 : vector<1x12x128xf32> to vector<12x128xf32>
    %702 = vector.shape_cast %699 : vector<12x128xf32> to vector<1x12x128xf32>
    tpu.vector_store %arg13[%c0_228, %c2_229, %c0_230], %702 {strides = array<i32>} : memref<3x16x128xf32, #tpu.memory_space<vmem>>, vector<1x12x128xf32>,
    %cst_231 = arith.constant 0.000000e+00 : f32
    %703 = vector.broadcast %cst_231 : f32 to vector<12x128xf32>
    %704 = arith.select %697, %680, %703 : vector<12x128xi1>, vector<12x128xf32>
    %c1_232 = arith.constant 1 : index
    %c2_233 = arith.constant 2 : index
    %c0_234 = arith.constant 0 : index
    %705 = vector.load %arg13[%c1_232, %c2_233, %c0_234] : memref<3x16x128xf32, #tpu.memory_space<vmem>>, vector<1x12x128xf32>
    %706 = vector.shape_cast %705 : vector<1x12x128xf32> to vector<12x128xf32>
    %707 = vector.shape_cast %704 : vector<12x128xf32> to vector<1x12x128xf32>
    tpu.vector_store %arg13[%c1_232, %c2_233, %c0_234], %707 {strides = array<i32>} : memref<3x16x128xf32, #tpu.memory_space<vmem>>, vector<1x12x128xf32>,
    %cst_235 = arith.constant 0.000000e+00 : f32
    %708 = vector.broadcast %cst_235 : f32 to vector<12x128xf32>
    %709 = arith.select %697, %684, %708 : vector<12x128xi1>, vector<12x128xf32>
    %c2_236 = arith.constant 2 : index
    %c2_237 = arith.constant 2 : index
    %c0_238 = arith.constant 0 : index
    %710 = vector.load %arg13[%c2_236, %c2_237, %c0_238] : memref<3x16x128xf32, #tpu.memory_space<vmem>>, vector<1x12x128xf32>
    %711 = vector.shape_cast %710 : vector<1x12x128xf32> to vector<12x128xf32>
    %712 = vector.shape_cast %709 : vector<12x128xf32> to vector<1x12x128xf32>
    tpu.vector_store %arg13[%c2_236, %c2_237, %c0_238], %712 {strides = array<i32>} : memref<3x16x128xf32, #tpu.memory_space<vmem>>, vector<1x12x128xf32>,
    %c0_239 = arith.constant 0 : index
    %c2_240 = arith.constant 2 : index
    %c0_241 = arith.constant 0 : index
    %713 = vector.load %arg13[%c0_239, %c2_240, %c0_241] : memref<3x16x128xf32, #tpu.memory_space<vmem>>, vector<1x10x128xf32>
    %714 = vector.shape_cast %713 : vector<1x10x128xf32> to vector<10x128xf32>
    %715 = vector.extract_strided_slice %714 {offsets = [0, 127], sizes = [10, 1], strides = [1, 1]} : vector<10x128xf32> to vector<10x1xf32>
    %716 = vector.extract_strided_slice %714 {offsets = [0, 0], sizes = [10, 127], strides = [1, 1]} : vector<10x128xf32> to vector<10x127xf32>
    %717 = tpu.concatenate %715, %716 in 1 : vector<10x1xf32>, vector<10x127xf32> -> vector<10x128xf32>
    %718 = vector.extract_strided_slice %714 {offsets = [0, 1], sizes = [10, 127], strides = [1, 1]} : vector<10x128xf32> to vector<10x127xf32>
    %719 = vector.extract_strided_slice %714 {offsets = [0, 0], sizes = [10, 1], strides = [1, 1]} : vector<10x128xf32> to vector<10x1xf32>
    %720 = tpu.concatenate %718, %719 in 1 : vector<10x127xf32>, vector<10x1xf32> -> vector<10x128xf32>
    %721 = vector.broadcast %88 : f32 to vector<10x128xf32>
    %722 = arith.mulf %717, %721 : vector<10x128xf32>
    %723 = vector.broadcast %115 : f32 to vector<10x128xf32>
    %724 = arith.mulf %717, %723 : vector<10x128xf32>
    %725 = vector.broadcast %142 : f32 to vector<10x128xf32>
    %726 = arith.mulf %717, %725 : vector<10x128xf32>
    %727 = vector.broadcast %89 : f32 to vector<10x128xf32>
    %728 = arith.mulf %714, %727 : vector<10x128xf32>
    %729 = arith.addf %722, %728 : vector<10x128xf32>
    %730 = vector.broadcast %116 : f32 to vector<10x128xf32>
    %731 = arith.mulf %714, %730 : vector<10x128xf32>
    %732 = arith.addf %724, %731 : vector<10x128xf32>
    %733 = vector.broadcast %143 : f32 to vector<10x128xf32>
    %734 = arith.mulf %714, %733 : vector<10x128xf32>
    %735 = arith.addf %726, %734 : vector<10x128xf32>
    %736 = vector.broadcast %90 : f32 to vector<10x128xf32>
    %737 = arith.mulf %720, %736 : vector<10x128xf32>
    %738 = arith.addf %729, %737 : vector<10x128xf32>
    %739 = vector.broadcast %117 : f32 to vector<10x128xf32>
    %740 = arith.mulf %720, %739 : vector<10x128xf32>
    %741 = arith.addf %732, %740 : vector<10x128xf32>
    %742 = vector.broadcast %144 : f32 to vector<10x128xf32>
    %743 = arith.mulf %720, %742 : vector<10x128xf32>
    %744 = arith.addf %735, %743 : vector<10x128xf32>
    %c0_242 = arith.constant 0 : index
    %c3_243 = arith.constant 3 : index
    %c0_244 = arith.constant 0 : index
    %745 = vector.load %arg13[%c0_242, %c3_243, %c0_244] : memref<3x16x128xf32, #tpu.memory_space<vmem>>, vector<1x10x128xf32>
    %746 = vector.shape_cast %745 : vector<1x10x128xf32> to vector<10x128xf32>
    %747 = vector.extract_strided_slice %746 {offsets = [0, 127], sizes = [10, 1], strides = [1, 1]} : vector<10x128xf32> to vector<10x1xf32>
    %748 = vector.extract_strided_slice %746 {offsets = [0, 0], sizes = [10, 127], strides = [1, 1]} : vector<10x128xf32> to vector<10x127xf32>
    %749 = tpu.concatenate %747, %748 in 1 : vector<10x1xf32>, vector<10x127xf32> -> vector<10x128xf32>
    %750 = vector.extract_strided_slice %746 {offsets = [0, 1], sizes = [10, 127], strides = [1, 1]} : vector<10x128xf32> to vector<10x127xf32>
    %751 = vector.extract_strided_slice %746 {offsets = [0, 0], sizes = [10, 1], strides = [1, 1]} : vector<10x128xf32> to vector<10x1xf32>
    %752 = tpu.concatenate %750, %751 in 1 : vector<10x127xf32>, vector<10x1xf32> -> vector<10x128xf32>
    %753 = vector.broadcast %91 : f32 to vector<10x128xf32>
    %754 = arith.mulf %749, %753 : vector<10x128xf32>
    %755 = arith.addf %738, %754 : vector<10x128xf32>
    %756 = vector.broadcast %118 : f32 to vector<10x128xf32>
    %757 = arith.mulf %749, %756 : vector<10x128xf32>
    %758 = arith.addf %741, %757 : vector<10x128xf32>
    %759 = vector.broadcast %145 : f32 to vector<10x128xf32>
    %760 = arith.mulf %749, %759 : vector<10x128xf32>
    %761 = arith.addf %744, %760 : vector<10x128xf32>
    %762 = vector.broadcast %92 : f32 to vector<10x128xf32>
    %763 = arith.mulf %746, %762 : vector<10x128xf32>
    %764 = arith.addf %755, %763 : vector<10x128xf32>
    %765 = vector.broadcast %119 : f32 to vector<10x128xf32>
    %766 = arith.mulf %746, %765 : vector<10x128xf32>
    %767 = arith.addf %758, %766 : vector<10x128xf32>
    %768 = vector.broadcast %146 : f32 to vector<10x128xf32>
    %769 = arith.mulf %746, %768 : vector<10x128xf32>
    %770 = arith.addf %761, %769 : vector<10x128xf32>
    %771 = vector.broadcast %93 : f32 to vector<10x128xf32>
    %772 = arith.mulf %752, %771 : vector<10x128xf32>
    %773 = arith.addf %764, %772 : vector<10x128xf32>
    %774 = vector.broadcast %120 : f32 to vector<10x128xf32>
    %775 = arith.mulf %752, %774 : vector<10x128xf32>
    %776 = arith.addf %767, %775 : vector<10x128xf32>
    %777 = vector.broadcast %147 : f32 to vector<10x128xf32>
    %778 = arith.mulf %752, %777 : vector<10x128xf32>
    %779 = arith.addf %770, %778 : vector<10x128xf32>
    %c0_245 = arith.constant 0 : index
    %c4_246 = arith.constant 4 : index
    %c0_247 = arith.constant 0 : index
    %780 = vector.load %arg13[%c0_245, %c4_246, %c0_247] : memref<3x16x128xf32, #tpu.memory_space<vmem>>, vector<1x10x128xf32>
    %781 = vector.shape_cast %780 : vector<1x10x128xf32> to vector<10x128xf32>
    %782 = vector.extract_strided_slice %781 {offsets = [0, 127], sizes = [10, 1], strides = [1, 1]} : vector<10x128xf32> to vector<10x1xf32>
    %783 = vector.extract_strided_slice %781 {offsets = [0, 0], sizes = [10, 127], strides = [1, 1]} : vector<10x128xf32> to vector<10x127xf32>
    %784 = tpu.concatenate %782, %783 in 1 : vector<10x1xf32>, vector<10x127xf32> -> vector<10x128xf32>
    %785 = vector.extract_strided_slice %781 {offsets = [0, 1], sizes = [10, 127], strides = [1, 1]} : vector<10x128xf32> to vector<10x127xf32>
    %786 = vector.extract_strided_slice %781 {offsets = [0, 0], sizes = [10, 1], strides = [1, 1]} : vector<10x128xf32> to vector<10x1xf32>
    %787 = tpu.concatenate %785, %786 in 1 : vector<10x127xf32>, vector<10x1xf32> -> vector<10x128xf32>
    %788 = vector.broadcast %94 : f32 to vector<10x128xf32>
    %789 = arith.mulf %784, %788 : vector<10x128xf32>
    %790 = arith.addf %773, %789 : vector<10x128xf32>
    %791 = vector.broadcast %121 : f32 to vector<10x128xf32>
    %792 = arith.mulf %784, %791 : vector<10x128xf32>
    %793 = arith.addf %776, %792 : vector<10x128xf32>
    %794 = vector.broadcast %148 : f32 to vector<10x128xf32>
    %795 = arith.mulf %784, %794 : vector<10x128xf32>
    %796 = arith.addf %779, %795 : vector<10x128xf32>
    %797 = vector.broadcast %95 : f32 to vector<10x128xf32>
    %798 = arith.mulf %781, %797 : vector<10x128xf32>
    %799 = arith.addf %790, %798 : vector<10x128xf32>
    %800 = vector.broadcast %122 : f32 to vector<10x128xf32>
    %801 = arith.mulf %781, %800 : vector<10x128xf32>
    %802 = arith.addf %793, %801 : vector<10x128xf32>
    %803 = vector.broadcast %149 : f32 to vector<10x128xf32>
    %804 = arith.mulf %781, %803 : vector<10x128xf32>
    %805 = arith.addf %796, %804 : vector<10x128xf32>
    %806 = vector.broadcast %96 : f32 to vector<10x128xf32>
    %807 = arith.mulf %787, %806 : vector<10x128xf32>
    %808 = arith.addf %799, %807 : vector<10x128xf32>
    %809 = vector.broadcast %123 : f32 to vector<10x128xf32>
    %810 = arith.mulf %787, %809 : vector<10x128xf32>
    %811 = arith.addf %802, %810 : vector<10x128xf32>
    %812 = vector.broadcast %150 : f32 to vector<10x128xf32>
    %813 = arith.mulf %787, %812 : vector<10x128xf32>
    %814 = arith.addf %805, %813 : vector<10x128xf32>
    %c1_248 = arith.constant 1 : index
    %c2_249 = arith.constant 2 : index
    %c0_250 = arith.constant 0 : index
    %815 = vector.load %arg13[%c1_248, %c2_249, %c0_250] : memref<3x16x128xf32, #tpu.memory_space<vmem>>, vector<1x10x128xf32>
    %816 = vector.shape_cast %815 : vector<1x10x128xf32> to vector<10x128xf32>
    %817 = vector.extract_strided_slice %816 {offsets = [0, 127], sizes = [10, 1], strides = [1, 1]} : vector<10x128xf32> to vector<10x1xf32>
    %818 = vector.extract_strided_slice %816 {offsets = [0, 0], sizes = [10, 127], strides = [1, 1]} : vector<10x128xf32> to vector<10x127xf32>
    %819 = tpu.concatenate %817, %818 in 1 : vector<10x1xf32>, vector<10x127xf32> -> vector<10x128xf32>
    %820 = vector.extract_strided_slice %816 {offsets = [0, 1], sizes = [10, 127], strides = [1, 1]} : vector<10x128xf32> to vector<10x127xf32>
    %821 = vector.extract_strided_slice %816 {offsets = [0, 0], sizes = [10, 1], strides = [1, 1]} : vector<10x128xf32> to vector<10x1xf32>
    %822 = tpu.concatenate %820, %821 in 1 : vector<10x127xf32>, vector<10x1xf32> -> vector<10x128xf32>
    %823 = vector.broadcast %97 : f32 to vector<10x128xf32>
    %824 = arith.mulf %819, %823 : vector<10x128xf32>
    %825 = arith.addf %808, %824 : vector<10x128xf32>
    %826 = vector.broadcast %124 : f32 to vector<10x128xf32>
    %827 = arith.mulf %819, %826 : vector<10x128xf32>
    %828 = arith.addf %811, %827 : vector<10x128xf32>
    %829 = vector.broadcast %151 : f32 to vector<10x128xf32>
    %830 = arith.mulf %819, %829 : vector<10x128xf32>
    %831 = arith.addf %814, %830 : vector<10x128xf32>
    %832 = vector.broadcast %98 : f32 to vector<10x128xf32>
    %833 = arith.mulf %816, %832 : vector<10x128xf32>
    %834 = arith.addf %825, %833 : vector<10x128xf32>
    %835 = vector.broadcast %125 : f32 to vector<10x128xf32>
    %836 = arith.mulf %816, %835 : vector<10x128xf32>
    %837 = arith.addf %828, %836 : vector<10x128xf32>
    %838 = vector.broadcast %152 : f32 to vector<10x128xf32>
    %839 = arith.mulf %816, %838 : vector<10x128xf32>
    %840 = arith.addf %831, %839 : vector<10x128xf32>
    %841 = vector.broadcast %99 : f32 to vector<10x128xf32>
    %842 = arith.mulf %822, %841 : vector<10x128xf32>
    %843 = arith.addf %834, %842 : vector<10x128xf32>
    %844 = vector.broadcast %126 : f32 to vector<10x128xf32>
    %845 = arith.mulf %822, %844 : vector<10x128xf32>
    %846 = arith.addf %837, %845 : vector<10x128xf32>
    %847 = vector.broadcast %153 : f32 to vector<10x128xf32>
    %848 = arith.mulf %822, %847 : vector<10x128xf32>
    %849 = arith.addf %840, %848 : vector<10x128xf32>
    %c1_251 = arith.constant 1 : index
    %c3_252 = arith.constant 3 : index
    %c0_253 = arith.constant 0 : index
    %850 = vector.load %arg13[%c1_251, %c3_252, %c0_253] : memref<3x16x128xf32, #tpu.memory_space<vmem>>, vector<1x10x128xf32>
    %851 = vector.shape_cast %850 : vector<1x10x128xf32> to vector<10x128xf32>
    %852 = vector.extract_strided_slice %851 {offsets = [0, 127], sizes = [10, 1], strides = [1, 1]} : vector<10x128xf32> to vector<10x1xf32>
    %853 = vector.extract_strided_slice %851 {offsets = [0, 0], sizes = [10, 127], strides = [1, 1]} : vector<10x128xf32> to vector<10x127xf32>
    %854 = tpu.concatenate %852, %853 in 1 : vector<10x1xf32>, vector<10x127xf32> -> vector<10x128xf32>
    %855 = vector.extract_strided_slice %851 {offsets = [0, 1], sizes = [10, 127], strides = [1, 1]} : vector<10x128xf32> to vector<10x127xf32>
    %856 = vector.extract_strided_slice %851 {offsets = [0, 0], sizes = [10, 1], strides = [1, 1]} : vector<10x128xf32> to vector<10x1xf32>
    %857 = tpu.concatenate %855, %856 in 1 : vector<10x127xf32>, vector<10x1xf32> -> vector<10x128xf32>
    %858 = vector.broadcast %100 : f32 to vector<10x128xf32>
    %859 = arith.mulf %854, %858 : vector<10x128xf32>
    %860 = arith.addf %843, %859 : vector<10x128xf32>
    %861 = vector.broadcast %127 : f32 to vector<10x128xf32>
    %862 = arith.mulf %854, %861 : vector<10x128xf32>
    %863 = arith.addf %846, %862 : vector<10x128xf32>
    %864 = vector.broadcast %154 : f32 to vector<10x128xf32>
    %865 = arith.mulf %854, %864 : vector<10x128xf32>
    %866 = arith.addf %849, %865 : vector<10x128xf32>
    %867 = vector.broadcast %101 : f32 to vector<10x128xf32>
    %868 = arith.mulf %851, %867 : vector<10x128xf32>
    %869 = arith.addf %860, %868 : vector<10x128xf32>
    %870 = vector.broadcast %128 : f32 to vector<10x128xf32>
    %871 = arith.mulf %851, %870 : vector<10x128xf32>
    %872 = arith.addf %863, %871 : vector<10x128xf32>
    %873 = vector.broadcast %155 : f32 to vector<10x128xf32>
    %874 = arith.mulf %851, %873 : vector<10x128xf32>
    %875 = arith.addf %866, %874 : vector<10x128xf32>
    %876 = vector.broadcast %102 : f32 to vector<10x128xf32>
    %877 = arith.mulf %857, %876 : vector<10x128xf32>
    %878 = arith.addf %869, %877 : vector<10x128xf32>
    %879 = vector.broadcast %129 : f32 to vector<10x128xf32>
    %880 = arith.mulf %857, %879 : vector<10x128xf32>
    %881 = arith.addf %872, %880 : vector<10x128xf32>
    %882 = vector.broadcast %156 : f32 to vector<10x128xf32>
    %883 = arith.mulf %857, %882 : vector<10x128xf32>
    %884 = arith.addf %875, %883 : vector<10x128xf32>
    %c1_254 = arith.constant 1 : index
    %c4_255 = arith.constant 4 : index
    %c0_256 = arith.constant 0 : index
    %885 = vector.load %arg13[%c1_254, %c4_255, %c0_256] : memref<3x16x128xf32, #tpu.memory_space<vmem>>, vector<1x10x128xf32>
    %886 = vector.shape_cast %885 : vector<1x10x128xf32> to vector<10x128xf32>
    %887 = vector.extract_strided_slice %886 {offsets = [0, 127], sizes = [10, 1], strides = [1, 1]} : vector<10x128xf32> to vector<10x1xf32>
    %888 = vector.extract_strided_slice %886 {offsets = [0, 0], sizes = [10, 127], strides = [1, 1]} : vector<10x128xf32> to vector<10x127xf32>
    %889 = tpu.concatenate %887, %888 in 1 : vector<10x1xf32>, vector<10x127xf32> -> vector<10x128xf32>
    %890 = vector.extract_strided_slice %886 {offsets = [0, 1], sizes = [10, 127], strides = [1, 1]} : vector<10x128xf32> to vector<10x127xf32>
    %891 = vector.extract_strided_slice %886 {offsets = [0, 0], sizes = [10, 1], strides = [1, 1]} : vector<10x128xf32> to vector<10x1xf32>
    %892 = tpu.concatenate %890, %891 in 1 : vector<10x127xf32>, vector<10x1xf32> -> vector<10x128xf32>
    %893 = vector.broadcast %103 : f32 to vector<10x128xf32>
    %894 = arith.mulf %889, %893 : vector<10x128xf32>
    %895 = arith.addf %878, %894 : vector<10x128xf32>
    %896 = vector.broadcast %130 : f32 to vector<10x128xf32>
    %897 = arith.mulf %889, %896 : vector<10x128xf32>
    %898 = arith.addf %881, %897 : vector<10x128xf32>
    %899 = vector.broadcast %157 : f32 to vector<10x128xf32>
    %900 = arith.mulf %889, %899 : vector<10x128xf32>
    %901 = arith.addf %884, %900 : vector<10x128xf32>
    %902 = vector.broadcast %104 : f32 to vector<10x128xf32>
    %903 = arith.mulf %886, %902 : vector<10x128xf32>
    %904 = arith.addf %895, %903 : vector<10x128xf32>
    %905 = vector.broadcast %131 : f32 to vector<10x128xf32>
    %906 = arith.mulf %886, %905 : vector<10x128xf32>
    %907 = arith.addf %898, %906 : vector<10x128xf32>
    %908 = vector.broadcast %158 : f32 to vector<10x128xf32>
    %909 = arith.mulf %886, %908 : vector<10x128xf32>
    %910 = arith.addf %901, %909 : vector<10x128xf32>
    %911 = vector.broadcast %105 : f32 to vector<10x128xf32>
    %912 = arith.mulf %892, %911 : vector<10x128xf32>
    %913 = arith.addf %904, %912 : vector<10x128xf32>
    %914 = vector.broadcast %132 : f32 to vector<10x128xf32>
    %915 = arith.mulf %892, %914 : vector<10x128xf32>
    %916 = arith.addf %907, %915 : vector<10x128xf32>
    %917 = vector.broadcast %159 : f32 to vector<10x128xf32>
    %918 = arith.mulf %892, %917 : vector<10x128xf32>
    %919 = arith.addf %910, %918 : vector<10x128xf32>
    %c2_257 = arith.constant 2 : index
    %c2_258 = arith.constant 2 : index
    %c0_259 = arith.constant 0 : index
    %920 = vector.load %arg13[%c2_257, %c2_258, %c0_259] : memref<3x16x128xf32, #tpu.memory_space<vmem>>, vector<1x10x128xf32>
    %921 = vector.shape_cast %920 : vector<1x10x128xf32> to vector<10x128xf32>
    %922 = vector.extract_strided_slice %921 {offsets = [0, 127], sizes = [10, 1], strides = [1, 1]} : vector<10x128xf32> to vector<10x1xf32>
    %923 = vector.extract_strided_slice %921 {offsets = [0, 0], sizes = [10, 127], strides = [1, 1]} : vector<10x128xf32> to vector<10x127xf32>
    %924 = tpu.concatenate %922, %923 in 1 : vector<10x1xf32>, vector<10x127xf32> -> vector<10x128xf32>
    %925 = vector.extract_strided_slice %921 {offsets = [0, 1], sizes = [10, 127], strides = [1, 1]} : vector<10x128xf32> to vector<10x127xf32>
    %926 = vector.extract_strided_slice %921 {offsets = [0, 0], sizes = [10, 1], strides = [1, 1]} : vector<10x128xf32> to vector<10x1xf32>
    %927 = tpu.concatenate %925, %926 in 1 : vector<10x127xf32>, vector<10x1xf32> -> vector<10x128xf32>
    %928 = vector.broadcast %106 : f32 to vector<10x128xf32>
    %929 = arith.mulf %924, %928 : vector<10x128xf32>
    %930 = arith.addf %913, %929 : vector<10x128xf32>
    %931 = vector.broadcast %133 : f32 to vector<10x128xf32>
    %932 = arith.mulf %924, %931 : vector<10x128xf32>
    %933 = arith.addf %916, %932 : vector<10x128xf32>
    %934 = vector.broadcast %160 : f32 to vector<10x128xf32>
    %935 = arith.mulf %924, %934 : vector<10x128xf32>
    %936 = arith.addf %919, %935 : vector<10x128xf32>
    %937 = vector.broadcast %107 : f32 to vector<10x128xf32>
    %938 = arith.mulf %921, %937 : vector<10x128xf32>
    %939 = arith.addf %930, %938 : vector<10x128xf32>
    %940 = vector.broadcast %134 : f32 to vector<10x128xf32>
    %941 = arith.mulf %921, %940 : vector<10x128xf32>
    %942 = arith.addf %933, %941 : vector<10x128xf32>
    %943 = vector.broadcast %161 : f32 to vector<10x128xf32>
    %944 = arith.mulf %921, %943 : vector<10x128xf32>
    %945 = arith.addf %936, %944 : vector<10x128xf32>
    %946 = vector.broadcast %108 : f32 to vector<10x128xf32>
    %947 = arith.mulf %927, %946 : vector<10x128xf32>
    %948 = arith.addf %939, %947 : vector<10x128xf32>
    %949 = vector.broadcast %135 : f32 to vector<10x128xf32>
    %950 = arith.mulf %927, %949 : vector<10x128xf32>
    %951 = arith.addf %942, %950 : vector<10x128xf32>
    %952 = vector.broadcast %162 : f32 to vector<10x128xf32>
    %953 = arith.mulf %927, %952 : vector<10x128xf32>
    %954 = arith.addf %945, %953 : vector<10x128xf32>
    %c2_260 = arith.constant 2 : index
    %c3_261 = arith.constant 3 : index
    %c0_262 = arith.constant 0 : index
    %955 = vector.load %arg13[%c2_260, %c3_261, %c0_262] : memref<3x16x128xf32, #tpu.memory_space<vmem>>, vector<1x10x128xf32>
    %956 = vector.shape_cast %955 : vector<1x10x128xf32> to vector<10x128xf32>
    %957 = vector.extract_strided_slice %956 {offsets = [0, 127], sizes = [10, 1], strides = [1, 1]} : vector<10x128xf32> to vector<10x1xf32>
    %958 = vector.extract_strided_slice %956 {offsets = [0, 0], sizes = [10, 127], strides = [1, 1]} : vector<10x128xf32> to vector<10x127xf32>
    %959 = tpu.concatenate %957, %958 in 1 : vector<10x1xf32>, vector<10x127xf32> -> vector<10x128xf32>
    %960 = vector.extract_strided_slice %956 {offsets = [0, 1], sizes = [10, 127], strides = [1, 1]} : vector<10x128xf32> to vector<10x127xf32>
    %961 = vector.extract_strided_slice %956 {offsets = [0, 0], sizes = [10, 1], strides = [1, 1]} : vector<10x128xf32> to vector<10x1xf32>
    %962 = tpu.concatenate %960, %961 in 1 : vector<10x127xf32>, vector<10x1xf32> -> vector<10x128xf32>
    %963 = vector.broadcast %109 : f32 to vector<10x128xf32>
    %964 = arith.mulf %959, %963 : vector<10x128xf32>
    %965 = arith.addf %948, %964 : vector<10x128xf32>
    %966 = vector.broadcast %136 : f32 to vector<10x128xf32>
    %967 = arith.mulf %959, %966 : vector<10x128xf32>
    %968 = arith.addf %951, %967 : vector<10x128xf32>
    %969 = vector.broadcast %163 : f32 to vector<10x128xf32>
    %970 = arith.mulf %959, %969 : vector<10x128xf32>
    %971 = arith.addf %954, %970 : vector<10x128xf32>
    %972 = vector.broadcast %110 : f32 to vector<10x128xf32>
    %973 = arith.mulf %956, %972 : vector<10x128xf32>
    %974 = arith.addf %965, %973 : vector<10x128xf32>
    %975 = vector.broadcast %137 : f32 to vector<10x128xf32>
    %976 = arith.mulf %956, %975 : vector<10x128xf32>
    %977 = arith.addf %968, %976 : vector<10x128xf32>
    %978 = vector.broadcast %164 : f32 to vector<10x128xf32>
    %979 = arith.mulf %956, %978 : vector<10x128xf32>
    %980 = arith.addf %971, %979 : vector<10x128xf32>
    %981 = vector.broadcast %111 : f32 to vector<10x128xf32>
    %982 = arith.mulf %962, %981 : vector<10x128xf32>
    %983 = arith.addf %974, %982 : vector<10x128xf32>
    %984 = vector.broadcast %138 : f32 to vector<10x128xf32>
    %985 = arith.mulf %962, %984 : vector<10x128xf32>
    %986 = arith.addf %977, %985 : vector<10x128xf32>
    %987 = vector.broadcast %165 : f32 to vector<10x128xf32>
    %988 = arith.mulf %962, %987 : vector<10x128xf32>
    %989 = arith.addf %980, %988 : vector<10x128xf32>
    %c2_263 = arith.constant 2 : index
    %c4_264 = arith.constant 4 : index
    %c0_265 = arith.constant 0 : index
    %990 = vector.load %arg13[%c2_263, %c4_264, %c0_265] : memref<3x16x128xf32, #tpu.memory_space<vmem>>, vector<1x10x128xf32>
    %991 = vector.shape_cast %990 : vector<1x10x128xf32> to vector<10x128xf32>
    %992 = vector.extract_strided_slice %991 {offsets = [0, 127], sizes = [10, 1], strides = [1, 1]} : vector<10x128xf32> to vector<10x1xf32>
    %993 = vector.extract_strided_slice %991 {offsets = [0, 0], sizes = [10, 127], strides = [1, 1]} : vector<10x128xf32> to vector<10x127xf32>
    %994 = tpu.concatenate %992, %993 in 1 : vector<10x1xf32>, vector<10x127xf32> -> vector<10x128xf32>
    %995 = vector.extract_strided_slice %991 {offsets = [0, 1], sizes = [10, 127], strides = [1, 1]} : vector<10x128xf32> to vector<10x127xf32>
    %996 = vector.extract_strided_slice %991 {offsets = [0, 0], sizes = [10, 1], strides = [1, 1]} : vector<10x128xf32> to vector<10x1xf32>
    %997 = tpu.concatenate %995, %996 in 1 : vector<10x127xf32>, vector<10x1xf32> -> vector<10x128xf32>
    %998 = vector.broadcast %112 : f32 to vector<10x128xf32>
    %999 = arith.mulf %994, %998 : vector<10x128xf32>
    %1000 = arith.addf %983, %999 : vector<10x128xf32>
    %1001 = vector.broadcast %139 : f32 to vector<10x128xf32>
    %1002 = arith.mulf %994, %1001 : vector<10x128xf32>
    %1003 = arith.addf %986, %1002 : vector<10x128xf32>
    %1004 = vector.broadcast %166 : f32 to vector<10x128xf32>
    %1005 = arith.mulf %994, %1004 : vector<10x128xf32>
    %1006 = arith.addf %989, %1005 : vector<10x128xf32>
    %1007 = vector.broadcast %113 : f32 to vector<10x128xf32>
    %1008 = arith.mulf %991, %1007 : vector<10x128xf32>
    %1009 = arith.addf %1000, %1008 : vector<10x128xf32>
    %1010 = vector.broadcast %140 : f32 to vector<10x128xf32>
    %1011 = arith.mulf %991, %1010 : vector<10x128xf32>
    %1012 = arith.addf %1003, %1011 : vector<10x128xf32>
    %1013 = vector.broadcast %167 : f32 to vector<10x128xf32>
    %1014 = arith.mulf %991, %1013 : vector<10x128xf32>
    %1015 = arith.addf %1006, %1014 : vector<10x128xf32>
    %1016 = vector.broadcast %114 : f32 to vector<10x128xf32>
    %1017 = arith.mulf %997, %1016 : vector<10x128xf32>
    %1018 = arith.addf %1009, %1017 : vector<10x128xf32>
    %1019 = vector.broadcast %141 : f32 to vector<10x128xf32>
    %1020 = arith.mulf %997, %1019 : vector<10x128xf32>
    %1021 = arith.addf %1012, %1020 : vector<10x128xf32>
    %1022 = vector.broadcast %168 : f32 to vector<10x128xf32>
    %1023 = arith.mulf %997, %1022 : vector<10x128xf32>
    %1024 = arith.addf %1015, %1023 : vector<10x128xf32>
    %1025 = vector.broadcast %352 : f32 to vector<10x128xf32>
    %1026 = arith.addf %1018, %1025 : vector<10x128xf32>
    %cst_266 = arith.constant 0.000000e+00 : f32
    %1027 = vector.broadcast %cst_266 : f32 to vector<10x128xf32>
    %1028 = arith.maximumf %1026, %1027 : vector<10x128xf32>
    %1029 = vector.broadcast %353 : f32 to vector<10x128xf32>
    %1030 = arith.addf %1021, %1029 : vector<10x128xf32>
    %cst_267 = arith.constant 0.000000e+00 : f32
    %1031 = vector.broadcast %cst_267 : f32 to vector<10x128xf32>
    %1032 = arith.maximumf %1030, %1031 : vector<10x128xf32>
    %1033 = vector.broadcast %354 : f32 to vector<10x128xf32>
    %1034 = arith.addf %1024, %1033 : vector<10x128xf32>
    %cst_268 = arith.constant 0.000000e+00 : f32
    %1035 = vector.broadcast %cst_268 : f32 to vector<10x128xf32>
    %1036 = arith.maximumf %1034, %1035 : vector<10x128xf32>
    %1037 = tpu.iota {dimensions = array<i32: 0>} : vector<10x128xi32>
    %c3_i32 = arith.constant 3 : i32
    %1038 = arith.addi %6, %c3_i32 : i32
    %1039 = vector.broadcast %1038 : i32 to vector<10x128xi32>
    %1040 = arith.addi %1037, %1039 : vector<10x128xi32>
    %1041 = tpu.iota {dimensions = array<i32: 1>} : vector<10x128xi32>
    %c0_i32_269 = arith.constant 0 : i32
    %1042 = vector.broadcast %c0_i32_269 : i32 to vector<10x128xi32>
    %1043 = arith.cmpi sge, %1040, %1042 : vector<10x128xi32>
    %c16_i32_270 = arith.constant 16 : i32
    %1044 = vector.broadcast %c16_i32_270 : i32 to vector<10x128xi32>
    %1045 = arith.cmpi slt, %1040, %1044 : vector<10x128xi32>
    %1046 = arith.andi %1043, %1045 : vector<10x128xi1>
    %c16_i32_271 = arith.constant 16 : i32
    %1047 = vector.broadcast %c16_i32_271 : i32 to vector<10x128xi32>
    %1048 = arith.cmpi slt, %1041, %1047 : vector<10x128xi32>
    %1049 = arith.andi %1046, %1048 : vector<10x128xi1>
    %cst_272 = arith.constant 0.000000e+00 : f32
    %1050 = vector.broadcast %cst_272 : f32 to vector<10x128xf32>
    %1051 = arith.select %1049, %1028, %1050 : vector<10x128xi1>, vector<10x128xf32>
    %c0_273 = arith.constant 0 : index
    %c3_274 = arith.constant 3 : index
    %c0_275 = arith.constant 0 : index
    %1052 = vector.load %arg14[%c0_273, %c3_274, %c0_275] : memref<3x16x128xf32, #tpu.memory_space<vmem>>, vector<1x10x128xf32>
    %1053 = vector.shape_cast %1052 : vector<1x10x128xf32> to vector<10x128xf32>
    %1054 = vector.shape_cast %1051 : vector<10x128xf32> to vector<1x10x128xf32>
    tpu.vector_store %arg14[%c0_273, %c3_274, %c0_275], %1054 {strides = array<i32>} : memref<3x16x128xf32, #tpu.memory_space<vmem>>, vector<1x10x128xf32>,
    %cst_276 = arith.constant 0.000000e+00 : f32
    %1055 = vector.broadcast %cst_276 : f32 to vector<10x128xf32>
    %1056 = arith.select %1049, %1032, %1055 : vector<10x128xi1>, vector<10x128xf32>
    %c1_277 = arith.constant 1 : index
    %c3_278 = arith.constant 3 : index
    %c0_279 = arith.constant 0 : index
    %1057 = vector.load %arg14[%c1_277, %c3_278, %c0_279] : memref<3x16x128xf32, #tpu.memory_space<vmem>>, vector<1x10x128xf32>
    %1058 = vector.shape_cast %1057 : vector<1x10x128xf32> to vector<10x128xf32>
    %1059 = vector.shape_cast %1056 : vector<10x128xf32> to vector<1x10x128xf32>
    tpu.vector_store %arg14[%c1_277, %c3_278, %c0_279], %1059 {strides = array<i32>} : memref<3x16x128xf32, #tpu.memory_space<vmem>>, vector<1x10x128xf32>,
    %cst_280 = arith.constant 0.000000e+00 : f32
    %1060 = vector.broadcast %cst_280 : f32 to vector<10x128xf32>
    %1061 = arith.select %1049, %1036, %1060 : vector<10x128xi1>, vector<10x128xf32>
    %c2_281 = arith.constant 2 : index
    %c3_282 = arith.constant 3 : index
    %c0_283 = arith.constant 0 : index
    %1062 = vector.load %arg14[%c2_281, %c3_282, %c0_283] : memref<3x16x128xf32, #tpu.memory_space<vmem>>, vector<1x10x128xf32>
    %1063 = vector.shape_cast %1062 : vector<1x10x128xf32> to vector<10x128xf32>
    %1064 = vector.shape_cast %1061 : vector<10x128xf32> to vector<1x10x128xf32>
    tpu.vector_store %arg14[%c2_281, %c3_282, %c0_283], %1064 {strides = array<i32>} : memref<3x16x128xf32, #tpu.memory_space<vmem>>, vector<1x10x128xf32>,
    %c0_284 = arith.constant 0 : index
    %c3_285 = arith.constant 3 : index
    %c0_286 = arith.constant 0 : index
    %1065 = vector.load %arg13[%c0_284, %c3_285, %c0_286] : memref<3x16x128xf32, #tpu.memory_space<vmem>>, vector<1x8x128xf32>
    %1066 = vector.shape_cast %1065 : vector<1x8x128xf32> to vector<8x128xf32>
    %1067 = vector.extract_strided_slice %1066 {offsets = [0, 127], sizes = [8, 1], strides = [1, 1]} : vector<8x128xf32> to vector<8x1xf32>
    %1068 = vector.extract_strided_slice %1066 {offsets = [0, 0], sizes = [8, 127], strides = [1, 1]} : vector<8x128xf32> to vector<8x127xf32>
    %1069 = tpu.concatenate %1067, %1068 in 1 : vector<8x1xf32>, vector<8x127xf32> -> vector<8x128xf32>
    %1070 = vector.extract_strided_slice %1066 {offsets = [0, 1], sizes = [8, 127], strides = [1, 1]} : vector<8x128xf32> to vector<8x127xf32>
    %1071 = vector.extract_strided_slice %1066 {offsets = [0, 0], sizes = [8, 1], strides = [1, 1]} : vector<8x128xf32> to vector<8x1xf32>
    %1072 = tpu.concatenate %1070, %1071 in 1 : vector<8x127xf32>, vector<8x1xf32> -> vector<8x128xf32>
    %1073 = vector.broadcast %169 : f32 to vector<8x128xf32>
    %1074 = arith.mulf %1069, %1073 : vector<8x128xf32>
    %1075 = vector.broadcast %223 : f32 to vector<8x128xf32>
    %1076 = arith.mulf %1069, %1075 : vector<8x128xf32>
    %1077 = vector.broadcast %277 : f32 to vector<8x128xf32>
    %1078 = arith.mulf %1069, %1077 : vector<8x128xf32>
    %1079 = vector.broadcast %170 : f32 to vector<8x128xf32>
    %1080 = arith.mulf %1066, %1079 : vector<8x128xf32>
    %1081 = arith.addf %1074, %1080 : vector<8x128xf32>
    %1082 = vector.broadcast %224 : f32 to vector<8x128xf32>
    %1083 = arith.mulf %1066, %1082 : vector<8x128xf32>
    %1084 = arith.addf %1076, %1083 : vector<8x128xf32>
    %1085 = vector.broadcast %278 : f32 to vector<8x128xf32>
    %1086 = arith.mulf %1066, %1085 : vector<8x128xf32>
    %1087 = arith.addf %1078, %1086 : vector<8x128xf32>
    %1088 = vector.broadcast %171 : f32 to vector<8x128xf32>
    %1089 = arith.mulf %1072, %1088 : vector<8x128xf32>
    %1090 = arith.addf %1081, %1089 : vector<8x128xf32>
    %1091 = vector.broadcast %225 : f32 to vector<8x128xf32>
    %1092 = arith.mulf %1072, %1091 : vector<8x128xf32>
    %1093 = arith.addf %1084, %1092 : vector<8x128xf32>
    %1094 = vector.broadcast %279 : f32 to vector<8x128xf32>
    %1095 = arith.mulf %1072, %1094 : vector<8x128xf32>
    %1096 = arith.addf %1087, %1095 : vector<8x128xf32>
    %c0_287 = arith.constant 0 : index
    %c4_288 = arith.constant 4 : index
    %c0_289 = arith.constant 0 : index
    %1097 = vector.load %arg13[%c0_287, %c4_288, %c0_289] : memref<3x16x128xf32, #tpu.memory_space<vmem>>, vector<1x8x128xf32>
    %1098 = vector.shape_cast %1097 : vector<1x8x128xf32> to vector<8x128xf32>
    %1099 = vector.extract_strided_slice %1098 {offsets = [0, 127], sizes = [8, 1], strides = [1, 1]} : vector<8x128xf32> to vector<8x1xf32>
    %1100 = vector.extract_strided_slice %1098 {offsets = [0, 0], sizes = [8, 127], strides = [1, 1]} : vector<8x128xf32> to vector<8x127xf32>
    %1101 = tpu.concatenate %1099, %1100 in 1 : vector<8x1xf32>, vector<8x127xf32> -> vector<8x128xf32>
    %1102 = vector.extract_strided_slice %1098 {offsets = [0, 1], sizes = [8, 127], strides = [1, 1]} : vector<8x128xf32> to vector<8x127xf32>
    %1103 = vector.extract_strided_slice %1098 {offsets = [0, 0], sizes = [8, 1], strides = [1, 1]} : vector<8x128xf32> to vector<8x1xf32>
    %1104 = tpu.concatenate %1102, %1103 in 1 : vector<8x127xf32>, vector<8x1xf32> -> vector<8x128xf32>
    %1105 = vector.broadcast %172 : f32 to vector<8x128xf32>
    %1106 = arith.mulf %1101, %1105 : vector<8x128xf32>
    %1107 = arith.addf %1090, %1106 : vector<8x128xf32>
    %1108 = vector.broadcast %226 : f32 to vector<8x128xf32>
    %1109 = arith.mulf %1101, %1108 : vector<8x128xf32>
    %1110 = arith.addf %1093, %1109 : vector<8x128xf32>
    %1111 = vector.broadcast %280 : f32 to vector<8x128xf32>
    %1112 = arith.mulf %1101, %1111 : vector<8x128xf32>
    %1113 = arith.addf %1096, %1112 : vector<8x128xf32>
    %1114 = vector.broadcast %173 : f32 to vector<8x128xf32>
    %1115 = arith.mulf %1098, %1114 : vector<8x128xf32>
    %1116 = arith.addf %1107, %1115 : vector<8x128xf32>
    %1117 = vector.broadcast %227 : f32 to vector<8x128xf32>
    %1118 = arith.mulf %1098, %1117 : vector<8x128xf32>
    %1119 = arith.addf %1110, %1118 : vector<8x128xf32>
    %1120 = vector.broadcast %281 : f32 to vector<8x128xf32>
    %1121 = arith.mulf %1098, %1120 : vector<8x128xf32>
    %1122 = arith.addf %1113, %1121 : vector<8x128xf32>
    %1123 = vector.broadcast %174 : f32 to vector<8x128xf32>
    %1124 = arith.mulf %1104, %1123 : vector<8x128xf32>
    %1125 = arith.addf %1116, %1124 : vector<8x128xf32>
    %1126 = vector.broadcast %228 : f32 to vector<8x128xf32>
    %1127 = arith.mulf %1104, %1126 : vector<8x128xf32>
    %1128 = arith.addf %1119, %1127 : vector<8x128xf32>
    %1129 = vector.broadcast %282 : f32 to vector<8x128xf32>
    %1130 = arith.mulf %1104, %1129 : vector<8x128xf32>
    %1131 = arith.addf %1122, %1130 : vector<8x128xf32>
    %c0_290 = arith.constant 0 : index
    %c5_291 = arith.constant 5 : index
    %c0_292 = arith.constant 0 : index
    %1132 = vector.load %arg13[%c0_290, %c5_291, %c0_292] : memref<3x16x128xf32, #tpu.memory_space<vmem>>, vector<1x8x128xf32>
    %1133 = vector.shape_cast %1132 : vector<1x8x128xf32> to vector<8x128xf32>
    %1134 = vector.extract_strided_slice %1133 {offsets = [0, 127], sizes = [8, 1], strides = [1, 1]} : vector<8x128xf32> to vector<8x1xf32>
    %1135 = vector.extract_strided_slice %1133 {offsets = [0, 0], sizes = [8, 127], strides = [1, 1]} : vector<8x128xf32> to vector<8x127xf32>
    %1136 = tpu.concatenate %1134, %1135 in 1 : vector<8x1xf32>, vector<8x127xf32> -> vector<8x128xf32>
    %1137 = vector.extract_strided_slice %1133 {offsets = [0, 1], sizes = [8, 127], strides = [1, 1]} : vector<8x128xf32> to vector<8x127xf32>
    %1138 = vector.extract_strided_slice %1133 {offsets = [0, 0], sizes = [8, 1], strides = [1, 1]} : vector<8x128xf32> to vector<8x1xf32>
    %1139 = tpu.concatenate %1137, %1138 in 1 : vector<8x127xf32>, vector<8x1xf32> -> vector<8x128xf32>
    %1140 = vector.broadcast %175 : f32 to vector<8x128xf32>
    %1141 = arith.mulf %1136, %1140 : vector<8x128xf32>
    %1142 = arith.addf %1125, %1141 : vector<8x128xf32>
    %1143 = vector.broadcast %229 : f32 to vector<8x128xf32>
    %1144 = arith.mulf %1136, %1143 : vector<8x128xf32>
    %1145 = arith.addf %1128, %1144 : vector<8x128xf32>
    %1146 = vector.broadcast %283 : f32 to vector<8x128xf32>
    %1147 = arith.mulf %1136, %1146 : vector<8x128xf32>
    %1148 = arith.addf %1131, %1147 : vector<8x128xf32>
    %1149 = vector.broadcast %176 : f32 to vector<8x128xf32>
    %1150 = arith.mulf %1133, %1149 : vector<8x128xf32>
    %1151 = arith.addf %1142, %1150 : vector<8x128xf32>
    %1152 = vector.broadcast %230 : f32 to vector<8x128xf32>
    %1153 = arith.mulf %1133, %1152 : vector<8x128xf32>
    %1154 = arith.addf %1145, %1153 : vector<8x128xf32>
    %1155 = vector.broadcast %284 : f32 to vector<8x128xf32>
    %1156 = arith.mulf %1133, %1155 : vector<8x128xf32>
    %1157 = arith.addf %1148, %1156 : vector<8x128xf32>
    %1158 = vector.broadcast %177 : f32 to vector<8x128xf32>
    %1159 = arith.mulf %1139, %1158 : vector<8x128xf32>
    %1160 = arith.addf %1151, %1159 : vector<8x128xf32>
    %1161 = vector.broadcast %231 : f32 to vector<8x128xf32>
    %1162 = arith.mulf %1139, %1161 : vector<8x128xf32>
    %1163 = arith.addf %1154, %1162 : vector<8x128xf32>
    %1164 = vector.broadcast %285 : f32 to vector<8x128xf32>
    %1165 = arith.mulf %1139, %1164 : vector<8x128xf32>
    %1166 = arith.addf %1157, %1165 : vector<8x128xf32>
    %c1_293 = arith.constant 1 : index
    %c3_294 = arith.constant 3 : index
    %c0_295 = arith.constant 0 : index
    %1167 = vector.load %arg13[%c1_293, %c3_294, %c0_295] : memref<3x16x128xf32, #tpu.memory_space<vmem>>, vector<1x8x128xf32>
    %1168 = vector.shape_cast %1167 : vector<1x8x128xf32> to vector<8x128xf32>
    %1169 = vector.extract_strided_slice %1168 {offsets = [0, 127], sizes = [8, 1], strides = [1, 1]} : vector<8x128xf32> to vector<8x1xf32>
    %1170 = vector.extract_strided_slice %1168 {offsets = [0, 0], sizes = [8, 127], strides = [1, 1]} : vector<8x128xf32> to vector<8x127xf32>
    %1171 = tpu.concatenate %1169, %1170 in 1 : vector<8x1xf32>, vector<8x127xf32> -> vector<8x128xf32>
    %1172 = vector.extract_strided_slice %1168 {offsets = [0, 1], sizes = [8, 127], strides = [1, 1]} : vector<8x128xf32> to vector<8x127xf32>
    %1173 = vector.extract_strided_slice %1168 {offsets = [0, 0], sizes = [8, 1], strides = [1, 1]} : vector<8x128xf32> to vector<8x1xf32>
    %1174 = tpu.concatenate %1172, %1173 in 1 : vector<8x127xf32>, vector<8x1xf32> -> vector<8x128xf32>
    %1175 = vector.broadcast %178 : f32 to vector<8x128xf32>
    %1176 = arith.mulf %1171, %1175 : vector<8x128xf32>
    %1177 = arith.addf %1160, %1176 : vector<8x128xf32>
    %1178 = vector.broadcast %232 : f32 to vector<8x128xf32>
    %1179 = arith.mulf %1171, %1178 : vector<8x128xf32>
    %1180 = arith.addf %1163, %1179 : vector<8x128xf32>
    %1181 = vector.broadcast %286 : f32 to vector<8x128xf32>
    %1182 = arith.mulf %1171, %1181 : vector<8x128xf32>
    %1183 = arith.addf %1166, %1182 : vector<8x128xf32>
    %1184 = vector.broadcast %179 : f32 to vector<8x128xf32>
    %1185 = arith.mulf %1168, %1184 : vector<8x128xf32>
    %1186 = arith.addf %1177, %1185 : vector<8x128xf32>
    %1187 = vector.broadcast %233 : f32 to vector<8x128xf32>
    %1188 = arith.mulf %1168, %1187 : vector<8x128xf32>
    %1189 = arith.addf %1180, %1188 : vector<8x128xf32>
    %1190 = vector.broadcast %287 : f32 to vector<8x128xf32>
    %1191 = arith.mulf %1168, %1190 : vector<8x128xf32>
    %1192 = arith.addf %1183, %1191 : vector<8x128xf32>
    %1193 = vector.broadcast %180 : f32 to vector<8x128xf32>
    %1194 = arith.mulf %1174, %1193 : vector<8x128xf32>
    %1195 = arith.addf %1186, %1194 : vector<8x128xf32>
    %1196 = vector.broadcast %234 : f32 to vector<8x128xf32>
    %1197 = arith.mulf %1174, %1196 : vector<8x128xf32>
    %1198 = arith.addf %1189, %1197 : vector<8x128xf32>
    %1199 = vector.broadcast %288 : f32 to vector<8x128xf32>
    %1200 = arith.mulf %1174, %1199 : vector<8x128xf32>
    %1201 = arith.addf %1192, %1200 : vector<8x128xf32>
    %c1_296 = arith.constant 1 : index
    %c4_297 = arith.constant 4 : index
    %c0_298 = arith.constant 0 : index
    %1202 = vector.load %arg13[%c1_296, %c4_297, %c0_298] : memref<3x16x128xf32, #tpu.memory_space<vmem>>, vector<1x8x128xf32>
    %1203 = vector.shape_cast %1202 : vector<1x8x128xf32> to vector<8x128xf32>
    %1204 = vector.extract_strided_slice %1203 {offsets = [0, 127], sizes = [8, 1], strides = [1, 1]} : vector<8x128xf32> to vector<8x1xf32>
    %1205 = vector.extract_strided_slice %1203 {offsets = [0, 0], sizes = [8, 127], strides = [1, 1]} : vector<8x128xf32> to vector<8x127xf32>
    %1206 = tpu.concatenate %1204, %1205 in 1 : vector<8x1xf32>, vector<8x127xf32> -> vector<8x128xf32>
    %1207 = vector.extract_strided_slice %1203 {offsets = [0, 1], sizes = [8, 127], strides = [1, 1]} : vector<8x128xf32> to vector<8x127xf32>
    %1208 = vector.extract_strided_slice %1203 {offsets = [0, 0], sizes = [8, 1], strides = [1, 1]} : vector<8x128xf32> to vector<8x1xf32>
    %1209 = tpu.concatenate %1207, %1208 in 1 : vector<8x127xf32>, vector<8x1xf32> -> vector<8x128xf32>
    %1210 = vector.broadcast %181 : f32 to vector<8x128xf32>
    %1211 = arith.mulf %1206, %1210 : vector<8x128xf32>
    %1212 = arith.addf %1195, %1211 : vector<8x128xf32>
    %1213 = vector.broadcast %235 : f32 to vector<8x128xf32>
    %1214 = arith.mulf %1206, %1213 : vector<8x128xf32>
    %1215 = arith.addf %1198, %1214 : vector<8x128xf32>
    %1216 = vector.broadcast %289 : f32 to vector<8x128xf32>
    %1217 = arith.mulf %1206, %1216 : vector<8x128xf32>
    %1218 = arith.addf %1201, %1217 : vector<8x128xf32>
    %1219 = vector.broadcast %182 : f32 to vector<8x128xf32>
    %1220 = arith.mulf %1203, %1219 : vector<8x128xf32>
    %1221 = arith.addf %1212, %1220 : vector<8x128xf32>
    %1222 = vector.broadcast %236 : f32 to vector<8x128xf32>
    %1223 = arith.mulf %1203, %1222 : vector<8x128xf32>
    %1224 = arith.addf %1215, %1223 : vector<8x128xf32>
    %1225 = vector.broadcast %290 : f32 to vector<8x128xf32>
    %1226 = arith.mulf %1203, %1225 : vector<8x128xf32>
    %1227 = arith.addf %1218, %1226 : vector<8x128xf32>
    %1228 = vector.broadcast %183 : f32 to vector<8x128xf32>
    %1229 = arith.mulf %1209, %1228 : vector<8x128xf32>
    %1230 = arith.addf %1221, %1229 : vector<8x128xf32>
    %1231 = vector.broadcast %237 : f32 to vector<8x128xf32>
    %1232 = arith.mulf %1209, %1231 : vector<8x128xf32>
    %1233 = arith.addf %1224, %1232 : vector<8x128xf32>
    %1234 = vector.broadcast %291 : f32 to vector<8x128xf32>
    %1235 = arith.mulf %1209, %1234 : vector<8x128xf32>
    %1236 = arith.addf %1227, %1235 : vector<8x128xf32>
    %c1_299 = arith.constant 1 : index
    %c5_300 = arith.constant 5 : index
    %c0_301 = arith.constant 0 : index
    %1237 = vector.load %arg13[%c1_299, %c5_300, %c0_301] : memref<3x16x128xf32, #tpu.memory_space<vmem>>, vector<1x8x128xf32>
    %1238 = vector.shape_cast %1237 : vector<1x8x128xf32> to vector<8x128xf32>
    %1239 = vector.extract_strided_slice %1238 {offsets = [0, 127], sizes = [8, 1], strides = [1, 1]} : vector<8x128xf32> to vector<8x1xf32>
    %1240 = vector.extract_strided_slice %1238 {offsets = [0, 0], sizes = [8, 127], strides = [1, 1]} : vector<8x128xf32> to vector<8x127xf32>
    %1241 = tpu.concatenate %1239, %1240 in 1 : vector<8x1xf32>, vector<8x127xf32> -> vector<8x128xf32>
    %1242 = vector.extract_strided_slice %1238 {offsets = [0, 1], sizes = [8, 127], strides = [1, 1]} : vector<8x128xf32> to vector<8x127xf32>
    %1243 = vector.extract_strided_slice %1238 {offsets = [0, 0], sizes = [8, 1], strides = [1, 1]} : vector<8x128xf32> to vector<8x1xf32>
    %1244 = tpu.concatenate %1242, %1243 in 1 : vector<8x127xf32>, vector<8x1xf32> -> vector<8x128xf32>
    %1245 = vector.broadcast %184 : f32 to vector<8x128xf32>
    %1246 = arith.mulf %1241, %1245 : vector<8x128xf32>
    %1247 = arith.addf %1230, %1246 : vector<8x128xf32>
    %1248 = vector.broadcast %238 : f32 to vector<8x128xf32>
    %1249 = arith.mulf %1241, %1248 : vector<8x128xf32>
    %1250 = arith.addf %1233, %1249 : vector<8x128xf32>
    %1251 = vector.broadcast %292 : f32 to vector<8x128xf32>
    %1252 = arith.mulf %1241, %1251 : vector<8x128xf32>
    %1253 = arith.addf %1236, %1252 : vector<8x128xf32>
    %1254 = vector.broadcast %185 : f32 to vector<8x128xf32>
    %1255 = arith.mulf %1238, %1254 : vector<8x128xf32>
    %1256 = arith.addf %1247, %1255 : vector<8x128xf32>
    %1257 = vector.broadcast %239 : f32 to vector<8x128xf32>
    %1258 = arith.mulf %1238, %1257 : vector<8x128xf32>
    %1259 = arith.addf %1250, %1258 : vector<8x128xf32>
    %1260 = vector.broadcast %293 : f32 to vector<8x128xf32>
    %1261 = arith.mulf %1238, %1260 : vector<8x128xf32>
    %1262 = arith.addf %1253, %1261 : vector<8x128xf32>
    %1263 = vector.broadcast %186 : f32 to vector<8x128xf32>
    %1264 = arith.mulf %1244, %1263 : vector<8x128xf32>
    %1265 = arith.addf %1256, %1264 : vector<8x128xf32>
    %1266 = vector.broadcast %240 : f32 to vector<8x128xf32>
    %1267 = arith.mulf %1244, %1266 : vector<8x128xf32>
    %1268 = arith.addf %1259, %1267 : vector<8x128xf32>
    %1269 = vector.broadcast %294 : f32 to vector<8x128xf32>
    %1270 = arith.mulf %1244, %1269 : vector<8x128xf32>
    %1271 = arith.addf %1262, %1270 : vector<8x128xf32>
    %c2_302 = arith.constant 2 : index
    %c3_303 = arith.constant 3 : index
    %c0_304 = arith.constant 0 : index
    %1272 = vector.load %arg13[%c2_302, %c3_303, %c0_304] : memref<3x16x128xf32, #tpu.memory_space<vmem>>, vector<1x8x128xf32>
    %1273 = vector.shape_cast %1272 : vector<1x8x128xf32> to vector<8x128xf32>
    %1274 = vector.extract_strided_slice %1273 {offsets = [0, 127], sizes = [8, 1], strides = [1, 1]} : vector<8x128xf32> to vector<8x1xf32>
    %1275 = vector.extract_strided_slice %1273 {offsets = [0, 0], sizes = [8, 127], strides = [1, 1]} : vector<8x128xf32> to vector<8x127xf32>
    %1276 = tpu.concatenate %1274, %1275 in 1 : vector<8x1xf32>, vector<8x127xf32> -> vector<8x128xf32>
    %1277 = vector.extract_strided_slice %1273 {offsets = [0, 1], sizes = [8, 127], strides = [1, 1]} : vector<8x128xf32> to vector<8x127xf32>
    %1278 = vector.extract_strided_slice %1273 {offsets = [0, 0], sizes = [8, 1], strides = [1, 1]} : vector<8x128xf32> to vector<8x1xf32>
    %1279 = tpu.concatenate %1277, %1278 in 1 : vector<8x127xf32>, vector<8x1xf32> -> vector<8x128xf32>
    %1280 = vector.broadcast %187 : f32 to vector<8x128xf32>
    %1281 = arith.mulf %1276, %1280 : vector<8x128xf32>
    %1282 = arith.addf %1265, %1281 : vector<8x128xf32>
    %1283 = vector.broadcast %241 : f32 to vector<8x128xf32>
    %1284 = arith.mulf %1276, %1283 : vector<8x128xf32>
    %1285 = arith.addf %1268, %1284 : vector<8x128xf32>
    %1286 = vector.broadcast %295 : f32 to vector<8x128xf32>
    %1287 = arith.mulf %1276, %1286 : vector<8x128xf32>
    %1288 = arith.addf %1271, %1287 : vector<8x128xf32>
    %1289 = vector.broadcast %188 : f32 to vector<8x128xf32>
    %1290 = arith.mulf %1273, %1289 : vector<8x128xf32>
    %1291 = arith.addf %1282, %1290 : vector<8x128xf32>
    %1292 = vector.broadcast %242 : f32 to vector<8x128xf32>
    %1293 = arith.mulf %1273, %1292 : vector<8x128xf32>
    %1294 = arith.addf %1285, %1293 : vector<8x128xf32>
    %1295 = vector.broadcast %296 : f32 to vector<8x128xf32>
    %1296 = arith.mulf %1273, %1295 : vector<8x128xf32>
    %1297 = arith.addf %1288, %1296 : vector<8x128xf32>
    %1298 = vector.broadcast %189 : f32 to vector<8x128xf32>
    %1299 = arith.mulf %1279, %1298 : vector<8x128xf32>
    %1300 = arith.addf %1291, %1299 : vector<8x128xf32>
    %1301 = vector.broadcast %243 : f32 to vector<8x128xf32>
    %1302 = arith.mulf %1279, %1301 : vector<8x128xf32>
    %1303 = arith.addf %1294, %1302 : vector<8x128xf32>
    %1304 = vector.broadcast %297 : f32 to vector<8x128xf32>
    %1305 = arith.mulf %1279, %1304 : vector<8x128xf32>
    %1306 = arith.addf %1297, %1305 : vector<8x128xf32>
    %c2_305 = arith.constant 2 : index
    %c4_306 = arith.constant 4 : index
    %c0_307 = arith.constant 0 : index
    %1307 = vector.load %arg13[%c2_305, %c4_306, %c0_307] : memref<3x16x128xf32, #tpu.memory_space<vmem>>, vector<1x8x128xf32>
    %1308 = vector.shape_cast %1307 : vector<1x8x128xf32> to vector<8x128xf32>
    %1309 = vector.extract_strided_slice %1308 {offsets = [0, 127], sizes = [8, 1], strides = [1, 1]} : vector<8x128xf32> to vector<8x1xf32>
    %1310 = vector.extract_strided_slice %1308 {offsets = [0, 0], sizes = [8, 127], strides = [1, 1]} : vector<8x128xf32> to vector<8x127xf32>
    %1311 = tpu.concatenate %1309, %1310 in 1 : vector<8x1xf32>, vector<8x127xf32> -> vector<8x128xf32>
    %1312 = vector.extract_strided_slice %1308 {offsets = [0, 1], sizes = [8, 127], strides = [1, 1]} : vector<8x128xf32> to vector<8x127xf32>
    %1313 = vector.extract_strided_slice %1308 {offsets = [0, 0], sizes = [8, 1], strides = [1, 1]} : vector<8x128xf32> to vector<8x1xf32>
    %1314 = tpu.concatenate %1312, %1313 in 1 : vector<8x127xf32>, vector<8x1xf32> -> vector<8x128xf32>
    %1315 = vector.broadcast %190 : f32 to vector<8x128xf32>
    %1316 = arith.mulf %1311, %1315 : vector<8x128xf32>
    %1317 = arith.addf %1300, %1316 : vector<8x128xf32>
    %1318 = vector.broadcast %244 : f32 to vector<8x128xf32>
    %1319 = arith.mulf %1311, %1318 : vector<8x128xf32>
    %1320 = arith.addf %1303, %1319 : vector<8x128xf32>
    %1321 = vector.broadcast %298 : f32 to vector<8x128xf32>
    %1322 = arith.mulf %1311, %1321 : vector<8x128xf32>
    %1323 = arith.addf %1306, %1322 : vector<8x128xf32>
    %1324 = vector.broadcast %191 : f32 to vector<8x128xf32>
    %1325 = arith.mulf %1308, %1324 : vector<8x128xf32>
    %1326 = arith.addf %1317, %1325 : vector<8x128xf32>
    %1327 = vector.broadcast %245 : f32 to vector<8x128xf32>
    %1328 = arith.mulf %1308, %1327 : vector<8x128xf32>
    %1329 = arith.addf %1320, %1328 : vector<8x128xf32>
    %1330 = vector.broadcast %299 : f32 to vector<8x128xf32>
    %1331 = arith.mulf %1308, %1330 : vector<8x128xf32>
    %1332 = arith.addf %1323, %1331 : vector<8x128xf32>
    %1333 = vector.broadcast %192 : f32 to vector<8x128xf32>
    %1334 = arith.mulf %1314, %1333 : vector<8x128xf32>
    %1335 = arith.addf %1326, %1334 : vector<8x128xf32>
    %1336 = vector.broadcast %246 : f32 to vector<8x128xf32>
    %1337 = arith.mulf %1314, %1336 : vector<8x128xf32>
    %1338 = arith.addf %1329, %1337 : vector<8x128xf32>
    %1339 = vector.broadcast %300 : f32 to vector<8x128xf32>
    %1340 = arith.mulf %1314, %1339 : vector<8x128xf32>
    %1341 = arith.addf %1332, %1340 : vector<8x128xf32>
    %c2_308 = arith.constant 2 : index
    %c5_309 = arith.constant 5 : index
    %c0_310 = arith.constant 0 : index
    %1342 = vector.load %arg13[%c2_308, %c5_309, %c0_310] : memref<3x16x128xf32, #tpu.memory_space<vmem>>, vector<1x8x128xf32>
    %1343 = vector.shape_cast %1342 : vector<1x8x128xf32> to vector<8x128xf32>
    %1344 = vector.extract_strided_slice %1343 {offsets = [0, 127], sizes = [8, 1], strides = [1, 1]} : vector<8x128xf32> to vector<8x1xf32>
    %1345 = vector.extract_strided_slice %1343 {offsets = [0, 0], sizes = [8, 127], strides = [1, 1]} : vector<8x128xf32> to vector<8x127xf32>
    %1346 = tpu.concatenate %1344, %1345 in 1 : vector<8x1xf32>, vector<8x127xf32> -> vector<8x128xf32>
    %1347 = vector.extract_strided_slice %1343 {offsets = [0, 1], sizes = [8, 127], strides = [1, 1]} : vector<8x128xf32> to vector<8x127xf32>
    %1348 = vector.extract_strided_slice %1343 {offsets = [0, 0], sizes = [8, 1], strides = [1, 1]} : vector<8x128xf32> to vector<8x1xf32>
    %1349 = tpu.concatenate %1347, %1348 in 1 : vector<8x127xf32>, vector<8x1xf32> -> vector<8x128xf32>
    %1350 = vector.broadcast %193 : f32 to vector<8x128xf32>
    %1351 = arith.mulf %1346, %1350 : vector<8x128xf32>
    %1352 = arith.addf %1335, %1351 : vector<8x128xf32>
    %1353 = vector.broadcast %247 : f32 to vector<8x128xf32>
    %1354 = arith.mulf %1346, %1353 : vector<8x128xf32>
    %1355 = arith.addf %1338, %1354 : vector<8x128xf32>
    %1356 = vector.broadcast %301 : f32 to vector<8x128xf32>
    %1357 = arith.mulf %1346, %1356 : vector<8x128xf32>
    %1358 = arith.addf %1341, %1357 : vector<8x128xf32>
    %1359 = vector.broadcast %194 : f32 to vector<8x128xf32>
    %1360 = arith.mulf %1343, %1359 : vector<8x128xf32>
    %1361 = arith.addf %1352, %1360 : vector<8x128xf32>
    %1362 = vector.broadcast %248 : f32 to vector<8x128xf32>
    %1363 = arith.mulf %1343, %1362 : vector<8x128xf32>
    %1364 = arith.addf %1355, %1363 : vector<8x128xf32>
    %1365 = vector.broadcast %302 : f32 to vector<8x128xf32>
    %1366 = arith.mulf %1343, %1365 : vector<8x128xf32>
    %1367 = arith.addf %1358, %1366 : vector<8x128xf32>
    %1368 = vector.broadcast %195 : f32 to vector<8x128xf32>
    %1369 = arith.mulf %1349, %1368 : vector<8x128xf32>
    %1370 = arith.addf %1361, %1369 : vector<8x128xf32>
    %1371 = vector.broadcast %249 : f32 to vector<8x128xf32>
    %1372 = arith.mulf %1349, %1371 : vector<8x128xf32>
    %1373 = arith.addf %1364, %1372 : vector<8x128xf32>
    %1374 = vector.broadcast %303 : f32 to vector<8x128xf32>
    %1375 = arith.mulf %1349, %1374 : vector<8x128xf32>
    %1376 = arith.addf %1367, %1375 : vector<8x128xf32>
    %c0_311 = arith.constant 0 : index
    %c3_312 = arith.constant 3 : index
    %c0_313 = arith.constant 0 : index
    %1377 = vector.load %arg14[%c0_311, %c3_312, %c0_313] : memref<3x16x128xf32, #tpu.memory_space<vmem>>, vector<1x8x128xf32>
    %1378 = vector.shape_cast %1377 : vector<1x8x128xf32> to vector<8x128xf32>
    %1379 = vector.extract_strided_slice %1378 {offsets = [0, 127], sizes = [8, 1], strides = [1, 1]} : vector<8x128xf32> to vector<8x1xf32>
    %1380 = vector.extract_strided_slice %1378 {offsets = [0, 0], sizes = [8, 127], strides = [1, 1]} : vector<8x128xf32> to vector<8x127xf32>
    %1381 = tpu.concatenate %1379, %1380 in 1 : vector<8x1xf32>, vector<8x127xf32> -> vector<8x128xf32>
    %1382 = vector.extract_strided_slice %1378 {offsets = [0, 1], sizes = [8, 127], strides = [1, 1]} : vector<8x128xf32> to vector<8x127xf32>
    %1383 = vector.extract_strided_slice %1378 {offsets = [0, 0], sizes = [8, 1], strides = [1, 1]} : vector<8x128xf32> to vector<8x1xf32>
    %1384 = tpu.concatenate %1382, %1383 in 1 : vector<8x127xf32>, vector<8x1xf32> -> vector<8x128xf32>
    %1385 = vector.broadcast %196 : f32 to vector<8x128xf32>
    %1386 = arith.mulf %1381, %1385 : vector<8x128xf32>
    %1387 = arith.addf %1370, %1386 : vector<8x128xf32>
    %1388 = vector.broadcast %250 : f32 to vector<8x128xf32>
    %1389 = arith.mulf %1381, %1388 : vector<8x128xf32>
    %1390 = arith.addf %1373, %1389 : vector<8x128xf32>
    %1391 = vector.broadcast %304 : f32 to vector<8x128xf32>
    %1392 = arith.mulf %1381, %1391 : vector<8x128xf32>
    %1393 = arith.addf %1376, %1392 : vector<8x128xf32>
    %1394 = vector.broadcast %197 : f32 to vector<8x128xf32>
    %1395 = arith.mulf %1378, %1394 : vector<8x128xf32>
    %1396 = arith.addf %1387, %1395 : vector<8x128xf32>
    %1397 = vector.broadcast %251 : f32 to vector<8x128xf32>
    %1398 = arith.mulf %1378, %1397 : vector<8x128xf32>
    %1399 = arith.addf %1390, %1398 : vector<8x128xf32>
    %1400 = vector.broadcast %305 : f32 to vector<8x128xf32>
    %1401 = arith.mulf %1378, %1400 : vector<8x128xf32>
    %1402 = arith.addf %1393, %1401 : vector<8x128xf32>
    %1403 = vector.broadcast %198 : f32 to vector<8x128xf32>
    %1404 = arith.mulf %1384, %1403 : vector<8x128xf32>
    %1405 = arith.addf %1396, %1404 : vector<8x128xf32>
    %1406 = vector.broadcast %252 : f32 to vector<8x128xf32>
    %1407 = arith.mulf %1384, %1406 : vector<8x128xf32>
    %1408 = arith.addf %1399, %1407 : vector<8x128xf32>
    %1409 = vector.broadcast %306 : f32 to vector<8x128xf32>
    %1410 = arith.mulf %1384, %1409 : vector<8x128xf32>
    %1411 = arith.addf %1402, %1410 : vector<8x128xf32>
    %c0_314 = arith.constant 0 : index
    %c4_315 = arith.constant 4 : index
    %c0_316 = arith.constant 0 : index
    %1412 = vector.load %arg14[%c0_314, %c4_315, %c0_316] : memref<3x16x128xf32, #tpu.memory_space<vmem>>, vector<1x8x128xf32>
    %1413 = vector.shape_cast %1412 : vector<1x8x128xf32> to vector<8x128xf32>
    %1414 = vector.extract_strided_slice %1413 {offsets = [0, 127], sizes = [8, 1], strides = [1, 1]} : vector<8x128xf32> to vector<8x1xf32>
    %1415 = vector.extract_strided_slice %1413 {offsets = [0, 0], sizes = [8, 127], strides = [1, 1]} : vector<8x128xf32> to vector<8x127xf32>
    %1416 = tpu.concatenate %1414, %1415 in 1 : vector<8x1xf32>, vector<8x127xf32> -> vector<8x128xf32>
    %1417 = vector.extract_strided_slice %1413 {offsets = [0, 1], sizes = [8, 127], strides = [1, 1]} : vector<8x128xf32> to vector<8x127xf32>
    %1418 = vector.extract_strided_slice %1413 {offsets = [0, 0], sizes = [8, 1], strides = [1, 1]} : vector<8x128xf32> to vector<8x1xf32>
    %1419 = tpu.concatenate %1417, %1418 in 1 : vector<8x127xf32>, vector<8x1xf32> -> vector<8x128xf32>
    %1420 = vector.broadcast %199 : f32 to vector<8x128xf32>
    %1421 = arith.mulf %1416, %1420 : vector<8x128xf32>
    %1422 = arith.addf %1405, %1421 : vector<8x128xf32>
    %1423 = vector.broadcast %253 : f32 to vector<8x128xf32>
    %1424 = arith.mulf %1416, %1423 : vector<8x128xf32>
    %1425 = arith.addf %1408, %1424 : vector<8x128xf32>
    %1426 = vector.broadcast %307 : f32 to vector<8x128xf32>
    %1427 = arith.mulf %1416, %1426 : vector<8x128xf32>
    %1428 = arith.addf %1411, %1427 : vector<8x128xf32>
    %1429 = vector.broadcast %200 : f32 to vector<8x128xf32>
    %1430 = arith.mulf %1413, %1429 : vector<8x128xf32>
    %1431 = arith.addf %1422, %1430 : vector<8x128xf32>
    %1432 = vector.broadcast %254 : f32 to vector<8x128xf32>
    %1433 = arith.mulf %1413, %1432 : vector<8x128xf32>
    %1434 = arith.addf %1425, %1433 : vector<8x128xf32>
    %1435 = vector.broadcast %308 : f32 to vector<8x128xf32>
    %1436 = arith.mulf %1413, %1435 : vector<8x128xf32>
    %1437 = arith.addf %1428, %1436 : vector<8x128xf32>
    %1438 = vector.broadcast %201 : f32 to vector<8x128xf32>
    %1439 = arith.mulf %1419, %1438 : vector<8x128xf32>
    %1440 = arith.addf %1431, %1439 : vector<8x128xf32>
    %1441 = vector.broadcast %255 : f32 to vector<8x128xf32>
    %1442 = arith.mulf %1419, %1441 : vector<8x128xf32>
    %1443 = arith.addf %1434, %1442 : vector<8x128xf32>
    %1444 = vector.broadcast %309 : f32 to vector<8x128xf32>
    %1445 = arith.mulf %1419, %1444 : vector<8x128xf32>
    %1446 = arith.addf %1437, %1445 : vector<8x128xf32>
    %c0_317 = arith.constant 0 : index
    %c5_318 = arith.constant 5 : index
    %c0_319 = arith.constant 0 : index
    %1447 = vector.load %arg14[%c0_317, %c5_318, %c0_319] : memref<3x16x128xf32, #tpu.memory_space<vmem>>, vector<1x8x128xf32>
    %1448 = vector.shape_cast %1447 : vector<1x8x128xf32> to vector<8x128xf32>
    %1449 = vector.extract_strided_slice %1448 {offsets = [0, 127], sizes = [8, 1], strides = [1, 1]} : vector<8x128xf32> to vector<8x1xf32>
    %1450 = vector.extract_strided_slice %1448 {offsets = [0, 0], sizes = [8, 127], strides = [1, 1]} : vector<8x128xf32> to vector<8x127xf32>
    %1451 = tpu.concatenate %1449, %1450 in 1 : vector<8x1xf32>, vector<8x127xf32> -> vector<8x128xf32>
    %1452 = vector.extract_strided_slice %1448 {offsets = [0, 1], sizes = [8, 127], strides = [1, 1]} : vector<8x128xf32> to vector<8x127xf32>
    %1453 = vector.extract_strided_slice %1448 {offsets = [0, 0], sizes = [8, 1], strides = [1, 1]} : vector<8x128xf32> to vector<8x1xf32>
    %1454 = tpu.concatenate %1452, %1453 in 1 : vector<8x127xf32>, vector<8x1xf32> -> vector<8x128xf32>
    %1455 = vector.broadcast %202 : f32 to vector<8x128xf32>
    %1456 = arith.mulf %1451, %1455 : vector<8x128xf32>
    %1457 = arith.addf %1440, %1456 : vector<8x128xf32>
    %1458 = vector.broadcast %256 : f32 to vector<8x128xf32>
    %1459 = arith.mulf %1451, %1458 : vector<8x128xf32>
    %1460 = arith.addf %1443, %1459 : vector<8x128xf32>
    %1461 = vector.broadcast %310 : f32 to vector<8x128xf32>
    %1462 = arith.mulf %1451, %1461 : vector<8x128xf32>
    %1463 = arith.addf %1446, %1462 : vector<8x128xf32>
    %1464 = vector.broadcast %203 : f32 to vector<8x128xf32>
    %1465 = arith.mulf %1448, %1464 : vector<8x128xf32>
    %1466 = arith.addf %1457, %1465 : vector<8x128xf32>
    %1467 = vector.broadcast %257 : f32 to vector<8x128xf32>
    %1468 = arith.mulf %1448, %1467 : vector<8x128xf32>
    %1469 = arith.addf %1460, %1468 : vector<8x128xf32>
    %1470 = vector.broadcast %311 : f32 to vector<8x128xf32>
    %1471 = arith.mulf %1448, %1470 : vector<8x128xf32>
    %1472 = arith.addf %1463, %1471 : vector<8x128xf32>
    %1473 = vector.broadcast %204 : f32 to vector<8x128xf32>
    %1474 = arith.mulf %1454, %1473 : vector<8x128xf32>
    %1475 = arith.addf %1466, %1474 : vector<8x128xf32>
    %1476 = vector.broadcast %258 : f32 to vector<8x128xf32>
    %1477 = arith.mulf %1454, %1476 : vector<8x128xf32>
    %1478 = arith.addf %1469, %1477 : vector<8x128xf32>
    %1479 = vector.broadcast %312 : f32 to vector<8x128xf32>
    %1480 = arith.mulf %1454, %1479 : vector<8x128xf32>
    %1481 = arith.addf %1472, %1480 : vector<8x128xf32>
    %c1_320 = arith.constant 1 : index
    %c3_321 = arith.constant 3 : index
    %c0_322 = arith.constant 0 : index
    %1482 = vector.load %arg14[%c1_320, %c3_321, %c0_322] : memref<3x16x128xf32, #tpu.memory_space<vmem>>, vector<1x8x128xf32>
    %1483 = vector.shape_cast %1482 : vector<1x8x128xf32> to vector<8x128xf32>
    %1484 = vector.extract_strided_slice %1483 {offsets = [0, 127], sizes = [8, 1], strides = [1, 1]} : vector<8x128xf32> to vector<8x1xf32>
    %1485 = vector.extract_strided_slice %1483 {offsets = [0, 0], sizes = [8, 127], strides = [1, 1]} : vector<8x128xf32> to vector<8x127xf32>
    %1486 = tpu.concatenate %1484, %1485 in 1 : vector<8x1xf32>, vector<8x127xf32> -> vector<8x128xf32>
    %1487 = vector.extract_strided_slice %1483 {offsets = [0, 1], sizes = [8, 127], strides = [1, 1]} : vector<8x128xf32> to vector<8x127xf32>
    %1488 = vector.extract_strided_slice %1483 {offsets = [0, 0], sizes = [8, 1], strides = [1, 1]} : vector<8x128xf32> to vector<8x1xf32>
    %1489 = tpu.concatenate %1487, %1488 in 1 : vector<8x127xf32>, vector<8x1xf32> -> vector<8x128xf32>
    %1490 = vector.broadcast %205 : f32 to vector<8x128xf32>
    %1491 = arith.mulf %1486, %1490 : vector<8x128xf32>
    %1492 = arith.addf %1475, %1491 : vector<8x128xf32>
    %1493 = vector.broadcast %259 : f32 to vector<8x128xf32>
    %1494 = arith.mulf %1486, %1493 : vector<8x128xf32>
    %1495 = arith.addf %1478, %1494 : vector<8x128xf32>
    %1496 = vector.broadcast %313 : f32 to vector<8x128xf32>
    %1497 = arith.mulf %1486, %1496 : vector<8x128xf32>
    %1498 = arith.addf %1481, %1497 : vector<8x128xf32>
    %1499 = vector.broadcast %206 : f32 to vector<8x128xf32>
    %1500 = arith.mulf %1483, %1499 : vector<8x128xf32>
    %1501 = arith.addf %1492, %1500 : vector<8x128xf32>
    %1502 = vector.broadcast %260 : f32 to vector<8x128xf32>
    %1503 = arith.mulf %1483, %1502 : vector<8x128xf32>
    %1504 = arith.addf %1495, %1503 : vector<8x128xf32>
    %1505 = vector.broadcast %314 : f32 to vector<8x128xf32>
    %1506 = arith.mulf %1483, %1505 : vector<8x128xf32>
    %1507 = arith.addf %1498, %1506 : vector<8x128xf32>
    %1508 = vector.broadcast %207 : f32 to vector<8x128xf32>
    %1509 = arith.mulf %1489, %1508 : vector<8x128xf32>
    %1510 = arith.addf %1501, %1509 : vector<8x128xf32>
    %1511 = vector.broadcast %261 : f32 to vector<8x128xf32>
    %1512 = arith.mulf %1489, %1511 : vector<8x128xf32>
    %1513 = arith.addf %1504, %1512 : vector<8x128xf32>
    %1514 = vector.broadcast %315 : f32 to vector<8x128xf32>
    %1515 = arith.mulf %1489, %1514 : vector<8x128xf32>
    %1516 = arith.addf %1507, %1515 : vector<8x128xf32>
    %c1_323 = arith.constant 1 : index
    %c4_324 = arith.constant 4 : index
    %c0_325 = arith.constant 0 : index
    %1517 = vector.load %arg14[%c1_323, %c4_324, %c0_325] : memref<3x16x128xf32, #tpu.memory_space<vmem>>, vector<1x8x128xf32>
    %1518 = vector.shape_cast %1517 : vector<1x8x128xf32> to vector<8x128xf32>
    %1519 = vector.extract_strided_slice %1518 {offsets = [0, 127], sizes = [8, 1], strides = [1, 1]} : vector<8x128xf32> to vector<8x1xf32>
    %1520 = vector.extract_strided_slice %1518 {offsets = [0, 0], sizes = [8, 127], strides = [1, 1]} : vector<8x128xf32> to vector<8x127xf32>
    %1521 = tpu.concatenate %1519, %1520 in 1 : vector<8x1xf32>, vector<8x127xf32> -> vector<8x128xf32>
    %1522 = vector.extract_strided_slice %1518 {offsets = [0, 1], sizes = [8, 127], strides = [1, 1]} : vector<8x128xf32> to vector<8x127xf32>
    %1523 = vector.extract_strided_slice %1518 {offsets = [0, 0], sizes = [8, 1], strides = [1, 1]} : vector<8x128xf32> to vector<8x1xf32>
    %1524 = tpu.concatenate %1522, %1523 in 1 : vector<8x127xf32>, vector<8x1xf32> -> vector<8x128xf32>
    %1525 = vector.broadcast %208 : f32 to vector<8x128xf32>
    %1526 = arith.mulf %1521, %1525 : vector<8x128xf32>
    %1527 = arith.addf %1510, %1526 : vector<8x128xf32>
    %1528 = vector.broadcast %262 : f32 to vector<8x128xf32>
    %1529 = arith.mulf %1521, %1528 : vector<8x128xf32>
    %1530 = arith.addf %1513, %1529 : vector<8x128xf32>
    %1531 = vector.broadcast %316 : f32 to vector<8x128xf32>
    %1532 = arith.mulf %1521, %1531 : vector<8x128xf32>
    %1533 = arith.addf %1516, %1532 : vector<8x128xf32>
    %1534 = vector.broadcast %209 : f32 to vector<8x128xf32>
    %1535 = arith.mulf %1518, %1534 : vector<8x128xf32>
    %1536 = arith.addf %1527, %1535 : vector<8x128xf32>
    %1537 = vector.broadcast %263 : f32 to vector<8x128xf32>
    %1538 = arith.mulf %1518, %1537 : vector<8x128xf32>
    %1539 = arith.addf %1530, %1538 : vector<8x128xf32>
    %1540 = vector.broadcast %317 : f32 to vector<8x128xf32>
    %1541 = arith.mulf %1518, %1540 : vector<8x128xf32>
    %1542 = arith.addf %1533, %1541 : vector<8x128xf32>
    %1543 = vector.broadcast %210 : f32 to vector<8x128xf32>
    %1544 = arith.mulf %1524, %1543 : vector<8x128xf32>
    %1545 = arith.addf %1536, %1544 : vector<8x128xf32>
    %1546 = vector.broadcast %264 : f32 to vector<8x128xf32>
    %1547 = arith.mulf %1524, %1546 : vector<8x128xf32>
    %1548 = arith.addf %1539, %1547 : vector<8x128xf32>
    %1549 = vector.broadcast %318 : f32 to vector<8x128xf32>
    %1550 = arith.mulf %1524, %1549 : vector<8x128xf32>
    %1551 = arith.addf %1542, %1550 : vector<8x128xf32>
    %c1_326 = arith.constant 1 : index
    %c5_327 = arith.constant 5 : index
    %c0_328 = arith.constant 0 : index
    %1552 = vector.load %arg14[%c1_326, %c5_327, %c0_328] : memref<3x16x128xf32, #tpu.memory_space<vmem>>, vector<1x8x128xf32>
    %1553 = vector.shape_cast %1552 : vector<1x8x128xf32> to vector<8x128xf32>
    %1554 = vector.extract_strided_slice %1553 {offsets = [0, 127], sizes = [8, 1], strides = [1, 1]} : vector<8x128xf32> to vector<8x1xf32>
    %1555 = vector.extract_strided_slice %1553 {offsets = [0, 0], sizes = [8, 127], strides = [1, 1]} : vector<8x128xf32> to vector<8x127xf32>
    %1556 = tpu.concatenate %1554, %1555 in 1 : vector<8x1xf32>, vector<8x127xf32> -> vector<8x128xf32>
    %1557 = vector.extract_strided_slice %1553 {offsets = [0, 1], sizes = [8, 127], strides = [1, 1]} : vector<8x128xf32> to vector<8x127xf32>
    %1558 = vector.extract_strided_slice %1553 {offsets = [0, 0], sizes = [8, 1], strides = [1, 1]} : vector<8x128xf32> to vector<8x1xf32>
    %1559 = tpu.concatenate %1557, %1558 in 1 : vector<8x127xf32>, vector<8x1xf32> -> vector<8x128xf32>
    %1560 = vector.broadcast %211 : f32 to vector<8x128xf32>
    %1561 = arith.mulf %1556, %1560 : vector<8x128xf32>
    %1562 = arith.addf %1545, %1561 : vector<8x128xf32>
    %1563 = vector.broadcast %265 : f32 to vector<8x128xf32>
    %1564 = arith.mulf %1556, %1563 : vector<8x128xf32>
    %1565 = arith.addf %1548, %1564 : vector<8x128xf32>
    %1566 = vector.broadcast %319 : f32 to vector<8x128xf32>
    %1567 = arith.mulf %1556, %1566 : vector<8x128xf32>
    %1568 = arith.addf %1551, %1567 : vector<8x128xf32>
    %1569 = vector.broadcast %212 : f32 to vector<8x128xf32>
    %1570 = arith.mulf %1553, %1569 : vector<8x128xf32>
    %1571 = arith.addf %1562, %1570 : vector<8x128xf32>
    %1572 = vector.broadcast %266 : f32 to vector<8x128xf32>
    %1573 = arith.mulf %1553, %1572 : vector<8x128xf32>
    %1574 = arith.addf %1565, %1573 : vector<8x128xf32>
    %1575 = vector.broadcast %320 : f32 to vector<8x128xf32>
    %1576 = arith.mulf %1553, %1575 : vector<8x128xf32>
    %1577 = arith.addf %1568, %1576 : vector<8x128xf32>
    %1578 = vector.broadcast %213 : f32 to vector<8x128xf32>
    %1579 = arith.mulf %1559, %1578 : vector<8x128xf32>
    %1580 = arith.addf %1571, %1579 : vector<8x128xf32>
    %1581 = vector.broadcast %267 : f32 to vector<8x128xf32>
    %1582 = arith.mulf %1559, %1581 : vector<8x128xf32>
    %1583 = arith.addf %1574, %1582 : vector<8x128xf32>
    %1584 = vector.broadcast %321 : f32 to vector<8x128xf32>
    %1585 = arith.mulf %1559, %1584 : vector<8x128xf32>
    %1586 = arith.addf %1577, %1585 : vector<8x128xf32>
    %c2_329 = arith.constant 2 : index
    %c3_330 = arith.constant 3 : index
    %c0_331 = arith.constant 0 : index
    %1587 = vector.load %arg14[%c2_329, %c3_330, %c0_331] : memref<3x16x128xf32, #tpu.memory_space<vmem>>, vector<1x8x128xf32>
    %1588 = vector.shape_cast %1587 : vector<1x8x128xf32> to vector<8x128xf32>
    %1589 = vector.extract_strided_slice %1588 {offsets = [0, 127], sizes = [8, 1], strides = [1, 1]} : vector<8x128xf32> to vector<8x1xf32>
    %1590 = vector.extract_strided_slice %1588 {offsets = [0, 0], sizes = [8, 127], strides = [1, 1]} : vector<8x128xf32> to vector<8x127xf32>
    %1591 = tpu.concatenate %1589, %1590 in 1 : vector<8x1xf32>, vector<8x127xf32> -> vector<8x128xf32>
    %1592 = vector.extract_strided_slice %1588 {offsets = [0, 1], sizes = [8, 127], strides = [1, 1]} : vector<8x128xf32> to vector<8x127xf32>
    %1593 = vector.extract_strided_slice %1588 {offsets = [0, 0], sizes = [8, 1], strides = [1, 1]} : vector<8x128xf32> to vector<8x1xf32>
    %1594 = tpu.concatenate %1592, %1593 in 1 : vector<8x127xf32>, vector<8x1xf32> -> vector<8x128xf32>
    %1595 = vector.broadcast %214 : f32 to vector<8x128xf32>
    %1596 = arith.mulf %1591, %1595 : vector<8x128xf32>
    %1597 = arith.addf %1580, %1596 : vector<8x128xf32>
    %1598 = vector.broadcast %268 : f32 to vector<8x128xf32>
    %1599 = arith.mulf %1591, %1598 : vector<8x128xf32>
    %1600 = arith.addf %1583, %1599 : vector<8x128xf32>
    %1601 = vector.broadcast %322 : f32 to vector<8x128xf32>
    %1602 = arith.mulf %1591, %1601 : vector<8x128xf32>
    %1603 = arith.addf %1586, %1602 : vector<8x128xf32>
    %1604 = vector.broadcast %215 : f32 to vector<8x128xf32>
    %1605 = arith.mulf %1588, %1604 : vector<8x128xf32>
    %1606 = arith.addf %1597, %1605 : vector<8x128xf32>
    %1607 = vector.broadcast %269 : f32 to vector<8x128xf32>
    %1608 = arith.mulf %1588, %1607 : vector<8x128xf32>
    %1609 = arith.addf %1600, %1608 : vector<8x128xf32>
    %1610 = vector.broadcast %323 : f32 to vector<8x128xf32>
    %1611 = arith.mulf %1588, %1610 : vector<8x128xf32>
    %1612 = arith.addf %1603, %1611 : vector<8x128xf32>
    %1613 = vector.broadcast %216 : f32 to vector<8x128xf32>
    %1614 = arith.mulf %1594, %1613 : vector<8x128xf32>
    %1615 = arith.addf %1606, %1614 : vector<8x128xf32>
    %1616 = vector.broadcast %270 : f32 to vector<8x128xf32>
    %1617 = arith.mulf %1594, %1616 : vector<8x128xf32>
    %1618 = arith.addf %1609, %1617 : vector<8x128xf32>
    %1619 = vector.broadcast %324 : f32 to vector<8x128xf32>
    %1620 = arith.mulf %1594, %1619 : vector<8x128xf32>
    %1621 = arith.addf %1612, %1620 : vector<8x128xf32>
    %c2_332 = arith.constant 2 : index
    %c4_333 = arith.constant 4 : index
    %c0_334 = arith.constant 0 : index
    %1622 = vector.load %arg14[%c2_332, %c4_333, %c0_334] : memref<3x16x128xf32, #tpu.memory_space<vmem>>, vector<1x8x128xf32>
    %1623 = vector.shape_cast %1622 : vector<1x8x128xf32> to vector<8x128xf32>
    %1624 = vector.extract_strided_slice %1623 {offsets = [0, 127], sizes = [8, 1], strides = [1, 1]} : vector<8x128xf32> to vector<8x1xf32>
    %1625 = vector.extract_strided_slice %1623 {offsets = [0, 0], sizes = [8, 127], strides = [1, 1]} : vector<8x128xf32> to vector<8x127xf32>
    %1626 = tpu.concatenate %1624, %1625 in 1 : vector<8x1xf32>, vector<8x127xf32> -> vector<8x128xf32>
    %1627 = vector.extract_strided_slice %1623 {offsets = [0, 1], sizes = [8, 127], strides = [1, 1]} : vector<8x128xf32> to vector<8x127xf32>
    %1628 = vector.extract_strided_slice %1623 {offsets = [0, 0], sizes = [8, 1], strides = [1, 1]} : vector<8x128xf32> to vector<8x1xf32>
    %1629 = tpu.concatenate %1627, %1628 in 1 : vector<8x127xf32>, vector<8x1xf32> -> vector<8x128xf32>
    %1630 = vector.broadcast %217 : f32 to vector<8x128xf32>
    %1631 = arith.mulf %1626, %1630 : vector<8x128xf32>
    %1632 = arith.addf %1615, %1631 : vector<8x128xf32>
    %1633 = vector.broadcast %271 : f32 to vector<8x128xf32>
    %1634 = arith.mulf %1626, %1633 : vector<8x128xf32>
    %1635 = arith.addf %1618, %1634 : vector<8x128xf32>
    %1636 = vector.broadcast %325 : f32 to vector<8x128xf32>
    %1637 = arith.mulf %1626, %1636 : vector<8x128xf32>
    %1638 = arith.addf %1621, %1637 : vector<8x128xf32>
    %1639 = vector.broadcast %218 : f32 to vector<8x128xf32>
    %1640 = arith.mulf %1623, %1639 : vector<8x128xf32>
    %1641 = arith.addf %1632, %1640 : vector<8x128xf32>
    %1642 = vector.broadcast %272 : f32 to vector<8x128xf32>
    %1643 = arith.mulf %1623, %1642 : vector<8x128xf32>
    %1644 = arith.addf %1635, %1643 : vector<8x128xf32>
    %1645 = vector.broadcast %326 : f32 to vector<8x128xf32>
    %1646 = arith.mulf %1623, %1645 : vector<8x128xf32>
    %1647 = arith.addf %1638, %1646 : vector<8x128xf32>
    %1648 = vector.broadcast %219 : f32 to vector<8x128xf32>
    %1649 = arith.mulf %1629, %1648 : vector<8x128xf32>
    %1650 = arith.addf %1641, %1649 : vector<8x128xf32>
    %1651 = vector.broadcast %273 : f32 to vector<8x128xf32>
    %1652 = arith.mulf %1629, %1651 : vector<8x128xf32>
    %1653 = arith.addf %1644, %1652 : vector<8x128xf32>
    %1654 = vector.broadcast %327 : f32 to vector<8x128xf32>
    %1655 = arith.mulf %1629, %1654 : vector<8x128xf32>
    %1656 = arith.addf %1647, %1655 : vector<8x128xf32>
    %c2_335 = arith.constant 2 : index
    %c5_336 = arith.constant 5 : index
    %c0_337 = arith.constant 0 : index
    %1657 = vector.load %arg14[%c2_335, %c5_336, %c0_337] : memref<3x16x128xf32, #tpu.memory_space<vmem>>, vector<1x8x128xf32>
    %1658 = vector.shape_cast %1657 : vector<1x8x128xf32> to vector<8x128xf32>
    %1659 = vector.extract_strided_slice %1658 {offsets = [0, 127], sizes = [8, 1], strides = [1, 1]} : vector<8x128xf32> to vector<8x1xf32>
    %1660 = vector.extract_strided_slice %1658 {offsets = [0, 0], sizes = [8, 127], strides = [1, 1]} : vector<8x128xf32> to vector<8x127xf32>
    %1661 = tpu.concatenate %1659, %1660 in 1 : vector<8x1xf32>, vector<8x127xf32> -> vector<8x128xf32>
    %1662 = vector.extract_strided_slice %1658 {offsets = [0, 1], sizes = [8, 127], strides = [1, 1]} : vector<8x128xf32> to vector<8x127xf32>
    %1663 = vector.extract_strided_slice %1658 {offsets = [0, 0], sizes = [8, 1], strides = [1, 1]} : vector<8x128xf32> to vector<8x1xf32>
    %1664 = tpu.concatenate %1662, %1663 in 1 : vector<8x127xf32>, vector<8x1xf32> -> vector<8x128xf32>
    %1665 = vector.broadcast %220 : f32 to vector<8x128xf32>
    %1666 = arith.mulf %1661, %1665 : vector<8x128xf32>
    %1667 = arith.addf %1650, %1666 : vector<8x128xf32>
    %1668 = vector.broadcast %274 : f32 to vector<8x128xf32>
    %1669 = arith.mulf %1661, %1668 : vector<8x128xf32>
    %1670 = arith.addf %1653, %1669 : vector<8x128xf32>
    %1671 = vector.broadcast %328 : f32 to vector<8x128xf32>
    %1672 = arith.mulf %1661, %1671 : vector<8x128xf32>
    %1673 = arith.addf %1656, %1672 : vector<8x128xf32>
    %1674 = vector.broadcast %221 : f32 to vector<8x128xf32>
    %1675 = arith.mulf %1658, %1674 : vector<8x128xf32>
    %1676 = arith.addf %1667, %1675 : vector<8x128xf32>
    %1677 = vector.broadcast %275 : f32 to vector<8x128xf32>
    %1678 = arith.mulf %1658, %1677 : vector<8x128xf32>
    %1679 = arith.addf %1670, %1678 : vector<8x128xf32>
    %1680 = vector.broadcast %329 : f32 to vector<8x128xf32>
    %1681 = arith.mulf %1658, %1680 : vector<8x128xf32>
    %1682 = arith.addf %1673, %1681 : vector<8x128xf32>
    %1683 = vector.broadcast %222 : f32 to vector<8x128xf32>
    %1684 = arith.mulf %1664, %1683 : vector<8x128xf32>
    %1685 = arith.addf %1676, %1684 : vector<8x128xf32>
    %1686 = vector.broadcast %276 : f32 to vector<8x128xf32>
    %1687 = arith.mulf %1664, %1686 : vector<8x128xf32>
    %1688 = arith.addf %1679, %1687 : vector<8x128xf32>
    %1689 = vector.broadcast %330 : f32 to vector<8x128xf32>
    %1690 = arith.mulf %1664, %1689 : vector<8x128xf32>
    %1691 = arith.addf %1682, %1690 : vector<8x128xf32>
    %1692 = vector.broadcast %355 : f32 to vector<8x128xf32>
    %1693 = arith.addf %1685, %1692 : vector<8x128xf32>
    %cst_338 = arith.constant 0.000000e+00 : f32
    %1694 = vector.broadcast %cst_338 : f32 to vector<8x128xf32>
    %1695 = arith.maximumf %1693, %1694 : vector<8x128xf32>
    %1696 = vector.broadcast %356 : f32 to vector<8x128xf32>
    %1697 = arith.addf %1688, %1696 : vector<8x128xf32>
    %cst_339 = arith.constant 0.000000e+00 : f32
    %1698 = vector.broadcast %cst_339 : f32 to vector<8x128xf32>
    %1699 = arith.maximumf %1697, %1698 : vector<8x128xf32>
    %1700 = vector.broadcast %357 : f32 to vector<8x128xf32>
    %1701 = arith.addf %1691, %1700 : vector<8x128xf32>
    %cst_340 = arith.constant 0.000000e+00 : f32
    %1702 = vector.broadcast %cst_340 : f32 to vector<8x128xf32>
    %1703 = arith.maximumf %1701, %1702 : vector<8x128xf32>
    %c0_341 = arith.constant 0 : index
    %c4_342 = arith.constant 4 : index
    %c0_343 = arith.constant 0 : index
    %1704 = vector.load %arg14[%c0_341, %c4_342, %c0_343] : memref<3x16x128xf32, #tpu.memory_space<vmem>>, vector<1x8x128xf32>
    %1705 = vector.shape_cast %1704 : vector<1x8x128xf32> to vector<8x128xf32>
    %c1_344 = arith.constant 1 : index
    %c4_345 = arith.constant 4 : index
    %c0_346 = arith.constant 0 : index
    %1706 = vector.load %arg14[%c1_344, %c4_345, %c0_346] : memref<3x16x128xf32, #tpu.memory_space<vmem>>, vector<1x8x128xf32>
    %1707 = vector.shape_cast %1706 : vector<1x8x128xf32> to vector<8x128xf32>
    %c2_347 = arith.constant 2 : index
    %c4_348 = arith.constant 4 : index
    %c0_349 = arith.constant 0 : index
    %1708 = vector.load %arg14[%c2_347, %c4_348, %c0_349] : memref<3x16x128xf32, #tpu.memory_space<vmem>>, vector<1x8x128xf32>
    %1709 = vector.shape_cast %1708 : vector<1x8x128xf32> to vector<8x128xf32>
    %1710 = vector.broadcast %331 : f32 to vector<8x128xf32>
    %1711 = arith.mulf %1705, %1710 : vector<8x128xf32>
    %1712 = vector.broadcast %332 : f32 to vector<8x128xf32>
    %1713 = arith.mulf %1707, %1712 : vector<8x128xf32>
    %1714 = arith.addf %1711, %1713 : vector<8x128xf32>
    %1715 = vector.broadcast %333 : f32 to vector<8x128xf32>
    %1716 = arith.mulf %1709, %1715 : vector<8x128xf32>
    %1717 = arith.addf %1714, %1716 : vector<8x128xf32>
    %1718 = vector.broadcast %334 : f32 to vector<8x128xf32>
    %1719 = arith.mulf %1695, %1718 : vector<8x128xf32>
    %1720 = arith.addf %1717, %1719 : vector<8x128xf32>
    %1721 = vector.broadcast %335 : f32 to vector<8x128xf32>
    %1722 = arith.mulf %1699, %1721 : vector<8x128xf32>
    %1723 = arith.addf %1720, %1722 : vector<8x128xf32>
    %1724 = vector.broadcast %336 : f32 to vector<8x128xf32>
    %1725 = arith.mulf %1703, %1724 : vector<8x128xf32>
    %1726 = arith.addf %1723, %1725 : vector<8x128xf32>
    %1727 = vector.broadcast %358 : f32 to vector<8x128xf32>
    %1728 = arith.addf %1726, %1727 : vector<8x128xf32>
    %cst_350 = arith.constant 0.000000e+00 : f32
    %1729 = vector.broadcast %cst_350 : f32 to vector<8x128xf32>
    %1730 = arith.maximumf %1728, %1729 : vector<8x128xf32>
    %c0_351 = arith.constant 0 : index
    %c4_352 = arith.constant 4 : index
    %c0_353 = arith.constant 0 : index
    %1731 = vector.load %arg12[%c0_351, %c4_352, %c0_353] : memref<3x16x128xf32, #tpu.memory_space<vmem>>, vector<1x8x128xf32>
    %1732 = vector.shape_cast %1731 : vector<1x8x128xf32> to vector<8x128xf32>
    %1733 = arith.mulf %1730, %1732 : vector<8x128xf32>
    %1734 = arith.subf %1733, %1730 : vector<8x128xf32>
    %cst_354 = arith.constant 1.000000e+00 : f32
    %1735 = vector.broadcast %cst_354 : f32 to vector<8x128xf32>
    %1736 = arith.addf %1734, %1735 : vector<8x128xf32>
    %c0_355 = arith.constant 0 : index
    %c0_356 = arith.constant 0 : index
    %c0_357 = arith.constant 0 : index
    %c0_358 = arith.constant 0 : index
    %1737 = vector.load %arg11[%c0_355, %c0_356, %c0_357, %c0_358] : memref<1x3x8x128xf32, #tpu.memory_space<vmem>>, vector<1x1x8x128xf32>
    %1738 = vector.shape_cast %1737 : vector<1x1x8x128xf32> to vector<8x128xf32>
    %1739 = vector.shape_cast %1736 : vector<8x128xf32> to vector<1x1x8x128xf32>
    tpu.vector_store %arg11[%c0_355, %c0_356, %c0_357, %c0_358], %1739 {strides = array<i32>} : memref<1x3x8x128xf32, #tpu.memory_space<vmem>>, vector<1x1x8x128xf32>,
    %1740 = vector.broadcast %337 : f32 to vector<8x128xf32>
    %1741 = arith.mulf %1705, %1740 : vector<8x128xf32>
    %1742 = vector.broadcast %338 : f32 to vector<8x128xf32>
    %1743 = arith.mulf %1707, %1742 : vector<8x128xf32>
    %1744 = arith.addf %1741, %1743 : vector<8x128xf32>
    %1745 = vector.broadcast %339 : f32 to vector<8x128xf32>
    %1746 = arith.mulf %1709, %1745 : vector<8x128xf32>
    %1747 = arith.addf %1744, %1746 : vector<8x128xf32>
    %1748 = vector.broadcast %340 : f32 to vector<8x128xf32>
    %1749 = arith.mulf %1695, %1748 : vector<8x128xf32>
    %1750 = arith.addf %1747, %1749 : vector<8x128xf32>
    %1751 = vector.broadcast %341 : f32 to vector<8x128xf32>
    %1752 = arith.mulf %1699, %1751 : vector<8x128xf32>
    %1753 = arith.addf %1750, %1752 : vector<8x128xf32>
    %1754 = vector.broadcast %342 : f32 to vector<8x128xf32>
    %1755 = arith.mulf %1703, %1754 : vector<8x128xf32>
    %1756 = arith.addf %1753, %1755 : vector<8x128xf32>
    %1757 = vector.broadcast %359 : f32 to vector<8x128xf32>
    %1758 = arith.addf %1756, %1757 : vector<8x128xf32>
    %cst_359 = arith.constant 0.000000e+00 : f32
    %1759 = vector.broadcast %cst_359 : f32 to vector<8x128xf32>
    %1760 = arith.maximumf %1758, %1759 : vector<8x128xf32>
    %c1_360 = arith.constant 1 : index
    %c4_361 = arith.constant 4 : index
    %c0_362 = arith.constant 0 : index
    %1761 = vector.load %arg12[%c1_360, %c4_361, %c0_362] : memref<3x16x128xf32, #tpu.memory_space<vmem>>, vector<1x8x128xf32>
    %1762 = vector.shape_cast %1761 : vector<1x8x128xf32> to vector<8x128xf32>
    %1763 = arith.mulf %1760, %1762 : vector<8x128xf32>
    %1764 = arith.subf %1763, %1760 : vector<8x128xf32>
    %cst_363 = arith.constant 1.000000e+00 : f32
    %1765 = vector.broadcast %cst_363 : f32 to vector<8x128xf32>
    %1766 = arith.addf %1764, %1765 : vector<8x128xf32>
    %c0_364 = arith.constant 0 : index
    %c1_365 = arith.constant 1 : index
    %c0_366 = arith.constant 0 : index
    %c0_367 = arith.constant 0 : index
    %1767 = vector.load %arg11[%c0_364, %c1_365, %c0_366, %c0_367] : memref<1x3x8x128xf32, #tpu.memory_space<vmem>>, vector<1x1x8x128xf32>
    %1768 = vector.shape_cast %1767 : vector<1x1x8x128xf32> to vector<8x128xf32>
    %1769 = vector.shape_cast %1766 : vector<8x128xf32> to vector<1x1x8x128xf32>
    tpu.vector_store %arg11[%c0_364, %c1_365, %c0_366, %c0_367], %1769 {strides = array<i32>} : memref<1x3x8x128xf32, #tpu.memory_space<vmem>>, vector<1x1x8x128xf32>,
    %1770 = vector.broadcast %343 : f32 to vector<8x128xf32>
    %1771 = arith.mulf %1705, %1770 : vector<8x128xf32>
    %1772 = vector.broadcast %344 : f32 to vector<8x128xf32>
    %1773 = arith.mulf %1707, %1772 : vector<8x128xf32>
    %1774 = arith.addf %1771, %1773 : vector<8x128xf32>
    %1775 = vector.broadcast %345 : f32 to vector<8x128xf32>
    %1776 = arith.mulf %1709, %1775 : vector<8x128xf32>
    %1777 = arith.addf %1774, %1776 : vector<8x128xf32>
    %1778 = vector.broadcast %346 : f32 to vector<8x128xf32>
    %1779 = arith.mulf %1695, %1778 : vector<8x128xf32>
    %1780 = arith.addf %1777, %1779 : vector<8x128xf32>
    %1781 = vector.broadcast %347 : f32 to vector<8x128xf32>
    %1782 = arith.mulf %1699, %1781 : vector<8x128xf32>
    %1783 = arith.addf %1780, %1782 : vector<8x128xf32>
    %1784 = vector.broadcast %348 : f32 to vector<8x128xf32>
    %1785 = arith.mulf %1703, %1784 : vector<8x128xf32>
    %1786 = arith.addf %1783, %1785 : vector<8x128xf32>
    %1787 = vector.broadcast %360 : f32 to vector<8x128xf32>
    %1788 = arith.addf %1786, %1787 : vector<8x128xf32>
    %cst_368 = arith.constant 0.000000e+00 : f32
    %1789 = vector.broadcast %cst_368 : f32 to vector<8x128xf32>
    %1790 = arith.maximumf %1788, %1789 : vector<8x128xf32>
    %c2_369 = arith.constant 2 : index
    %c4_370 = arith.constant 4 : index
    %c0_371 = arith.constant 0 : index
    %1791 = vector.load %arg12[%c2_369, %c4_370, %c0_371] : memref<3x16x128xf32, #tpu.memory_space<vmem>>, vector<1x8x128xf32>
    %1792 = vector.shape_cast %1791 : vector<1x8x128xf32> to vector<8x128xf32>
    %1793 = arith.mulf %1790, %1792 : vector<8x128xf32>
    %1794 = arith.subf %1793, %1790 : vector<8x128xf32>
    %cst_372 = arith.constant 1.000000e+00 : f32
    %1795 = vector.broadcast %cst_372 : f32 to vector<8x128xf32>
    %1796 = arith.addf %1794, %1795 : vector<8x128xf32>
    %c0_373 = arith.constant 0 : index
    %c2_374 = arith.constant 2 : index
    %c0_375 = arith.constant 0 : index
    %c0_376 = arith.constant 0 : index
    %1797 = vector.load %arg11[%c0_373, %c2_374, %c0_375, %c0_376] : memref<1x3x8x128xf32, #tpu.memory_space<vmem>>, vector<1x1x8x128xf32>
    %1798 = vector.shape_cast %1797 : vector<1x1x8x128xf32> to vector<8x128xf32>
    %1799 = vector.shape_cast %1796 : vector<8x128xf32> to vector<1x1x8x128xf32>
    tpu.vector_store %arg11[%c0_373, %c2_374, %c0_375, %c0_376], %1799 {strides = array<i32>} : memref<1x3x8x128xf32, #tpu.memory_space<vmem>>, vector<1x1x8x128xf32>,
    return
  }
  func.func @transform_1(%arg0: i32, %arg1: i32) -> i32 {
    %c0_i32 = arith.constant 0 : i32
    %c0_i32_0 = arith.constant 0 : i32
    return %c0_i32 : i32
  }
  func.func @transform_2(%arg0: i32, %arg1: i32) -> i32 {
    %c0_i32 = arith.constant 0 : i32
    %c0_i32_0 = arith.constant 0 : i32
    return %c0_i32 : i32
  }
  func.func @transform_3(%arg0: i32, %arg1: i32) -> i32 {
    %c0_i32 = arith.constant 0 : i32
    %c0_i32_0 = arith.constant 0 : i32
    return %c0_i32 : i32
  }
  func.func @transform_4(%arg0: i32, %arg1: i32) -> i32 {
    %c0_i32 = arith.constant 0 : i32
    %c0_i32_0 = arith.constant 0 : i32
    return %c0_i32 : i32
  }
  func.func @transform_5(%arg0: i32, %arg1: i32) -> i32 {
    %c0_i32 = arith.constant 0 : i32
    %c0_i32_0 = arith.constant 0 : i32
    return %c0_i32 : i32
  }
  func.func @transform_6(%arg0: i32, %arg1: i32) -> i32 {
    %c0_i32 = arith.constant 0 : i32
    %c0_i32_0 = arith.constant 0 : i32
    return %c0_i32 : i32
  }
  func.func @transform_7(%arg0: i32, %arg1: i32) -> i32 {
    %c0_i32 = arith.constant 0 : i32
    %c0_i32_0 = arith.constant 0 : i32
    return %c0_i32 : i32
  }
  func.func @transform_8(%arg0: i32, %arg1: i32) -> i32 {
    %c0_i32 = arith.constant 0 : i32
    %c0_i32_0 = arith.constant 0 : i32
    return %c0_i32 : i32
  }
  func.func @transform_9(%arg0: i32, %arg1: i32) -> (i32, i32, i32, i32) {
    %c0_i32 = arith.constant 0 : i32
    %c0_i32_0 = arith.constant 0 : i32
    %c0_i32_1 = arith.constant 0 : i32
    return %arg0, %c0_i32, %arg1, %c0_i32_0 : i32, i32, i32, i32
  }
}

</mosaic_0001>

<bundles_post_ra>
// kernel: xl_tiny_aod_net.1
= control target key start
LH: loop header
LB: loop body
LE: loop exit
PB: predicated region body
PF: predicated region fallthrough
CT: control target
= control target key end

     0   :  { %s6472_s0 = inlined_call_operand.vmem [shape: f32[2,3,24,128], index: 0, kind: input, shape index: {}]   ;;  %s6473_s1 = inlined_call_operand.vmem [shape: f32[81], index: 1, kind: input, shape index: {}]   ;;  %s6474_s2 = inlined_call_operand.vmem [shape: f32[3], index: 2, kind: input, shape index: {}]   ;;  %s6475_s3 = inlined_call_operand.vmem [shape: f32[81], index: 3, kind: input, shape index: {}]   ;;  %s6476_s4 = inlined_call_operand.vmem [shape: f32[3], index: 4, kind: input, shape index: {}]   ;;  %s6477_s5 = inlined_call_operand.vmem [shape: f32[162], index: 5, kind: input, shape index: {}]   ;;  %s6478_s6 = inlined_call_operand.vmem [shape: f32[3], index: 6, kind: input, shape index: {}]   ;;  %s6479_s7 = inlined_call_operand.vmem [shape: f32[18], index: 7, kind: input, shape index: {}]   ;;  %s6480_s8 = inlined_call_operand.vmem [shape: f32[3], index: 8, kind: input, shape index: {}]   ;;  %s6481_s9 = inlined_call_operand.hbm [shape: f32[2,3,16,128], index: 9, kind: output, shape index: {}]  }
   0x1   :  { %6661 = sst [smem:[#allocation97_spill]] %s6472_s0 }
   0x2   :  { %6662 = sst [smem:[#allocation98_spill]] %s6473_s1 }
   0x3   :  { %6663 = sst [smem:[#allocation99_spill]] %s6474_s2 }
   0x4   :  { %6664 = sst [smem:[#allocation100_spill]] %s6475_s3 }
   0x5   :  { %6665 = sst [smem:[#allocation101_spill]] %s6476_s4 }
   0x6   :  { %6666 = sst [smem:[#allocation102_spill]] %s6477_s5 }
   0x7   :  { %6667 = sst [smem:[#allocation103_spill]] %s6478_s6 }
   0x8   :  { %6668 = sst [smem:[#allocation104_spill]] %s6479_s7 }
   0x9   :  { %6669 = sst [smem:[#allocation105_spill]] %s6480_s8 }
   0xa   :  { %6670 = sst [smem:[#allocation106_spill]] %s6481_s9 }
   0xb   :  { %14 = vsyncpa [#allocation8], 0 }
   0xc   :  { %15 = vsyncpa [#allocation10], 0 }
   0xd   :  { %16 = vsyncpa [#allocation13], 0 }
   0xe   :  { %17 = vsyncpa [#allocation16], 0 }
   0xf   :  { %18 = vsyncpa [#allocation19], 0 }
  0x10   :  { %19 = vsyncpa [#allocation7], 0 }
  0x11   :  { %21 = vsyncpa [#allocation7 + $0x1], 0  ;;  %s3729_s30 = smov 0   ;;  %s3731_s10 = smov 0  }
  0x12   :  { %s3733_s11 = smov 0   ;;  %s3735_s12 = smov 0  }
  0x13   :  { %s3737_s13 = smov 0   ;;  %s3739_s14 = smov 0  }
  0x14   :  { %s3741_s15 = smov 0   ;;  %s3743_s16 = smov 0  }
  0x15 LB: > { %6671 = sst [smem:[#allocation29_spill]] %s3635_s30  ;;  %s2884_s17 = sadd.s32 4294967295, %s3663_s16   ;;  %s3663_s16 = sphi %s3743_s16, %s27_s16   ;;  %s3659_s15 = sphi %s3741_s15, %s7184_s15   ;;  %s3655_s14 = sphi %s3739_s14, %s7183_s14   ;;  %s3651_s13 = sphi %s3737_s13, %s7182_s13   ;;  %s3647_s12 = sphi %s3735_s12, %s7181_s12   ;;  %s3643_s11 = sphi %s3733_s11, %s7180_s11   ;;  %s3639_s10 = sphi %s3731_s10, %s7179_s10   ;;  %s3635_s30 = sphi %s3729_s30, %s7178_s30  }
  0x16   : > { %6672 = sst [smem:[#allocation30_spill]] %s3639_s10  ;;  %s2885_s18 = sadd.s32 4294967294, %s3663_s16  }
  0x17   : > { %6673 = sst [smem:[#allocation31_spill]] %s3643_s11  ;;  %s36_s19 = sadd.s32 1, %s3655_s14 }
  0x18   : > { %6674 = sst [smem:[#allocation32_spill]] %s3647_s12  ;;  %s39_s20 = sadd.s32 1, %s3659_s15 }
  0x19   : > { %6675 = sst [smem:[#allocation33_spill]] %s3651_s13  ;;  %p37_p0 = scmp.ge.s32.totalorder %s36_s19, 2 }
  0x1a   : > { %6676 = sst [smem:[#allocation34_spill]] %s3655_s14  ;;  %s216_s21 = sadd.s32 1, %s3643_s11 }
  0x1b   : > { %6677 = sst [smem:[#allocation35_spill]] %s3659_s15  ;;  %p226_p1 = scmp.ne.s32.totalorder %s3643_s11, %s3639_s10 }
  0x1c   : > { %6678 = sst [smem:[#allocation36_spill]] %s3663_s16  ;;  %p227_p2 = scmp.eq.s32.totalorder %s2884_s17, 3 }
  0x1d   : > { %s7186_s19 = smov (%p37_p0, %s36_s19), 0  ;;  %s7188_s20 = smov (!%p37_p0, %s39_s20), %s3659_s15 }
  0x1e   : > { %6679 = sst [smem:[#allocation37_spill]] %s7186_s19  ;;  %s212_s22 = ssub.s32 %s3655_s14, %s7186_s19 }
  0x1f   : > { %p3781_p3 = por %p227_p2, %p226_p1  ;;  %p41_p4 = scmp.ge.s32.totalorder %s7188_s20, 2 }
  0x20   : > { %p232_p5 = scmp.ne.s32.totalorder %s3639_s10, %s3635_s30  ;;  %p233_p6 = scmp.eq.s32.totalorder %s2885_s18, 3 }
  0x21   : > { %s6680_s23 = scalar_select %p3781_p3, 1, 0 }
  0x22   : > { %p2886_p7 = scmp.ge.s32.totalorder %s3663_s16, 1  ;;  %s7190_s20 = smov (%p41_p4, %s7188_s20), 0 }
  0x23   : > { %6681 = sst [smem:[#allocation38_spill]] %s6680_s23  ;;  %p3790_p8 = por %p233_p6, %p232_p5 }
  0x24   : > { %6682 = sst [smem:[#allocation39_spill]] %s7190_s20  ;;  %p240_p9 = scmp.lt.s32.totalorder %s3663_s16, 5 }
  0x25   : > { %s6683_s24 = scalar_select %p3790_p8, 1, 0 }
  0x26   : > { %s211_s25 = ssub.s32 %s3659_s15, %s7190_s20  ;;  %p3797_p10 = pnand %p2886_p7, %p240_p9 }
  0x27   : > { %6684 = sst [smem:[#allocation40_spill]] %s6683_s24  ;;  %s213_s26 = sor.u32 %s212_s22, %s211_s25 }
  0x28   : > { %s6685_s27 = scalar_select %p3797_p10, 1, 0 }
  0x29   : > { %p214_p11 = scmp.eq.s32.totalorder %s213_s26, 0  ;;  %p3801_p12 = scmp.eq.s32.totalorder %s2884_s17, 0 }
  0x2a   : > { %p3293_p13 = pneg %p3797_p10  ;;  %s6687_s2 = sld [smem:[#allocation99_spill]] }
  0x2b   : > { %s6686_s28 = scalar_select %p3801_p12, 1, 0 }
  0x2c   : > { %s3811_s14 = scalar_select %p214_p11, %s3643_s11, %s216_s21  }
  0x2d   : > { %p3815_p0 = pnand %p3801_p12, %p3293_p13  ;;  %s6690_s4 = sld [smem:[#allocation101_spill]] }
  0x2e   : > { %6688 = sst [smem:[#allocation41_spill]] %s3811_s14 }
  0x2f   : > { %p3824_p2 = pneg %p3815_p0 }
  0x30   : > { %s264_s19 = sshll.u32 %s6687_s2, 4  ;;  %s265_s19 = int_to_ptr.vmem [resolvable:$true] %s264_s19 }
  0x31   : > { %s3429_s20 = scalar_lea.vmem %s265_s19, 16  ;;  %p3437_p6 = scmp.lt.s32.totalorder %s265_s19, %s265_s19 }
  0x32   : > { %p3430_p1 = scmp.ne.s32.totalorder %s265_s19, %s3429_s20  ;;  %p3438_p7 = scmp.lt.s32.totalorder %s3429_s20, %s3429_s20 }
  0x33   : > { %s286_s26 = sshll.u32 %s6690_s4, 4  ;;  %s287_s26 = int_to_ptr.vmem [resolvable:$true] %s286_s26 }
  0x34   : > { %p3432_p4 = pnand %p3824_p2, %p3430_p1  ;;  %p3439_p9 = por %p3438_p7, %p3437_p6 }
  0x36   : > { %p3433_p5 = pneg %p3432_p4 }
  0x38   : > { %p3440_p11 = pnand %p3439_p9, %p3433_p5 }
  0x3a   : > { %3443 = shalt.err (!%p3440_p11)
}
  0x3b   : > { %s3665_s21 = smov [#allocation9]   ;;  %s6692_s6 = sld [smem:[#allocation103_spill]] }
  0x3c   : > { %3299 = dma.vmem_to_smem (!%p3815_p0), %s265_s19, 16, %s3665_s21, [#allocation10]  }
  0x3d   : > { %s3444_s2 = scalar_lea.vmem %s287_s26, 16  ;;  %p3452_p4 = scmp.lt.s32.totalorder %s287_s26, %s287_s26 }
  0x3e   : > { %p3445_p13 = scmp.ne.s32.totalorder %s287_s26, %s3444_s2  ;;  %p3453_p3 = scmp.lt.s32.totalorder %s3444_s2, %s3444_s2 }
  0x40   : > { %p3447_p8 = pnand %p3445_p13, %p3824_p2  ;;  %p3454_p12 = por %p3453_p3, %p3452_p4 }
  0x41   : > { %s308_s25 = sshll.u32 %s6692_s6, 4  ;;  %s309_s25 = int_to_ptr.vmem [resolvable:$true] %s308_s25 }
  0x42   : > { %p3448_p1 = pneg %p3447_p8 }
  0x44   : > { %p3455_p6 = pnand %p3454_p12, %p3448_p1 }
  0x46   : > { %3458 = shalt.err (!%p3455_p6)
}
  0x47   : > { %s3666_s20 = smov [#allocation12]   ;;  %s3459_s19 = scalar_lea.vmem %s309_s25, 16 }
  0x48   : > { %3305 = dma.vmem_to_smem (!%p3815_p0), %s287_s26, 16, %s3666_s20, [#allocation13]  }
  0x49   : > { %p3460_p5 = scmp.ne.s32.totalorder %s309_s25, %s3459_s19  ;;  %p3467_p11 = scmp.lt.s32.totalorder %s309_s25, %s309_s25 }
  0x4a   : > { %p3468_p10 = scmp.lt.s32.totalorder %s3459_s19, %s3459_s19 }
  0x4b   : > { %p3462_p7 = pnand %p3460_p5, %p3824_p2 }
  0x4c   : > { %p3469_p13 = por %p3468_p10, %p3467_p11 }
  0x4d   : > { %p3463_p9 = pneg %p3462_p7 }
  0x4f   : > { %p3470_p8 = pnand %p3469_p13, %p3463_p9 }
  0x51   : > { %3473 = shalt.err (!%p3470_p8)
}
  0x52   : > { %s3667_s2 = smov [#allocation15]   ;;  %s6693_s1 = sld [smem:[#allocation98_spill]] }
  0x53   : > { %3311 = dma.vmem_to_smem (!%p3815_p0), %s309_s25, 16, %s3667_s2, [#allocation16]  }
  0x54   : > { %s6694_s3 = sld [smem:[#allocation100_spill]] }
  0x58   : > { %s253_s26 = sshll.u32 %s6693_s1, 4  ;;  %s254_s26 = int_to_ptr.vmem [resolvable:$true] %s253_s26 }
  0x59   : > { %s3474_s6 = scalar_lea.vmem %s254_s26, 16  ;;  %p3482_p1 = scmp.lt.s32.totalorder %s254_s26, %s254_s26 }
  0x5a   : > { %s275_s4 = sshll.u32 %s6694_s3, 4  ;;  %p3475_p3 = scmp.ne.s32.totalorder %s254_s26, %s3474_s6  ;;  %s276_s4 = int_to_ptr.vmem [resolvable:$true] %s275_s4 }
  0x5b   : > { %p3483_p4 = scmp.lt.s32.totalorder %s3474_s6, %s3474_s6 }
  0x5c   : > { %p3477_p10 = pnand %p3475_p3, %p3824_p2 }
  0x5d   : > { %p3484_p6 = por %p3483_p4, %p3482_p1 }
  0x5e   : > { %p3478_p12 = pneg %p3477_p10 }
  0x60   : > { %p3485_p5 = pnand %p3484_p6, %p3478_p12 }
  0x62   : > { %3488 = shalt.err (!%p3485_p5)
}
  0x63   : > { %s3668_s25 = smov [#allocation6]   ;;  %s3489_s19 = scalar_lea.vmem %s276_s4, 16 }
  0x64   : > { %3296 = dma.vmem_to_smem (!%p3815_p0), %s254_s26, 16, %s3668_s25, [#allocation8]  }
  0x65   : > { %p3490_p7 = scmp.ne.s32.totalorder %s276_s4, %s3489_s19  ;;  %p3497_p13 = scmp.lt.s32.totalorder %s276_s4, %s276_s4 }
  0x66   : > { %p3498_p8 = scmp.lt.s32.totalorder %s3489_s19, %s3489_s19 }
  0x67   : > { %p3492_p9 = pnand %p3490_p7, %p3824_p2 }
  0x68   : > { %p3499_p3 = por %p3498_p8, %p3497_p13 }
  0x69   : > { %p3493_p11 = pneg %p3492_p9 }
  0x6b   : > { %p3500_p10 = pnand %p3499_p3, %p3493_p11 }
  0x6d   : > { %3503 = shalt.err (!%p3500_p10)
}
  0x6e   : > { %s3669_s6 = smov [#allocation11]   ;;  %s6695_s5 = sld [smem:[#allocation102_spill]] }
  0x6f   : > { %3302 = dma.vmem_to_smem (!%p3815_p0), %s276_s4, 16, %s3669_s6, [#allocation10]  }
  0x70   : > { %s6696_s7 = sld [smem:[#allocation104_spill]] }
  0x74   : > { %s297_s18 = sshll.u32 %s6695_s5, 4  ;;  %s298_s18 = int_to_ptr.vmem [resolvable:$true] %s297_s18 }
  0x75   : > { %s3504_s25 = scalar_lea.vmem %s298_s18, 32  ;;  %p3512_p6 = scmp.lt.s32.totalorder %s298_s18, %s298_s18 }
  0x76   : > { %s319_s20 = sshll.u32 %s6696_s7, 4  ;;  %p3505_p12 = scmp.ne.s32.totalorder %s298_s18, %s3504_s25  ;;  %s320_s20 = int_to_ptr.vmem [resolvable:$true] %s319_s20 }
  0x77   : > { %p3513_p5 = scmp.lt.s32.totalorder %s3504_s25, %s3504_s25 }
  0x78   : > { %p3507_p1 = pnand %p3505_p12, %p3824_p2 }
  0x79   : > { %p3514_p7 = por %p3513_p5, %p3512_p6 }
  0x7a   : > { %p3508_p4 = pneg %p3507_p1 }
  0x7c   : > { %p3515_p9 = pnand %p3514_p7, %p3508_p4 }
  0x7e   : > { %3518 = shalt.err (!%p3515_p9)
}
  0x7f   : > { %s3670_s4 = smov [#allocation14]   ;;  %s3519_s19 = scalar_lea.vmem %s320_s20, 16 }
  0x80   : > { %3308 = dma.vmem_to_smem (!%p3815_p0), %s298_s18, 32, %s3670_s4, [#allocation13]  }
  0x81   : > { %p3520_p11 = scmp.ne.s32.totalorder %s320_s20, %s3519_s19  ;;  %p3527_p3 = scmp.lt.s32.totalorder %s320_s20, %s320_s20 }
  0x82   : > { %p3528_p10 = scmp.lt.s32.totalorder %s3519_s19, %s3519_s19 }
  0x83   : > { %p3522_p13 = pnand %p3520_p11, %p3824_p2 }
  0x84   : > { %p3529_p12 = por %p3528_p10, %p3527_p3 }
  0x85   : > { %p3523_p8 = pneg %p3522_p13 }
  0x87   : > { %p3530_p1 = pnand %p3529_p12, %p3523_p8 }
  0x89   : > { %3533 = shalt.err (!%p3530_p1)
}
  0x8a   : > { %s3671_s6 = smov [#allocation17]   ;;  %s6697_s8 = sld [smem:[#allocation105_spill]] }
  0x8b   : > { %3314 = dma.vmem_to_smem (!%p3815_p0), %s320_s20, 16, %s3671_s6, [#allocation16]  }
  0x90   : > { %s330_s18 = sshll.u32 %s6697_s8, 4  ;;  %s331_s18 = int_to_ptr.vmem [resolvable:$true] %s330_s18 }
  0x91   : > { %s3534_s26 = scalar_lea.vmem %s331_s18, 16  ;;  %p3542_p7 = scmp.lt.s32.totalorder %s331_s18, %s331_s18 }
  0x92   : > { %p3535_p4 = scmp.ne.s32.totalorder %s331_s18, %s3534_s26  ;;  %p3543_p9 = scmp.lt.s32.totalorder %s3534_s26, %s3534_s26 }
  0x94   : > { %p3537_p6 = pnand %p3535_p4, %p3824_p2  ;;  %p3544_p11 = por %p3543_p9, %p3542_p7 }
  0x96   : > { %p3538_p5 = pneg %p3537_p6 }
  0x98   : > { %p3545_p13 = pnand %p3544_p11, %p3538_p5 }
  0x9a   : > { %3548 = shalt.err (!%p3545_p13)
}
  0x9b   : > { %s3672_s17 = smov [#allocation18]   ;;  %p6698_p8 = scmp.ne.s32.totalorder %s6685_s27, 0 }
  0x9c   : > { %3317 = dma.vmem_to_smem (!%p3815_p0), %s331_s18, 16, %s3672_s17, [#allocation19]  }
  0x9d   : > { %343 = sbr.rel (%p6698_p8) target bundleno = 854 (0x356), region = 52 }
  0xa2   : > { %p6699_p3 = scmp.ne.s32.totalorder %s6686_s28, 0 }
  0xa4   : > { %3608 = dma.done.wait (%p6699_p3), [#allocation8], 16  }
  0xa5   : > { %3610 = vsyncadd (%p6699_p3), [#allocation8], 4294967280 }
  0xa6   : > { %3612 = dma.done.wait (%p6699_p3), [#allocation10], 32  }
  0xa7   : > { %3614 = vsyncadd (%p6699_p3), [#allocation10], 4294967264 }
  0xa8   : > { %3616 = dma.done.wait (%p6699_p3), [#allocation13], 48  }
  0xa9   : > { %3618 = vsyncadd (%p6699_p3), [#allocation13], 4294967248 }
  0xaa   : > { %3620 = dma.done.wait (%p6699_p3), [#allocation16], 32  }
  0xab   : > { %3622 = vsyncadd (%p6699_p3), [#allocation16], 4294967264 }
  0xac   : > { %3624 = dma.done.wait (%p6699_p3), [#allocation19], 16  }
  0xad   : > { %3626 = vsyncadd (%p6699_p3), [#allocation19], 4294967280 }
  0xae   : > { %377 = sfence }
  0xaf   : > { %s6489_s27 = sand.u32 1, %s3639_s10   ;;  %s3904_s29 = sshll.u32 %s3647_s12, 3 }
  0xb0   : > { %s3257_s22 = smul.u32 24, %s6489_s27  ;;  %6700 = sst [smem:[#allocation42_spill]] %s3904_s29 }
  0xb1   : > { %s402_s20 = smul.u32 72, %s3651_s13  ;;  %s6701_s0 = sld [smem:[#allocation97_spill]] }
  0xb2   : > { %s3911_s28 = scalar_lea.vmem [#allocation20], %s3257_s22 }
  0xb3   : > { %s403_s25 = sadd.s32 %s3904_s29, %s402_s20  ;;  %6702 = sst [smem:[#allocation43_spill]] %s3911_s28 }
  0xb7   : > { %s404_s6 = scalar_lea.vmem %s6701_s0, %s403_s25 }
  0xb8   : > { %v442_v0 = vld [vmem:[%s404_s6] sm:$0xff]  ;;  %v444_v1 = vld [vmem:[%s404_s6 + $0x8] sm:$0xff]  ;;  %v446_v2 = vld [vmem:[%s404_s6 + $0x18] sm:$0xff] }
  0xb9   : > { %443 = vst [vmem:[#allocation2] sm:$0xff] %v442_v0  ;;  %445 = vst [vmem:[#allocation2 + $0x8] sm:$0xff] %v444_v1  ;;  %v448_v3 = vld [vmem:[%s404_s6 + $0x20] sm:$0xff]  ;;  %v450_v4 = vld [vmem:[%s404_s6 + $0x30] sm:$0xff] }
  0xba   : > { %447 = vst [vmem:[#allocation2 + $0x10] sm:$0xff] %v446_v2  ;;  %v452_v5 = vld [vmem:[%s404_s6 + $0x38] sm:$0xff]  ;;  %449 = vst [vmem:[#allocation2 + $0x18] sm:$0xff] %v448_v3 }
  0xbb   : > { %451 = vst [vmem:[#allocation2 + $0x20] sm:$0xff] %v450_v4  ;;  %453 = vst [vmem:[#allocation2 + $0x28] sm:$0xff] %v452_v5 }
  0xbc   : > { %461 = vsyncadd [#allocation5], 768 }
  0xbd   : > { %3627 = dma.done.wait [#allocation5], 768 }
  0xbe   : > { %3628 = vsyncadd [#allocation5], 4294966528  ;;  %s6508_s2 = smov 1   ;;  %s6514_s21 = smov 127  }
  0xbf   : > { %s3977_s18 = sld [smem:[#allocation6]] }
  0xc0   : > { %v3913_v6 = vld [vmem:[#allocation2 + $0x1] sm:$0xff]  ;;  %v3915_v7 = vld [vmem:[#allocation2 + $0x9] sm:$0xf]  ;;  %s3979_s26 = sld [smem:[#allocation6 + $0x1]] }
  0xc1   : > { %824 = vrot.lane.b32.xlu0 %v3913_v6, %s6508_s2  ;;  %826 = vrot.lane.b32.xlu1 %v3915_v7, %s6508_s2  ;;  %v3921_v8 = vld [vmem:[#allocation2 + $0x2] sm:$0xff]  ;;  %v3927_v9 = vld [vmem:[#allocation2 + $0xa] sm:$0xf]  ;;  %v3945_v12 = vld [vmem:[#allocation2 + $0x11] sm:$0xff]  ;;  %s3985_s17 = sld [smem:[#allocation6 + $0x1b]] }
  0xc2   : > { %v3933_v10 = vld [vmem:[#allocation2 + $0x3] sm:$0xff]  ;;  %v3939_v11 = vld [vmem:[#allocation2 + $0xb] sm:$0xf]  ;;  %v3951_v13 = vld [vmem:[#allocation2 + $0x19] sm:$0xf]  ;;  %s3989_s22 = sld [smem:[#allocation6 + $0x1c]] }
  0xc3   : > { %v3957_v14 = vld [vmem:[#allocation2 + $0x12] sm:$0xff]  ;;  %v3963_v15 = vld [vmem:[#allocation2 + $0x1a] sm:$0xf]  ;;  %v3987_v18 = vld [vmem:[#allocation2 + $0x21] sm:$0xff]  ;;  %s3991_s20 = sld [smem:[#allocation6 + $0x36]] }
  0xc4   : > { %v3969_v16 = vld [vmem:[#allocation2 + $0x13] sm:$0xff]  ;;  %v3975_v17 = vld [vmem:[#allocation2 + $0x1b] sm:$0xf]  ;;  %s3993_s25 = sld [smem:[#allocation6 + $0x37]]  ;;  %v4001_v19 = vld [vmem:[#allocation2 + $0x29] sm:$0xf] }
  0xc5   : > { %830 = vrot.lane.b32.xlu0 %v3913_v6, %s6514_s21  ;;  %879 = vrot.lane.b32.xlu1 %v3921_v8, %s6508_s2  ;;  %s3999_s4 = sld [smem:[#allocation6 + $0x2]]  ;;  %v4015_v20 = vld [vmem:[#allocation2 + $0x22] sm:$0xff]  ;;  %v4029_v21 = vld [vmem:[#allocation2 + $0x2a] sm:$0xf]  ;;  %v836_v27 = vstv %s3977_s18 }
  0xc6   : > { %s4003_s19 = sld [smem:[#allocation6 + $0x1d]]  ;;  %v4043_v22 = vld [vmem:[#allocation2 + $0x23] sm:$0xff]  ;;  %v4057_v23 = vld [vmem:[#allocation2 + $0x2b] sm:$0xf]  ;;  %v845_v24 = vstv %s3979_s26 }
  0xc7   : > { %6703 = sst [smem:[#allocation44_spill]] %s3985_s17  ;;  %v4123_v29 = vmul.f32 %v845_v24, %v3913_v6  ;;  %v4126_v30 = vmul.f32 %v845_v24, %v3915_v7 }
  0xc8   : > { %s4005_s6 = sld [smem:[#allocation6 + $0x38]]  ;;  %v850_v25 = vstv %s3989_s22 }
  0xc9   : > { %832 = vrot.lane.b32.xlu0 %v3915_v7, %s6514_s21  ;;  %881 = vrot.lane.b32.xlu1 %v3927_v9, %s6508_s2  ;;  %6704 = sst [smem:[#allocation45_spill]] %s3991_s20  ;;  %v4132_v32 = vmul.f32 %v850_v25, %v3913_v6  ;;  %v4135_v33 = vmul.f32 %v850_v25, %v3915_v7 }
  0xca   : > { %s4007_s27 = sld [smem:[#allocation6 + $0x3]]  ;;  %v855_v26 = vstv %s3993_s25 }
  0xcb   : > { %6705 = sst [smem:[#allocation46_spill]] %s3999_s4  ;;  %v4141_v35 = vmul.f32 %v855_v26, %v3913_v6  ;;  %v4144_v36 = vmul.f32 %v855_v26, %v3915_v7 }
  0xcc   : > { %6706 = sst [smem:[#allocation47_spill]] %s4003_s19 }
  0xcd   : > { %885 = vrot.lane.b32.xlu0 %v3921_v8, %s6514_s21  ;;  %940 = vrot.lane.b32.xlu1 %v3933_v10, %s6508_s2  ;;  %s4013_s0 = sld [smem:[#allocation6 + $0x1e]] }
  0xce   : > { %6707 = sst [smem:[#allocation48_spill]] %s4005_s6 }
  0xcf   : > { %s4017_s1 = sld [smem:[#allocation6 + $0x39]] }
  0xd0   : > { %6708 = sst [smem:[#allocation49_spill]] %s4007_s27 }
  0xd1   : > { %887 = vrot.lane.b32.xlu0 %v3927_v9, %s6514_s21  ;;  %942 = vrot.lane.b32.xlu1 %v3939_v11, %s6508_s2  ;;  %s4019_s3 = sld [smem:[#allocation6 + $0x4]] }
  0xd2   : > { %s4021_s5 = sld [smem:[#allocation6 + $0x5]] }
  0xd3   : > { %6709 = sst [smem:[#allocation50_spill]] %s4013_s0 }
  0xd4   : > { %s4027_s7 = sld [smem:[#allocation6 + $0x1f]] }
  0xd5   : > { %946 = vrot.lane.b32.xlu0 %v3933_v10, %s6514_s21  ;;  %1002 = vrot.lane.b32.xlu1 %v3945_v12, %s6508_s2  ;;  %6710 = sst [smem:[#allocation51_spill]] %s4017_s1 }
  0xd6   : > { %s4031_s8 = sld [smem:[#allocation6 + $0x20]] }
  0xd7   : > { %s4033_s15 = sld [smem:[#allocation6 + $0x3a]]  ;;  %v906_v34 = vstv %s4019_s3 }
  0xd8   : > { %6711 = sst [smem:[#allocation52_spill]] %s4021_s5  ;;  %v4159_v45 = vmul.f32 %v906_v34, %v3921_v8  ;;  %v4169_v49 = vmul.f32 %v906_v34, %v3927_v9 }
  0xd9   : > { %948 = vrot.lane.b32.xlu0 %v3939_v11, %s6514_s21  ;;  %1004 = vrot.lane.b32.xlu1 %v3951_v13, %s6508_s2  ;;  %s4035_s14 = sld [smem:[#allocation6 + $0x3b]] }
  0xda   : > { %s4041_s11 = sld [smem:[#allocation6 + $0x6]]  ;;  %v911_v38 = vstv %s4027_s7 }
  0xdb   : > { %s4045_s24 = sld [smem:[#allocation6 + $0x21]]  ;;  %v4165_v47 = vmul.f32 %v911_v38, %v3921_v8  ;;  %v4179_v53 = vmul.f32 %v911_v38, %v3927_v9 }
  0xdc   : > { %6712 = sst [smem:[#allocation53_spill]] %s4031_s8 }
  0xdd   : > { %1008 = vrot.lane.b32.xlu0 %v3945_v12, %s6514_s21  ;;  %1063 = vrot.lane.b32.xlu1 %v3957_v14, %s6508_s2  ;;  %s4047_s30 = sld [smem:[#allocation6 + $0x3c]]  ;;  %v916_v42 = vstv %s4033_s15 }
  0xde   : > { %s4049_s16 = sld [smem:[#allocation6 + $0x7]]  ;;  %v4175_v51 = vmul.f32 %v916_v42, %v3921_v8  ;;  %v4187_v57 = vmul.f32 %v916_v42, %v3927_v9 }
  0xdf   : > { %6713 = sst [smem:[#allocation54_spill]] %s4035_s14 }
  0xe0   : > { %6714 = sst [smem:[#allocation55_spill]] %s4041_s11 }
  0xe1   : > { %1010 = vrot.lane.b32.xlu0 %v3951_v13, %s6514_s21  ;;  %1065 = vrot.lane.b32.xlu1 %v3963_v15, %s6508_s2  ;;  %6715 = sst [smem:[#allocation56_spill]] %s4045_s24 }
  0xe2   : > { %s4055_s9 = sld [smem:[#allocation6 + $0x8]] }
  0xe3   : > { %6716 = sst [smem:[#allocation57_spill]] %s4047_s30 }
  0xe4   : > { %s4059_s23 = sld [smem:[#allocation6 + $0x22]]  ;;  %v967_v50 = vstv %s4049_s16 }
  0xe5   : > { %1069 = vrot.lane.b32.xlu0 %v3957_v14, %s6514_s21  ;;  %1124 = vrot.lane.b32.xlu1 %v3969_v16, %s6508_s2  ;;  %s4061_s10 = sld [smem:[#allocation6 + $0x23]]  ;;  %v4194_v60 = vmul.f32 %v967_v50, %v3933_v10  ;;  %v4198_v62 = vmul.f32 %v967_v50, %v3939_v11  ;;  %v1380_v50 = vlaneseq }
  0xe6   : > { %s4063_s28 = sld [smem:[#allocation6 + $0x3d]] }
  0xe7   : > { %s4069_s12 = sld [smem:[#allocation6 + $0x3e]] }
  0xe8   : > { %6717 = sst [smem:[#allocation58_spill]] %s4055_s9 }
  0xe9   : > { %1071 = vrot.lane.b32.xlu0 %v3963_v15, %s6514_s21  ;;  %1126 = vrot.lane.b32.xlu1 %v3975_v17, %s6508_s2  ;;  %s4071_s13 = sld [smem:[#allocation6 + $0x9]] }
  0xea   : > { %s4073_s29 = sld [smem:[#allocation6 + $0x24]]  ;;  %v972_v54 = vstv %s4059_s23 }
  0xeb   : > { %6718 = sst [smem:[#allocation59_spill]] %s4061_s10  ;;  %v4203_v63 = vmul.f32 %v972_v54, %v3933_v10  ;;  %v4215_v5 = vmul.f32 %v972_v54, %v3939_v11 }
  0xec   : > { %6719 = sst [smem:[#allocation60_spill]] %s4063_s28 }
  0xed   : > { %1130 = vrot.lane.b32.xlu0 %v3969_v16, %s6514_s21  ;;  %1186 = vrot.lane.b32.xlu1 %v3987_v18, %s6508_s2  ;;  %6720 = sst [smem:[#allocation61_spill]] %s4069_s12 }
  0xee   : > { %s4075_s9 = sld [smem:[#allocation6 + $0x3f]] }
  0xef   : > { %6721 = sst [smem:[#allocation62_spill]] %s4071_s13 }
  0xf0   : > { %6722 = sst [smem:[#allocation63_spill]] %s4073_s29 }
  0xf1   : > { %1132 = vrot.lane.b32.xlu0 %v3975_v17, %s6514_s21  ;;  %1188 = vrot.lane.b32.xlu1 %v4001_v19, %s6508_s2  ;;  %s4081_s10 = sld [smem:[#allocation6 + $0xa]] }
  0xf2   : > { %s4083_s30 = sld [smem:[#allocation6 + $0xb]] }
  0xf3   : > { %s4087_s12 = sld [smem:[#allocation6 + $0x26]] }
  0xf4   : > { %6723 = sst [smem:[#allocation64_spill]] %s4075_s9 }
  0xf5   : > { %1192 = vrot.lane.b32.xlu0 %v3987_v18, %s6514_s21  ;;  %1247 = vrot.lane.b32.xlu1 %v4015_v20, %s6508_s2  ;;  %s4089_s29 = sld [smem:[#allocation6 + $0x40]] }
  0xf6   : > { %s4091_s9 = sld [smem:[#allocation6 + $0x41]] }
  0xf7   : > { %6724 = sst [smem:[#allocation65_spill]] %s4081_s10 }
  0xf8   : > { %6725 = sst [smem:[#allocation66_spill]] %s4083_s30 }
  0xf9   : > { %1194 = vrot.lane.b32.xlu0 %v4001_v19, %s6514_s21  ;;  %1249 = vrot.lane.b32.xlu1 %v4029_v21, %s6508_s2  ;;  %6727 = sst [smem:[#allocation68_spill]] %s4087_s12 }
  0xfa   : > { %s4093_s13 = sld [smem:[#allocation6 + $0xc]] }
  0xfb   : > { %6728 = sst [smem:[#allocation69_spill]] %s4089_s29 }
  0xfc   : > { %6729 = sst [smem:[#allocation70_spill]] %s4091_s9 }
  0xfd   : > { %1253 = vrot.lane.b32.xlu0 %v4015_v20, %s6514_s21  ;;  %1308 = vrot.lane.b32.xlu1 %v4043_v22, %s6508_s2  ;;  %s4097_s28 = sld [smem:[#allocation6 + $0x42]] }
  0xfe   : > { %s4099_s10 = sld [smem:[#allocation6 + $0xd]] }
  0xff   : > { %s4101_s30 = sld [smem:[#allocation6 + $0xe]] }
 0x100   : > { %6730 = sst [smem:[#allocation71_spill]] %s4093_s13 }
 0x101   : > { %1255 = vrot.lane.b32.xlu0 %v4029_v21, %s6514_s21  ;;  %1310 = vrot.lane.b32.xlu1 %v4057_v23, %s6508_s2  ;;  %s4085_s2 = sld [smem:[#allocation6 + $0x25]] }
 0x102   : > { %s4105_s12 = sld [smem:[#allocation6 + $0x29]] }
 0x103   : > { %6732 = sst [smem:[#allocation73_spill]] %s4097_s28 }
 0x104   : > { %s4107_s29 = sld [smem:[#allocation6 + $0x43]]  ;;  %v1090_v38 = vstv %s4099_s10 }
 0x105   : > { %1314 = vrot.lane.b32.xlu0 %v4043_v22, %s6514_s21  ;;  %1316 = vrot.lane.b32.xlu1 %v4057_v23, %s6514_s21  ;;  %s4095_s21 = sld [smem:[#allocation6 + $0x27]] }
 0x106   : > { %6733 = sst [smem:[#allocation74_spill]] %s4101_s30 }
 0x107   : > { %6726 = sst [smem:[#allocation67_spill]] %s4085_s2 }
 0x108   : > { %s4103_s2 = sld [smem:[#allocation6 + $0x28]] }
 0x109   : > { %6734 = sst [smem:[#allocation75_spill]] %s4105_s12 }
 0x10a   : > { %s4109_s9 = sld [smem:[#allocation6 + $0x44]]  ;;  %v1100_v7 = vstv %s4107_s29 }
 0x10b   : > { %6731 = sst [smem:[#allocation72_spill]] %s4095_s21  ;;  %v4283_v4 = vmul.f32 %v1100_v7, %v3957_v14  ;;  %v4290_v0 = vmul.f32 %v1100_v7, %v3963_v15 }
 0x10c   : > { %s4112_s13 = sld [smem:[#allocation6 + $0xf]] }
 0x10d   : > { %s4115_s28 = sld [smem:[#allocation6 + $0x2a]] }
 0x10e   : > { %s4118_s30 = sld [smem:[#allocation6 + $0x45]]  ;;  %v1095_v42 = vstv %s4103_s2 }
 0x10f   : > { %s4128_s26 = sld [smem:[#allocation6 + $0x10]] }
 0x110   : > { %s4138_s22 = sld [smem:[#allocation6 + $0x11]] }
 0x111   : > { %s4148_s25 = sld [smem:[#allocation6 + $0x2b]] }
 0x112   : > { %s4154_s3 = sld [smem:[#allocation6 + $0x2c]] }
 0x113   : > { %s6736_s4 = sld [smem:[#allocation60_spill]] }
 0x114   : > { %s4162_s7 = sld [smem:[#allocation6 + $0x46]] }
 0x115   : > { %s4172_s0 = sld [smem:[#allocation6 + $0x47]]  ;;  %v1151_v9 = vstv %s4128_s26 }
 0x116   : > { %s6740_s5 = sld [smem:[#allocation65_spill]]  ;;  %v4309_v7 = vmul.f32 %v1151_v9, %v3975_v17 }
 0x117   : > { %s6741_s27 = sld [smem:[#allocation67_spill]]  ;;  %v1156_v34 = vstv %s4148_s25 }
 0x118   : > { %6735 = sst [smem:[#allocation76_spill]] %s4154_s3 }
 0x119   : > { %s4182_s6 = sld [smem:[#allocation6 + $0x12]]  ;;  %v977_v58 = vstv %s6736_s4 }
 0x11a   : > { %s4190_s16 = sld [smem:[#allocation6 + $0x2d]]  ;;  %v4211_v3 = vmul.f32 %v977_v58, %v3933_v10  ;;  %v4218_v6 = vmul.f32 %v977_v58, %v3939_v11  ;;  %v4280_v58 = vshrl.u32 %v1380_v50, 7  ;;  %v1161_v56 = vstv %s4162_s7 }
 0x11b   : > { %s6744_s14 = sld [smem:[#allocation63_spill]]  ;;  %v4321_v55 = vmul.f32 %v1161_v56, %v3969_v16  ;;  %v4328_v52 = vmul.f32 %v1161_v56, %v3975_v17 }
 0x11c   : > { %s6746_s23 = sld [smem:[#allocation69_spill]]  ;;  %v1029_v1 = vstv %s6740_s5  ;;  %6758 = vst [vmem:[#allocation77_spill] sm:$0xff] %v4280_v58 }
 0x11d   : > { %s4200_s11 = sld [smem:[#allocation6 + $0x48]]  ;;  %v1034_v2 = vstv %s6741_s27  ;;  %v4229_v10 = vmul.f32 %v1029_v1, %v3945_v12  ;;  %v4236_v26 = vmul.f32 %v1029_v1, %v3951_v13 }
 0x11e   : > { %s6747_s4 = sld [smem:[#allocation66_spill]]  ;;  %v4232_v25 = vmul.f32 %v1034_v2, %v3945_v12  ;;  %v4250_v11 = vmul.f32 %v1034_v2, %v3951_v13  ;;  %v4267_v2 = vmul.f32 %v1095_v42, %v3957_v14 }
 0x11f   : > { %s4208_s19 = sld [smem:[#allocation6 + $0x13]] }
 0x120   : > { %s4220_s15 = sld [smem:[#allocation6 + $0x14]] }
 0x121   : > { %s6749_s5 = sld [smem:[#allocation70_spill]] }
 0x122   : > { %v1039_v24 = vstv %s6746_s23  ;;  %s4226_s27 = sld [smem:[#allocation6 + $0x2e]] }
 0x123   : > { %s6750_s1 = sld [smem:[#allocation71_spill]]  ;;  %v4246_v54 = vmul.f32 %v1039_v24, %v3945_v12  ;;  %v4253_v1 = vmul.f32 %v1039_v24, %v3951_v13  ;;  %v4264_v12 = vmul.f32 %v1090_v38, %v3957_v14  ;;  %v4271_v24 = vmul.f32 %v1090_v38, %v3963_v15 }
 0x124   : > { %s6751_s8 = sld [smem:[#allocation73_spill]]  ;;  %v4287_v38 = vmul.f32 %v1095_v42, %v3963_v15  ;;  %v4302_v14 = vmul.f32 %v1151_v9, %v3969_v16  ;;  %v4305_v42 = vmul.f32 %v1156_v34, %v3969_v16  ;;  %v4318_v13 = vadd.s32 8, %v4280_v58 }
 0x125   : > { %s4238_s20 = sld [smem:[#allocation6 + $0x2f]]  ;;  %v1213_v61 = vstv %s4208_s19  ;;  %v4325_v9 = vmul.f32 %v1156_v34, %v3975_v17  ;;  %v4345_v17 = vand.u32 127, %v1380_v50 }
 0x126   : > { %s6753_s23 = sld [smem:[#allocation74_spill]]  ;;  %6760 = vst [vmem:[#allocation78_spill] sm:$0xff] %v4318_v13  ;;  %v4340_v15 = vmul.f32 %v1213_v61, %v3987_v18  ;;  %v4349_v48 = vmul.f32 %v1213_v61, %v4001_v19 }
 0x127   : > { %s4243_s17 = sld [smem:[#allocation6 + $0x49]]  ;;  %6762 = vst [vmem:[#allocation80_spill] sm:$0xff] %v4345_v17 }
 0x128   : > { %s4255_s24 = sld [smem:[#allocation6 + $0x4a]]  ;;  %v1218_v46 = vstv %s4226_s27  ;;  %6763 = vst [vmem:[#allocation81_spill] sm:$0xff] %v4349_v48 }
 0x129   : > { %s4261_s10 = sld [smem:[#allocation6 + $0x15]]  ;;  %v4356_v16 = vmul.f32 %v1218_v46, %v3987_v18  ;;  %v4363_v56 = vmul.f32 %v1218_v46, %v4001_v19 }
 0x12a   : > { %s6756_s2 = sld [smem:[#allocation42_spill]] }
 0x12b   : > { %6752 = sst [smem:[#allocation60_spill]] %s4238_s20  ;;  %6766 = vst [vmem:[#allocation83_spill] sm:$0xff] %v4363_v56 }
 0x12c   : > { %s4273_s21 = sld [smem:[#allocation6 + $0x30]] }
 0x12d   : > { %s4278_s29 = sld [smem:[#allocation6 + $0x16]]  ;;  %v1223_v44 = vstv %s4243_s17 }
 0x12e   : > { %6754 = sst [smem:[#allocation65_spill]] %s4255_s24  ;;  %v4359_v41 = vmul.f32 %v1223_v44, %v3987_v18  ;;  %v4370_v40 = vmul.f32 %v1223_v44, %v4001_v19 }
 0x12f   : > { %6755 = sst [smem:[#allocation67_spill]] %s4261_s10 }
 0x130   : > { %s4292_s12 = sld [smem:[#allocation6 + $0x4b]]  ;;  %s1383_s26 = sadd.s32 4294967294, %s6756_s2  ;;  %6768 = vst [vmem:[#allocation84_spill] sm:$0xff] %v4370_v40 }
 0x131   : > { %s4299_s25 = sld [smem:[#allocation6 + $0x31]]  ;;  %v1384_v8 = vstv %s1383_s26 }
 0x132   : > { %6757 = sst [smem:[#allocation63_spill]] %s4273_s21  ;;  %v4343_v34 = vadd.s32 %v1384_v8, %v4280_v58  ;;  %v4353_v43 = vadd.s32 %v1384_v8, %v4318_v13 }
 0x133   : > { %s4311_s2 = sld [smem:[#allocation6 + $0x4c]]  ;;  %v1274_v59 = vstv %s4278_s29  ;;  %v825_v18 = vpop.permute.xlu0 %824  ;;  %v827_v50 = vpop.permute.xlu1 %826 }
 0x134   : > { %s4315_s7 = sld [smem:[#allocation6 + $0x17]]  ;;  %6761 = vst [vmem:[#allocation79_spill] sm:$0xff] %v4343_v34  ;;  %6764 = vst [vmem:[#allocation82_spill] sm:$0xff] %v4353_v43  ;;  %v4378_v31 = vmul.f32 %v1274_v59, %v4015_v20  ;;  %v837_v19 = vmul.f32 %v836_v27, %v825_v18  ;;  %v4395_v37 = vmul.f32 %v1274_v59, %v4029_v21 }
 0x135   : > { %s4330_s3 = sld [smem:[#allocation6 + $0x32]] }
 0x136   : > { %6759 = sst [smem:[#allocation69_spill]] %s4292_s12  ;;  %6770 = vst [vmem:[#allocation85_spill] sm:$0xff] %v4378_v31  ;;  %6778 = vst [vmem:[#allocation87_spill] sm:$0xff] %v4395_v37  ;;  %v848_v46 = vadd.f32 %v4123_v29, %v837_v19 }
 0x137   : > { %s4336_s19 = sld [smem:[#allocation6 + $0x4d]]  ;;  %v1279_v39 = vstv %s4299_s25  ;;  %v880_v31 = vpop.permute.xlu1 %879 }
 0x138   : > { %s6765_s17 = sld [smem:[#allocation44_spill]]  ;;  %v4391_v17 = vmul.f32 %v1279_v39, %v4015_v20  ;;  %v4398_v43 = vmul.f32 %v1279_v39, %v4029_v21 }
 0x139   : > { %s6767_s27 = sld [smem:[#allocation45_spill]]  ;;  %v1284_v28 = vstv %s4311_s2 }
 0x13a   : > { %s4365_s26 = sld [smem:[#allocation6 + $0x18]]  ;;  %6775 = vst [vmem:[#allocation86_spill] sm:$0xff] %v4391_v17  ;;  %6780 = vst [vmem:[#allocation88_spill] sm:$0xff] %v4398_v43  ;;  %v831_v43 = vpop.permute.xlu0 %830 }
 0x13b   : > { %s4373_s29 = sld [smem:[#allocation6 + $0x33]] }
 0x13c   : > { %s4381_s24 = sld [smem:[#allocation6 + $0x4e]] }
 0x13d   : > { %s6774_s25 = sld [smem:[#allocation46_spill]] }
 0x13e   : > { %v6772_v44 = vstv %s6765_s17  ;;  %s6776_s21 = sld [smem:[#allocation47_spill]]  ;;  %v6782_v34 = vstv %s6765_s17 }
 0x13f   : > { %v840_v8 = vmul.f32 %v6772_v44, %v825_v18  ;;  %v6773_v61 = vstv %s6767_s27  ;;  %s6777_s12 = sld [smem:[#allocation48_spill]]  ;;  %v838_v44 = vmul.f32 %v836_v27, %v827_v50  ;;  %v6785_v17 = vstv %s6767_s27 }
 0x140   : > { %v843_v13 = vmul.f32 %v6773_v61, %v825_v18  ;;  %s6779_s2 = sld [smem:[#allocation49_spill]]  ;;  %v841_v61 = vmul.f32 %v6782_v34, %v827_v50  ;;  %v4405_v18 = vmul.f32 %v1284_v28, %v4015_v20  ;;  %v844_v39 = vmul.f32 %v6785_v17, %v827_v50 }
 0x141   : > { %6769 = sst [smem:[#allocation66_spill]] %s4373_s29  ;;  %v853_v59 = vadd.f32 %v4132_v32, %v840_v8  ;;  %v4429_v17 = vmul.f32 %v1284_v28, %v4029_v21  ;;  %v1325_v48 = vstv %s4373_s29 }
 0x142   : > { %6771 = sst [smem:[#allocation70_spill]] %s4381_s24  ;;  %6784 = vst [vmem:[#allocation89_spill] sm:$0xff] %v4405_v18  ;;  %v858_v37 = vadd.f32 %v4141_v35, %v843_v13 }
 0x143   : > { %s6781_s10 = sld [smem:[#allocation50_spill]]  ;;  %v6786_v27 = vstv %s6774_s25  ;;  %6792 = vst [vmem:[#allocation90_spill] sm:$0xff] %v4429_v17  ;;  %v6793_v17 = vstv %s6774_s25 }
 0x144   : > { %s6783_s20 = sld [smem:[#allocation51_spill]]  ;;  %v861_v34 = vmul.f32 %v6786_v27, %v831_v43  ;;  %v6787_v40 = vstv %s6776_s21 }
 0x145   : > { %s4413_s18 = sld [smem:[#allocation6 + $0x19]]  ;;  %v866_v56 = vmul.f32 %v6787_v40, %v831_v43  ;;  %v6788_v20 = vstv %s6777_s12 }
 0x146   : > { %v871_v58 = vmul.f32 %v6788_v20, %v831_v43  ;;  %v6789_v18 = vstv %s6779_s2  ;;  %v863_v50 = vadd.f32 %v861_v34, %v848_v46  ;;  %v849_v43 = vadd.f32 %v4126_v30, %v838_v44  ;;  %v833_v20 = vpop.permute.xlu0 %832  ;;  %s6796_s17 = sld [smem:[#allocation52_spill]] }
 0x147   : > { %v892_v29 = vmul.f32 %v6789_v18, %v880_v31  ;;  %v868_v27 = vadd.f32 %v866_v56, %v853_v59  ;;  %v854_v18 = vadd.f32 %v4135_v33, %v841_v61  ;;  %v862_v46 = vmul.f32 %v6793_v17, %v833_v20  ;;  %s6798_s27 = sld [smem:[#allocation53_spill]] }
 0x148   : > { %v873_v40 = vadd.f32 %v871_v58, %v858_v37  ;;  %v6794_v56 = vstv %s6776_s21  ;;  %v6795_v37 = vstv %s6777_s12  ;;  %v6797_v34 = vstv %s6779_s2  ;;  %s6800_s29 = sld [smem:[#allocation54_spill]] }
 0x149   : > { %v6790_v19 = vstv %s6781_s10  ;;  %v894_v13 = vadd.f32 %v892_v29, %v863_v50  ;;  %v867_v59 = vmul.f32 %v6794_v56, %v833_v20  ;;  %v872_v58 = vmul.f32 %v6795_v37, %v833_v20  ;;  %s6803_s25 = sld [smem:[#allocation56_spill]] }
 0x14a   : > { %v897_v32 = vmul.f32 %v6790_v19, %v880_v31  ;;  %v6791_v8 = vstv %s6783_s20  ;;  %v882_v19 = vpop.permute.xlu1 %881  ;;  %v6799_v33 = vstv %s6781_s10  ;;  %v864_v44 = vadd.f32 %v862_v46, %v849_v43  ;;  %v886_v50 = vpop.permute.xlu0 %885  ;;  %s6804_s12 = sld [smem:[#allocation57_spill]] }
 0x14b   : > { %v902_v35 = vmul.f32 %v6791_v8, %v880_v31  ;;  %v859_v31 = vadd.f32 %v4144_v36, %v844_v39  ;;  %v1330_v8 = vstv %s4381_s24  ;;  %v893_v30 = vmul.f32 %v6797_v34, %v882_v19  ;;  %s6802_s24 = sld [smem:[#allocation55_spill]] }
 0x14c   : > { %v899_v21 = vadd.f32 %v897_v32, %v868_v27  ;;  %v898_v36 = vmul.f32 %v6799_v33, %v882_v19  ;;  %v6801_v61 = vstv %s6783_s20  ;;  %v909_v29 = vadd.f32 %v4159_v45, %v894_v13  ;;  %s4451_s21 = sld [smem:[#allocation6 + $0x1a]] }
 0x14d   : > { %v904_v28 = vadd.f32 %v902_v35, %v873_v40  ;;  %v903_v39 = vmul.f32 %v6801_v61, %v882_v19  ;;  %v869_v35 = vadd.f32 %v867_v59, %v854_v18  ;;  %v874_v17 = vadd.f32 %v872_v58, %v859_v31  ;;  %s6814_s20 = sld [smem:[#allocation58_spill]] }
 0x14e   : > { %v914_v32 = vadd.f32 %v4165_v47, %v899_v21  ;;  %v941_v40 = vpop.permute.xlu1 %940  ;;  %v1335_v20 = vstv %s4413_s18  ;;  %v895_v56 = vadd.f32 %v893_v30, %v864_v44  ;;  %v6805_v43 = vstv %s6796_s17  ;;  %v888_v44 = vpop.permute.xlu0 %887  ;;  %s6816_s10 = sld [smem:[#allocation59_spill]] }
 0x14f   : > { %v919_v27 = vadd.f32 %v4175_v51, %v904_v28  ;;  %v922_v46 = vmul.f32 %v6805_v43, %v886_v50  ;;  %v6806_v19 = vstv %s6798_s27  ;;  %v6807_v34 = vstv %s6800_s29  ;;  %s6818_s2 = sld [smem:[#allocation61_spill]] }
 0x150   : > { %v927_v37 = vmul.f32 %v6806_v19, %v886_v50  ;;  %v932_v45 = vmul.f32 %v6807_v34, %v886_v50  ;;  %v900_v13 = vadd.f32 %v898_v36, %v869_v35  ;;  %v905_v33 = vadd.f32 %v903_v39, %v874_v17  ;;  %s6820_s18 = sld [smem:[#allocation62_spill]] }
 0x151   : > { %v6808_v47 = vstv %s6802_s24  ;;  %v6809_v31 = vstv %s6803_s25  ;;  %v924_v51 = vadd.f32 %v922_v46, %v909_v29  ;;  %v6810_v58 = vstv %s6804_s12  ;;  %s6821_s29 = sld [smem:[#allocation64_spill]] }
 0x152   : > { %v953_v18 = vmul.f32 %v6808_v47, %v941_v40  ;;  %v958_v21 = vmul.f32 %v6809_v31, %v941_v40  ;;  %v929_v28 = vadd.f32 %v927_v37, %v914_v32  ;;  %v934_v59 = vadd.f32 %v932_v45, %v919_v27  ;;  %v943_v35 = vpop.permute.xlu1 %942  ;;  %s4487_s24 = sld [smem:[#allocation6 + $0x34]] }
 0x153   : > { %v963_v30 = vmul.f32 %v6810_v58, %v941_v40  ;;  %v910_v61 = vadd.f32 %v4169_v49, %v895_v56  ;;  %v915_v36 = vadd.f32 %v4179_v53, %v900_v13  ;;  %v920_v39 = vadd.f32 %v4187_v57, %v905_v33  ;;  %s6835_s27 = sld [smem:[#allocation72_spill]] }
 0x154   : > { %v4470_v17 = vmul.f32 %v1335_v20, %v4043_v22  ;;  %v955_v50 = vadd.f32 %v953_v18, %v924_v51  ;;  %v960_v29 = vadd.f32 %v958_v21, %v929_v28  ;;  %v6811_v32 = vstv %s6796_s17  ;;  %v947_v21 = vpop.permute.xlu0 %946  ;;  %s6832_s17 = sld [smem:[#allocation68_spill]] }
 0x155   : > { %v965_v43 = vadd.f32 %v963_v30, %v934_v59  ;;  %v923_v27 = vmul.f32 %v6811_v32, %v888_v44  ;;  %v6812_v46 = vmov %v6806_v19  ;;  %v6813_v19 = vmov %v6807_v34  ;;  %s4523_s25 = sld [smem:[#allocation6 + $0x35]] }
 0x156   : > { %v928_v40 = vmul.f32 %v6812_v46, %v888_v44  ;;  %v933_v37 = vmul.f32 %v6813_v19, %v888_v44  ;;  %v6815_v49 = vmov %v6808_v47  ;;  %v6817_v56 = vmov %v6809_v31  ;;  %v1003_v28 = vpop.permute.xlu1 %1002  ;;  %s4835_s12 = sld [smem:[#allocation11 + $0x1f]] }
 0x157   : > { %v954_v53 = vmul.f32 %v6815_v49, %v943_v35  ;;  %v959_v57 = vmul.f32 %v6817_v56, %v943_v35  ;;  %v925_v34 = vadd.f32 %v923_v27, %v910_v61  ;;  %v6819_v45 = vmov %v6810_v58 }
 0x158   : > { %v964_v13 = vmul.f32 %v6819_v45, %v943_v35  ;;  %v970_v33 = vadd.f32 %v4194_v60, %v955_v50  ;;  %v975_v47 = vadd.f32 %v4203_v63, %v960_v29  ;;  %v930_v18 = vadd.f32 %v928_v40, %v915_v36 }
 0x159   : > { %v935_v31 = vadd.f32 %v933_v37, %v920_v39  ;;  %v980_v51 = vadd.f32 %v4211_v3, %v965_v43  ;;  %v1350_v59 = vstv %s4451_s21  ;;  %v956_v58 = vadd.f32 %v954_v53, %v925_v34  ;;  %v949_v37 = vpop.permute.xlu0 %948  ;;  %s4841_s21 = sld [smem:[#allocation11 + $0x3a]] }
 0x15a   : > { %v6822_v30 = vstv %s6814_s20  ;;  %v6823_v61 = vstv %s6816_s10  ;;  %v6824_v32 = vstv %s6818_s2  ;;  %v961_v50 = vadd.f32 %v959_v57, %v930_v18  ;;  %v1005_v57 = vpop.permute.xlu1 %1004  ;;  %s4843_s20 = sld [smem:[#allocation11 + $0x7]] }
 0x15b   : > { %v983_v44 = vmul.f32 %v6822_v30, %v947_v21  ;;  %v988_v35 = vmul.f32 %v6823_v61, %v947_v21  ;;  %v993_v60 = vmul.f32 %v6824_v32, %v947_v21  ;;  %v966_v27 = vadd.f32 %v964_v13, %v935_v31  ;;  %s4845_s10 = sld [smem:[#allocation11 + $0x22]] }
 0x15c   : > { %v6825_v63 = vstv %s6820_s18  ;;  %v6826_v39 = vstv %s6744_s14  ;;  %v6827_v40 = vstv %s6821_s29  ;;  %v971_v49 = vadd.f32 %v4198_v62, %v956_v58  ;;  %s6846_s14 = sld [smem:[#allocation75_spill]] }
 0x15d   : > { %v1015_v36 = vmul.f32 %v6825_v63, %v1003_v28  ;;  %v1020_v29 = vmul.f32 %v6826_v39, %v1003_v28  ;;  %v985_v3 = vadd.f32 %v983_v44, %v970_v33  ;;  %v990_v43 = vadd.f32 %v988_v35, %v975_v47  ;;  %6918 = sst [smem:[#allocation73_spill]] %s4835_s12 }
 0x15e   : > { %v995_v46 = vadd.f32 %v993_v60, %v980_v51  ;;  %v1025_v19 = vmul.f32 %v6827_v40, %v1003_v28  ;;  %v976_v53 = vadd.f32 %v4215_v5, %v961_v50  ;;  %v981_v56 = vadd.f32 %v4218_v6, %v966_v27  ;;  %v1009_v50 = vpop.permute.xlu0 %1008  ;;  %s4851_s2 = sld [smem:[#allocation11 + $0x3d]] }
 0x15f   : > { %v4506_v34 = vmul.f32 %v1335_v20, %v4057_v23  ;;  %v1017_v45 = vadd.f32 %v1015_v36, %v985_v3  ;;  %v1022_v13 = vadd.f32 %v1020_v29, %v990_v43  ;;  %v6828_v47 = vmov %v6822_v30  ;;  %6919 = sst [smem:[#allocation74_spill]] %s4841_s21 }
 0x160   : > { %v1027_v33 = vadd.f32 %v1025_v19, %v995_v46  ;;  %v984_v18 = vmul.f32 %v6828_v47, %v949_v37  ;;  %v6829_v31 = vmov %v6823_v61  ;;  %v6830_v51 = vmov %v6824_v32  ;;  %6920 = sst [smem:[#allocation44_spill]] %s4843_s20 }
 0x161   : > { %v989_v21 = vmul.f32 %v6829_v31, %v949_v37  ;;  %v994_v28 = vmul.f32 %v6830_v51, %v949_v37  ;;  %v6831_v62 = vmov %v6825_v63  ;;  %v6833_v58 = vmov %v6826_v39  ;;  %v1064_v63 = vpop.permute.xlu1 %1063  ;;  %6921 = sst [smem:[#allocation45_spill]] %s4845_s10 }
 0x162   : > { %v1016_v5 = vmul.f32 %v6831_v62, %v1005_v57  ;;  %v1021_v6 = vmul.f32 %v6833_v58, %v1005_v57  ;;  %v986_v30 = vadd.f32 %v984_v18, %v971_v49  ;;  %v6834_v20 = vmov %v6827_v40  ;;  %v1011_v47 = vpop.permute.xlu0 %1010  ;;  %s4857_s18 = sld [smem:[#allocation11 + $0xa]] }
 0x163   : > { %v1026_v44 = vmul.f32 %v6834_v20, %v1005_v57  ;;  %v1032_v61 = vadd.f32 %v4229_v10, %v1017_v45  ;;  %v1037_v35 = vadd.f32 %v4232_v25, %v1022_v13  ;;  %v991_v32 = vadd.f32 %v989_v21, %v976_v53  ;;  %s4859_s29 = sld [smem:[#allocation11 + $0x25]] }
 0x164   : > { %v996_v60 = vadd.f32 %v994_v28, %v981_v56  ;;  %v1042_v27 = vadd.f32 %v4246_v54, %v1027_v33  ;;  %v1340_v36 = vstv %s4487_s24  ;;  %v1018_v39 = vadd.f32 %v1016_v5, %v986_v30  ;;  %6922 = sst [smem:[#allocation46_spill]] %s4851_s2 }
 0x165   : > { %v6836_v29 = vstv %s6747_s4  ;;  %v6837_v43 = vstv %s6832_s17  ;;  %v6838_v40 = vstv %s6749_s5  ;;  %v1023_v19 = vadd.f32 %v1021_v6, %v991_v32  ;;  %v1066_v51 = vpop.permute.xlu1 %1065  ;;  %s4671_s4 = sld [smem:[#allocation9 + $0x2]]  ;;  %s6916_s5 = smov 1  }
 0x166   : > { %v1045_v3 = vmul.f32 %v6836_v29, %v1009_v50  ;;  %v1050_v46 = vmul.f32 %v6837_v43, %v1009_v50  ;;  %v1055_v10 = vmul.f32 %v6838_v40, %v1009_v50  ;;  %v1028_v37 = vadd.f32 %v1026_v44, %v996_v60  ;;  %s4861_s24 = sld [smem:[#allocation11 + $0x40]] }
 0x167   : > { %v6839_v25 = vstv %s6750_s1  ;;  %v6840_v53 = vstv %s6835_s27  ;;  %v6841_v13 = vstv %s6751_s8  ;;  %v1033_v18 = vadd.f32 %v4236_v26, %v1018_v39  ;;  %s4559_s1 = sld [smem:[#allocation6 + $0x4f]] }
 0x168   : > { %v1076_v49 = vmul.f32 %v6839_v25, %v1064_v63  ;;  %v1081_v56 = vmul.f32 %v6840_v53, %v1064_v63  ;;  %v1047_v54 = vadd.f32 %v1045_v3, %v1032_v61  ;;  %v1052_v57 = vadd.f32 %v1050_v46, %v1037_v35  ;;  %s6859_s8 = sld [smem:[#allocation76_spill]] }
 0x169   : > { %v1057_v45 = vadd.f32 %v1055_v10, %v1042_v27  ;;  %v1086_v33 = vmul.f32 %v6841_v13, %v1064_v63  ;;  %v1038_v31 = vadd.f32 %v4250_v11, %v1023_v19  ;;  %v1043_v21 = vadd.f32 %v4253_v1, %v1028_v37  ;;  %s4863_s17 = sld [smem:[#allocation11 + $0xd]] }
 0x16a   : > { %v4542_v28 = vmul.f32 %v1340_v36, %v4043_v22  ;;  %v1078_v62 = vadd.f32 %v1076_v49, %v1047_v54  ;;  %v1083_v5 = vadd.f32 %v1081_v56, %v1052_v57  ;;  %v6842_v6 = vmov %v6836_v29  ;;  %s4869_s27 = sld [smem:[#allocation11 + $0x28]] }
 0x16b   : > { %v1088_v58 = vadd.f32 %v1086_v33, %v1057_v45  ;;  %v1046_v30 = vmul.f32 %v6842_v6, %v1011_v47  ;;  %v6843_v20 = vmov %v6837_v43  ;;  %v6844_v61 = vmov %v6838_v40  ;;  %v1070_v43 = vpop.permute.xlu0 %1069  ;;  %v1125_v40 = vpop.permute.xlu1 %1124 }
 0x16c   : > { %v1051_v44 = vmul.f32 %v6843_v20, %v1011_v47  ;;  %v1056_v35 = vmul.f32 %v6844_v61, %v1011_v47  ;;  %v6845_v26 = vmov %v6839_v25  ;;  %v6847_v32 = vmov %v6840_v53 }
 0x16d   : > { %v1077_v11 = vmul.f32 %v6845_v26, %v1066_v51  ;;  %v1082_v1 = vmul.f32 %v6847_v32, %v1066_v51  ;;  %v1048_v60 = vadd.f32 %v1046_v30, %v1033_v18  ;;  %v6848_v50 = vmov %v6841_v13 }
 0x16e   : > { %v1087_v27 = vmul.f32 %v6848_v50, %v1066_v51  ;;  %v1093_v63 = vadd.f32 %v4264_v12, %v1078_v62  ;;  %v1098_v39 = vadd.f32 %v4267_v2, %v1083_v5  ;;  %v1053_v29 = vadd.f32 %v1051_v44, %v1038_v31 }
 0x16f   : > { %v1058_v3 = vadd.f32 %v1056_v35, %v1043_v21  ;;  %v1103_v46 = vadd.f32 %v4283_v4, %v1088_v58  ;;  %v1355_v10 = vstv %s4523_s25  ;;  %v1079_v19 = vadd.f32 %v1077_v11, %v1048_v60  ;;  %v1072_v51 = vpop.permute.xlu0 %1071  ;;  %v1127_v6 = vpop.permute.xlu1 %1126  ;;  %s4871_s25 = sld [smem:[#allocation11 + $0x43]] }
 0x170   : > { %v6849_v37 = vstv %s6753_s23  ;;  %v6850_v49 = vstv %s6846_s14  ;;  %v6851_v56 = vstv %s4109_s9  ;;  %v1084_v54 = vadd.f32 %v1082_v1, %v1053_v29  ;;  %s4595_s9 = sld [smem:[#allocation6 + $0x50]] }
 0x171   : > { %v1106_v25 = vmul.f32 %v6849_v37, %v1070_v43  ;;  %v1111_v53 = vmul.f32 %v6850_v49, %v1070_v43  ;;  %v1116_v12 = vmul.f32 %v6851_v56, %v1070_v43  ;;  %v1089_v57 = vadd.f32 %v1087_v27, %v1058_v3  ;;  %s4823_s23 = sld [smem:[#allocation11 + $0x1]] }
 0x172   : > { %v6852_v2 = vstv %s4112_s13  ;;  %v6853_v13 = vstv %s4115_s28  ;;  %v6854_v31 = vstv %s4118_s30  ;;  %v1094_v62 = vadd.f32 %v4271_v24, %v1079_v19  ;;  %s6872_s30 = sld [smem:[#allocation60_spill]] }
 0x173   : > { %v1137_v45 = vmul.f32 %v6852_v2, %v1125_v40  ;;  %v1142_v33 = vmul.f32 %v6853_v13, %v1125_v40  ;;  %v1108_v4 = vadd.f32 %v1106_v25, %v1093_v63  ;;  %v1113_v47 = vadd.f32 %v1111_v53, %v1098_v39  ;;  %v1187_v19 = vpop.permute.xlu1 %1186  ;;  %s6874_s13 = sld [smem:[#allocation65_spill]] }
 0x174   : > { %v1118_v18 = vadd.f32 %v1116_v12, %v1103_v46  ;;  %v1147_v21 = vmul.f32 %v6854_v31, %v1125_v40  ;;  %v1099_v5 = vadd.f32 %v4287_v38, %v1084_v54  ;;  %v1104_v58 = vadd.f32 %v4290_v0, %v1089_v57  ;;  %v1131_v46 = vpop.permute.xlu0 %1130  ;;  %s6876_s28 = sld [smem:[#allocation67_spill]] }
 0x175   : > { %v4578_v30 = vmul.f32 %v1340_v36, %v4057_v23  ;;  %v1139_v20 = vadd.f32 %v1137_v45, %v1108_v4  ;;  %v1144_v44 = vadd.f32 %v1142_v33, %v1113_v47  ;;  %v6855_v35 = vmov %v6849_v37  ;;  %6923 = sst [smem:[#allocation47_spill]] %s4871_s25 }
 0x176   : > { %v1149_v61 = vadd.f32 %v1147_v21, %v1118_v18  ;;  %v1107_v26 = vmul.f32 %v6855_v35, %v1072_v51  ;;  %v6856_v11 = vmov %v6850_v49  ;;  %v6857_v1 = vmov %v6851_v56  ;;  %s4873_s14 = sld [smem:[#allocation11 + $0x10]] }
 0x177   : > { %v1112_v32 = vmul.f32 %v6856_v11, %v1072_v51  ;;  %v1117_v60 = vmul.f32 %v6857_v1, %v1072_v51  ;;  %v6858_v24 = vmov %v6852_v2  ;;  %v6860_v50 = vmov %v6853_v13 }
 0x178   : > { %v1138_v38 = vmul.f32 %v6858_v24, %v1127_v6  ;;  %v1143_v0 = vmul.f32 %v6860_v50, %v1127_v6  ;;  %v1109_v27 = vadd.f32 %v1107_v26, %v1094_v62  ;;  %v6861_v36 = vmov %v6854_v31  ;;  %v1133_v21 = vpop.permute.xlu0 %1132 }
 0x179   : > { %v1148_v63 = vmul.f32 %v6861_v36, %v1127_v6  ;;  %v1154_v39 = vadd.f32 %v4302_v14, %v1139_v20  ;;  %v1159_v29 = vadd.f32 %v4305_v42, %v1144_v44  ;;  %v1114_v3 = vadd.f32 %v1112_v32, %v1099_v5 }
 0x17a   : > { %v1119_v43 = vadd.f32 %v1117_v60, %v1104_v58  ;;  %v1164_v40 = vadd.f32 %v4321_v55, %v1149_v61  ;;  %v1345_v37 = vstv %s4559_s1  ;;  %v1140_v25 = vadd.f32 %v1138_v38, %v1109_v27  ;;  %v1189_v58 = vpop.permute.xlu1 %1188  ;;  %s4879_s1 = sld [smem:[#allocation11 + $0x2b]] }
 0x17b   : > { %v6862_v49 = vstv %s4138_s22  ;;  %v6863_v56 = vstv %s6859_s8  ;;  %v6864_v54 = vstv %s4172_s0  ;;  %v1145_v57 = vadd.f32 %v1143_v0, %v1114_v3  ;;  %s6877_s22 = sld [smem:[#allocation63_spill]] }
 0x17c   : > { %v1167_v53 = vmul.f32 %v6862_v49, %v1131_v46  ;;  %v1172_v12 = vmul.f32 %v6863_v56, %v1131_v46  ;;  %v1177_v14 = vmul.f32 %v6864_v54, %v1131_v46  ;;  %v1150_v2 = vadd.f32 %v1148_v63, %v1119_v43  ;;  %s6878_s0 = sld [smem:[#allocation69_spill]] }
 0x17d   : > { %v6865_v42 = vstv %s4182_s6  ;;  %v6866_v13 = vstv %s4190_s16  ;;  %v6867_v18 = vstv %s4200_s11  ;;  %v1155_v51 = vadd.f32 %v4309_v7, %v1140_v25  ;;  %s4631_s6 = sld [smem:[#allocation9]] }
 0x17e   : > { %v1199_v45 = vmul.f32 %v6865_v42, %v1187_v19  ;;  %v1204_v33 = vmul.f32 %v6866_v13, %v1187_v19  ;;  %v1169_v55 = vadd.f32 %v1167_v53, %v1154_v39  ;;  %v1174_v4 = vadd.f32 %v1172_v12, %v1159_v29  ;;  %v1193_v39 = vpop.permute.xlu0 %1192  ;;  %v1248_v3 = vpop.permute.xlu1 %1247  ;;  %s4649_s11 = sld [smem:[#allocation9 + $0x1]] }
 0x17f   : > { %v1179_v47 = vadd.f32 %v1177_v14, %v1164_v40  ;;  %v1209_v31 = vmul.f32 %v6867_v18, %v1187_v19  ;;  %v1160_v62 = vadd.f32 %v4325_v9, %v1145_v57  ;;  %v1165_v5 = vadd.f32 %v4328_v52, %v1150_v2  ;;  %6924 = sst [smem:[#allocation48_spill]] %s4873_s14 }
 0x180   : > { %v4614_v6 = vmul.f32 %v1345_v37, %v4043_v22  ;;  %v1201_v20 = vadd.f32 %v1199_v45, %v1169_v55  ;;  %v1206_v44 = vadd.f32 %v1204_v33, %v1174_v4  ;;  %v6868_v35 = vmov %v6862_v49  ;;  %v6885_v55 = vld [vmem:[#allocation81_spill] sm:$0xff]  ;;  %6925 = sst [smem:[#allocation49_spill]] %s4879_s1 }
 0x181   : > { %v1211_v61 = vadd.f32 %v1209_v31, %v1179_v47  ;;  %v1168_v26 = vmul.f32 %v6868_v35, %v1133_v21  ;;  %v6869_v11 = vmov %v6863_v56  ;;  %v6870_v1 = vmov %v6864_v54  ;;  %v6886_v47 = vld [vmem:[#allocation83_spill] sm:$0xff]  ;;  %v6887_v31 = vld [vmem:[#allocation84_spill] sm:$0xff]  ;;  %s4885_s8 = sld [smem:[#allocation11 + $0x46]] }
 0x182   : > { %v1173_v32 = vmul.f32 %v6869_v11, %v1133_v21  ;;  %v1178_v60 = vmul.f32 %v6870_v1, %v1133_v21  ;;  %v6871_v7 = vmov %v6865_v42  ;;  %v6873_v24 = vmov %v6866_v13  ;;  %v1195_v33 = vpop.permute.xlu0 %1194  ;;  %s4915_s16 = sld [smem:[#allocation11 + $0x2]] }
 0x183   : > { %v1200_v9 = vmul.f32 %v6871_v7, %v1189_v58  ;;  %v1205_v52 = vmul.f32 %v6873_v24, %v1189_v58  ;;  %v1170_v38 = vadd.f32 %v1168_v26, %v1155_v51  ;;  %v6875_v22 = vmov %v6867_v18  ;;  %v1250_v51 = vpop.permute.xlu1 %1249 }
 0x184   : > { %v1210_v50 = vmul.f32 %v6875_v22, %v1189_v58  ;;  %v1216_v0 = vadd.f32 %v4340_v15, %v1201_v20  ;;  %v1221_v27 = vadd.f32 %v4356_v16, %v1206_v44  ;;  %v1175_v36 = vadd.f32 %v1173_v32, %v1160_v62  ;;  %v6895_v22 = vld [vmem:[#allocation86_spill] sm:$0xff] }
 0x185   : > { %v1180_v63 = vadd.f32 %v1178_v60, %v1165_v5  ;;  %v1226_v29 = vadd.f32 %v4359_v41, %v1211_v61  ;;  %v1360_v43 = vstv %s4595_s9  ;;  %v1202_v46 = vadd.f32 %v1200_v9, %v1170_v38  ;;  %s4887_s9 = sld [smem:[#allocation11 + $0x13]] }
 0x186   : > { %v6879_v40 = vstv %s4220_s15  ;;  %v6880_v25 = vstv %s6872_s30  ;;  %v6881_v53 = vstv %s6874_s13  ;;  %v1207_v56 = vadd.f32 %v1205_v52, %v1175_v36  ;;  %v1254_v36 = vpop.permute.xlu0 %1253  ;;  %s4889_s30 = sld [smem:[#allocation11 + $0x2e]] }
 0x187   : > { %v1229_v19 = vmul.f32 %v6879_v40, %v1193_v39  ;;  %v1234_v49 = vmul.f32 %v6880_v25, %v1193_v39  ;;  %v1239_v15 = vmul.f32 %v6881_v53, %v1193_v39  ;;  %v1212_v12 = vadd.f32 %v1210_v50, %v1180_v63  ;;  %v6897_v63 = vld [vmem:[#allocation89_spill] sm:$0xff]  ;;  %6926 = sst [smem:[#allocation50_spill]] %s4885_s8 }
 0x188   : > { %v6882_v16 = vstv %s6876_s28  ;;  %v6883_v14 = vstv %s6877_s22  ;;  %v6884_v45 = vstv %s6878_s0  ;;  %v1217_v4 = vadd.f32 %v6885_v55, %v1202_v46  ;;  %s4891_s13 = sld [smem:[#allocation11 + $0x49]] }
 0x189   : > { %v1260_v54 = vmul.f32 %v6882_v16, %v1248_v3  ;;  %v1265_v57 = vmul.f32 %v6883_v14, %v1248_v3  ;;  %v1231_v41 = vadd.f32 %v1229_v19, %v1216_v0  ;;  %v1236_v2 = vadd.f32 %v1234_v49, %v1221_v27  ;;  %s4897_s28 = sld [smem:[#allocation11 + $0x16]] }
 0x18a   : > { %v1241_v42 = vadd.f32 %v1239_v15, %v1226_v29  ;;  %v1270_v13 = vmul.f32 %v6884_v45, %v1248_v3  ;;  %v1222_v18 = vadd.f32 %v6886_v47, %v1207_v56  ;;  %v1227_v21 = vadd.f32 %v6887_v31, %v1212_v12  ;;  %v1309_v29 = vpop.permute.xlu1 %1308  ;;  %v6898_v3 = vld [vmem:[#allocation79_spill] sm:$0xff]  ;;  %v1256_v55 = vpop.permute.xlu0 %1255  ;;  %s4899_s22 = sld [smem:[#allocation11 + $0x31]] }
 0x18b   : > { %v4652_v62 = vmul.f32 %v1345_v37, %v4057_v23  ;;  %v1262_v5 = vadd.f32 %v1260_v54, %v1231_v41  ;;  %v1267_v58 = vadd.f32 %v1265_v57, %v1236_v2  ;;  %v6888_v44 = vmov %v6879_v40  ;;  %v6894_v37 = vld [vmem:[#allocation85_spill] sm:$0xff]  ;;  %v6904_v41 = vld [vmem:[#allocation82_spill] sm:$0xff]  ;;  %s4901_s0 = sld [smem:[#allocation11 + $0x4c]] }
 0x18c   : > { %v1272_v20 = vadd.f32 %v1270_v13, %v1241_v42  ;;  %v1230_v61 = vmul.f32 %v6888_v44, %v1195_v33  ;;  %v6889_v35 = vmov %v6880_v25  ;;  %v6890_v11 = vmov %v6881_v53  ;;  %s4913_s15 = sld [smem:[#allocation11 + $0x4f]] }
 0x18d   : > { %v1235_v26 = vmul.f32 %v6889_v35, %v1195_v33  ;;  %v1240_v32 = vmul.f32 %v6890_v11, %v1195_v33  ;;  %v6891_v1 = vmov %v6882_v16  ;;  %v6892_v7 = vmov %v6883_v14  ;;  %v6905_v33 = vld [vmem:[#allocation80_spill] sm:$0xff]  ;;  %6934 = sst [smem:[#allocation57_spill]] %s4915_s16 }
 0x18e   : > { %v1261_v60 = vmul.f32 %v6891_v1, %v1250_v51  ;;  %v1266_v9 = vmul.f32 %v6892_v7, %v1250_v51  ;;  %v1232_v24 = vadd.f32 %v1230_v61, %v1217_v4  ;;  %v6893_v52 = vmov %v6884_v45  ;;  %v6906_v4 = vld [vmem:[#allocation87_spill] sm:$0xff]  ;;  %s5034_s16 = sld [smem:[#allocation11 + $0x27]] }
 0x18f   : > { %v1271_v23 = vmul.f32 %v6893_v52, %v1250_v51  ;;  %v1277_v38 = vadd.f32 %v6894_v37, %v1262_v5  ;;  %v1282_v50 = vadd.f32 %v6895_v22, %v1267_v58  ;;  %v1237_v0 = vadd.f32 %v1235_v26, %v1222_v18  ;;  %v6907_v18 = vld [vmem:[#allocation88_spill] sm:$0xff]  ;;  %v1311_v5 = vpop.permute.xlu1 %1310  ;;  %6927 = sst [smem:[#allocation51_spill]] %s4897_s28 }
 0x190   : > { %v1242_v27 = vadd.f32 %v1240_v32, %v1227_v21  ;;  %v1287_v39 = vadd.f32 %v6897_v63, %v1272_v20  ;;  %vm1389_vm0 = vcmp.ge.s32.totalorder %v6898_v3, 0  ;;  %vm1391_vm1 = vcmp.lt.s32.totalorder %v6898_v3, 16  ;;  %v6908_v21 = vld [vmem:[#allocation90_spill] sm:$0xff]  ;;  %6928 = sst [smem:[#allocation52_spill]] %s4899_s22 }
 0x191   : > { %v1365_v46 = vstv %s4631_s6  ;;  %v1263_v40 = vadd.f32 %v1261_v60, %v1232_v24  ;;  %v6900_v19 = vstv %s4315_s7  ;;  %v6901_v49 = vstv %s4330_s3  ;;  %vm1393_vm5 = vmand %vm1389_vm0, %vm1391_vm1  ;;  %s6915_s3 = smov 127   ;;  %s4829_s7 = sld [smem:[#allocation11 + $0x1c]] }
 0x192   : > { %v1290_v25 = vmul.f32 %v6900_v19, %v1254_v36  ;;  %v1295_v53 = vmul.f32 %v6901_v49, %v1254_v36  ;;  %v6902_v15 = vstv %s4336_s19  ;;  %v1268_v12 = vadd.f32 %v1266_v9, %v1237_v0  ;;  %v1315_v0 = vpop.permute.xlu0 %1314  ;;  %s4831_s19 = sld [smem:[#allocation11 + $0x37]] }
 0x193   : > { %v1300_v56 = vmul.f32 %v6902_v15, %v1254_v36  ;;  %v1273_v16 = vadd.f32 %v1271_v23, %v1242_v27  ;;  %v6903_v54 = vstv %s4365_s26  ;;  %v1326_v57 = vmul.f32 %v1325_v48, %v1309_v29  ;;  %v1317_v63 = vpop.permute.xlu1 %1316  ;;  %s4833_s26 = sld [smem:[#allocation11 + $0x4]] }
 0x194   : > { %v1321_v14 = vmul.f32 %v6903_v54, %v1309_v29  ;;  %vm1390_vm2 = vcmp.ge.s32.totalorder %v6904_v41, 0  ;;  %vm1392_vm3 = vcmp.lt.s32.totalorder %v6904_v41, 16  ;;  %v1292_v2 = vadd.f32 %v1290_v25, %v1277_v38  ;;  %6929 = sst [smem:[#allocation53_spill]] %s4901_s0 }
 0x195   : > { %v1297_v42 = vadd.f32 %v1295_v53, %v1282_v50  ;;  %v1302_v45 = vadd.f32 %v1300_v56, %v1287_v39  ;;  %v1331_v13 = vmul.f32 %v1330_v8, %v1309_v29  ;;  %vm1395_vm4 = vcmp.lt.s32.totalorder %v6905_v33, 16  ;;  %vm1394_vm6 = vmand %vm1390_vm2, %vm1392_vm3  ;;  %s4905_s6 = sld [smem:[#allocation11 + $0x19]] }
 0x196   : > { %v1278_v47 = vadd.f32 %v6906_v4, %v1263_v40  ;;  %v1283_v31 = vadd.f32 %v6907_v18, %v1268_v12  ;;  %v1288_v51 = vadd.f32 %v6908_v21, %v1273_v16  ;;  %v1370_v58 = vstv %s4649_s11  ;;  %vm1396_vm7 = vmand %vm1393_vm5, %vm1395_vm4  ;;  %s4911_s11 = sld [smem:[#allocation11 + $0x34]] }
 0x197   : > { %v1323_v20 = vadd.f32 %v1321_v14, %v1292_v2  ;;  %v1328_v44 = vadd.f32 %v1326_v57, %v1297_v42  ;;  %v1333_v61 = vadd.f32 %v1331_v13, %v1302_v45  ;;  %v6909_v35 = vmov %v6900_v19  ;;  %vm4740_vm8 = vmand %vm1394_vm6, %vm1395_vm4  ;;  %6933 = sst [smem:[#allocation56_spill]] %s4913_s15 }
 0x198   : > { %v1291_v26 = vmul.f32 %v6909_v35, %v1256_v55  ;;  %v6910_v11 = vmov %v6901_v49  ;;  %v6911_v1 = vmov %v6902_v15  ;;  %v6912_v7 = vmov %v6903_v54  ;;  %s4925_s0 = sld [smem:[#allocation11]] }
 0x199   : > { %v1296_v32 = vmul.f32 %v6910_v11, %v1256_v55  ;;  %v1301_v60 = vmul.f32 %v6911_v1, %v1256_v55  ;;  %v1322_v9 = vmul.f32 %v6912_v7, %v1311_v5  ;;  %v1327_v24 = vmul.f32 %v1325_v48, %v1311_v5  ;;  %6917 = sst [smem:[#allocation71_spill]] %s4833_s26 }
 0x19a   : > { %v1293_v52 = vadd.f32 %v1291_v26, %v1278_v47  ;;  %v1332_v23 = vmul.f32 %v1330_v8, %v1311_v5  ;;  %v1338_v37 = vadd.f32 %v4470_v17, %v1323_v20  ;;  %v1343_v38 = vadd.f32 %v4542_v28, %v1328_v44  ;;  %s4927_s22 = sld [smem:[#allocation11 + $0x1b]] }
 0x19b   : > { %v1298_v22 = vadd.f32 %v1296_v32, %v1283_v31  ;;  %v1303_v50 = vadd.f32 %v1301_v60, %v1288_v51  ;;  %v1348_v27 = vadd.f32 %v4614_v6, %v1333_v61  ;;  %v1375_v36 = vstv %s4671_s4  ;;  %6931 = sst [smem:[#allocation54_spill]] %s4905_s6 }
 0x19c   : > { %v1324_v39 = vadd.f32 %v1322_v9, %v1293_v52  ;;  %v1351_v48 = vmul.f32 %v1350_v59, %v1315_v0  ;;  %v1356_v29 = vmul.f32 %v1355_v10, %v1315_v0  ;;  %v1361_v8 = vmul.f32 %v1360_v43, %v1315_v0  ;;  %6932 = sst [smem:[#allocation55_spill]] %s4911_s11 }
 0x19d   : > { %v1329_v40 = vadd.f32 %v1327_v24, %v1298_v22  ;;  %v1334_v17 = vadd.f32 %v1332_v23, %v1303_v50  ;;  %v1352_v28 = vmul.f32 %v1350_v59, %v1317_v63  ;;  %v1357_v19 = vmul.f32 %v1355_v10, %v1317_v63  ;;  %s4917_s4 = sld [smem:[#allocation11 + $0x1d]] }
 0x19e   : > { %v1353_v6 = vadd.f32 %v1351_v48, %v1338_v37  ;;  %v1358_v25 = vadd.f32 %v1356_v29, %v1343_v38  ;;  %v1363_v49 = vadd.f32 %v1361_v8, %v1348_v27  ;;  %v1339_v53 = vadd.f32 %v4506_v34, %v1324_v39  ;;  %s4923_s6 = sld [smem:[#allocation11 + $0x38]] }
 0x19f   : > { %v1344_v15 = vadd.f32 %v4578_v30, %v1329_v40  ;;  %v1349_v56 = vadd.f32 %v4652_v62, %v1334_v17  ;;  %v1362_v12 = vmul.f32 %v1360_v43, %v1317_v63  ;;  %6937 = sst [smem:[#allocation61_spill]] %s4925_s0  ;;  %v1437_v52 = vstv %s4823_s23 }
 0x1a0   : > { %v1366_v59 = vadd.f32 %v1365_v46, %v1353_v6  ;;  %v1371_v10 = vadd.f32 %v1370_v58, %v1358_v25  ;;  %v1376_v16 = vadd.f32 %v1375_v36, %v1363_v49  ;;  %v1354_v3 = vadd.f32 %v1352_v28, %v1339_v53  ;;  %6938 = sst [smem:[#allocation62_spill]] %s4927_s22 }
 0x1a1   : > { %v1359_v34 = vadd.f32 %v1357_v19, %v1344_v15  ;;  %v1364_v54 = vadd.f32 %v1362_v12, %v1349_v56  ;;  %s4929_s28 = sld [smem:[#allocation11 + $0x36]]  ;;  %v1442_v23 = vstv %s4829_s7  ;;  %v1447_v37 = vstv %s4831_s19 }
 0x1a2   : > { %v1368_v30 = vmax.f32 %v1366_v59, 0.0  ;;  %v1373_v14 = vmax.f32 %v1371_v10, 0.0  ;;  %v1378_v62 = vmax.f32 %v1376_v16, 0.0  ;;  %v1367_v43 = vadd.f32 %v1365_v46, %v1354_v3  ;;  %s4935_s15 = sld [smem:[#allocation11 + $0x3]] }
 0x1a3   : > { %v1372_v2 = vadd.f32 %v1370_v58, %v1359_v34  ;;  %v1377_v41 = vadd.f32 %v1375_v36, %v1364_v54  ;;  %6935 = sst [smem:[#allocation58_spill]] %s4917_s4  ;;  %v1498_v38 = vstv %s4833_s26  ;;  %v1503_v22 = vstv %s4835_s12 }
 0x1a4   : > { %v4744_v42 = vsel %vm1396_vm7, %v1368_v30, 0.0  ;;  %v4746_v45 = vsel %vm1396_vm7, %v1373_v14, 0.0  ;;  %v4748_v13 = vsel %vm1396_vm7, %v1378_v62, 0.0  ;;  %v1369_v55 = vmax.f32 %v1367_v43, 0.0  ;;  %6936 = sst [smem:[#allocation59_spill]] %s4923_s6 }
 0x1a5   : > { %1400 = vst [vmem:[#allocation3 + $0x2] sm:$0xff] %v4744_v42  ;;  %1405 = vst [vmem:[#allocation3 + $0x12] sm:$0xff] %v4746_v45  ;;  %v1374_v46 = vmax.f32 %v1372_v2, 0.0  ;;  %v1379_v4 = vmax.f32 %v1377_v41, 0.0  ;;  %1422 = vrot.lane.b32.xlu1 %v4744_v42, %s6915_s3  ;;  %1416 = vrot.lane.b32.xlu0 %v4744_v42, %s6916_s5  ;;  %s4937_s11 = sld [smem:[#allocation11 + $0x1e]]  ;;  %v1508_v50 = vstv %s4841_s21  ;;  %v1559_v0 = vstv %s4843_s20 }
 0x1a6   : > { %1410 = vst [vmem:[#allocation3 + $0x22] sm:$0xff] %v4748_v13  ;;  %v1399_v47 = vsel %vm4740_vm8, %v1369_v55, 0.0  ;;  %s4939_s6 = sld [smem:[#allocation11 + $0x39]]  ;;  %v1564_v27 = vstv %s4845_s10  ;;  %v1569_v36 = vstv %s4851_s2  ;;  %v1620_v63 = vstv %s4857_s18 }
 0x1a7   : > { %1401 = vst [vmem:[#allocation3 + $0xa] sm:$0xf] %v1399_v47  ;;  %v1403_v18 = vsel %vm4740_vm8, %v1374_v46, 0.0  ;;  %v1408_v31 = vsel %vm4740_vm8, %v1379_v4, 0.0  ;;  %6939 = sst [smem:[#allocation64_spill]] %s4929_s28  ;;  %v1625_v39 = vstv %s4859_s29  ;;  %v1630_v48 = vstv %s4861_s24 }
 0x1a8   : > { %1406 = vst [vmem:[#allocation3 + $0x1a] sm:$0xf] %v1403_v18  ;;  %1411 = vst [vmem:[#allocation3 + $0x2a] sm:$0xf] %v1408_v31  ;;  %6940 = sst [smem:[#allocation68_spill]] %s4935_s15  ;;  %v1681_v29 = vstv %s4863_s17  ;;  %v1686_v8 = vstv %s4869_s27  ;;  %v1691_v40 = vstv %s4871_s25  ;;  %v1742_v17 = vstv %s4873_s14 }
 0x1a9   : > { %s4941_s22 = sld [smem:[#allocation11 + $0x5]]  ;;  %v1747_v28 = vstv %s4879_s1  ;;  %v1752_v19 = vstv %s4885_s8  ;;  %v1803_v6 = vstv %s4887_s9  ;;  %v1808_v49 = vstv %s4889_s30 }
 0x1aa   : > { %s4945_s28 = sld [smem:[#allocation11 + $0x20]]  ;;  %v1813_v53 = vstv %s4891_s13  ;;  %v6635_v30 = vstv %s4925_s0  ;;  %v5021_v43 = vmul.f32 %v1437_v52, %v4744_v42  ;;  %v5026_v57 = vmul.f32 %v1442_v23, %v4744_v42 }
 0x1ab   : > { %6941 = sst [smem:[#allocation72_spill]] %s4937_s11  ;;  %v5031_v2 = vmul.f32 %v1447_v37, %v4744_v42  ;;  %v5045_v42 = vmul.f32 %v1620_v63, %v4746_v45  ;;  %v5050_v4 = vmul.f32 %v1625_v39, %v4746_v45  ;;  %v5057_v47 = vmul.f32 %v1630_v48, %v4746_v45 }
 0x1ac   : > { %6942 = sst [smem:[#allocation75_spill]] %s4939_s6  ;;  %v5064_v18 = vmul.f32 %v1803_v6, %v4748_v13  ;;  %v5069_v31 = vmul.f32 %v1808_v49, %v4748_v13 }
 0x1ad   : > { %s4947_s15 = sld [smem:[#allocation11 + $0x3b]] }
 0x1ae   : > { %v4763_v21 = vld [vmem:[#allocation3 + $0xa] sm:$0x3]  ;;  %v4787_v20 = vld [vmem:[#allocation3 + $0xc] sm:$0x3]  ;;  %s4949_s11 = sld [smem:[#allocation11 + $0x6]] }
 0x1af   : > { %v4765_v51 = vld [vmem:[#allocation3 + $0x3] sm:$0xff]  ;;  %1418 = vrot.lane.b32.xlu1 %v4763_v21, %s6916_s5  ;;  %v4777_v58 = vld [vmem:[#allocation3 + $0xb] sm:$0x3]  ;;  %v4797_v44 = vld [vmem:[#allocation3 + $0x13] sm:$0xff]  ;;  %6943 = sst [smem:[#allocation76_spill]] %s4941_s22  ;;  %v5085_v41 = vmul.f32 %v1437_v52, %v4763_v21  ;;  %v5090_v54 = vmul.f32 %v1442_v23, %v4763_v21 }
 0x1b0   : > { %1471 = vrot.lane.b32.xlu0 %v4765_v51, %s6916_s5  ;;  %v4775_v5 = vld [vmem:[#allocation3 + $0x4] sm:$0xff]  ;;  %v4799_v61 = vld [vmem:[#allocation3 + $0x1a] sm:$0x3]  ;;  %v4821_v11 = vld [vmem:[#allocation3 + $0x1c] sm:$0x3]  ;;  %6944 = sst [smem:[#allocation60_spill]] %s4945_s28  ;;  %v5107_v52 = vmul.f32 %v1498_v38, %v4765_v51  ;;  %v5117_v23 = vmul.f32 %v1508_v50, %v4765_v51  ;;  %v5153_v16 = vmul.f32 %v1508_v50, %v4777_v58  ;;  %v5176_v50 = vmul.f32 %v1681_v29, %v4797_v44 }
 0x1b1   : > { %v4809_v35 = vld [vmem:[#allocation3 + $0x14] sm:$0xff]  ;;  %v4847_v32 = vld [vmem:[#allocation3 + $0x23] sm:$0xff]  ;;  %v4877_v7 = vld [vmem:[#allocation3 + $0x2b] sm:$0x3]  ;;  %s4951_s6 = sld [smem:[#allocation11 + $0x21]]  ;;  %v5125_v46 = vmul.f32 %v1559_v0, %v4775_v5  ;;  %v5130_v55 = vmul.f32 %v1564_v27, %v4775_v5 }
 0x1b2   : > { %v4811_v26 = vld [vmem:[#allocation3 + $0x1b] sm:$0x3]  ;;  %v4849_v1 = vld [vmem:[#allocation3 + $0x2a] sm:$0x3]  ;;  %v4903_v9 = vld [vmem:[#allocation3 + $0x2c] sm:$0x3] }
 0x1b3   : > { %1477 = vrot.lane.b32.xlu1 %v4765_v51, %s6915_s3  ;;  %v4875_v60 = vld [vmem:[#allocation3 + $0x24] sm:$0xff]  ;;  %6930 = vst [vmem:[#allocation81_spill] sm:$0xff] %v4903_v9  ;;  %6945 = sst [smem:[#allocation65_spill]] %s4947_s15  ;;  %v2168_v25 = vld [vmem:[#allocation3 + $0x15] sm:$0xff]  ;;  %v5290_v10 = vmul.f32 %v1808_v49, %v4849_v1 }
 0x1b4   : > { %1424 = vrot.lane.b32.xlu0 %v4763_v21, %s6915_s3  ;;  %v2063_v24 = vld [vmem:[#allocation3 + $0x5] sm:$0xff]  ;;  %6946 = sst [smem:[#allocation67_spill]] %s4949_s11 }
 0x1b5   : > { %s4957_s22 = sld [smem:[#allocation11 + $0x3c]]  ;;  %7006 = vst [vmem:[#allocation84_spill] sm:$0xff] %v5290_v10 }
 0x1b6   : > { %s4960_s28 = sld [smem:[#allocation11 + $0x8]] }
 0x1b7   : > { %1532 = vrot.lane.b32.xlu1 %v4775_v5, %s6916_s5  ;;  %6947 = sst [smem:[#allocation63_spill]] %s4951_s6 }
 0x1b8   : > { %1473 = vrot.lane.b32.xlu0 %v4777_v58, %s6916_s5  ;;  %s4966_s6 = sld [smem:[#allocation11 + $0x23]] }
 0x1b9   : > { %s4969_s11 = sld [smem:[#allocation11 + $0x3e]] }
 0x1ba   : > { %s6956_s2 = sld [smem:[#allocation53_spill]] }
 0x1bb   : > { %1538 = vrot.lane.b32.xlu1 %v4775_v5, %s6915_s3  ;;  %6948 = sst [smem:[#allocation69_spill]] %s4957_s22 }
 0x1bc   : > { %1479 = vrot.lane.b32.xlu0 %v4777_v58, %s6915_s3  ;;  %6949 = sst [smem:[#allocation66_spill]] %s4960_s28 }
 0x1bd   : > { %s4978_s28 = sld [smem:[#allocation11 + $0x9]] }
 0x1be   : > { %6950 = sst [smem:[#allocation70_spill]] %s4966_s6 }
 0x1bf   : > { %1593 = vrot.lane.b32.xlu1 %v4746_v45, %s6916_s5  ;;  %6951 = sst [smem:[#allocation91_spill]] %s4969_s11 }
 0x1c0   : > { %1534 = vrot.lane.b32.xlu0 %v4787_v20, %s6916_s5  ;;  %s6953_s6 = sld [smem:[#allocation51_spill]]  ;;  %v1874_v12 = vstv %s6956_s2 }
 0x1c1   : > { %s6954_s11 = sld [smem:[#allocation52_spill]] }
 0x1c2   : > { %s4982_s22 = sld [smem:[#allocation11 + $0x24]] }
 0x1c3   : > { %1599 = vrot.lane.b32.xlu1 %v4746_v45, %s6915_s3  ;;  %6952 = sst [smem:[#allocation92_spill]] %s4978_s28  ;;  %v5148_v45 = vmul.f32 %v1503_v22, %v4777_v58 }
 0x1c4   : > { %1540 = vrot.lane.b32.xlu0 %v4787_v20, %s6915_s3  ;;  %s6957_s10 = sld [smem:[#allocation54_spill]] }
 0x1c5   : > { %s4988_s20 = sld [smem:[#allocation11 + $0x3f]] }
 0x1c6   : > { %s6959_s28 = sld [smem:[#allocation55_spill]]  ;;  %v1864_v15 = vstv %s6953_s6 }
 0x1c7   : > { %1654 = vrot.lane.b32.xlu1 %v4797_v44, %s6916_s5  ;;  %s6960_s21 = sld [smem:[#allocation56_spill]]  ;;  %v1869_v56 = vstv %s6954_s11 }
 0x1c8   : > { %1595 = vrot.lane.b32.xlu0 %v4799_v61, %s6916_s5  ;;  %6955 = sst [smem:[#allocation51_spill]] %s4982_s22 }
 0x1c9   : > { %s4994_s26 = sld [smem:[#allocation11 + $0xb]] }
 0x1ca   : > { %s6963_s22 = sld [smem:[#allocation62_spill]]  ;;  %v1925_v59 = vstv %s6957_s10 }
 0x1cb   : > { %1660 = vrot.lane.b32.xlu1 %v4797_v44, %s6915_s3  ;;  %6958 = sst [smem:[#allocation52_spill]] %s4988_s20 }
 0x1cc   : > { %1601 = vrot.lane.b32.xlu0 %v4799_v61, %s6915_s3  ;;  %s5002_s20 = sld [smem:[#allocation11 + $0x26]]  ;;  %v6634_v3 = vstv %s6959_s28 }
 0x1cd   : > { %s5008_s1 = sld [smem:[#allocation11 + $0x41]]  ;;  %v6633_v34 = vstv %s6960_s21  ;;  %v5308_v49 = vmul.f32 %v6634_v3, %v4875_v60 }
 0x1ce   : > { %s6972_s4 = sld [smem:[#allocation60_spill]]  ;;  %v5313_v62 = vmul.f32 %v6633_v34, %v4875_v60 }
 0x1cf   : > { %1715 = vrot.lane.b32.xlu1 %v4809_v35, %s6916_s5  ;;  %6962 = sst [smem:[#allocation53_spill]] %s4994_s26  ;;  %7014 = vst [vmem:[#allocation89_spill] sm:$0xff] %v5308_v49 }
 0x1d0   : > { %1656 = vrot.lane.b32.xlu0 %v4811_v26, %s6916_s5  ;;  %v6637_v14 = vstv %s6963_s22  ;;  %6973 = sst [smem:[#allocation60_spill]] %s5034_s16  ;;  %7015 = vst [vmem:[#allocation79_spill] sm:$0xff] %v5313_v62 }
 0x1d1   : > { %s5052_s16 = sld [smem:[#allocation11 + $0x42]] }
 0x1d2   : > { %6965 = sst [smem:[#allocation54_spill]] %s5002_s20 }
 0x1d3   : > { %1721 = vrot.lane.b32.xlu1 %v4809_v35, %s6915_s3  ;;  %6968 = sst [smem:[#allocation93_spill]] %s5008_s1 }
 0x1d4   : > { %1662 = vrot.lane.b32.xlu0 %v4811_v26, %s6915_s3  ;;  %s5016_s20 = sld [smem:[#allocation11 + $0xc]] }
 0x1d5   : > { %s5059_s1 = sld [smem:[#allocation11 + $0xe]] }
 0x1d6   : > { %s5080_s21 = sld [smem:[#allocation11 + $0x29]] }
 0x1d7   : > { %1776 = vrot.lane.b32.xlu1 %v4748_v13, %s6916_s5  ;;  %6976 = sst [smem:[#allocation95_spill]] %s5052_s16 }
 0x1d8   : > { %1717 = vrot.lane.b32.xlu0 %v4821_v11, %s6916_s5  ;;  %s5120_s7 = sld [smem:[#allocation11 + $0xf]] }
 0x1d9   : > { %s5142_s16 = sld [smem:[#allocation11 + $0x2a]] }
 0x1da   : > { %6970 = sst [smem:[#allocation94_spill]] %s5016_s20 }
 0x1db   : > { %1782 = vrot.lane.b32.xlu1 %v4748_v13, %s6915_s3  ;;  %6977 = sst [smem:[#allocation96_spill]] %s5059_s1 }
 0x1dc   : > { %1723 = vrot.lane.b32.xlu0 %v4821_v11, %s6915_s3  ;;  %s5098_s20 = sld [smem:[#allocation11 + $0x44]] }
 0x1dd   : > { %s5160_s14 = sld [smem:[#allocation11 + $0x45]] }
 0x1de   : > { %6988 = sst [smem:[#allocation73_spill]] %s5120_s7 }
 0x1df   : > { %1837 = vrot.lane.b32.xlu1 %v4847_v32, %s6916_s5  ;;  %s5178_s22 = sld [smem:[#allocation11 + $0x11]] }
 0x1e0   : > { %1778 = vrot.lane.b32.xlu0 %v4849_v1, %s6916_s5  ;;  %s5198_s1 = sld [smem:[#allocation11 + $0x2c]] }
 0x1e1   : > { %s5242_s29 = sld [smem:[#allocation11 + $0x12]] }
 0x1e2   : > { %6986 = sst [smem:[#allocation71_spill]] %s5098_s20 }
 0x1e3   : > { %1843 = vrot.lane.b32.xlu1 %v4847_v32, %s6915_s3  ;;  %6991 = sst [smem:[#allocation74_spill]] %s5160_s14 }
 0x1e4   : > { %1784 = vrot.lane.b32.xlu0 %v4849_v1, %s6915_s3  ;;  %s5244_s24 = sld [smem:[#allocation11 + $0x2d]] }
 0x1e5   : > { %s7000_s8 = sld [smem:[#allocation61_spill]] }
 0x1e6   : > { %s5267_s15 = sld [smem:[#allocation11 + $0x48]] }
 0x1e7   : > { %1898 = vrot.lane.b32.xlu1 %v4875_v60, %s6916_s5  ;;  %s7003_s26 = sld [smem:[#allocation62_spill]] }
 0x1e8   : > { %1839 = vrot.lane.b32.xlu0 %v4877_v7, %s6916_s5  ;;  %s7004_s25 = sld [smem:[#allocation64_spill]] }
 0x1e9   : > { %s7005_s0 = sld [smem:[#allocation53_spill]] }
 0x1ea   : > { %6997 = sst [smem:[#allocation44_spill]] %s5244_s24 }
 0x1eb   : > { %1904 = vrot.lane.b32.xlu1 %v4875_v60, %s6915_s3  ;;  %s7007_s19 = sld [smem:[#allocation54_spill]] }
 0x1ec   : > { %1845 = vrot.lane.b32.xlu0 %v4877_v7, %s6915_s3  ;;  %7001 = sst [smem:[#allocation45_spill]] %s5267_s15 }
 0x1ed   : > { %s7009_s9 = sld [smem:[#allocation93_spill]] }
 0x1ee   : > { %s7011_s23 = sld [smem:[#allocation94_spill]]  ;;  %v7022_v3 = vstv %s7004_s25 }
 0x1ef   : > { %1906 = vrot.lane.b32.xlu1 %v4903_v9, %s6915_s3  ;;  %s7012_s18 = sld [smem:[#allocation60_spill]] }
 0x1f0   : > { %1900 = vrot.lane.b32.xlu0 %v4903_v9, %s6916_s5  ;;  %s5303_s12 = sld [smem:[#allocation11 + $0x2f]] }
 0x1f1   : > { %s7013_s30 = sld [smem:[#allocation95_spill]] }
 0x1f2   : > { %s7017_s13 = sld [smem:[#allocation96_spill]] }
 0x1f3   : > { %2001 = vrot.lane.b32.xlu1 %v4765_v51, %s6915_s3  ;;  %s5322_s17 = sld [smem:[#allocation11 + $0x4a]] }
 0x1f4   : > { %1998 = vrot.lane.b32.xlu0 %v4765_v51, %s6916_s5  ;;  %s7023_s2 = sld [smem:[#allocation57_spill]] }
 0x1f5   : > { %s5349_s6 = sld [smem:[#allocation11 + $0x15]] }
 0x1f6   : > { %s7025_s10 = sld [smem:[#allocation58_spill]] }
 0x1f7   : > { %2033 = vrot.lane.b32.xlu1 %v4775_v5, %s6915_s3  ;;  %s7026_s11 = sld [smem:[#allocation59_spill]] }
 0x1f8   : > { %2030 = vrot.lane.b32.xlu0 %v4775_v5, %s6916_s5  ;;  %s5355_s27 = sld [smem:[#allocation11 + $0x30]] }
 0x1f9   : > { %7018 = sst [smem:[#allocation46_spill]] %s5322_s17 }
 0x1fa   : > { %s7028_s28 = sld [smem:[#allocation68_spill]] }
 0x1fb   : > { %2068 = vrot.lane.b32.xlu1 %v2063_v24, %s6915_s3  ;;  %7024 = sst [smem:[#allocation47_spill]] %s5349_s6 }
 0x1fc   : > { %2065 = vrot.lane.b32.xlu0 %v2063_v24, %s6916_s5  ;;  %v5074_v24 = vmul.f32 %v1813_v53, %v4748_v13  ;;  %v5095_v13 = vmul.f32 %v1447_v37, %v4763_v21  ;;  %v5112_v21 = vmul.f32 %v1503_v22, %v4765_v51  ;;  %v5140_v51 = vmul.f32 %v1498_v38, %v4777_v58  ;;  %v2273_v38 = vld [vmem:[#allocation3 + $0x25] sm:$0xff]  ;;  %s7030_s7 = sld [smem:[#allocation72_spill]] }
 0x1fd   : > { %v5166_v22 = vmul.f32 %v1564_v27, %v4787_v20  ;;  %v5171_v58 = vmul.f32 %v1569_v36, %v4787_v20  ;;  %v5186_v27 = vmul.f32 %v1686_v8, %v4797_v44  ;;  %v5240_v37 = vmul.f32 %v1691_v40, %v4811_v26  ;;  %s7031_s20 = sld [smem:[#allocation75_spill]] }
 0x1fe   : > { %7027 = sst [smem:[#allocation48_spill]] %s5355_s27 }
 0x1ff   : > { %2103 = vrot.lane.b32.xlu1 %v4797_v44, %s6915_s3  ;;  %s5370_s14 = sld [smem:[#allocation11 + $0x4b]] }
 0x200   : > { %2100 = vrot.lane.b32.xlu0 %v4797_v44, %s6916_s5  ;;  %v7036_v62 = vstv %s7028_s28  ;;  %s7038_s15 = sld [smem:[#allocation76_spill]] }
 0x201   : > { %s7041_s24 = sld [smem:[#allocation65_spill]] }
 0x202   : > { %s7047_s25 = sld [smem:[#allocation67_spill]] }
 0x203   : > { %2138 = vrot.lane.b32.xlu1 %v4809_v35, %s6915_s3  ;;  %s7051_s27 = sld [smem:[#allocation69_spill]] }
 0x204   : > { %2135 = vrot.lane.b32.xlu0 %v4809_v35, %s6916_s5 }
 0x205   : > { %7032 = sst [smem:[#allocation49_spill]] %s5370_s14 }
 0x206   : > { %s7062_s14 = sld [smem:[#allocation91_spill]] }
 0x207   : > { %2173 = vrot.lane.b32.xlu1 %v2168_v25, %s6915_s3 }
 0x208   : > { %2170 = vrot.lane.b32.xlu0 %v2168_v25, %s6916_s5  ;;  %v5135_v25 = vmul.f32 %v1569_v36, %v4775_v5  ;;  %v5158_v5 = vmul.f32 %v1559_v0, %v4787_v20  ;;  %v5191_v20 = vmul.f32 %v1691_v40, %v4797_v44  ;;  %v5196_v36 = vmul.f32 %v1620_v63, %v4799_v61 }
 0x209   : > { %v5208_v0 = vmul.f32 %v1630_v48, %v4799_v61  ;;  %v5215_v44 = vmul.f32 %v1742_v17, %v4809_v35  ;;  %v5220_v63 = vmul.f32 %v1747_v28, %v4809_v35  ;;  %v5235_v48 = vmul.f32 %v1686_v8, %v4811_v26 }
 0x20a   : > { %v5264_v8 = vmul.f32 %v1864_v15, %v4847_v32 }
 0x20b   : > { %2208 = vrot.lane.b32.xlu1 %v4847_v32, %s6915_s3 }
 0x20c   : > { %2205 = vrot.lane.b32.xlu0 %v4847_v32, %s6916_s5 }
 0x20f   : > { %2243 = vrot.lane.b32.xlu1 %v4875_v60, %s6915_s3 }
 0x210   : > { %2240 = vrot.lane.b32.xlu0 %v4875_v60, %s6916_s5 }
 0x213   : > { %2278 = vrot.lane.b32.xlu1 %v2273_v38, %s6915_s3  ;;  %s5285_s3 = sld [smem:[#allocation11 + $0x14]] }
 0x214   : > { %2275 = vrot.lane.b32.xlu0 %v2273_v38, %s6916_s5  ;;  %v5203_v38 = vmul.f32 %v1625_v39, %v4799_v61  ;;  %s5210_s5 = sld [smem:[#allocation11 + $0x47]]  ;;  %v5225_v39 = vmul.f32 %v1752_v19, %v4809_v35  ;;  %v5230_v61 = vmul.f32 %v1681_v29, %v4811_v26  ;;  %v5249_v35 = vmul.f32 %v1742_v17, %v4821_v11 }
 0x215   : > { %v5254_v29 = vmul.f32 %v1747_v28, %v4821_v11  ;;  %v5259_v26 = vmul.f32 %v1752_v19, %v4821_v11  ;;  %v5272_v17 = vmul.f32 %v1869_v56, %v4847_v32  ;;  %v5277_v11 = vmul.f32 %v1874_v12, %v4847_v32 }
 0x216   : > { %v5282_v28 = vmul.f32 %v1803_v6, %v4849_v1  ;;  %v5295_v32 = vmul.f32 %v1813_v53, %v4849_v1  ;;  %v5300_v6 = vmul.f32 %v1925_v59, %v4875_v60  ;;  %v5318_v1 = vmul.f32 %v1864_v15, %v4877_v7 }
 0x217   : > { %v1417_v40 = vpop.permute.xlu0 %1416  ;;  %v5327_v19 = vmul.f32 %v1869_v56, %v4877_v7  ;;  %v5332_v60 = vmul.f32 %v1874_v12, %v4877_v7  ;;  %v5337_v15 = vmul.f32 %v1925_v59, %v4903_v9  ;;  %v1423_v12 = vpop.permute.xlu1 %1422  ;;  %v7035_v7 = vstv %s7000_s8  ;;  %s5392_s8 = sld [smem:[#allocation11 + $0x17]] }
 0x218   : > { %7002 = vst [vmem:[#allocation83_spill] sm:$0xff] %v5282_v28  ;;  %7008 = vst [vmem:[#allocation85_spill] sm:$0xff] %v5295_v32  ;;  %v1429_v53 = vmul.f32 %v6635_v30, %v1417_v40  ;;  %v1432_v34 = vmul.f32 %v6637_v14, %v1417_v40  ;;  %v1435_v30 = vmul.f32 %v7022_v3, %v1417_v40  ;;  %v7029_v40 = vstv %s7023_s2 }
 0x219   : > { %7010 = vst [vmem:[#allocation86_spill] sm:$0xff] %v5300_v6  ;;  %7016 = vst [vmem:[#allocation82_spill] sm:$0xff] %v5318_v1  ;;  %v1453_v33 = vmul.f32 %v7029_v40, %v1423_v12  ;;  %v7037_v6 = vstv %s7030_s7  ;;  %v7042_v14 = vmov %v7022_v3 }
 0x21a   : > { %7019 = vst [vmem:[#allocation87_spill] sm:$0xff] %v5327_v19  ;;  %7020 = vst [vmem:[#allocation88_spill] sm:$0xff] %v5332_v60  ;;  %v1440_v19 = vadd.f32 %v5021_v43, %v1429_v53  ;;  %v1445_v1 = vadd.f32 %v5026_v57, %v1432_v34  ;;  %v1450_v59 = vadd.f32 %v5031_v2, %v1435_v30  ;;  %v7033_v53 = vstv %s7025_s10 }
 0x21b   : > { %7021 = vst [vmem:[#allocation90_spill] sm:$0xff] %v5337_v15  ;;  %v1458_v56 = vmul.f32 %v7033_v53, %v1423_v12  ;;  %v7034_v34 = vstv %s7026_s11  ;;  %v1828_v43 = vstv %s5322_s17  ;;  %v7039_v53 = vstv %s7031_s20  ;;  %s5416_s17 = sld [smem:[#allocation11 + $0x4d]] }
 0x21c   : > { %v1463_v57 = vmul.f32 %v7034_v34, %v1423_v12  ;;  %v1455_v15 = vadd.f32 %v1453_v33, %v1440_v19  ;;  %v7040_v34 = vstv %s7003_s26  ;;  %v1849_v33 = vstv %s5349_s6  ;;  %s5396_s26 = sld [smem:[#allocation11 + $0x32]] }
 0x21d   : > { %v1460_v60 = vadd.f32 %v1458_v56, %v1445_v1  ;;  %s7049_s6 = sld [smem:[#allocation63_spill]] }
 0x21e   : > { %v1465_v49 = vadd.f32 %v1463_v57, %v1450_v59 }
 0x221   : > { %v1419_v30 = vpop.permute.xlu1 %1418 }
 0x222   : > { %v1472_v2 = vpop.permute.xlu0 %1471  ;;  %v1430_v40 = vmul.f32 %v7035_v7, %v1419_v30  ;;  %v1433_v10 = vmul.f32 %v7040_v34, %v1419_v30  ;;  %v1436_v3 = vmul.f32 %v7042_v14, %v1419_v30  ;;  %7043 = sst [smem:[#allocation50_spill]] %s5396_s26  ;;  %v7044_v14 = vstv %s7038_s15 }
 0x223   : > { %v1484_v9 = vmul.f32 %v7036_v62, %v1472_v2  ;;  %v1489_v32 = vmul.f32 %v7037_v6, %v1472_v2  ;;  %v1494_v12 = vmul.f32 %v7039_v53, %v1472_v2  ;;  %v7046_v30 = vstv %s7041_s24 }
 0x224   : > { %v1441_v62 = vadd.f32 %v5085_v41, %v1430_v40  ;;  %v7057_v7 = vstv %s7030_s7  ;;  %s7067_s7 = sld [smem:[#allocation51_spill]] }
 0x225   : > { %v1486_v28 = vadd.f32 %v1484_v9, %v1455_v15  ;;  %v1491_v19 = vadd.f32 %v1489_v32, %v1460_v60  ;;  %v1496_v1 = vadd.f32 %v1494_v12, %v1465_v49  ;;  %v1478_v6 = vpop.permute.xlu1 %1477  ;;  %v7045_v15 = vstv %s6972_s4 }
 0x226   : > { %v1425_v56 = vpop.permute.xlu0 %1424  ;;  %v1514_v9 = vmul.f32 %v7044_v14, %v1478_v6  ;;  %v1519_v57 = vmul.f32 %v7045_v15, %v1478_v6  ;;  %v1524_v2 = vmul.f32 %v7046_v30, %v1478_v6  ;;  %v7048_v32 = vstv %s7023_s2  ;;  %s7058_s2 = sld [smem:[#allocation66_spill]] }
 0x227   : > { %v1501_v59 = vadd.f32 %v5107_v52, %v1486_v28  ;;  %v1506_v53 = vadd.f32 %v5112_v21, %v1491_v19  ;;  %v1511_v41 = vadd.f32 %v5117_v23, %v1496_v1  ;;  %v1454_v49 = vmul.f32 %v7048_v32, %v1425_v56 }
 0x228   : > { %v7050_v60 = vstv %s7025_s10  ;;  %v1446_v12 = vadd.f32 %v5090_v54, %v1433_v10  ;;  %v1451_v52 = vadd.f32 %v5095_v13, %v1436_v3  ;;  %v7052_v28 = vstv %s7026_s11  ;;  %s7060_s10 = sld [smem:[#allocation42_spill]] }
 0x229   : > { %v1459_v40 = vmul.f32 %v7050_v60, %v1425_v56  ;;  %v1464_v34 = vmul.f32 %v7052_v28, %v1425_v56  ;;  %v1516_v21 = vadd.f32 %v1514_v9, %v1501_v59  ;;  %v1521_v23 = vadd.f32 %v1519_v57, %v1506_v53  ;;  %v1533_v14 = vpop.permute.xlu1 %1532  ;;  %s7061_s11 = sld [smem:[#allocation70_spill]] }
 0x22a   : > { %v1526_v19 = vadd.f32 %v1524_v2, %v1511_v41  ;;  %v1456_v1 = vadd.f32 %v1454_v49, %v1441_v62  ;;  %v1474_v15 = vpop.permute.xlu0 %1473  ;;  %v7053_v32 = vstv %s7047_s25  ;;  %v7054_v54 = vstv %s7049_s6 }
 0x22b   : > { %v1461_v30 = vadd.f32 %v1459_v40, %v1446_v12  ;;  %v1545_v10 = vmul.f32 %v7053_v32, %v1533_v14  ;;  %v1550_v13 = vmul.f32 %v7054_v54, %v1533_v14  ;;  %v7055_v3 = vstv %s7051_s27 }
 0x22c   : > { %v1555_v60 = vmul.f32 %v7055_v3, %v1533_v14  ;;  %v1466_v56 = vadd.f32 %v1464_v34, %v1451_v52  ;;  %v7056_v28 = vstv %s7028_s28  ;;  %v1490_v59 = vmul.f32 %v7057_v7, %v1474_v15  ;;  %s7066_s28 = sld [smem:[#allocation92_spill]] }
 0x22d   : > { %v1485_v6 = vmul.f32 %v7056_v28, %v1474_v15  ;;  %v7059_v9 = vstv %s7031_s20  ;;  %v1547_v62 = vadd.f32 %v1545_v10, %v1516_v21  ;;  %v1552_v2 = vadd.f32 %v1550_v13, %v1521_v23  ;;  %v1539_v52 = vpop.permute.xlu1 %1538 }
 0x22e   : > { %v1495_v57 = vmul.f32 %v7059_v9, %v1474_v15  ;;  %v1557_v53 = vadd.f32 %v1555_v60, %v1526_v19  ;;  %v1879_v41 = vstv %s5392_s8  ;;  %v1492_v40 = vadd.f32 %v1490_v59, %v1461_v30  ;;  %v1480_v34 = vpop.permute.xlu0 %1479  ;;  %s1970_s20 = sadd.s32 4294967295, %s7060_s10  ;;  %s5723_s8 = sld [smem:[#allocation14 + $0x36]] }
 0x22f   : > { %v1487_v49 = vadd.f32 %v1485_v6, %v1456_v1  ;;  %v1884_v14 = vstv %s5396_s26  ;;  %v1562_v7 = vadd.f32 %v5125_v46, %v1547_v62  ;;  %v1567_v15 = vadd.f32 %v5130_v55, %v1552_v2  ;;  %s7068_s26 = sld [smem:[#allocation52_spill]] }
 0x230   : > { %v1497_v12 = vadd.f32 %v1495_v57, %v1466_v56  ;;  %v1572_v21 = vadd.f32 %v5135_v25, %v1557_v53  ;;  %v7063_v32 = vstv %s7058_s2  ;;  %v7064_v19 = vstv %s7061_s11  ;;  %s5735_s10 = sld [smem:[#allocation14 + $0x37]] }
 0x231   : > { %v1575_v23 = vmul.f32 %v7063_v32, %v1539_v52  ;;  %v1580_v6 = vmul.f32 %v7064_v19, %v1539_v52  ;;  %v7065_v1 = vstv %s7062_s14  ;;  %v1502_v10 = vadd.f32 %v5140_v51, %v1487_v49  ;;  %v1594_v57 = vpop.permute.xlu1 %1593 }
 0x232   : > { %v1585_v30 = vmul.f32 %v7065_v1, %v1539_v52  ;;  %v1507_v54 = vadd.f32 %v5148_v45, %v1492_v40  ;;  %v1512_v46 = vadd.f32 %v5153_v16, %v1497_v12  ;;  %v7069_v13 = vstv %s7038_s15  ;;  %v1535_v62 = vpop.permute.xlu0 %1534  ;;  %s7095_s15 = sld [smem:[#allocation73_spill]] }
 0x233   : > { %v1515_v55 = vmul.f32 %v7069_v13, %v1480_v34  ;;  %v7070_v25 = vstv %s6972_s4  ;;  %v1889_v60 = vstv %s5416_s17  ;;  %v1577_v56 = vadd.f32 %v1575_v23, %v1562_v7  ;;  %s5464_s4 = sld [smem:[#allocation11 + $0x18]] }
 0x234   : > { %v1520_v3 = vmul.f32 %v7070_v25, %v1480_v34  ;;  %v1582_v28 = vadd.f32 %v1580_v6, %v1567_v15  ;;  %v7071_v59 = vstv %s7041_s24  ;;  %v1971_v51 = vstv %s1970_s20  ;;  %s5487_s24 = sld [smem:[#allocation11 + $0x33]] }
 0x235   : > { %v1525_v9 = vmul.f32 %v7071_v59, %v1480_v34  ;;  %v1587_v2 = vadd.f32 %v1585_v30, %v1572_v21  ;;  %v1517_v45 = vadd.f32 %v1515_v55, %v1502_v10  ;;  %v7072_v53 = vstv %s7066_s28  ;;  %v1600_v25 = vpop.permute.xlu1 %1599  ;;  %s5707_s17 = sld [smem:[#allocation14]] }
 0x236   : > { %v1606_v49 = vmul.f32 %v7072_v53, %v1594_v57  ;;  %v7073_v16 = vstv %s7067_s7  ;;  %v1522_v12 = vadd.f32 %v1520_v3, %v1507_v54  ;;  %v7074_v52 = vstv %s7068_s26  ;;  %v1541_v54 = vpop.permute.xlu0 %1540  ;;  %v7078_v3 = vld [vmem:[#allocation77_spill] sm:$0xff]  ;;  %s5743_s20 = sld [smem:[#allocation14 + $0x6d]] }
 0x237   : > { %v1611_v40 = vmul.f32 %v7073_v16, %v1594_v57  ;;  %v1616_v32 = vmul.f32 %v7074_v52, %v1594_v57  ;;  %v7075_v19 = vstv %s7047_s25  ;;  %v7076_v13 = vstv %s7049_s6  ;;  %s7097_s6 = sld [smem:[#allocation74_spill]] }
 0x238   : > { %v1546_v1 = vmul.f32 %v7075_v19, %v1535_v62  ;;  %v1551_v7 = vmul.f32 %v7076_v13, %v1535_v62  ;;  %v1527_v15 = vadd.f32 %v1525_v9, %v1512_v46  ;;  %v1608_v34 = vadd.f32 %v1606_v49, %v1577_v56  ;;  %s5731_s25 = sld [smem:[#allocation14 + $0x6c]] }
 0x239   : > { %v1613_v23 = vadd.f32 %v1611_v40, %v1582_v28  ;;  %v7077_v6 = vstv %s7051_s27  ;;  %v1618_v30 = vadd.f32 %v1616_v32, %v1587_v2  ;;  %v5467_v59 = vadd.s32 %v1971_v51, %v7078_v3  ;;  %s5501_s27 = sld [smem:[#allocation11 + $0x4e]] }
 0x23a   : > { %v1556_v21 = vmul.f32 %v7077_v6, %v1535_v62  ;;  %v1548_v10 = vadd.f32 %v1546_v1, %v1517_v45  ;;  %v1553_v55 = vadd.f32 %v1551_v7, %v1522_v12  ;;  %v1623_v56 = vadd.f32 %v5045_v42, %v1608_v34  ;;  %v1596_v34 = vpop.permute.xlu0 %1595 }
 0x23b   : > { %v1628_v28 = vadd.f32 %v5050_v4, %v1613_v23  ;;  %v7079_v9 = vstv %s7005_s0  ;;  %v1633_v62 = vadd.f32 %v5057_v47, %v1618_v30  ;;  %v7080_v2 = vstv %s7007_s19 }
 0x23c   : > { %v1558_v46 = vadd.f32 %v1556_v21, %v1527_v15  ;;  %v1636_v57 = vmul.f32 %v7079_v9, %v1600_v25  ;;  %v1641_v45 = vmul.f32 %v7080_v2, %v1600_v25  ;;  %v7081_v53 = vstv %s7009_s9  ;;  %v1655_v15 = vpop.permute.xlu1 %1654 }
 0x23d   : > { %v1646_v49 = vmul.f32 %v7081_v53, %v1600_v25  ;;  %v1563_v16 = vadd.f32 %v5158_v5, %v1548_v10  ;;  %v1568_v12 = vadd.f32 %v5166_v22, %v1553_v55  ;;  %v7082_v4 = vstv %s7058_s2  ;;  %s7159_s2 = smov 127  }
 0x23e   : > { %v1638_v40 = vadd.f32 %v1636_v57, %v1623_v56  ;;  %v1573_v42 = vadd.f32 %v5171_v58, %v1558_v46  ;;  %v1576_v52 = vmul.f32 %v7082_v4, %v1541_v54  ;;  %v1643_v32 = vadd.f32 %v1641_v45, %v1628_v28 }
 0x23f   : > { %v1648_v47 = vadd.f32 %v1646_v49, %v1633_v62  ;;  %v7083_v19 = vstv %s7061_s11  ;;  %v7084_v13 = vstv %s7062_s14  ;;  %v7085_v23 = vstv %s7011_s23  ;;  %s7090_s14 = sld [smem:[#allocation71_spill]]  ;;  %v1602_v49 = vpop.permute.xlu0 %1601  ;;  %s7160_s11 = smov 1  }
 0x240   : > { %v1581_v1 = vmul.f32 %v7083_v19, %v1541_v54  ;;  %v1586_v7 = vmul.f32 %v7084_v13, %v1541_v54  ;;  %v1578_v5 = vadd.f32 %v1576_v52, %v1563_v16  ;;  %v1667_v22 = vmul.f32 %v7085_v23, %v1655_v15  ;;  %v1661_v53 = vpop.permute.xlu1 %1660 }
 0x241   : > { %v7086_v6 = vstv %s7012_s18  ;;  %v7087_v21 = vstv %s7013_s30  ;;  %v7088_v25 = vstv %s7066_s28  ;;  %v7089_v46 = vstv %s7067_s7  ;;  %s5745_s28 = sld [smem:[#allocation14 + $0x2]] }
 0x242   : > { %v1672_v58 = vmul.f32 %v7086_v6, %v1655_v15  ;;  %v1677_v30 = vmul.f32 %v7087_v21, %v1655_v15  ;;  %v1583_v10 = vadd.f32 %v1581_v1, %v1568_v12  ;;  %v1588_v55 = vadd.f32 %v1586_v7, %v1573_v42  ;;  %v7092_v12 = vld [vmem:[#allocation78_spill] sm:$0xff]  ;;  %s5753_s7 = sld [smem:[#allocation14 + $0x38]] }
 0x243   : > { %v1607_v3 = vmul.f32 %v7088_v25, %v1596_v34  ;;  %v1612_v56 = vmul.f32 %v7089_v46, %v1596_v34  ;;  %v1669_v54 = vadd.f32 %v1667_v22, %v1638_v40  ;;  %v7091_v57 = vstv %s7068_s26  ;;  %s7126_s26 = sld [smem:[#allocation49_spill]] }
 0x244   : > { %v1674_v28 = vadd.f32 %v1672_v58, %v1643_v32  ;;  %v1679_v9 = vadd.f32 %v1677_v30, %v1648_v47  ;;  %v1617_v62 = vmul.f32 %v7091_v57, %v1596_v34  ;;  %v1910_v16 = vstv %s5464_s4  ;;  %v1716_v30 = vpop.permute.xlu1 %1715  ;;  %s5757_s4 = sld [smem:[#allocation14 + $0x6e]] }
 0x245   : > { %v1609_v2 = vadd.f32 %v1607_v3, %v1578_v5  ;;  %v1614_v45 = vadd.f32 %v1612_v56, %v1583_v10  ;;  %v5505_v42 = vadd.s32 %v1971_v51, %v7092_v12  ;;  %v1684_v4 = vadd.f32 %v5176_v50, %v1669_v54  ;;  %v1657_v10 = vpop.permute.xlu0 %1656 }
 0x246   : > { %v1619_v40 = vadd.f32 %v1617_v62, %v1588_v55  ;;  %v1689_v52 = vadd.f32 %v5186_v27, %v1674_v28  ;;  %v1694_v32 = vadd.f32 %v5191_v20, %v1679_v9  ;;  %v7093_v47 = vstv %s7017_s13 }
 0x247   : > { %v1697_v19 = vmul.f32 %v7093_v47, %v1661_v53  ;;  %v7094_v1 = vstv %s5080_s21  ;;  %v7096_v7 = vstv %s7090_s14  ;;  %v1624_v34 = vadd.f32 %v5196_v36, %v1609_v2 }
 0x248   : > { %v1702_v13 = vmul.f32 %v7094_v1, %v1661_v53  ;;  %v1707_v15 = vmul.f32 %v7096_v7, %v1661_v53  ;;  %v1629_v51 = vadd.f32 %v5203_v38, %v1614_v45  ;;  %v1634_v50 = vadd.f32 %v5208_v0, %v1619_v40  ;;  %v1722_v47 = vpop.permute.xlu1 %1721 }
 0x249   : > { %v7098_v5 = vstv %s7005_s0  ;;  %v7099_v20 = vstv %s7007_s19  ;;  %v1699_v22 = vadd.f32 %v1697_v19, %v1684_v4  ;;  %v7100_v58 = vstv %s7009_s9  ;;  %s5538_s19 = sld [smem:[#allocation11 + $0x1a]]  ;;  %v1663_v19 = vpop.permute.xlu0 %1662 }
 0x24a   : > { %v1637_v27 = vmul.f32 %v7098_v5, %v1602_v49  ;;  %v1642_v23 = vmul.f32 %v7099_v20, %v1602_v49  ;;  %v1704_v6 = vadd.f32 %v1702_v13, %v1689_v52  ;;  %v1647_v21 = vmul.f32 %v7100_v58, %v1602_v49  ;;  %s7110_s0 = sld [smem:[#allocation44_spill]] }
 0x24b   : > { %v1915_v55 = vstv %s5487_s24  ;;  %v1709_v36 = vadd.f32 %v1707_v15, %v1694_v32  ;;  %v7101_v3 = vstv %s7095_s15  ;;  %v7102_v46 = vstv %s5142_s16  ;;  %s5561_s9 = sld [smem:[#allocation11 + $0x50]] }
 0x24c   : > { %v1639_v25 = vadd.f32 %v1637_v27, %v1624_v34  ;;  %v1728_v38 = vmul.f32 %v7101_v3, %v1716_v30  ;;  %v1733_v0 = vmul.f32 %v7102_v46, %v1716_v30  ;;  %v1644_v56 = vadd.f32 %v1642_v23, %v1629_v51  ;;  %s5760_s24 = sld [smem:[#allocation14 + $0x3]] }
 0x24d   : > { %v7103_v54 = vstv %s7097_s6  ;;  %v7104_v9 = vstv %s7011_s23  ;;  %v7105_v62 = vstv %s7012_s18  ;;  %v1649_v45 = vadd.f32 %v1647_v21, %v1634_v50  ;;  %s5541_s23 = sld [smem:[#allocation11 + $0x35]]  ;;  %v1718_v46 = vpop.permute.xlu0 %1717 }
 0x24e   : > { %v1738_v28 = vmul.f32 %v7103_v54, %v1716_v30  ;;  %v1668_v57 = vmul.f32 %v7104_v9, %v1657_v10  ;;  %v1673_v2 = vmul.f32 %v7105_v62, %v1657_v10  ;;  %v1730_v53 = vadd.f32 %v1728_v38, %v1699_v22  ;;  %s7111_s18 = sld [smem:[#allocation45_spill]]  ;;  %v1777_v38 = vpop.permute.xlu1 %1776 }
 0x24f   : > { %v1735_v49 = vadd.f32 %v1733_v0, %v1704_v6  ;;  %v7106_v12 = vstv %s7013_s30  ;;  %v1920_v1 = vstv %s5501_s27  ;;  %v7107_v34 = vstv %s5178_s22  ;;  %s5575_s30 = sld [smem:[#allocation12]] }
 0x250   : > { %v1678_v40 = vmul.f32 %v7106_v12, %v1657_v10  ;;  %v1740_v4 = vadd.f32 %v1738_v28, %v1709_v36  ;;  %v1670_v52 = vadd.f32 %v1668_v57, %v1639_v25  ;;  %v1675_v32 = vadd.f32 %v1673_v2, %v1644_v56  ;;  %s5767_s27 = sld [smem:[#allocation14 + $0x6f]] }
 0x251   : > { %v1745_v7 = vadd.f32 %v5215_v44, %v1730_v53  ;;  %v1750_v15 = vadd.f32 %v5220_v63, %v1735_v49  ;;  %v1758_v51 = vmul.f32 %v7107_v34, %v1722_v47  ;;  %v7108_v5 = vstv %s5198_s1 }
 0x252   : > { %v1680_v13 = vadd.f32 %v1678_v40, %v1649_v45  ;;  %v1755_v50 = vadd.f32 %v5225_v39, %v1740_v4  ;;  %v1763_v27 = vmul.f32 %v7108_v5, %v1722_v47  ;;  %v7109_v20 = vstv %s5210_s5 }
 0x253   : > { %v1768_v23 = vmul.f32 %v7109_v20, %v1722_v47  ;;  %v1685_v22 = vadd.f32 %v5230_v61, %v1670_v52  ;;  %v1760_v6 = vadd.f32 %v1758_v51, %v1745_v7  ;;  %v1690_v58 = vadd.f32 %v5235_v48, %v1675_v32 }
 0x254   : > { %v1695_v44 = vadd.f32 %v5240_v37, %v1680_v13  ;;  %v7112_v63 = vstv %s7017_s13  ;;  %v1765_v30 = vadd.f32 %v1763_v27, %v1750_v15  ;;  %v7113_v10 = vstv %s5080_s21  ;;  %v1724_v13 = vpop.permute.xlu0 %1723  ;;  %s7125_s13 = sld [smem:[#allocation48_spill]] }
 0x255   : > { %v1698_v21 = vmul.f32 %v7112_v63, %v1663_v19  ;;  %v1770_v39 = vadd.f32 %v1768_v23, %v1755_v50  ;;  %v1703_v36 = vmul.f32 %v7113_v10, %v1663_v19  ;;  %v7114_v25 = vstv %s7090_s14  ;;  %s5764_s14 = sld [smem:[#allocation14 + $0x39]] }
 0x256   : > { %v1708_v3 = vmul.f32 %v7114_v25, %v1663_v19  ;;  %v7115_v0 = vstv %s5242_s29  ;;  %v7116_v56 = vstv %s7110_s0  ;;  %v7117_v54 = vstv %s7111_s18  ;;  %v1783_v19 = vpop.permute.xlu1 %1782  ;;  %s5790_s21 = sld [smem:[#allocation14 + $0x5]] }
 0x257   : > { %v1700_v61 = vadd.f32 %v1698_v21, %v1685_v22  ;;  %v1789_v48 = vmul.f32 %v7115_v0, %v1777_v38  ;;  %v1794_v37 = vmul.f32 %v7116_v56, %v1777_v38  ;;  %v1799_v28 = vmul.f32 %v7117_v54, %v1777_v38 }
 0x258   : > { %v1705_v9 = vadd.f32 %v1703_v36, %v1690_v58  ;;  %v1710_v57 = vadd.f32 %v1708_v3, %v1695_v44  ;;  %v7118_v62 = vstv %s7095_s15  ;;  %v7119_v45 = vstv %s5142_s16  ;;  %v1779_v3 = vpop.permute.xlu0 %1778  ;;  %s5770_s15 = sld [smem:[#allocation14 + $0x4]] }
 0x259   : > { %v1729_v2 = vmul.f32 %v7118_v62, %v1718_v46  ;;  %v1734_v53 = vmul.f32 %v7119_v45, %v1718_v46  ;;  %v1791_v49 = vadd.f32 %v1789_v48, %v1760_v6  ;;  %v1796_v12 = vadd.f32 %v1794_v37, %v1765_v30  ;;  %s5801_s16 = sld [smem:[#allocation14 + $0x71]] }
 0x25a   : > { %v1801_v40 = vadd.f32 %v1799_v28, %v1770_v39  ;;  %v7121_v4 = vstv %s7097_s6  ;;  %v1940_v7 = vstv %s5538_s19  ;;  %v1945_v15 = vstv %s5541_s23  ;;  %v1838_v25 = vpop.permute.xlu1 %1837  ;;  %s5773_s6 = sld [smem:[#allocation14 + $0x3a]] }
 0x25b   : > { %v1739_v52 = vmul.f32 %v7121_v4, %v1718_v46  ;;  %v1731_v32 = vadd.f32 %v1729_v2, %v1700_v61  ;;  %v1736_v47 = vadd.f32 %v1734_v53, %v1705_v9  ;;  %v1806_v51 = vadd.f32 %v5064_v18, %v1791_v49  ;;  %s5775_s19 = sld [smem:[#allocation14 + $0x70]] }
 0x25c   : > { %v1811_v50 = vadd.f32 %v5069_v31, %v1796_v12  ;;  %v1816_v5 = vadd.f32 %v5074_v24, %v1801_v40  ;;  %v7122_v27 = vstv %s5285_s3  ;;  %v7123_v23 = vstv %s5303_s12  ;;  %s5778_s23 = sld [smem:[#allocation14 + $0x7]] }
 0x25d   : > { %v1741_v34 = vadd.f32 %v1739_v52, %v1710_v57  ;;  %v1819_v20 = vmul.f32 %v7122_v27, %v1783_v19  ;;  %v1824_v22 = vmul.f32 %v7123_v23, %v1783_v19  ;;  %v1829_v6 = vmul.f32 %v1828_v43, %v1783_v19  ;;  %v1785_v52 = vpop.permute.xlu0 %1784  ;;  %v7136_v27 = vld [vmem:[#allocation83_spill] sm:$0xff]  ;;  %v7137_v23 = vld [vmem:[#allocation84_spill] sm:$0xff] }
 0x25e   : > { %v1746_v58 = vadd.f32 %v5249_v35, %v1731_v32  ;;  %v1751_v44 = vadd.f32 %v5254_v29, %v1736_v47  ;;  %v7127_v63 = vstv %s5178_s22  ;;  %v7128_v24 = vstv %s5198_s1  ;;  %s5610_s22 = sld [smem:[#allocation12 + $0x1]]  ;;  %v1844_v4 = vpop.permute.xlu1 %1843 }
 0x25f   : > { %v1756_v18 = vadd.f32 %v5259_v26, %v1741_v34  ;;  %v1759_v31 = vmul.f32 %v7127_v63, %v1724_v13  ;;  %v1764_v21 = vmul.f32 %v7128_v24, %v1724_v13  ;;  %v1821_v30 = vadd.f32 %v1819_v20, %v1806_v51  ;;  %s5612_s1 = sld [smem:[#allocation12 + $0x2]] }
 0x260   : > { %v1826_v39 = vadd.f32 %v1824_v22, %v1811_v50  ;;  %v7129_v10 = vstv %s5210_s5  ;;  %v1950_v38 = vstv %s5561_s9  ;;  %v1831_v35 = vadd.f32 %v1829_v6, %v1816_v5  ;;  %v7138_v22 = vld [vmem:[#allocation85_spill] sm:$0xff]  ;;  %s5788_s9 = sld [smem:[#allocation14 + $0xa]] }
 0x261   : > { %v1769_v36 = vmul.f32 %v7129_v10, %v1724_v13  ;;  %v1761_v46 = vadd.f32 %v1759_v31, %v1746_v58  ;;  %v1850_v29 = vmul.f32 %v1849_v33, %v1838_v25  ;;  %v7130_v61 = vstv %s7125_s13  ;;  %s5803_s13 = sld [smem:[#allocation14 + $0x40]] }
 0x262   : > { %v1855_v0 = vmul.f32 %v7130_v61, %v1838_v25  ;;  %v1766_v26 = vadd.f32 %v1764_v21, %v1751_v44  ;;  %v7131_v48 = vstv %s7126_s26  ;;  %v7132_v37 = vstv %s5242_s29  ;;  %v1899_v21 = vpop.permute.xlu1 %1898  ;;  %s5703_s29 = sld [smem:[#allocation14 + $0x1]] }
 0x263   : > { %v1860_v56 = vmul.f32 %v7131_v48, %v1838_v25  ;;  %v1790_v54 = vmul.f32 %v7132_v37, %v1779_v3  ;;  %v7133_v28 = vstv %s7110_s0  ;;  %v1771_v57 = vadd.f32 %v1769_v36, %v1756_v18  ;;  %s5781_s0 = sld [smem:[#allocation14 + $0x3d]] }
 0x264   : > { %v1795_v9 = vmul.f32 %v7133_v28, %v1779_v3  ;;  %v1852_v62 = vadd.f32 %v1850_v29, %v1821_v30  ;;  %v1857_v2 = vadd.f32 %v1855_v0, %v1826_v39  ;;  %v7134_v45 = vstv %s7111_s18  ;;  %v1840_v30 = vpop.permute.xlu0 %1839  ;;  %s5785_s18 = sld [smem:[#allocation14 + $0x73]] }
 0x265   : > { %v1800_v53 = vmul.f32 %v7134_v45, %v1779_v3  ;;  %v1862_v49 = vadd.f32 %v1860_v56, %v1831_v35  ;;  %v1792_v12 = vadd.f32 %v1790_v54, %v1761_v46  ;;  %v1955_v32 = vstv %s5575_s30  ;;  %s5795_s30 = sld [smem:[#allocation14 + $0x3b]] }
 0x266   : > { %v1797_v40 = vadd.f32 %v1795_v9, %v1766_v26  ;;  %v1867_v19 = vadd.f32 %v5264_v8, %v1852_v62  ;;  %v1872_v13 = vadd.f32 %v5272_v17, %v1857_v2  ;;  %v1880_v34 = vmul.f32 %v1879_v41, %v1844_v4  ;;  %s5806_s26 = sld [smem:[#allocation14 + $0x6]] }
 0x267   : > { %v1802_v47 = vadd.f32 %v1800_v53, %v1771_v57  ;;  %vm1974_vm9 = vcmp.ge.s32.totalorder %v5467_v59, 0  ;;  %vm1976_vm10 = vcmp.lt.s32.totalorder %v5467_v59, 16  ;;  %v1877_v51 = vadd.f32 %v5277_v11, %v1862_v49  ;;  %v1905_v57 = vpop.permute.xlu1 %1904  ;;  %v7143_v53 = vld [vmem:[#allocation89_spill] sm:$0xff]  ;;  %s5811_s5 = sld [smem:[#allocation14 + $0x3c]] }
 0x268   : > { %v1885_v50 = vmul.f32 %v1884_v14, %v1844_v4  ;;  %v1890_v5 = vmul.f32 %v1889_v60, %v1844_v4  ;;  %v1807_v8 = vadd.f32 %v7136_v27, %v1792_v12  ;;  %v1882_v20 = vadd.f32 %v1880_v34, %v1867_v19  ;;  %v1846_v62 = vpop.permute.xlu0 %1845  ;;  %v7144_v12 = vld [vmem:[#allocation79_spill] sm:$0xff]  ;;  %v7147_v19 = vld [vmem:[#allocation82_spill] sm:$0xff]  ;;  %vm5669_vm11 = vmand %vm1974_vm9, %vm1976_vm10 }
 0x269   : > { %v1812_v17 = vadd.f32 %v7137_v23, %v1797_v40  ;;  %v1817_v6 = vadd.f32 %v7138_v22, %v1802_v47  ;;  %v7139_v58 = vstv %s5285_s3  ;;  %v7140_v11 = vstv %s5303_s12  ;;  %s7145_s3 = sld [smem:[#allocation55_spill]]  ;;  %v7148_v34 = vld [vmem:[#allocation87_spill] sm:$0xff]  ;;  %vm5692_vm13 = vmand %vm5669_vm11, %vm1395_vm4 }
 0x26a   : > { %v1820_v44 = vmul.f32 %v7139_v58, %v1785_v52  ;;  %v1887_v18 = vadd.f32 %v1885_v50, %v1872_v13  ;;  %v1892_v63 = vadd.f32 %v1890_v5, %v1877_v51  ;;  %v1825_v31 = vmul.f32 %v7140_v11, %v1785_v52  ;;  %s7146_s12 = sld [smem:[#allocation56_spill]]  ;;  %v7149_v50 = vld [vmem:[#allocation88_spill] sm:$0xff] }
 0x26b   : > { %v1830_v24 = vmul.f32 %v1828_v43, %v1785_v52  ;;  %v1911_v10 = vmul.f32 %v1910_v16, %v1899_v21  ;;  %v1916_v36 = vmul.f32 %v1915_v55, %v1899_v21  ;;  %v1921_v25 = vmul.f32 %v1920_v1, %v1899_v21 }
 0x26c   : > { %v1822_v39 = vadd.f32 %v1820_v44, %v1807_v8  ;;  %v1827_v3 = vadd.f32 %v1825_v31, %v1812_v17  ;;  %v1851_v46 = vmul.f32 %v1849_v33, %v1840_v30  ;;  %v7141_v29 = vmov %v7130_v61  ;;  %v7142_v33 = vld [vmem:[#allocation86_spill] sm:$0xff]  ;;  %v1901_v58 = vpop.permute.xlu0 %1900  ;;  %v7152_v44 = vld [vmem:[#allocation81_spill] sm:$0xff] }
 0x26d   : > { %v1832_v35 = vadd.f32 %v1830_v24, %v1817_v6  ;;  %v1856_v61 = vmul.f32 %v7141_v29, %v1840_v30  ;;  %v1913_v43 = vadd.f32 %v1911_v10, %v1882_v20  ;;  %v1918_v0 = vadd.f32 %v1916_v36, %v1887_v18 }
 0x26e   : > { %v1923_v26 = vadd.f32 %v1921_v25, %v1892_v63  ;;  %v1861_v56 = vmul.f32 %v7131_v48, %v1840_v30  ;;  %v1853_v37 = vadd.f32 %v1851_v46, %v1822_v39  ;;  %v1960_v28 = vstv %s5610_s22  ;;  %v1907_v30 = vpop.permute.xlu1 %1906  ;;  %s5818_s22 = sld [smem:[#allocation14 + $0x72]] }
 0x26f   : > { %v1858_v54 = vadd.f32 %v1856_v61, %v1827_v3  ;;  %v1965_v9 = vstv %s5612_s1  ;;  %v1928_v45 = vadd.f32 %v7142_v33, %v1913_v43  ;;  %v1933_v49 = vadd.f32 %v7143_v53, %v1918_v0  ;;  %s5820_s1 = sld [smem:[#allocation14 + $0x76]] }
 0x270   : > { %v1863_v2 = vadd.f32 %v1861_v56, %v1832_v35  ;;  %v1938_v40 = vadd.f32 %v7144_v12, %v1923_v26  ;;  %v1941_v4 = vmul.f32 %v1940_v7, %v1905_v57  ;;  %v1946_v52 = vmul.f32 %v1945_v15, %v1905_v57  ;;  %v7158_v56 = vld [vmem:[#allocation90_spill] sm:$0xff] }
 0x271   : > { %v1951_v47 = vmul.f32 %v1950_v38, %v1905_v57  ;;  %v1868_v13 = vadd.f32 %v7147_v19, %v1853_v37  ;;  %v1873_v51 = vadd.f32 %v7148_v34, %v1858_v54  ;;  %v1881_v27 = vmul.f32 %v1879_v41, %v1846_v62 }
 0x272   : > { %v1878_v5 = vadd.f32 %v7149_v50, %v1863_v2  ;;  %v1886_v8 = vmul.f32 %v1884_v14, %v1846_v62  ;;  %v1943_v23 = vadd.f32 %v1941_v4, %v1928_v45  ;;  %v1948_v17 = vadd.f32 %v1946_v52, %v1933_v49  ;;  %v3416_v50 = vld [vmem:[#allocation3 + $0x3] sm:$0xff]  ;;  %v2002_v20 = vpop.permute.xlu1 %2001 }
 0x273   : > { %v1953_v22 = vadd.f32 %v1951_v47, %v1938_v40  ;;  %v1891_v6 = vmul.f32 %v1889_v60, %v1846_v62  ;;  %v1883_v41 = vadd.f32 %v1881_v27, %v1868_v13  ;;  %v7153_v14 = vstv %s7145_s3  ;;  %v1999_v40 = vpop.permute.xlu0 %1998  ;;  %s5823_s3 = sld [smem:[#allocation14 + $0xd]] }
 0x274   : > { %v1932_v18 = vmul.f32 %v7153_v14, %v7152_v44  ;;  %v7154_v63 = vstv %s7146_s12  ;;  %vm1975_vm12 = vcmp.ge.s32.totalorder %v5505_v42, 0  ;;  %v1956_v11 = vadd.f32 %v1955_v32, %v1943_v23  ;;  %s5826_s12 = sld [smem:[#allocation14 + $0x43]] }
 0x275   : > { %v1937_v59 = vmul.f32 %v7154_v63, %v7152_v44  ;;  %v1961_v31 = vadd.f32 %v1960_v28, %v1948_v17  ;;  %v1966_v24 = vadd.f32 %v1965_v9, %v1953_v22  ;;  %v1888_v21 = vadd.f32 %v1886_v8, %v1873_v51 }
 0x276   : > { %v1893_v10 = vadd.f32 %v1891_v6, %v1878_v5  ;;  %v1912_v36 = vmul.f32 %v1910_v16, %v1901_v58  ;;  %v1917_v25 = vmul.f32 %v1915_v55, %v1901_v58  ;;  %v1922_v3 = vmul.f32 %v1920_v1, %v1901_v58 }
 0x277   : > { %v1958_v35 = vmax.f32 %v1956_v11, 0.0  ;;  %v1963_v46 = vmax.f32 %v1961_v31, 0.0  ;;  %v1968_v29 = vmax.f32 %v1966_v24, 0.0  ;;  %vm1977_vm14 = vcmp.lt.s32.totalorder %v5505_v42, 16  ;;  %v2031_v14 = vpop.permute.xlu0 %2030 }
 0x278   : > { %v1942_v61 = vmul.f32 %v1940_v7, %v1907_v30  ;;  %v1914_v43 = vadd.f32 %v1912_v36, %v1883_v41  ;;  %v1919_v0 = vadd.f32 %v1917_v25, %v1888_v21  ;;  %v1924_v26 = vadd.f32 %v1922_v3, %v1893_v10  ;;  %vm1979_vm15 = vmand %vm1975_vm12, %vm1977_vm14 }
 0x279   : > { %v5711_v16 = vsel %vm5692_vm13, %v1958_v35, 0.0  ;;  %v5715_v55 = vsel %vm5692_vm13, %v1963_v46, 0.0  ;;  %v5719_v1 = vsel %vm5692_vm13, %v1968_v29, 0.0  ;;  %v1947_v48 = vmul.f32 %v1945_v15, %v1907_v30  ;;  %vm1981_vm0 = vmand %vm1979_vm15, %vm1395_vm4 }
 0x27a   : > { %1984 = vst [vmem:[#allocation4 + $0x3] sm:$0xff] %v5711_v16  ;;  %1989 = vst [vmem:[#allocation4 + $0x13] sm:$0xff] %v5715_v55  ;;  %v1952_v7 = vmul.f32 %v1950_v38, %v1907_v30  ;;  %v1929_v37 = vadd.f32 %v7158_v56, %v1914_v43  ;;  %v1934_v54 = vadd.f32 %v1932_v18, %v1919_v0  ;;  %2313 = vrot.lane.b32.xlu1 %v5711_v16, %s7159_s2  ;;  %v3417_v0 = vld [vmem:[#allocation3 + $0x4] sm:$0xff]  ;;  %v2034_v56 = vpop.permute.xlu1 %2033 }
 0x27b   : > { %1994 = vst [vmem:[#allocation4 + $0x23] sm:$0xff] %v5719_v1  ;;  %v1939_v57 = vadd.f32 %v1937_v59, %v1924_v26  ;;  %2310 = vrot.lane.b32.xlu0 %v5711_v16, %s7160_s11  ;;  %v2004_v12 = vstv %s5707_s17  ;;  %v2008_v47 = vstv %s5731_s25  ;;  %v2013_v19 = vstv %s5735_s10  ;;  %s5835_s17 = sld [smem:[#allocation14 + $0x10]] }
 0x27c   : > { %v1944_v15 = vadd.f32 %v1942_v61, %v1929_v37  ;;  %v1949_v38 = vadd.f32 %v1947_v48, %v1934_v54  ;;  %v2005_v13 = vmul.f32 %v2004_v12, %v1999_v40  ;;  %v2016_v34 = vstv %s5743_s20  ;;  %s5842_s25 = sld [smem:[#allocation14 + $0x3e]] }
 0x27d   : > { %v1954_v62 = vadd.f32 %v1952_v7, %v1939_v57  ;;  %v2009_v27 = vmul.f32 %v2008_v47, %v1999_v40  ;;  %v2019_v8 = vstv %s5745_s28  ;;  %v2014_v23 = vmul.f32 %v3416_v50, %v2013_v19  ;;  %s5849_s10 = sld [smem:[#allocation14 + $0x74]] }
 0x27e   : > { %v1957_v2 = vadd.f32 %v1955_v32, %v1944_v15  ;;  %v1962_v33 = vadd.f32 %v1960_v28, %v1949_v38  ;;  %v2006_v32 = vstv %s5723_s8  ;;  %v2010_v28 = vstv %s5703_s29  ;;  %s5833_s29 = sld [smem:[#allocation14 + $0x79]] }
 0x27f   : > { %v1967_v45 = vadd.f32 %v1965_v9, %v1954_v62  ;;  %v2007_v51 = vmul.f32 %v2006_v32, %v1999_v40  ;;  %v2011_v5 = vmul.f32 %v3416_v50, %v2010_v28  ;;  %v2022_v17 = vstv %s5753_s7  ;;  %s5837_s8 = sld [smem:[#allocation14 + $0x8]] }
 0x280   : > { %v1959_v42 = vmax.f32 %v1957_v2, 0.0  ;;  %v1964_v53 = vmax.f32 %v1962_v33, 0.0  ;;  %v2017_v22 = vmul.f32 %v3416_v50, %v2016_v34  ;;  %v2025_v58 = vstv %s5757_s4  ;;  %s5852_s20 = sld [smem:[#allocation14 + $0x46]] }
 0x281   : > { %v1969_v49 = vmax.f32 %v1967_v45, 0.0  ;;  %v2012_v6 = vadd.f32 %v2011_v5, %v2005_v13  ;;  %v2015_v41 = vadd.f32 %v2014_v23, %v2007_v51  ;;  %v2036_v44 = vstv %s5760_s24  ;;  %s5855_s28 = sld [smem:[#allocation14 + $0x9]] }
 0x282   : > { %v1983_v9 = vsel %vm1981_vm0, %v1959_v42, 0.0  ;;  %v1987_v4 = vsel %vm1981_vm0, %v1964_v53, 0.0  ;;  %v2020_v18 = vmul.f32 %v2019_v8, %v2002_v20  ;;  %v2018_v63 = vadd.f32 %v2017_v22, %v2009_v27  ;;  %v2066_v53 = vpop.permute.xlu0 %2065  ;;  %s5860_s7 = sld [smem:[#allocation14 + $0x3f]]  ;;  %v3418_v27 = vld [vmem:[#allocation3 + $0x5] sm:$0xff] }
 0x283   : > { %v1992_v52 = vsel %vm1981_vm0, %v1969_v49, 0.0  ;;  %1985 = vst [vmem:[#allocation4 + $0xb] sm:$0x3] %v1983_v9  ;;  %1990 = vst [vmem:[#allocation4 + $0x1b] sm:$0x3] %v1987_v4  ;;  %v2039_v59 = vstv %s5764_s14  ;;  %v2023_v11 = vmul.f32 %v2022_v17, %v2002_v20  ;;  %v2042_v31 = vstv %s5767_s27  ;;  %s5867_s4 = sld [smem:[#allocation14 + $0x75]]  ;;  %v2069_v17 = vpop.permute.xlu1 %2068 }
 0x284   : > { %1995 = vst [vmem:[#allocation4 + $0x2b] sm:$0x3] %v1992_v52  ;;  %v2026_v21 = vmul.f32 %v2025_v58, %v2002_v20  ;;  %v2021_v30 = vadd.f32 %v2020_v18, %v2012_v6  ;;  %v2037_v60 = vmul.f32 %v2036_v44, %v2031_v14  ;;  %v2040_v10 = vmul.f32 %v2039_v59, %v2031_v14  ;;  %s5869_s24 = sld [smem:[#allocation14 + $0x7c]] }
 0x285   : > { %v2024_v39 = vadd.f32 %v2023_v11, %v2015_v41  ;;  %v2043_v25 = vmul.f32 %v2042_v31, %v2031_v14  ;;  %v2045_v3 = vstv %s5770_s15  ;;  %v2048_v46 = vstv %s5773_s6  ;;  %s5872_s14 = sld [smem:[#allocation14 + $0x13]] }
 0x286   : > { %v2027_v36 = vadd.f32 %v2026_v21, %v2018_v63  ;;  %v2038_v29 = vadd.f32 %v2037_v60, %v2021_v30  ;;  %v2051_v61 = vstv %s5775_s19  ;;  %v2046_v26 = vmul.f32 %v3417_v0, %v2045_v3  ;;  %s5875_s27 = sld [smem:[#allocation14 + $0x49]]  ;;  %v2101_v31 = vpop.permute.xlu0 %2100 }
 0x287   : > { %v2041_v43 = vadd.f32 %v2040_v10, %v2024_v39  ;;  %v2054_v7 = vstv %s5790_s21  ;;  %v2049_v37 = vmul.f32 %v3417_v0, %v2048_v46  ;;  %v2057_v54 = vstv %s5795_s30  ;;  %s5882_s15 = sld [smem:[#allocation14 + $0xb]] }
 0x288   : > { %v2044_v48 = vadd.f32 %v2043_v25, %v2027_v36  ;;  %v2052_v57 = vmul.f32 %v3417_v0, %v2051_v61  ;;  %v2047_v15 = vadd.f32 %v2046_v26, %v2038_v29  ;;  %v2060_v38 = vstv %s5801_s16  ;;  %s5884_s6 = sld [smem:[#allocation14 + $0x41]] }
 0x289   : > { %v2050_v62 = vadd.f32 %v2049_v37, %v2041_v43  ;;  %v2055_v2 = vmul.f32 %v2054_v7, %v2034_v56  ;;  %v2058_v45 = vmul.f32 %v2057_v54, %v2034_v56  ;;  %v2071_v42 = vstv %s5806_s26  ;;  %s5886_s19 = sld [smem:[#allocation14 + $0x77]]  ;;  %v3419_v7 = vld [vmem:[#allocation3 + $0x13] sm:$0xff] }
 0x28a   : > { %v5793_v24 = vld [vmem:[#allocation4 + $0x4] sm:$0xff]  ;;  %v2053_v33 = vadd.f32 %v2052_v57, %v2044_v48  ;;  %v5840_v49 = vld [vmem:[#allocation4 + $0x14] sm:$0xff]  ;;  %v2061_v12 = vmul.f32 %v2060_v38, %v2034_v56  ;;  %v2074_v40 = vstv %s5811_s5  ;;  %v2077_v28 = vstv %s5818_s22  ;;  %s5904_s21 = sld [smem:[#allocation14 + $0xc]]  ;;  %v2104_v57 = vpop.permute.xlu1 %2103 }
 0x28b   : > { %2348 = vrot.lane.b32.xlu1 %v5793_v24, %s7159_s2  ;;  %2345 = vrot.lane.b32.xlu0 %v5793_v24, %s7160_s11  ;;  %v5808_v35 = vld [vmem:[#allocation4 + $0x5] sm:$0xff]  ;;  %v2059_v32 = vadd.f32 %v2058_v45, %v2050_v62  ;;  %v2072_v4 = vmul.f32 %v2071_v42, %v2066_v53  ;;  %v2080_v52 = vstv %s5778_s23  ;;  %v2075_v47 = vmul.f32 %v2074_v40, %v2066_v53  ;;  %v5857_v19 = vld [vmem:[#allocation4 + $0x15] sm:$0xff]  ;;  %s5892_s23 = sld [smem:[#allocation14 + $0xe]]  ;;  %v2136_v40 = vpop.permute.xlu0 %2135 }
 0x28c   : > { %v2062_v9 = vadd.f32 %v2061_v12, %v2053_v33  ;;  %v2083_v13 = vstv %s5781_s0  ;;  %v2078_v51 = vmul.f32 %v2077_v28, %v2066_v53  ;;  %v2086_v50 = vstv %s5785_s18  ;;  %v5889_v21 = vld [vmem:[#allocation4 + $0x24] sm:$0xff]  ;;  %s5899_s0 = sld [smem:[#allocation14 + $0x44]] }
 0x28d   : > { %v2076_v5 = vadd.f32 %v2075_v47, %v2059_v32  ;;  %v2081_v8 = vmul.f32 %v3418_v27, %v2080_v52  ;;  %v2089_v23 = vstv %s5837_s8  ;;  %v2084_v22 = vmul.f32 %v3418_v27, %v2083_v13  ;;  %s5901_s18 = sld [smem:[#allocation14 + $0x7a]]  ;;  %v2588_v29 = vld [vmem:[#allocation4 + $0x25] sm:$0xff] }
 0x28e   : > { %v2079_v20 = vadd.f32 %v2078_v51, %v2062_v9  ;;  %v2092_v6 = vstv %s5842_s25  ;;  %v2087_v58 = vmul.f32 %v3418_v27, %v2086_v50  ;;  %v2095_v44 = vstv %s5849_s10  ;;  %s5907_s30 = sld [smem:[#allocation14 + $0x42]]  ;;  %v3420_v27 = vld [vmem:[#allocation3 + $0x14] sm:$0xff] }
 0x28f   : > { %2383 = vrot.lane.b32.xlu1 %v5808_v35, %s7159_s2  ;;  %2380 = vrot.lane.b32.xlu0 %v5808_v35, %s7160_s11  ;;  %v2085_v14 = vadd.f32 %v2084_v22, %v2076_v5  ;;  %v2090_v18 = vmul.f32 %v2089_v23, %v2069_v17  ;;  %v2093_v59 = vmul.f32 %v2092_v6, %v2069_v17  ;;  %v2106_v11 = vstv %s5855_s28  ;;  %s5912_s16 = sld [smem:[#allocation14 + $0x78]] }
 0x290   : > { %v2088_v63 = vadd.f32 %v2087_v58, %v2079_v20  ;;  %v2096_v30 = vmul.f32 %v2095_v44, %v2069_v17  ;;  %v2109_v60 = vstv %s5860_s7  ;;  %v2112_v10 = vstv %s5867_s4  ;;  %s5925_s26 = sld [smem:[#allocation17 + $0x6]] }
 0x291   : > { %v2094_v39 = vadd.f32 %v2093_v59, %v2085_v14  ;;  %v2107_v25 = vmul.f32 %v2106_v11, %v2101_v31  ;;  %v2115_v3 = vstv %s5788_s9  ;;  %v2110_v46 = vmul.f32 %v2109_v60, %v2101_v31  ;;  %s5914_s9 = sld [smem:[#allocation14 + $0xf]] }
 0x292   : > { %v2097_v36 = vadd.f32 %v2096_v30, %v2088_v63  ;;  %v2118_v61 = vstv %s5803_s13  ;;  %v2113_v0 = vmul.f32 %v2112_v10, %v2101_v31  ;;  %v2121_v26 = vstv %s5820_s1  ;;  %s5917_s13 = sld [smem:[#allocation17]] }
 0x293   : > { %2418 = vrot.lane.b32.xlu1 %v5715_v55, %s7159_s2  ;;  %2415 = vrot.lane.b32.xlu0 %v5715_v55, %s7160_s11  ;;  %v2056_v55 = vadd.f32 %v2055_v2, %v2047_v15  ;;  %v2111_v48 = vadd.f32 %v2110_v46, %v2094_v39  ;;  %v2116_v56 = vmul.f32 %v3419_v7, %v2115_v3  ;;  %v2124_v54 = vstv %s5882_s15  ;;  %s5928_s5 = sld [smem:[#allocation17 + $0x7]] }
 0x294   : > { %v2114_v37 = vadd.f32 %v2113_v0, %v2097_v36  ;;  %v2119_v15 = vmul.f32 %v3419_v7, %v2118_v61  ;;  %v2127_v38 = vstv %s5884_s6  ;;  %v2122_v62 = vmul.f32 %v3419_v7, %v2121_v26  ;;  %s5931_s22 = sld [smem:[#allocation17 + $0x8]]  ;;  %v2139_v36 = vpop.permute.xlu1 %2138 }
 0x295   : > { %v2073_v34 = vadd.f32 %v2072_v4, %v2056_v55  ;;  %v2130_v33 = vstv %s5886_s19  ;;  %v2125_v42 = vmul.f32 %v2124_v54, %v2104_v57  ;;  %v2128_v12 = vmul.f32 %v2127_v38, %v2104_v57  ;;  %s5936_s1 = sld [smem:[#allocation14 + $0x45]] }
 0x296   : > { %v2120_v45 = vadd.f32 %v2119_v15, %v2111_v48  ;;  %v2123_v53 = vadd.f32 %v2122_v62, %v2114_v37  ;;  %v2141_v55 = vstv %s5904_s21  ;;  %v2131_v32 = vmul.f32 %v2130_v33, %v2104_v57  ;;  %s5939_s8 = sld [smem:[#allocation17 + $0xc]] }
 0x297   : > { %2453 = vrot.lane.b32.xlu1 %v5840_v49, %s7159_s2  ;;  %2450 = vrot.lane.b32.xlu0 %v5840_v49, %s7160_s11  ;;  %v2082_v41 = vadd.f32 %v2081_v8, %v2073_v34  ;;  %v2144_v9 = vstv %s5907_s30  ;;  %v2147_v52 = vstv %s5912_s16  ;;  %v2142_v50 = vmul.f32 %v2141_v55, %v2136_v40  ;;  %s5941_s25 = sld [smem:[#allocation17 + $0xd]] }
 0x298   : > { %v2129_v4 = vadd.f32 %v2128_v12, %v2120_v45  ;;  %v2150_v47 = vstv %s5823_s3  ;;  %v2153_v13 = vstv %s5826_s12  ;;  %v2132_v34 = vadd.f32 %v2131_v32, %v2123_v53  ;;  %s5943_s3 = sld [smem:[#allocation17 + $0xe]]  ;;  %v2171_v45 = vpop.permute.xlu0 %2170 }
 0x299   : > { %v2156_v51 = vstv %s5833_s29  ;;  %v2145_v5 = vmul.f32 %v2144_v9, %v2136_v40  ;;  %v2151_v8 = vmul.f32 %v3420_v27, %v2150_v47  ;;  %v2154_v20 = vmul.f32 %v3420_v27, %v2153_v13  ;;  %s5946_s12 = sld [smem:[#allocation14 + $0x7b]] }
 0x29a   : > { %v2148_v17 = vmul.f32 %v2147_v52, %v2136_v40  ;;  %v2159_v22 = vstv %s5892_s23  ;;  %v2157_v6 = vmul.f32 %v3420_v27, %v2156_v51  ;;  %s5949_s29 = sld [smem:[#allocation14 + $0x7f]]  ;;  %v2162_v59 = vstv %s5899_s0 }
 0x29b   : > { %2488 = vrot.lane.b32.xlu1 %v5857_v19, %s7159_s2  ;;  %2485 = vrot.lane.b32.xlu0 %v5857_v19, %s7160_s11  ;;  %v2146_v58 = vadd.f32 %v2145_v5, %v2129_v4  ;;  %v2165_v11 = vstv %s5901_s18  ;;  %v2176_v31 = vstv %s5914_s9  ;;  %s5957_s10 = sld [smem:[#allocation14 + $0x16]]  ;;  %v2160_v54 = vmul.f32 %v2159_v22, %v2139_v36  ;;  %v3421_v5 = vld [vmem:[#allocation3 + $0x15] sm:$0xff] }
 0x29c   : > { %v2149_v44 = vadd.f32 %v2148_v17, %v2132_v34  ;;  %s5960_s28 = sld [smem:[#allocation14 + $0x4c]]  ;;  %v2657_v60 = vstv %s5925_s26  ;;  %v2659_v39 = vstv %s5928_s5  ;;  %v2662_v10 = vstv %s5931_s22  ;;  %v2174_v17 = vpop.permute.xlu1 %2173 }
 0x29d   : > { %s5965_s7 = sld [smem:[#allocation14 + $0x82]]  ;;  %v2658_v46 = vmul.f32 %v2657_v60, %v5793_v24  ;;  %v2155_v61 = vadd.f32 %v2154_v20, %v2146_v58  ;;  %v2663_v0 = vmul.f32 %v2662_v10, %v5889_v21  ;;  %v2683_v26 = vstv %s5939_s8 }
 0x29e   : > { %s5970_s4 = sld [smem:[#allocation14 + $0x19]]  ;;  %v2685_v37 = vstv %s5941_s25  ;;  %v2163_v57 = vmul.f32 %v2162_v59, %v2139_v36  ;;  %v2688_v38 = vstv %s5943_s3  ;;  %v2166_v62 = vmul.f32 %v2165_v11, %v2139_v36 }
 0x29f   : > { %2523 = vrot.lane.b32.xlu1 %v5719_v1, %s7159_s2  ;;  %2520 = vrot.lane.b32.xlu0 %v5719_v1, %s7160_s11  ;;  %v2091_v1 = vadd.f32 %v2090_v18, %v2082_v41  ;;  %v2632_v41 = vstv %s5917_s13  ;;  %s5974_s15 = sld [smem:[#allocation14 + $0x4f]]  ;;  %v2686_v15 = vmul.f32 %v2685_v37, %v5840_v49  ;;  %v2182_v33 = vstv %s5946_s12 }
 0x2a0   : > { %v2633_v14 = vmul.f32 %v2632_v41, %v5793_v24  ;;  %s5980_s6 = sld [smem:[#allocation14 + $0x11]]  ;;  %v2164_v12 = vadd.f32 %v2163_v57, %v2155_v61  ;;  %v2689_v40 = vmul.f32 %v2688_v38, %v5889_v21  ;;  %v2185_v52 = vstv %s5835_s17  ;;  %v2209_v57 = vpop.permute.xlu1 %2208 }
 0x2a1   : > { %v2108_v43 = vadd.f32 %v2107_v25, %v2091_v1  ;;  %s5984_s19 = sld [smem:[#allocation14 + $0x47]]  ;;  %v2188_v47 = vstv %s5852_s20  ;;  %v2183_v13 = vmul.f32 %v2182_v33, %v2171_v45  ;;  %v2191_v34 = vstv %s5869_s24 }
 0x2a2   : > { %s5990_s23 = sld [smem:[#allocation14 + $0x7d]]  ;;  %v2186_v27 = vmul.f32 %v3421_v5, %v2185_v52  ;;  %v2192_v22 = vmul.f32 %v3421_v5, %v2191_v34 }
 0x2a3   : > { %2558 = vrot.lane.b32.xlu1 %v5889_v21, %s7159_s2  ;;  %2555 = vrot.lane.b32.xlu0 %v5889_v21, %s7160_s11  ;;  %v2117_v2 = vadd.f32 %v2116_v56, %v2108_v43  ;;  %v2158_v43 = vadd.f32 %v2157_v6, %v2149_v44  ;;  %v2684_v56 = vmul.f32 %v2683_v26, %v5793_v24  ;;  %s5993_s0 = sld [smem:[#allocation14 + $0x85]]  ;;  %v3422_v26 = vld [vmem:[#allocation3 + $0x23] sm:$0xff] }
 0x2a4   : > { %s5995_s18 = sld [smem:[#allocation14 + $0x12]] }
 0x2a5   : > { %v2126_v28 = vadd.f32 %v2125_v42, %v2117_v2  ;;  %v2179_v2 = vstv %s5936_s1  ;;  %v2687_v55 = vadd.f32 %v2686_v15, %v2684_v56  ;;  %v2167_v32 = vadd.f32 %v2166_v62, %v2158_v43  ;;  %s6001_s21 = sld [smem:[#allocation14 + $0x48]] }
 0x2a6   : > { %v2180_v9 = vmul.f32 %v2179_v2, %v2171_v45  ;;  %s6004_s30 = sld [smem:[#allocation14 + $0x7e]]  ;;  %v2194_v20 = vstv %s5980_s6 }
 0x2a7   : > { %2593 = vrot.lane.b32.xlu1 %v2588_v29, %s7159_s2  ;;  %2590 = vrot.lane.b32.xlu0 %v2588_v29, %s7160_s11  ;;  %s5920_s2 = sld [smem:[#allocation17 + $0x1]]  ;;  %v2143_v23 = vadd.f32 %v2142_v50, %v2126_v28  ;;  %v2660_v29 = vmul.f32 %v2659_v39, %v5840_v49  ;;  %v2177_v28 = vmul.f32 %v2176_v31, %v2171_v45  ;;  %v2206_v31 = vpop.permute.xlu0 %2205 }
 0x2a8   : > { %s5923_s11 = sld [smem:[#allocation17 + $0x2]]  ;;  %v5997_v4 = vadd.f32 %v2689_v40, %v2687_v55  ;;  %v2184_v50 = vadd.f32 %v2183_v13, %v2167_v32  ;;  %v2200_v6 = vstv %s5990_s23 }
 0x2a9   : > { %v2152_v1 = vadd.f32 %v2151_v8, %v2143_v23  ;;  %v2661_v7 = vadd.f32 %v2660_v29, %v2658_v46  ;;  %s6006_s16 = sld [smem:[#allocation14 + $0x14]]  ;;  %v2189_v8 = vmul.f32 %v3421_v5, %v2188_v47  ;;  %v2197_v23 = vstv %s5984_s19 }
 0x2aa   : > { %s6008_s9 = sld [smem:[#allocation14 + $0x4a]]  ;;  %v2193_v44 = vadd.f32 %v2192_v22, %v2184_v50  ;;  %v2211_v59 = vstv %s5995_s18  ;;  %v2226_v29 = vstv %s5949_s29  ;;  %v2261_v5 = vstv %s5965_s7 }
 0x2ab   : > { %v5988_v42 = vadd.f32 %v2663_v0, %v2661_v7  ;;  %v2161_v53 = vadd.f32 %v2160_v54, %v2152_v1  ;;  %s6012_s17 = sld [smem:[#allocation14 + $0x80]]  ;;  %v2214_v11 = vstv %s6001_s21  ;;  %v2212_v10 = vmul.f32 %v2211_v59, %v2206_v31  ;;  %v2241_v32 = vpop.permute.xlu0 %2240 }
 0x2ac   : > { %s6015_s20 = sld [smem:[#allocation14 + $0x17]]  ;;  %v2217_v60 = vstv %s6004_s30  ;;  %v2215_v36 = vmul.f32 %v2214_v11, %v2206_v31  ;;  %v2227_v15 = vmul.f32 %v3422_v26, %v2226_v29 }
 0x2ad   : > { %v2634_v18 = vstv %s5920_s2  ;;  %v2178_v51 = vadd.f32 %v2177_v28, %v2161_v53  ;;  %s6017_s24 = sld [smem:[#allocation14 + $0x4d]]  ;;  %v2218_v46 = vmul.f32 %v2217_v60, %v2206_v31 }
 0x2ae   : > { %v2637_v63 = vstv %s5923_s11  ;;  %v2635_v30 = vmul.f32 %v2634_v18, %v5840_v49  ;;  %v2198_v18 = vmul.f32 %v2197_v23, %v2174_v17  ;;  %s6019_s13 = sld [smem:[#allocation14 + $0x83]]  ;;  %v3423_v23 = vld [vmem:[#allocation3 + $0x24] sm:$0xff] }
 0x2af   : > { %v2638_v3 = vmul.f32 %v2637_v63, %v5889_v21  ;;  %v2181_v21 = vadd.f32 %v2180_v9, %v2164_v12  ;;  %v2187_v58 = vadd.f32 %v2186_v27, %v2178_v51  ;;  %v2201_v63 = vmul.f32 %v2200_v6, %v2174_v17  ;;  %s6023_s2 = sld [smem:[#allocation14 + $0x15]] }
 0x2b0   : > { %v2636_v25 = vadd.f32 %v2635_v30, %v2633_v14  ;;  %v2195_v14 = vmul.f32 %v2194_v20, %v2174_v17  ;;  %s6026_s11 = sld [smem:[#allocation14 + $0x4b]]  ;;  %v2229_v37 = vstv %s6006_s16  ;;  %v2232_v54 = vstv %s6008_s9 }
 0x2b1   : > { %v2190_v41 = vadd.f32 %v2189_v8, %v2181_v21  ;;  %v2202_v39 = vadd.f32 %v2201_v63, %v2193_v44  ;;  %s6028_s26 = sld [smem:[#allocation14 + $0x81]]  ;;  %v2235_v38 = vstv %s6012_s17  ;;  %v2230_v45 = vmul.f32 %v2229_v37, %v2209_v57 }
 0x2b2   : > { %v5976_v48 = vadd.f32 %v2638_v3, %v2636_v25  ;;  %v2196_v30 = vadd.f32 %v2195_v14, %v2187_v58  ;;  %s6030_s5 = sld [smem:[#allocation14 + $0x1a]]  ;;  %v2220_v25 = vstv %s5872_s14  ;;  %v2223_v3 = vstv %s5875_s27 }
 0x2b3   : > { %v2199_v1 = vadd.f32 %v2198_v18, %v2190_v41  ;;  %s6034_s22 = sld [smem:[#allocation14 + $0x50]]  ;;  %v2219_v0 = vadd.f32 %v2218_v46, %v2202_v39  ;;  %v2221_v7 = vmul.f32 %v3422_v26, %v2220_v25  ;;  %v2224_v56 = vmul.f32 %v3422_v26, %v2223_v3  ;;  %v2244_v41 = vpop.permute.xlu1 %2243  ;;  %v2276_v39 = vpop.permute.xlu0 %2275 }
 0x2b4   : > { %v2213_v61 = vadd.f32 %v2212_v10, %v2196_v30  ;;  %s6037_s1 = sld [smem:[#allocation14 + $0x86]]  ;;  %v2233_v53 = vmul.f32 %v2232_v54, %v2209_v57  ;;  %v2236_v12 = vmul.f32 %v2235_v38, %v2209_v57  ;;  %v2255_v51 = vstv %s5957_s10  ;;  %v3424_v54 = vld [vmem:[#allocation3 + $0x25] sm:$0xff] }
 0x2b5   : > { %v2216_v43 = vadd.f32 %v2215_v36, %v2199_v1  ;;  %s6039_s8 = sld [smem:[#allocation14 + $0x18]]  ;;  %v2228_v33 = vadd.f32 %v2227_v15, %v2219_v0  ;;  %v2246_v55 = vstv %s6023_s2  ;;  %v2258_v21 = vstv %s5960_s28 }
 0x2b6   : > { %s6041_s25 = sld [smem:[#allocation14 + $0x4e]]  ;;  %v2222_v62 = vadd.f32 %v2221_v7, %v2213_v61  ;;  %v2249_v40 = vstv %s6026_s11  ;;  %v2247_v13 = vmul.f32 %v2246_v55, %v2241_v32  ;;  %v2256_v17 = vmul.f32 %v3423_v23, %v2255_v51 }
 0x2b7   : > { %s6045_s14 = sld [smem:[#allocation14 + $0x84]]  ;;  %v2225_v2 = vadd.f32 %v2224_v56, %v2216_v43  ;;  %v2252_v52 = vstv %s6028_s26  ;;  %v2237_v47 = vadd.f32 %v2236_v12, %v2228_v33  ;;  %v2250_v34 = vmul.f32 %v2249_v40, %v2241_v32 }
 0x2b8   : > { %s6048_s27 = sld [smem:[#allocation14 + $0x1d]]  ;;  %v2231_v28 = vadd.f32 %v2230_v45, %v2222_v62  ;;  %v2253_v50 = vmul.f32 %v2252_v52, %v2241_v32  ;;  %v2259_v22 = vmul.f32 %v3423_v23, %v2258_v21  ;;  %v2264_v6 = vstv %s6015_s20 }
 0x2b9   : > { %s6050_s3 = sld [smem:[#allocation14 + $0x53]]  ;;  %v2234_v9 = vadd.f32 %v2233_v53, %v2225_v2  ;;  %v2267_v58 = vstv %s6017_s24  ;;  %v2262_v44 = vmul.f32 %v3423_v23, %v2261_v5  ;;  %v2270_v14 = vstv %s6019_s13  ;;  %v2279_v2 = vpop.permute.xlu1 %2278 }
 0x2ba   : > { %s6052_s12 = sld [smem:[#allocation14 + $0x89]]  ;;  %v2248_v27 = vadd.f32 %v2247_v13, %v2231_v28  ;;  %v2254_v20 = vadd.f32 %v2253_v50, %v2237_v47  ;;  %v2265_v11 = vmul.f32 %v2264_v6, %v2244_v41  ;;  %v2268_v31 = vmul.f32 %v2267_v58, %v2244_v41 }
 0x2bb   : > { %s6056_s29 = sld [smem:[#allocation14 + $0x1c]]  ;;  %v2251_v8 = vadd.f32 %v2250_v34, %v2234_v9  ;;  %v2271_v30 = vmul.f32 %v2270_v14, %v2244_v41  ;;  %v2281_v1 = vstv %s6039_s8  ;;  %v2290_v61 = vstv %s5970_s4 }
 0x2bc   : > { %s6059_s6 = sld [smem:[#allocation14 + $0x52]]  ;;  %v2257_v18 = vadd.f32 %v2256_v17, %v2248_v27  ;;  %v2263_v59 = vadd.f32 %v2262_v44, %v2254_v20  ;;  %v2284_v60 = vstv %s6041_s25  ;;  %v2282_v46 = vmul.f32 %v2281_v1, %v2276_v39 }
 0x2bd   : > { %s6061_s19 = sld [smem:[#allocation14 + $0x88]]  ;;  %v2260_v63 = vadd.f32 %v2259_v22, %v2251_v8  ;;  %v2287_v25 = vstv %s6045_s14  ;;  %v2285_v29 = vmul.f32 %v2284_v60, %v2276_v39  ;;  %v2293_v43 = vstv %s5974_s15 }
 0x2be   : > { %s6063_s23 = sld [smem:[#allocation14 + $0x1f]]  ;;  %v2266_v10 = vadd.f32 %v2265_v11, %v2257_v18  ;;  %v2272_v3 = vadd.f32 %v2271_v30, %v2263_v59  ;;  %v2288_v0 = vmul.f32 %v2287_v25, %v2276_v39  ;;  %v2296_v26 = vstv %s5993_s0 }
 0x2bf   : > { %s6067_s18 = sld [smem:[#allocation14 + $0x55]]  ;;  %v2269_v36 = vadd.f32 %v2268_v31, %v2260_v63  ;;  %v2291_v57 = vmul.f32 %v3424_v54, %v2290_v61  ;;  %v2294_v15 = vmul.f32 %v3424_v54, %v2293_v43  ;;  %v2299_v38 = vstv %s6030_s5 }
 0x2c0   : > { %s6070_s21 = sld [smem:[#allocation14 + $0x8b]]  ;;  %v2283_v7 = vadd.f32 %v2282_v46, %v2266_v10  ;;  %v2289_v37 = vadd.f32 %v2288_v0, %v2272_v3  ;;  %v2302_v62 = vstv %s6034_s22  ;;  %v2297_v33 = vmul.f32 %v3424_v54, %v2296_v26 }
 0x2c1   : > { %s6072_s30 = sld [smem:[#allocation14 + $0x22]]  ;;  %v2286_v56 = vadd.f32 %v2285_v29, %v2269_v36  ;;  %v2305_v45 = vstv %s6037_s1  ;;  %v2300_v32 = vmul.f32 %v2299_v38, %v2279_v2  ;;  %v2303_v28 = vmul.f32 %v2302_v62, %v2279_v2 }
 0x2c2   : > { %s6074_s16 = sld [smem:[#allocation14 + $0x58]]  ;;  %v2292_v53 = vadd.f32 %v2291_v57, %v2283_v7  ;;  %v2298_v55 = vadd.f32 %v2297_v33, %v2289_v37  ;;  %v2306_v47 = vmul.f32 %v2305_v45, %v2279_v2  ;;  %v2325_v13 = vstv %s6056_s29 }
 0x2c3   : > { %s6078_s10 = sld [smem:[#allocation14 + $0x8e]]  ;;  %v2295_v12 = vadd.f32 %v2294_v15, %v2286_v56  ;;  %v2328_v34 = vstv %s6059_s6  ;;  %v2331_v50 = vstv %s6061_s19  ;;  %v2326_v17 = vmul.f32 %v2325_v13, %v5711_v16 }
 0x2c4   : > { %s6081_s28 = sld [smem:[#allocation14 + $0x25]]  ;;  %v2301_v51 = vadd.f32 %v2300_v32, %v2292_v53  ;;  %v2307_v27 = vadd.f32 %v2306_v47, %v2298_v55  ;;  %v2329_v22 = vmul.f32 %v2328_v34, %v5711_v16  ;;  %v2332_v44 = vmul.f32 %v2331_v50, %v5711_v16 }
 0x2c5   : > { %s6083_s7 = sld [smem:[#allocation14 + $0x5b]]  ;;  %v2304_v21 = vadd.f32 %v2303_v28, %v2295_v12  ;;  %v2334_v16 = vstv %s6048_s27  ;;  %v2337_v59 = vstv %s6050_s3  ;;  %v2340_v11 = vstv %s6052_s12 }
 0x2c6   : > { %s6085_s9 = sld [smem:[#allocation14 + $0x91]]  ;;  %v2360_v31 = vstv %s6063_s23  ;;  %v2363_v30 = vstv %s6067_s18  ;;  %v2366_v1 = vstv %s6070_s21 }
 0x2c7   : > { %s6089_s17 = sld [smem:[#allocation14 + $0x28]]  ;;  %v2395_v60 = vstv %s6072_s30  ;;  %v2361_v37 = vmul.f32 %v2360_v31, %v5793_v24  ;;  %v2364_v54 = vmul.f32 %v2363_v30, %v5793_v24  ;;  %v2367_v57 = vmul.f32 %v2366_v1, %v5793_v24 }
 0x2c8   : > { %s6092_s20 = sld [smem:[#allocation14 + $0x1b]]  ;;  %v2398_v39 = vstv %s6074_s16  ;;  %v2396_v32 = vmul.f32 %v2395_v60, %v5808_v35 }
 0x2c9   : > { %s6094_s24 = sld [smem:[#allocation14 + $0x51]]  ;;  %v2401_v10 = vstv %s6078_s10 }
 0x2ca   : > { %s6096_s13 = sld [smem:[#allocation14 + $0x87]]  ;;  %v2430_v36 = vstv %s6081_s28 }
 0x2cb   : > { %s6100_s2 = sld [smem:[#allocation14 + $0x5e]]  ;;  %v2433_v25 = vstv %s6083_s7 }
 0x2cc   : > { %s6103_s11 = sld [smem:[#allocation14 + $0x94]]  ;;  %v2436_v3 = vstv %s6085_s9 }
 0x2cd   : > { %s6105_s26 = sld [smem:[#allocation14 + $0x2b]]  ;;  %v2465_v0 = vstv %s6089_s17 }
 0x2ce   : > { %s6107_s8 = sld [smem:[#allocation14 + $0x61]]  ;;  %v2316_v40 = vstv %s6092_s20 }
 0x2cf   : > { %s6111_s4 = sld [smem:[#allocation14 + $0x97]]  ;;  %v2319_v9 = vstv %s6094_s24 }
 0x2d0   : > { %s6114_s15 = sld [smem:[#allocation14 + $0x20]]  ;;  %v2322_v52 = vstv %s6096_s13 }
 0x2d1   : > { %s6117_s0 = sld [smem:[#allocation14 + $0x56]] }
 0x2d2   : > { %s6121_s5 = sld [smem:[#allocation14 + $0x8c]] }
 0x2d3   : > { %s6125_s22 = sld [smem:[#allocation14 + $0x1e]] }
 0x2d4   : > { %7161 = sst [smem:[#allocation61_spill]] %s6107_s8 }
 0x2d5   : > { %7162 = sst [smem:[#allocation62_spill]] %s6111_s4 }
 0x2d6   : > { %s6128_s1 = sld [smem:[#allocation14 + $0x54]]  ;;  %v2369_v29 = vstv %s6114_s15 }
 0x2d7   : > { %s6130_s25 = sld [smem:[#allocation14 + $0x8a]]  ;;  %v2372_v61 = vstv %s6117_s0 }
 0x2d8   : > { %s6134_s14 = sld [smem:[#allocation14 + $0x23]]  ;;  %v2375_v43 = vstv %s6121_s5 }
 0x2d9   : > { %s6137_s29 = sld [smem:[#allocation14 + $0x59]]  ;;  %v2351_v26 = vstv %s6125_s22 }
 0x2da   : > { %s6139_s6 = sld [smem:[#allocation14 + $0x8f]] }
 0x2db   : > { %s6141_s19 = sld [smem:[#allocation14 + $0x21]] }
 0x2dc   : > { %s6143_s20 = sld [smem:[#allocation14 + $0x57]]  ;;  %v2354_v7 = vstv %s6128_s1 }
 0x2dd   : > { %s6145_s24 = sld [smem:[#allocation14 + $0x8d]]  ;;  %v2357_v56 = vstv %s6130_s25 }
 0x2de   : > { %s6147_s13 = sld [smem:[#allocation14 + $0x26]]  ;;  %v2404_v15 = vstv %s6134_s14 }
 0x2df   : > { %s6153_s4 = sld [smem:[#allocation14 + $0x5c]]  ;;  %v2407_v38 = vstv %s6137_s29 }
 0x2e0   : > { %s6159_s8 = sld [smem:[#allocation14 + $0x92]]  ;;  %v2410_v2 = vstv %s6139_s6 }
 0x2e1   : > { %s6162_s27 = sld [smem:[#allocation14 + $0x24]]  ;;  %v2386_v33 = vstv %s6141_s19 }
 0x2e2   : > { %s6170_s3 = sld [smem:[#allocation14 + $0x5a]]  ;;  %v2389_v45 = vstv %s6143_s20 }
 0x2e3   : > { %s6177_s12 = sld [smem:[#allocation14 + $0x90]] }
 0x2e4   : > { %s6183_s23 = sld [smem:[#allocation14 + $0x29]] }
 0x2e5   : > { %s6188_s18 = sld [smem:[#allocation14 + $0x5f]] }
 0x2e6   : > { %s6192_s21 = sld [smem:[#allocation14 + $0x95]] }
 0x2e7   : > { %s6196_s30 = sld [smem:[#allocation14 + $0x27]] }
 0x2e8   : > { %s6198_s16 = sld [smem:[#allocation14 + $0x5d]] }
 0x2e9   : > { %s6203_s10 = sld [smem:[#allocation14 + $0x2e]] }
 0x2ea   : > { %s6207_s28 = sld [smem:[#allocation14 + $0x64]] }
 0x2eb   : > { %s6210_s15 = sld [smem:[#allocation14 + $0x93]] }
 0x2ec   : > { %v2314_v46 = vpop.permute.xlu1 %2313  ;;  %s6212_s0 = sld [smem:[#allocation14 + $0x2c]] }
 0x2ed   : > { %v2311_v5 = vpop.permute.xlu0 %2310  ;;  %v2335_v62 = vmul.f32 %v2334_v16, %v2314_v46  ;;  %v2338_v53 = vmul.f32 %v2337_v59, %v2314_v46  ;;  %v2341_v12 = vmul.f32 %v2340_v11, %v2314_v46  ;;  %s6218_s5 = sld [smem:[#allocation14 + $0x62]] }
 0x2ee   : > { %v2317_v8 = vmul.f32 %v2316_v40, %v2311_v5  ;;  %v2320_v20 = vmul.f32 %v2319_v9, %v2311_v5  ;;  %v2323_v23 = vmul.f32 %v2322_v52, %v2311_v5  ;;  %v2392_v40 = vstv %s6145_s24  ;;  %s6220_s22 = sld [smem:[#allocation14 + $0x98]] }
 0x2ef   : > { %v2399_v9 = vmul.f32 %v2398_v39, %v5808_v35  ;;  %v2439_v52 = vstv %s6147_s13  ;;  %v2402_v5 = vmul.f32 %v2401_v10, %v5808_v35  ;;  %s6225_s7 = sld [smem:[#allocation14 + $0x2a]] }
 0x2f0   : > { %v2318_v6 = vadd.f32 %v2317_v8, %v2301_v51  ;;  %v2321_v58 = vadd.f32 %v2320_v20, %v2304_v21  ;;  %v2324_v41 = vadd.f32 %v2323_v23, %v2307_v27  ;;  %v2442_v27 = vstv %s6153_s4  ;;  %s6229_s9 = sld [smem:[#allocation14 + $0x9a]] }
 0x2f1   : > { %v2445_v8 = vstv %s6159_s8  ;;  %s6235_s1 = sld [smem:[#allocation14 + $0x31]] }
 0x2f2   : > { %v2327_v14 = vadd.f32 %v2326_v17, %v2318_v6  ;;  %v2330_v18 = vadd.f32 %v2329_v22, %v2321_v58  ;;  %v2333_v63 = vadd.f32 %v2332_v44, %v2324_v41  ;;  %v2421_v22 = vstv %s6162_s27  ;;  %s6241_s25 = sld [smem:[#allocation14 + $0x60]] }
 0x2f3   : > { %v2424_v6 = vstv %s6170_s3  ;;  %v2427_v44 = vstv %s6177_s12  ;;  %s6254_s17 = sld [smem:[#allocation14 + $0x65]] }
 0x2f4   : > { %v2336_v24 = vadd.f32 %v2335_v62, %v2327_v14  ;;  %v2339_v13 = vadd.f32 %v2338_v53, %v2330_v18  ;;  %v2342_v34 = vadd.f32 %v2341_v12, %v2333_v63  ;;  %v3425_v14 = vld [vmem:[#allocation4 + $0x13] sm:$0xff]  ;;  %v2468_v62 = vstv %s6100_s2  ;;  %s6247_s2 = sld [smem:[#allocation14 + $0x96]] }
 0x2f5   : > { %v2431_v18 = vmul.f32 %v3425_v14, %v2430_v36  ;;  %v2434_v30 = vmul.f32 %v3425_v14, %v2433_v25  ;;  %v2437_v1 = vmul.f32 %v3425_v14, %v2436_v3  ;;  %v2477_v25 = vstv %s6188_s18  ;;  %s7163_s14 = sld [smem:[#allocation61_spill]] }
 0x2f6   : > { %v2480_v3 = vstv %s6192_s21  ;;  %s7164_s29 = sld [smem:[#allocation62_spill]] }
 0x2f7   : > { %s6258_s6 = sld [smem:[#allocation14 + $0x67]] }
 0x2f8   : > { %s6264_s19 = sld [smem:[#allocation14 + $0x9b]] }
 0x2f9   : > { %s6270_s20 = sld [smem:[#allocation14 + $0x2d]] }
 0x2fa   : > { %s6274_s24 = sld [smem:[#allocation14 + $0x63]] }
 0x2fb   : > { %s6281_s8 = sld [smem:[#allocation14 + $0x9d]] }
 0x2fc   : > { %s6285_s4 = sld [smem:[#allocation14 + $0x32]] }
 0x2fd   : > { %v2346_v55 = vpop.permute.xlu0 %2345  ;;  %v2349_v47 = vpop.permute.xlu1 %2348  ;;  %s6291_s13 = sld [smem:[#allocation14 + $0x68]] }
 0x2fe   : > { %v2352_v28 = vmul.f32 %v2351_v26, %v2346_v55  ;;  %v2355_v51 = vmul.f32 %v2354_v7, %v2346_v55  ;;  %v2358_v21 = vmul.f32 %v2357_v56, %v2346_v55  ;;  %v2370_v58 = vmul.f32 %v2369_v29, %v2349_v47  ;;  %s6297_s27 = sld [smem:[#allocation14 + $0x30]] }
 0x2ff   : > { %v2373_v35 = vmul.f32 %v2372_v61, %v2349_v47  ;;  %v2376_v63 = vmul.f32 %v2375_v43, %v2349_v47  ;;  %v2474_v61 = vstv %s6183_s23  ;;  %v2456_v56 = vstv %s6196_s30  ;;  %s6301_s3 = sld [smem:[#allocation14 + $0x66]] }
 0x300   : > { %v2353_v50 = vadd.f32 %v2352_v28, %v2336_v24  ;;  %v2356_v20 = vadd.f32 %v2355_v51, %v2339_v13  ;;  %v2359_v23 = vadd.f32 %v2358_v21, %v2342_v34  ;;  %v2462_v28 = vstv %s6210_s15  ;;  %s6303_s12 = sld [smem:[#allocation14 + $0x9c]] }
 0x301   : > { %v2381_v17 = vpop.permute.xlu0 %2380  ;;  %v2384_v60 = vpop.permute.xlu1 %2383  ;;  %v2469_v34 = vmul.f32 %v2468_v62, %v5840_v49  ;;  %v2509_v51 = vstv %s6212_s0  ;;  %s6308_s23 = sld [smem:[#allocation14 + $0x34]] }
 0x302   : > { %v2362_v41 = vadd.f32 %v2361_v37, %v2353_v50  ;;  %v2365_v16 = vadd.f32 %v2364_v54, %v2356_v20  ;;  %v2368_v59 = vadd.f32 %v2367_v57, %v2359_v23  ;;  %v2387_v31 = vmul.f32 %v2386_v33, %v2381_v17  ;;  %s6312_s18 = sld [smem:[#allocation14 + $0x6a]] }
 0x303   : > { %v2390_v36 = vmul.f32 %v2389_v45, %v2381_v17  ;;  %v2393_v46 = vmul.f32 %v2392_v40, %v2381_v17  ;;  %v2459_v37 = vstv %s6198_s16  ;;  %v2405_v54 = vmul.f32 %v2404_v15, %v2384_v60  ;;  %s6316_s21 = sld [smem:[#allocation14 + $0x9e]] }
 0x304   : > { %v2371_v11 = vadd.f32 %v2370_v58, %v2362_v41  ;;  %v2374_v39 = vadd.f32 %v2373_v35, %v2365_v16  ;;  %v2377_v10 = vadd.f32 %v2376_v63, %v2368_v59  ;;  %v2471_v33 = vstv %s6103_s11  ;;  %s6249_s11 = sld [smem:[#allocation14 + $0x2f]] }
 0x305   : > { %v2416_v7 = vpop.permute.xlu0 %2415  ;;  %v2408_v45 = vmul.f32 %v2407_v38, %v2384_v60  ;;  %v2411_v53 = vmul.f32 %v2410_v2, %v2384_v60  ;;  %v2466_v15 = vmul.f32 %v2465_v0, %v5840_v49  ;;  %v2472_v0 = vmul.f32 %v2471_v33, %v5840_v49  ;;  %s6322_s30 = sld [smem:[#allocation14 + $0x35]] }
 0x306   : > { %v2388_v29 = vadd.f32 %v2387_v31, %v2371_v11  ;;  %v2391_v43 = vadd.f32 %v2390_v36, %v2374_v39  ;;  %v2394_v26 = vadd.f32 %v2393_v46, %v2377_v10  ;;  %v2422_v24 = vmul.f32 %v2421_v22, %v2416_v7  ;;  %s6325_s16 = sld [smem:[#allocation14 + $0x33]] }
 0x307   : > { %v2425_v2 = vmul.f32 %v2424_v6, %v2416_v7  ;;  %v2512_v20 = vstv %s6218_s5  ;;  %v2515_v23 = vstv %s6220_s22  ;;  %v2491_v6 = vstv %s6225_s7  ;;  %s6336_s15 = sld [smem:[#allocation14 + $0xa0]] }
 0x308   : > { %v2397_v57 = vadd.f32 %v2396_v32, %v2388_v29  ;;  %v2400_v12 = vadd.f32 %v2399_v9, %v2391_v43  ;;  %v2403_v55 = vadd.f32 %v2402_v5, %v2394_v26  ;;  %v2419_v32 = vpop.permute.xlu1 %2418  ;;  %v2428_v9 = vmul.f32 %v2427_v44, %v2416_v7  ;;  %s6342_s0 = sld [smem:[#allocation14 + $0x6b]] }
 0x309   : > { %v2451_v5 = vpop.permute.xlu0 %2450  ;;  %v2440_v17 = vmul.f32 %v2439_v52, %v2419_v32  ;;  %v2500_v58 = vstv %s6105_s26  ;;  %v2443_v49 = vmul.f32 %v2442_v27, %v2419_v32  ;;  %v2446_v41 = vmul.f32 %v2445_v8, %v2419_v32  ;;  %s6276_s26 = sld [smem:[#allocation14 + $0x99]] }
 0x30a   : > { %v2406_v40 = vadd.f32 %v2405_v54, %v2397_v57  ;;  %v2409_v47 = vadd.f32 %v2408_v45, %v2400_v12  ;;  %v2412_v38 = vadd.f32 %v2411_v53, %v2403_v55  ;;  %v2457_v63 = vmul.f32 %v2456_v56, %v2451_v5  ;;  %s6346_s5 = sld [smem:[#allocation14 + $0xa1]] }
 0x30b   : > { %v2503_v16 = vstv %s7163_s14  ;;  %v2506_v59 = vstv %s7164_s29  ;;  %v2460_v31 = vmul.f32 %v2459_v37, %v2451_v5  ;;  %v2463_v27 = vmul.f32 %v2462_v28, %v2451_v5  ;;  %s6349_s22 = sld [smem:[#allocation17 + $0x3]] }
 0x30c   : > { %v2423_v13 = vadd.f32 %v2422_v24, %v2406_v40  ;;  %v2426_v21 = vadd.f32 %v2425_v2, %v2409_v47  ;;  %v2429_v50 = vadd.f32 %v2428_v9, %v2412_v38  ;;  %v2454_v52 = vpop.permute.xlu1 %2453  ;;  %v2501_v60 = vmul.f32 %v2500_v58, %v5857_v19  ;;  %s6351_s7 = sld [smem:[#allocation17 + $0x4]] }
 0x30d   : > { %v2504_v36 = vmul.f32 %v2503_v16, %v5857_v19  ;;  %v2507_v46 = vmul.f32 %v2506_v59, %v5857_v19  ;;  %v2486_v29 = vpop.permute.xlu0 %2485  ;;  %v2475_v43 = vmul.f32 %v2474_v61, %v2454_v52  ;;  %v2544_v7 = vstv %s6249_s11  ;;  %s6366_s11 = sld [smem:[#allocation17 + $0x9]] }
 0x30e   : > { %v2432_v22 = vadd.f32 %v2431_v18, %v2423_v13  ;;  %v2435_v44 = vadd.f32 %v2434_v30, %v2426_v21  ;;  %v2438_v14 = vadd.f32 %v2437_v1, %v2429_v50  ;;  %v2494_v30 = vstv %s6241_s25  ;;  %s6360_s25 = sld [smem:[#allocation15 + $0x2]] }
 0x30f   : > { %v2497_v1 = vstv %s6247_s2  ;;  %v2547_v56 = vstv %s6254_s17  ;;  %v2478_v37 = vmul.f32 %v2477_v25, %v2454_v52  ;;  %v2481_v54 = vmul.f32 %v2480_v3, %v2454_v52  ;;  %s6364_s2 = sld [smem:[#allocation17 + $0x5]] }
 0x310   : > { %v2441_v35 = vadd.f32 %v2440_v17, %v2432_v22  ;;  %v2444_v18 = vadd.f32 %v2443_v49, %v2435_v44  ;;  %v2447_v11 = vadd.f32 %v2446_v41, %v2438_v14  ;;  %v2492_v33 = vmul.f32 %v2491_v6, %v2486_v29  ;;  %v2489_v53 = vpop.permute.xlu1 %2488  ;;  %s6370_s17 = sld [smem:[#allocation17 + $0xf]] }
 0x311   : > { %v2535_v45 = vstv %s6203_s10  ;;  %v2538_v61 = vstv %s6207_s28  ;;  %v2495_v3 = vmul.f32 %v2494_v30, %v2486_v29  ;;  %v2498_v55 = vmul.f32 %v2497_v1, %v2486_v29  ;;  %v2521_v9 = vpop.permute.xlu0 %2520  ;;  %s6327_s10 = sld [smem:[#allocation14 + $0x69]] }
 0x312   : > { %v2458_v8 = vadd.f32 %v2457_v63, %v2441_v35  ;;  %v2461_v39 = vadd.f32 %v2460_v31, %v2444_v18  ;;  %v2464_v10 = vadd.f32 %v2463_v27, %v2447_v11  ;;  %v2550_v24 = vstv %s6264_s19  ;;  %s6332_s28 = sld [smem:[#allocation14 + $0x9f]] }
 0x313   : > { %v2526_v28 = vstv %s6270_s20  ;;  %v2532_v38 = vstv %s6276_s26  ;;  %v2541_v2 = vstv %s6229_s9  ;;  %v2510_v13 = vmul.f32 %v2509_v51, %v2489_v53  ;;  %s6354_s9 = sld [smem:[#allocation15]] }
 0x314   : > { %v2467_v26 = vadd.f32 %v2466_v15, %v2458_v8  ;;  %v2470_v57 = vadd.f32 %v2469_v34, %v2461_v39  ;;  %v2473_v62 = vadd.f32 %v2472_v0, %v2464_v10  ;;  %v2529_v15 = vstv %s6274_s24  ;;  %v3426_v0 = vld [vmem:[#allocation4 + $0x23] sm:$0xff]  ;;  %v2524_v44 = vpop.permute.xlu1 %2523  ;;  %s6374_s14 = sld [smem:[#allocation17 + $0xa]] }
 0x315   : > { %v2536_v21 = vmul.f32 %v3426_v0, %v2535_v45  ;;  %v2539_v50 = vmul.f32 %v3426_v0, %v2538_v61  ;;  %v2513_v5 = vmul.f32 %v2512_v20, %v2489_v53  ;;  %v2516_v17 = vmul.f32 %v2515_v23, %v2489_v53  ;;  %v2556_v8 = vpop.permute.xlu0 %2555  ;;  %s6376_s29 = sld [smem:[#allocation17 + $0x10]] }
 0x316   : > { %v2476_v19 = vadd.f32 %v2475_v43, %v2467_v26  ;;  %v2479_v12 = vadd.f32 %v2478_v37, %v2470_v57  ;;  %v2482_v25 = vadd.f32 %v2481_v54, %v2473_v62  ;;  %v2542_v58 = vmul.f32 %v3426_v0, %v2541_v2  ;;  %v3427_v26 = vld [vmem:[#allocation4 + $0x24] sm:$0xff]  ;;  %s6381_s19 = sld [smem:[#allocation17 + $0x11]] }
 0x317   : > { %v2527_v51 = vmul.f32 %v2526_v28, %v2521_v9  ;;  %v2579_v41 = vstv %s6285_s4  ;;  %v2530_v23 = vmul.f32 %v2529_v15, %v2521_v9  ;;  %v2533_v35 = vmul.f32 %v2532_v38, %v2521_v9  ;;  %s6385_s20 = sld [smem:[#allocation18]] }
 0x318   : > { %v2493_v40 = vadd.f32 %v2492_v33, %v2476_v19  ;;  %v2496_v32 = vadd.f32 %v2495_v3, %v2479_v12  ;;  %v2499_v47 = vadd.f32 %v2498_v55, %v2482_v25  ;;  %v2582_v16 = vstv %s6291_s13  ;;  %s6387_s24 = sld [smem:[#allocation18 + $0x1]] }
 0x319   : > { %v2561_v59 = vstv %s6297_s27  ;;  %v2564_v52 = vstv %s6301_s3  ;;  %v2567_v31 = vstv %s6303_s12  ;;  %v2570_v27 = vstv %s6235_s1  ;;  %s6356_s1 = sld [smem:[#allocation15 + $0x1]] }
 0x31a   : > { %v2502_v34 = vadd.f32 %v2501_v60, %v2493_v40  ;;  %v2505_v22 = vadd.f32 %v2504_v36, %v2496_v32  ;;  %v2508_v6 = vadd.f32 %v2507_v46, %v2499_v47  ;;  %v2545_v30 = vmul.f32 %v2544_v7, %v2524_v44  ;;  %v2559_v7 = vpop.permute.xlu1 %2558  ;;  %s6390_s26 = sld [smem:[#allocation18 + $0x2]] }
 0x31b   : > { %v2573_v60 = vstv %s6258_s6  ;;  %v2576_v39 = vstv %s6281_s8  ;;  %v2548_v10 = vmul.f32 %v2547_v56, %v2524_v44  ;;  %v2551_v36 = vmul.f32 %v2550_v24, %v2524_v44  ;;  %v2591_v24 = vpop.permute.xlu0 %2590  ;;  %s6378_s6 = sld [smem:[#allocation17 + $0xb]] }
 0x31c   : > { %v2511_v49 = vadd.f32 %v2510_v13, %v2502_v34  ;;  %v2514_v14 = vadd.f32 %v2513_v5, %v2505_v22  ;;  %v2517_v20 = vadd.f32 %v2516_v17, %v2508_v6  ;;  %v2585_v43 = vstv %s6316_s21  ;;  %s7165_s8 = sld [smem:[#allocation33_spill]] }
 0x31d   : > { %v2571_v37 = vmul.f32 %v3427_v26, %v2570_v27  ;;  %v2562_v57 = vmul.f32 %v2561_v59, %v2556_v8  ;;  %v2565_v33 = vmul.f32 %v2564_v52, %v2556_v8  ;;  %v2568_v56 = vmul.f32 %v2567_v31, %v2556_v8  ;;  %s7166_s4 = sld [smem:[#allocation32_spill]] }
 0x31e   : > { %v2528_v63 = vadd.f32 %v2527_v51, %v2511_v49  ;;  %v2531_v18 = vadd.f32 %v2530_v23, %v2514_v14  ;;  %v2534_v11 = vadd.f32 %v2533_v35, %v2517_v20  ;;  %v2574_v45 = vmul.f32 %v3427_v26, %v2573_v60  ;;  %v2594_v5 = vpop.permute.xlu1 %2593  ;;  %s7167_s13 = sld [smem:[#allocation43_spill]] }
 0x31f   : > { %v2577_v61 = vmul.f32 %v3427_v26, %v2576_v39  ;;  %v2614_v12 = vstv %s6322_s30  ;;  %v2596_v55 = vstv %s6325_s16  ;;  %v2599_v40 = vstv %s6327_s10  ;;  %s7168_s12 = sld [smem:[#allocation30_spill]] }
 0x320   : > { %v2537_v1 = vadd.f32 %v2536_v21, %v2528_v63  ;;  %v2540_v46 = vadd.f32 %v2539_v50, %v2531_v18  ;;  %v2543_v29 = vadd.f32 %v2542_v58, %v2534_v11  ;;  %v2580_v28 = vmul.f32 %v2579_v41, %v2559_v7  ;;  %v3428_v41 = vld [vmem:[#allocation4 + $0x25] sm:$0xff]  ;;  %s7170_s10 = sld [smem:[#allocation106_spill]] }
 0x321   : > { %v2602_v32 = vstv %s6332_s28  ;;  %v2605_v47 = vstv %s6308_s23  ;;  %v2583_v38 = vmul.f32 %v2582_v16, %v2559_v7  ;;  %v2586_v2 = vmul.f32 %v2585_v43, %v2559_v7 }
 0x322   : > { %v2546_v54 = vadd.f32 %v2545_v30, %v2537_v1  ;;  %v2549_v62 = vadd.f32 %v2548_v10, %v2540_v46  ;;  %v2552_v19 = vadd.f32 %v2551_v36, %v2543_v29  ;;  %v2608_v34 = vstv %s6312_s18  ;;  %s3258_s27 = smul.u32 6, %s7165_s8  ;;  %s7169_s18 = sld [smem:[#allocation38_spill]] }
 0x323   : > { %v2611_v0 = vstv %s6336_s15  ;;  %v2597_v50 = vmul.f32 %v2596_v55, %v2591_v24  ;;  %v2600_v6 = vmul.f32 %v2599_v40, %v2591_v24  ;;  %v2603_v58 = vmul.f32 %v2602_v32, %v2591_v24 }
 0x324   : > { %v2563_v53 = vadd.f32 %v2562_v57, %v2546_v54  ;;  %v2566_v25 = vadd.f32 %v2565_v33, %v2549_v62  ;;  %v2569_v3 = vadd.f32 %v2568_v56, %v2552_v19  ;;  %v2617_v49 = vstv %s6342_s0  ;;  %s2721_s3 = sadd.s32 %s7166_s4, %s3258_s27  ;;  %s2724_s23 = sshll.u32 %s7167_s13, 4  ;;  %s6409_s23 = int_to_ptr.vmem [resolvable:$true] %s2724_s23 }
 0x325   : > { %v2620_v51 = vstv %s6346_s5  ;;  %v2606_v44 = vmul.f32 %v3428_v41, %v2605_v47  ;;  %v2609_v20 = vmul.f32 %v3428_v41, %v2608_v34  ;;  %v2612_v23 = vmul.f32 %v3428_v41, %v2611_v0  ;;  %s3253_s21 = sshll.u32 %s2721_s3, 7  ;;  %s7172_s0 = sand.u32 1, %s7168_s12  }
 0x326   : > { %v2572_v15 = vadd.f32 %v2571_v37, %v2563_v53  ;;  %v2575_v9 = vadd.f32 %v2574_v45, %v2566_v25  ;;  %v2578_v13 = vadd.f32 %v2577_v61, %v2569_v3  ;;  %v2615_v16 = vmul.f32 %v2614_v12, %v2594_v5  ;;  %s7171_s28 = smov %s7170_s10  ;;  %s6414_s15 = scalar_lea.hbm %s7170_s10, %s3253_s21 }
 0x327   : > { %v2623_v59 = vstv %s6354_s9  ;;  %v2618_v18 = vmul.f32 %v2617_v49, %v2594_v5  ;;  %v2621_v11 = vmul.f32 %v2620_v51, %v2594_v5  ;;  %v2626_v8 = vstv %s6356_s1  ;;  %s6421_s5 = scalar_lea.sflag [#allocation7], %s7172_s0 }
 0x328   : > { %v2581_v21 = vadd.f32 %v2580_v28, %v2572_v15  ;;  %v2584_v17 = vadd.f32 %v2583_v38, %v2575_v9  ;;  %v2587_v22 = vadd.f32 %v2586_v2, %v2578_v13  ;;  %v2629_v30 = vstv %s6360_s25  ;;  %p7173_p2 = scmp.ne.s32.totalorder %s7169_s18, 0 }
 0x329   : > { %v2640_v10 = vstv %s6349_s22  ;;  %v2665_v46 = vstv %s6366_s11  ;;  %v2691_v29 = vstv %s6370_s17  ;;  %v2643_v37 = vstv %s6351_s7  ;;  %s3549_s22 = scalar_lea.vmem %s6409_s23, 384  ;;  %s3675_s7 = smov [#allocation20]  }
 0x32a   : > { %v2598_v14 = vadd.f32 %v2597_v50, %v2581_v21  ;;  %v2601_v35 = vadd.f32 %v2600_v6, %v2584_v17  ;;  %v2604_v63 = vadd.f32 %v2603_v58, %v2587_v22  ;;  %v2668_v54 = vstv %s6374_s14  ;;  %v2677_v22 = vld [vmem:[#allocation2 + $0x14] sm:$0xff]  ;;  %v2703_v6 = vld [vmem:[#allocation2 + $0x24] sm:$0xff]  ;;  %p3550_p0 = scmp.ne.s32.totalorder %s6409_s23, %s3549_s22  ;;  %s3553_s9 = sshll.u32 %s3675_s7, 4  ;;  %s3554_s9 = int_to_ptr.vmem [resolvable:$false] %s3553_s9 }
 0x32b   : > { %v2646_v7 = vstv %s6364_s2  ;;  %v2694_v62 = vstv %s6376_s29  ;;  %v2671_v56 = vstv %s6378_s6  ;;  %v2697_v12 = vstv %s6381_s19  ;;  %s3555_s1 = scalar_lea.vmem %s3554_s9, 768  ;;  %p3556_p1 = scmp.lt.s32.totalorder %s6409_s23, %s3554_s9 }
 0x32c   : > { %v2607_v52 = vadd.f32 %v2606_v44, %v2598_v14  ;;  %v2610_v31 = vadd.f32 %v2609_v20, %v2601_v35  ;;  %v2613_v27 = vadd.f32 %v2612_v23, %v2604_v63  ;;  %v2649_v13 = vstv %s6385_s20  ;;  %p3551_p10 = pnand %p3550_p0, %p7173_p2  ;;  %p3557_p4 = scmp.lt.s32.totalorder %s3555_s1, %s3549_s22 }
 0x32d   : > { %v2674_v34 = vstv %s6387_s24  ;;  %v2700_v0 = vstv %s6390_s26 }
 0x32e   : > { %v2616_v1 = vadd.f32 %v2615_v16, %v2607_v52  ;;  %v2619_v60 = vadd.f32 %v2618_v18, %v2610_v31  ;;  %v2622_v39 = vadd.f32 %v2621_v11, %v2613_v27  ;;  %p3552_p12 = pneg %p3551_p10  ;;  %p3558_p6 = por %p3557_p4, %p3556_p1 }
 0x330   : > { %v2624_v36 = vadd.f32 %v2623_v59, %v2616_v1  ;;  %v2627_v43 = vadd.f32 %v2626_v8, %v2619_v60  ;;  %v2630_v26 = vadd.f32 %v2629_v30, %v2622_v39  ;;  %p3559_p5 = pnand %p3558_p6, %p3552_p12 }
 0x332   : > { %v2625_v57 = vmax.f32 %v2624_v36, 0.0  ;;  %v2628_v19 = vmax.f32 %v2627_v43, 0.0  ;;  %v2631_v33 = vmax.f32 %v2630_v26, 0.0 }
 0x334   : > { %v2641_v45 = vmul.f32 %v2640_v10, %v2625_v57  ;;  %v2666_v61 = vmul.f32 %v2665_v46, %v2625_v57  ;;  %v2692_v53 = vmul.f32 %v2691_v29, %v2625_v57  ;;  %v2644_v25 = vmul.f32 %v2643_v37, %v2628_v19 }
 0x335   : > { %v2669_v3 = vmul.f32 %v2668_v54, %v2628_v19  ;;  %v2695_v28 = vmul.f32 %v2694_v62, %v2628_v19  ;;  %v2647_v15 = vmul.f32 %v2646_v7, %v2631_v33  ;;  %v2672_v32 = vmul.f32 %v2671_v56, %v2631_v33 }
 0x336   : > { %v2642_v55 = vadd.f32 %v2641_v45, %v5976_v48  ;;  %v2667_v40 = vadd.f32 %v2666_v61, %v5988_v42  ;;  %v2693_v24 = vadd.f32 %v2692_v53, %v5997_v4  ;;  %v2698_v9 = vmul.f32 %v2697_v12, %v2631_v33  ;;  %v2652_v4 = vld [vmem:[#allocation2 + $0x4] sm:$0xff] }
 0x338   : > { %v2645_v47 = vadd.f32 %v2644_v25, %v2642_v55  ;;  %v2670_v38 = vadd.f32 %v2669_v3, %v2667_v40  ;;  %v2696_v2 = vadd.f32 %v2695_v28, %v2693_v24 }
 0x33a   : > { %v2648_v21 = vadd.f32 %v2647_v15, %v2645_v47  ;;  %v2673_v50 = vadd.f32 %v2672_v32, %v2670_v38  ;;  %v2699_v48 = vadd.f32 %v2698_v9, %v2696_v2 }
 0x33c   : > { %v2650_v5 = vadd.f32 %v2649_v13, %v2648_v21  ;;  %v2675_v42 = vadd.f32 %v2674_v34, %v2673_v50  ;;  %v2701_v17 = vadd.f32 %v2700_v0, %v2699_v48 }
 0x33e   : > { %v2651_v58 = vmax.f32 %v2650_v5, 0.0  ;;  %v2676_v49 = vmax.f32 %v2675_v42, 0.0  ;;  %v2702_v51 = vmax.f32 %v2701_v17, 0.0 }
 0x340   : > { %v2653_v41 = vmul.f32 %v2652_v4, %v2651_v58  ;;  %v2678_v44 = vmul.f32 %v2677_v22, %v2676_v49  ;;  %v2704_v14 = vmul.f32 %v2703_v6, %v2702_v51 }
 0x342   : > { %v2654_v20 = vsub.f32 %v2653_v41, %v2651_v58  ;;  %v2679_v23 = vsub.f32 %v2678_v44, %v2676_v49  ;;  %v2705_v35 = vsub.f32 %v2704_v14, %v2702_v51 }
 0x344   : > { %v2655_v63 = vadd.f32 1.0, %v2654_v20  ;;  %v2680_v16 = vadd.f32 1.0, %v2679_v23  ;;  %v2706_v59 = vadd.f32 1.0, %v2705_v35 }
 0x346   : > { %2656 = vst [vmem:[%s7167_s13] sm:$0xff] %v2655_v63  ;;  %3251 = vst [vmem:[%s7167_s13 + $0x8] sm:$0xff] %v2680_v16 }
 0x347   : > { %3252 = vst [vmem:[%s7167_s13 + $0x10] sm:$0xff] %v2706_v59 }
 0x348   : > { %3562 = shalt.err (!%p3559_p5)
}
 0x349   : > { %s3563_s25 = scalar_lea.hbm %s6414_s15, 384  ;;  %s3567_s17 = scalar_lea.hbm %s7171_s28, 1536 }
 0x34a   : > { %p3564_p7 = scmp.ne.s32.totalorder %s6414_s15, %s3563_s25  ;;  %p3568_p13 = scmp.lt.s32.totalorder %s6414_s15, %s7171_s28 }
 0x34b   : > { %p3569_p8 = scmp.lt.s32.totalorder %s3567_s17, %s3563_s25 }
 0x34c   : > { %p3565_p9 = pnand %p3564_p7, %p7173_p2 }
 0x34d   : > { %p3570_p3 = por %p3569_p8, %p3568_p13 }
 0x34e   : > { %p3566_p11 = pneg %p3565_p9 }
 0x350   : > { %p3571_p0 = pnand %p3570_p3, %p3566_p11 }
 0x352   : > { %3574 = shalt.err (!%p3571_p0)
}
 0x353   : > { %s3676_s6 = smov 128   ;;  %s3677_s19 = smov 256  }
 0x354   : > { %s3678_s20 = smov 8  }
 0x355   : > { %3291 = dma.vmem_to_hbm [thread:$0]  (%p7173_p2), %s6409_s23, 384, %s6414_s15, %s6421_s5, %s3676_s6, %s3677_s19, %s3678_s20  }
 0x356 PF: > { %s7174_s24 = sld [smem:[#allocation36_spill]] }
 0x357   : > { %s7175_s26 = sld [smem:[#allocation29_spill]] }
 0x358   : > { %s7176_s8 = sld [smem:[#allocation40_spill]] }
 0x35c   : > { %p3338_p10 = scmp.ge.s32.totalorder %s7174_s24, 2 }
 0x35d   : > { %s2739_s4 = sand.u32 1, %s7175_s26  }
 0x35e   : > { %p7177_p12 = scmp.ne.s32.totalorder %s7176_s8, 0  ;;  %s2740_s13 = scalar_lea.sflag [#allocation7], %s2739_s4 }
 0x360   : > { %p3319_p1 = pnand %p3338_p10, %p7177_p12 }
 0x362   : > { %p3320_p4 = pneg %p3319_p1 }
 0x364   : > { %3630 = dma.done.wait (%p3320_p4), %s2740_s13, 384  }
 0x365   : > { %3632 = vsyncadd (%p3320_p4), %s2740_s13, 4294966912  ;;  %s27_s16 = sadd.s32 1, %s7174_s24   ;;  %s7178_s30 = sld [smem:[#allocation30_spill]] }
 0x366   : > { %p24_p6 = scmp.ge.s32.totalorder %s27_s16, 6   ;;  %s7179_s10 = sld [smem:[#allocation31_spill]] }
 0x367   : > { %s7180_s11 = sld [smem:[#allocation41_spill]] }
 0x368   : > { %s7181_s12 = sld [smem:[#allocation34_spill]]  ;;  %26 = sbr.rel (!%p24_p6) target bundleno = 21 (0x15), region = 168 }
 0x369   : > { %s7182_s13 = sld [smem:[#allocation35_spill]] }
 0x36a   : > { %s7183_s14 = sld [smem:[#allocation37_spill]] }
 0x36b   : > { %s7184_s15 = sld [smem:[#allocation39_spill]] }
 0x36d   :  { %2745 = vsyncpa [#allocation7], 1 }
 0x36e   :  { %2747 = vsyncpa [#allocation7 + $0x1], 1 }
 0x36f   :  { %2748 = vsyncpa [#allocation8], 1 }
 0x370   :  { %2750 = vsyncpa [#allocation8 + $0x1], 1 }
 0x371   :  { %2751 = vsyncpa [#allocation10], 1 }
 0x372   :  { %2752 = vsyncpa [#allocation13], 1 }
 0x373   :  { %2753 = vsyncpa [#allocation16], 1 }
 0x374   :  { %2754 = vsyncpa [#allocation19], 1 }
 0x375   :  { %2755 = vsyncmov [#allocation5] }
 0x378   :  { %s2756_s27 = vpop.sfrf %2755 }
 0x379   :  { %p3256_p2 = scmp.ne.s32.totalorder %s2756_s27, 0 }
 0x37b   :  { %2760 = shalt.err (%p3256_p2)  }

</bundles_post_ra>
